<compile_context>
chip_gen: v5e
topology: v5e:2x2
jax: 0.10.0
libtpu: 0.0.40
codegen_flags: <defaults>
</compile_context>

<pallas_src>
import numpy as np
from functools import partial

import jax
import jax.numpy as jnp
from jax.experimental import pallas as pl
from jax.experimental.pallas import tpu as pltpu

# ---------------------------------------------------------------------------
# Small synthetic Swin config (torchvision Swin-v1 semantics)
# ---------------------------------------------------------------------------
IN_CHANS = 4
EMBED_DIM = 32
DEPTHS = (2, 2)
NUM_HEADS = (2, 4)
WINDOW_SIZE = (4, 4)
PATCH_SIZE = (2, 2)
MLP_RATIO = 2.0
OUT_INDICES = (1, -1)          # SwinEncoderWrapper.out_indices
LN_EPS = 1e-5

_PARALLEL = pltpu.CompilerParams(dimension_semantics=("parallel",))


def _full_spec(shape):
    """Non-gridded input: the whole array is one block, revisited every step."""
    return pl.BlockSpec(shape, lambda i: (0,) * len(shape))


# ---------------------------------------------------------------------------
# Pallas kernels
# ---------------------------------------------------------------------------
def _ln(x, g, b):
    mu = jnp.mean(x, axis=-1, keepdims=True)
    xc = x - mu
    var = jnp.mean(xc * xc, axis=-1, keepdims=True)
    return xc * jax.lax.rsqrt(var + LN_EPS) * g + b


def _ln_mm_kernel(x_ref, g_ref, b_ref, w_ref, o_ref):
    # o = LN(x) @ w   (bias-free; patch merging reduction)
    h = _ln(x_ref[...], g_ref[...], b_ref[...])
    o_ref[...] = jnp.dot(h.astype(jnp.bfloat16), w_ref[...],
                         preferred_element_type=jnp.float32).astype(o_ref.dtype)


def _mm_ln_kernel(x_ref, w_ref, bw_ref, g_ref, b_ref, o_ref):
    # o = LN(x @ w + bw)   (patch embed: conv-as-matmul fused with its LN)
    y = jnp.dot(x_ref[...].astype(jnp.bfloat16), w_ref[...],
                preferred_element_type=jnp.float32) + bw_ref[...]
    o_ref[...] = _ln(y, g_ref[...], b_ref[...]).astype(o_ref.dtype)


def _mm_res_kernel(h_ref, w_ref, bw_ref, xres_ref, o_ref):
    # o = xres + (h @ w + bw)   (second MLP half fused with the residual add)
    y = jnp.dot(h_ref[...], w_ref[...],
                preferred_element_type=jnp.float32) + bw_ref[...]
    o_ref[...] = (xres_ref[...] + y).astype(o_ref.dtype)


def _attn_mlp1_kernel(*refs, num_heads, nW, L, has_mask):
    """Attention residual branch + (LN2 -> fc1) for one image's windows.

    Inputs (per grid step b):
      x:     (1, nW*L, C)  f32 residual stream (shifted + window-partitioned)
      ln1/ln2 params, qkv/proj/fc1 weights (bf16) + biases (f32)
      rel:   (nH, L, L)    f32 relative-position bias (shared by all windows)
      mask:  (nW, L, L)    f32 shift mask (only present for shifted blocks)
    Outputs:
      y_ref: (1, nW*L, C)       f32  = x + proj(attn(LN1(x)))
      h_ref: (1, nW*L, hidden)  bf16 = LN2(y) @ w_fc1 + b_fc1   (pre-GELU)
    """
    if has_mask:
        (x_ref, g1_ref, b1_ref, wqkv_ref, bqkv_ref, rel_ref, mask_ref,
         wproj_ref, bproj_ref, g2_ref, b2_ref, wfc1_ref, bfc1_ref,
         y_ref, h_ref) = refs
    else:
        (x_ref, g1_ref, b1_ref, wqkv_ref, bqkv_ref, rel_ref,
         wproj_ref, bproj_ref, g2_ref, b2_ref, wfc1_ref, bfc1_ref,
         y_ref, h_ref) = refs
        mask_ref = None

    C = x_ref.shape[-1]
    Dh = C // num_heads
    scale = Dh ** -0.5

    x = x_ref[0]                                            # (nW*L, C) f32
    hln = _ln(x, g1_ref[...], b1_ref[...])
    qkv = jnp.dot(hln.astype(jnp.bfloat16), wqkv_ref[...],
                  preferred_element_type=jnp.float32) + bqkv_ref[...]
    qkv = qkv.reshape(nW, L, 3 * C)

    rel = rel_ref[...]                                      # (nH, L, L)
    mask = mask_ref[...] if mask_ref is not None else None  # (nW, L, L) or None
    wp = wproj_ref[...]                                     # (C, C) bf16

    # Per-head attention with a static head loop (no head transposes); the
    # output projection is accumulated per head (== concat(heads) @ wp).
    acc = jnp.zeros((nW * L, C), jnp.float32)
    for hd in range(num_heads):
        q = qkv[:, :, hd * Dh:(hd + 1) * Dh]                # (nW, L, Dh)
        k = qkv[:, :, C + hd * Dh:C + (hd + 1) * Dh]
        v = qkv[:, :, 2 * C + hd * Dh:2 * C + (hd + 1) * Dh]
        s = jnp.einsum("wld,wmd->wlm",
                       q.astype(jnp.bfloat16), k.astype(jnp.bfloat16),
                       preferred_element_type=jnp.float32)
        s = s * scale + rel[hd]                             # (nW, L, L) f32
        if mask is not None:
            s = s + mask
        s = s - jnp.max(s, axis=-1, keepdims=True)
        p = jnp.exp(s)
        p = p * pl.reciprocal(jnp.sum(p, axis=-1, keepdims=True), approx=True)
        oh = jnp.einsum("wlm,wmd->wld",
                        p.astype(jnp.bfloat16), v.astype(jnp.bfloat16),
                        preferred_element_type=jnp.float32)  # (nW, L, Dh)
        acc = acc + jnp.dot(oh.reshape(nW * L, Dh).astype(jnp.bfloat16),
                            wp[hd * Dh:(hd + 1) * Dh, :],
                            preferred_element_type=jnp.float32)

    y = x + acc + bproj_ref[...]                            # residual stream
    y_ref[0] = y
    h2 = _ln(y, g2_ref[...], b2_ref[...])
    hidden = jnp.dot(h2.astype(jnp.bfloat16), wfc1_ref[...],
                     preferred_element_type=jnp.float32) + bfc1_ref[...]
    h_ref[0] = hidden.astype(h_ref.dtype)


# ---------------------------------------------------------------------------
# Pallas wrappers (row-tiled token-wise fused ops)
# ---------------------------------------------------------------------------
def ln_mm(x, g, b, w, out_dtype=jnp.float32, tile_m=256):
    """out = LayerNorm(x) @ w (bias-free).  x f32 (M,K); w bf16 (K,N)."""
    M, K = x.shape
    N = w.shape[1]
    tm = min(tile_m, M)
    grid = (pl.cdiv(M, tm),)
    in_row = pl.BlockSpec((tm, K), lambda i: (i, 0))
    out_row = pl.BlockSpec((tm, N), lambda i: (i, 0))
    return pl.pallas_call(
        _ln_mm_kernel,
        out_shape=jax.ShapeDtypeStruct((M, N), out_dtype),
        grid=grid,
        in_specs=[in_row, _full_spec((1, K)), _full_spec((1, K)),
                  _full_spec((K, N))],
        out_specs=out_row,
        compiler_params=_PARALLEL,
    )(x, g.reshape(1, K), b.reshape(1, K), w)


def mm_ln(x, w, bw, g, b, tile_m=256):
    """out = LayerNorm(x @ w + bw).  Patch embed."""
    M, K = x.shape
    N = w.shape[1]
    tm = min(tile_m, M)
    grid = (pl.cdiv(M, tm),)
    in_row = pl.BlockSpec((tm, K), lambda i: (i, 0))
    out_row = pl.BlockSpec((tm, N), lambda i: (i, 0))
    return pl.pallas_call(
        _mm_ln_kernel,
        out_shape=jax.ShapeDtypeStruct((M, N), jnp.float32),
        grid=grid,
        in_specs=[in_row, _full_spec((K, N)), _full_spec((1, N)),
                  _full_spec((1, N)), _full_spec((1, N))],
        out_specs=out_row,
        compiler_params=_PARALLEL,
    )(x, w, bw.reshape(1, N), g.reshape(1, N), b.reshape(1, N))


def mm_residual(h, w, bw, xres, tile_m=256):
    """out = xres + (h @ w + bw).  h bf16, xres/out f32."""
    M, K = h.shape
    N = w.shape[1]
    tm = min(tile_m, M)
    grid = (pl.cdiv(M, tm),)
    h_row = pl.BlockSpec((tm, K), lambda i: (i, 0))
    x_row = pl.BlockSpec((tm, N), lambda i: (i, 0))
    return pl.pallas_call(
        _mm_res_kernel,
        out_shape=jax.ShapeDtypeStruct((M, N), jnp.float32),
        grid=grid,
        in_specs=[h_row, _full_spec((K, N)), _full_spec((1, N)), x_row],
        out_specs=x_row,
        compiler_params=_PARALLEL,
    )(h, w, bw.reshape(1, N), xres)


def attn_mlp1_windows(xw, p, num_heads, nW, L, mask):
    """Fused (attention residual branch) + (LN2 -> fc1) on windowed tokens."""
    B, T, C = xw.shape                      # T == nW * L
    hidden = p["w_fc1"].shape[1]
    has_mask = mask is not None

    row_y = pl.BlockSpec((1, T, C), lambda b: (b, 0, 0))
    row_h = pl.BlockSpec((1, T, hidden), lambda b: (b, 0, 0))

    in_specs = [row_y,
                _full_spec((1, C)), _full_spec((1, C)),
                _full_spec((C, 3 * C)), _full_spec((1, 3 * C)),
                _full_spec((num_heads, L, L))]
    args = [xw,
            p["ln1_g"].reshape(1, C), p["ln1_b"].reshape(1, C),
            p["w_qkv"], p["b_qkv"].reshape(1, 3 * C),
            p["rel_bias"]]
    if has_mask:
        in_specs.append(_full_spec((nW, L, L)))
        args.append(mask)
    in_specs += [_full_spec((C, C)), _full_spec((1, C)),
                 _full_spec((1, C)), _full_spec((1, C)),
                 _full_spec((C, hidden)), _full_spec((1, hidden))]
    args += [p["w_proj"], p["b_proj"].reshape(1, C),
             p["ln2_g"].reshape(1, C), p["ln2_b"].reshape(1, C),
             p["w_fc1"], p["b_fc1"].reshape(1, hidden)]

    kern = partial(_attn_mlp1_kernel, num_heads=num_heads, nW=nW, L=L,
                   has_mask=has_mask)
    y, h = pl.pallas_call(
        kern,
        out_shape=(jax.ShapeDtypeStruct((B, T, C), jnp.float32),
                   jax.ShapeDtypeStruct((B, T, hidden), jnp.bfloat16)),
        grid=(B,),
        in_specs=in_specs,
        out_specs=(row_y, row_h),
        compiler_params=_PARALLEL,
    )(*args)
    return y, h


# ---------------------------------------------------------------------------
# Host-side constants (computed once; the rel-bias gather lives in init_params)
# ---------------------------------------------------------------------------
def _relative_position_bias(table, window_size, num_heads):
    ws0, ws1 = window_size
    coords = np.stack(np.meshgrid(np.arange(ws0), np.arange(ws1), indexing="ij"))
    coords_flat = coords.reshape(2, -1)
    rel = coords_flat[:, :, None] - coords_flat[:, None, :]
    rel = rel.transpose(1, 2, 0).astype(np.int64)
    rel[:, :, 0] += ws0 - 1
    rel[:, :, 1] += ws1 - 1
    rel[:, :, 0] *= 2 * ws1 - 1
    idx = rel.sum(-1).reshape(-1)
    L = ws0 * ws1
    bias = table[jnp.asarray(idx)]                          # (L*L, nH)
    return bias.reshape(L, L, num_heads).transpose(2, 0, 1)  # (nH, L, L)


def _shift_attn_mask(pad_H, pad_W, window_size, shift_size):
    ws0, ws1 = window_size
    ss0, ss1 = shift_size
    mask = np.zeros((pad_H, pad_W), np.float32)
    h_slices = (slice(0, -ws0), slice(-ws0, -ss0), slice(-ss0, None))
    w_slices = (slice(0, -ws1), slice(-ws1, -ss1), slice(-ss1, None))
    cnt = 0
    for h in h_slices:
        for w in w_slices:
            mask[h, w] = cnt
            cnt += 1
    nW = (pad_H // ws0) * (pad_W // ws1)
    L = ws0 * ws1
    mask = mask.reshape(pad_H // ws0, ws0, pad_W // ws1, ws1)
    mask = mask.transpose(0, 2, 1, 3).reshape(nW, L)
    diff = mask[:, None, :] - mask[:, :, None]
    return np.where(diff != 0.0, -100.0, 0.0).astype(np.float32)   # (nW, L, L)


# ---------------------------------------------------------------------------
# torchvision Swin building blocks
# ---------------------------------------------------------------------------
def swin_block(x, p, num_heads, window_size, shift_size):
    """One SwinTransformerBlock; all token math happens in shifted+windowed
    coordinates (valid because LN/MLP/residual are token-wise permutation-
    equivariant), so the residual stream is (un)partitioned exactly once."""
    B, H, W, C = x.shape
    ws0, ws1 = window_size
    pad_r = (ws1 - W % ws1) % ws1
    pad_b = (ws0 - H % ws0) % ws0
    xp = jnp.pad(x, ((0, 0), (0, pad_b), (0, pad_r), (0, 0)))
    _, pH, pW, _ = xp.shape

    ss = list(shift_size)
    if ws0 >= pH:
        ss[0] = 0
    if ws1 >= pW:
        ss[1] = 0
    shifted = sum(ss) > 0
    if shifted:
        xp = jnp.roll(xp, shift=(-ss[0], -ss[1]), axis=(1, 2))

    nWh, nWw = pH // ws0, pW // ws1
    nW, L = nWh * nWw, ws0 * ws1
    xw = xp.reshape(B, nWh, ws0, nWw, ws1, C)
    xw = xw.transpose(0, 1, 3, 2, 4, 5).reshape(B, nW * L, C)

    mask = (jnp.asarray(_shift_attn_mask(pH, pW, (ws0, ws1), ss))
            if shifted else None)

    # kernel A: attention residual branch + (LN2 -> fc1)
    y, h = attn_mlp1_windows(xw, p, num_heads, nW, L, mask)

    # TODO(synk): exact erf GELU kept in plain JAX (no guaranteed Mosaic erf).
    g = jax.nn.gelu(h.astype(jnp.float32), approximate=False).astype(jnp.bfloat16)

    # kernel B: fc2 matmul fused with the residual add (still windowed order)
    hidden = g.shape[-1]
    out = mm_residual(g.reshape(B * nW * L, hidden), p["w_fc2"], p["b_fc2"],
                      y.reshape(B * nW * L, C))

    out = out.reshape(B, nWh, nWw, ws0, ws1, C).transpose(0, 1, 3, 2, 4, 5)
    out = out.reshape(B, pH, pW, C)
    if shifted:
        out = jnp.roll(out, shift=(ss[0], ss[1]), axis=(1, 2))
    return out[:, :H, :W, :]


def patch_embed(x_nchw, p):
    B, C, H, W = x_nchw.shape
    ph, pw = PATCH_SIZE
    Hp, Wp = H // ph, W // pw
    # non-overlapping patches, flattened in (c, kh, kw) order (= conv weight order)
    xp = x_nchw.reshape(B, C, Hp, ph, Wp, pw).transpose(0, 2, 4, 1, 3, 5)
    xp = xp.reshape(B * Hp * Wp, C * ph * pw)
    y = mm_ln(xp, p["w"], p["b"], p["ln_g"], p["ln_b"])     # fused matmul + LN
    return y.reshape(B, Hp, Wp, EMBED_DIM)


def patch_merging(x, p):
    B, H, W, C = x.shape
    x0 = x[:, 0::2, 0::2, :]
    x1 = x[:, 1::2, 0::2, :]
    x2 = x[:, 0::2, 1::2, :]
    x3 = x[:, 1::2, 1::2, :]
    xc = jnp.concatenate([x0, x1, x2, x3], axis=-1).reshape(-1, 4 * C)
    out = ln_mm(xc, p["ln_g"], p["ln_b"], p["w_red"])       # fused LN + matmul, no bias
    return out.reshape(B, H // 2, W // 2, 2 * C)


# ---------------------------------------------------------------------------
# Full backbone forward (== swin_model.features) + wrapper forward
# ---------------------------------------------------------------------------
def swin_features_forward(x_nchw, params):
    feats = []
    x = patch_embed(x_nchw, params["patch"])                 # features[0]
    feats.append(x)
    for si in range(len(DEPTHS)):
        if si > 0:
            x = patch_merging(x, params["merge"][si - 1])    # features[2*si]
            feats.append(x)
        for bi, bp in enumerate(params["stages"][si]):
            shift = (0, 0) if bi % 2 == 0 else (WINDOW_SIZE[0] // 2,
                                                WINDOW_SIZE[1] // 2)
            x = swin_block(x, bp, NUM_HEADS[si], WINDOW_SIZE, shift)
        feats.append(x)                                      # features[2*si + 1]
    return feats


def encoder_wrapper_forward(x_nchw, params, out_indices):
    """Exactly mirrors SwinEncoderWrapper.forward."""
    feats = swin_features_forward(x_nchw, params)
    n = len(feats)
    outs = []
    for i, f in enumerate(feats):
        if i in out_indices:
            outs.append(f)
        elif (i == n - 1) & (-1 in out_indices):
            outs.append(f)
    return tuple(outs)


# ---------------------------------------------------------------------------
# Deterministic synthetic parameters (matmul weights bf16, LN/bias f32)
# ---------------------------------------------------------------------------
def init_params(key):
    keys = iter(jax.random.split(key, 512))

    def nrm(shape, scale=0.02, dtype=jnp.bfloat16):
        return (scale * jax.random.normal(next(keys), shape, jnp.float32)).astype(dtype)

    ph, pw = PATCH_SIZE
    ws0, ws1 = WINDOW_SIZE

    params = {
        "patch": {
            "w": nrm((IN_CHANS * ph * pw, EMBED_DIM)),
            "b": jnp.zeros((EMBED_DIM,), jnp.float32),
            "ln_g": jnp.ones((EMBED_DIM,), jnp.float32),
            "ln_b": jnp.zeros((EMBED_DIM,), jnp.float32),
        },
        "stages": [],
        "merge": [],
    }

    for si, depth in enumerate(DEPTHS):
        dim = EMBED_DIM * (2 ** si)
        hidden = int(dim * MLP_RATIO)
        nh = NUM_HEADS[si]
        blocks = []
        for _ in range(depth):
            table = nrm(((2 * ws0 - 1) * (2 * ws1 - 1), nh), dtype=jnp.float32)
            blocks.append({
                "ln1_g": jnp.ones((dim,), jnp.float32),
                "ln1_b": jnp.zeros((dim,), jnp.float32),
                "w_qkv": nrm((dim, 3 * dim)),
                "b_qkv": jnp.zeros((3 * dim,), jnp.float32),
                "w_proj": nrm((dim, dim)),
                "b_proj": jnp.zeros((dim,), jnp.float32),
                # rel-bias gathered from the table ONCE at init (nH, L, L)
                "rel_bias": _relative_position_bias(table, WINDOW_SIZE, nh),
                "ln2_g": jnp.ones((dim,), jnp.float32),
                "ln2_b": jnp.zeros((dim,), jnp.float32),
                "w_fc1": nrm((dim, hidden)),
                "b_fc1": jnp.zeros((hidden,), jnp.float32),
                "w_fc2": nrm((hidden, dim)),
                "b_fc2": jnp.zeros((dim,), jnp.float32),
            })
        params["stages"].append(blocks)
        if si < len(DEPTHS) - 1:
            params["merge"].append({
                "ln_g": jnp.ones((4 * dim,), jnp.float32),
                "ln_b": jnp.zeros((4 * dim,), jnp.float32),
                "w_red": nrm((4 * dim, 2 * dim)),            # bias-free Linear
            })
    return params


# ---------------------------------------------------------------------------
if __name__ == "__main__":
    key = jax.random.PRNGKey(0)
    kx, kp = jax.random.split(key)

    # PyTorch-style NCHW input: [batch=2, in_chans=4, H=16, W=16]
    x = jax.random.normal(kx, (2, IN_CHANS, 16, 16), jnp.float32)
    params = init_params(kp)

    fwd = jax.jit(lambda inp: encoder_wrapper_forward(inp, params, OUT_INDICES))
    outs = fwd(x)
    outs = jax.block_until_ready(outs)

    # out_indices = (1, -1) -> stage-1 feature and final stage feature
    assert isinstance(outs, tuple) and len(outs) == 2
    assert outs[0].shape == (2, 8, 8, EMBED_DIM)          # features[1]
    assert outs[1].shape == (2, 4, 4, EMBED_DIM * 2)      # features[-1]
    assert all(bool(jnp.isfinite(o).all()) for o in outs)

    print("KERNEL_OK")
</pallas_src>

<mosaic_0001>
module attributes {stable_mosaic.version = 11 : i64} {
  func.func @_mm_ln_kernel(%arg0: i32, %arg1: memref<128x16xf32, #tpu.memory_space<vmem>>, %arg2: memref<16x32xbf16, #tpu.memory_space<vmem>>, %arg3: memref<1x32xf32, #tpu.memory_space<vmem>>, %arg4: memref<1x32xf32, #tpu.memory_space<vmem>>, %arg5: memref<1x32xf32, #tpu.memory_space<vmem>>, %arg6: memref<128x32xf32, #tpu.memory_space<vmem>>) attributes {dimension_semantics = [#tpu.dimension_semantics<parallel>], iteration_bounds = array<i64: 1>, scalar_prefetch = 0 : i64, scratch_operands = 0 : i64, tpu.core_type = #tpu.core_type<tc>, window_params = [{transform_indices = @transform_0, window_bounds = array<i64: 128, 16>}, {pipeline_mode = #tpu.pipeline_mode<synchronous>, transform_indices = @transform_1, window_bounds = array<i64: 16, 32>}, {pipeline_mode = #tpu.pipeline_mode<synchronous>, transform_indices = @transform_2, window_bounds = array<i64: 1, 32>}, {pipeline_mode = #tpu.pipeline_mode<synchronous>, transform_indices = @transform_3, window_bounds = array<i64: 1, 32>}, {pipeline_mode = #tpu.pipeline_mode<synchronous>, transform_indices = @transform_4, window_bounds = array<i64: 1, 32>}, {transform_indices = @transform_5, window_bounds = array<i64: 128, 32>}]} {
    %c0 = arith.constant 0 : index
    %c0_0 = arith.constant 0 : index
    %0 = vector.load %arg1[%c0, %c0_0] : memref<128x16xf32, #tpu.memory_space<vmem>>, vector<128x16xf32>
    %1 = arith.truncf %0 : vector<128x16xf32> to vector<128x16xbf16>
    %c0_1 = arith.constant 0 : index
    %c0_2 = arith.constant 0 : index
    %2 = vector.load %arg2[%c0_1, %c0_2] : memref<16x32xbf16, #tpu.memory_space<vmem>>, vector<16x32xbf16>
    %cst = arith.constant dense<0.000000e+00> : vector<128x32xf32>
    %3 = tpu.matmul %1, %2, %cst {dimension_numbers = #tpu.dot_dimension_numbers<[1], [0], [0], [1], [0, 0, 1, 1], [], []>} : vector<128x16xbf16>, vector<16x32xbf16>, vector<128x32xf32> -> vector<128x32xf32>
    %c0_3 = arith.constant 0 : index
    %c0_4 = arith.constant 0 : index
    %4 = vector.load %arg3[%c0_3, %c0_4] : memref<1x32xf32, #tpu.memory_space<vmem>>, vector<1x32xf32>
    %5 = vector.broadcast %4 : vector<1x32xf32> to vector<128x32xf32>
    %6 = arith.addf %3, %5 : vector<128x32xf32>
    %c0_5 = arith.constant 0 : index
    %c0_6 = arith.constant 0 : index
    %7 = vector.load %arg4[%c0_5, %c0_6] : memref<1x32xf32, #tpu.memory_space<vmem>>, vector<1x32xf32>
    %c0_7 = arith.constant 0 : index
    %c0_8 = arith.constant 0 : index
    %8 = vector.load %arg5[%c0_7, %c0_8] : memref<1x32xf32, #tpu.memory_space<vmem>>, vector<1x32xf32>
    %cst_9 = arith.constant dense<0.000000e+00> : vector<128xf32>
    %9 = vector.multi_reduction <add>, %6, %cst_9 [1] : vector<128x32xf32> to vector<128xf32>
    %10 = vector.shape_cast %9 : vector<128xf32> to vector<128x1xf32>
    %cst_10 = arith.constant 3.200000e+01 : f32
    %11 = vector.broadcast %cst_10 : f32 to vector<128x1xf32>
    %12 = arith.divf %10, %11 : vector<128x1xf32>
    %13 = vector.broadcast %12 : vector<128x1xf32> to vector<128x32xf32>
    %14 = arith.subf %6, %13 : vector<128x32xf32>
    %15 = arith.mulf %14, %14 : vector<128x32xf32>
    %cst_11 = arith.constant dense<0.000000e+00> : vector<128xf32>
    %16 = vector.multi_reduction <add>, %15, %cst_11 [1] : vector<128x32xf32> to vector<128xf32>
    %17 = vector.shape_cast %16 : vector<128xf32> to vector<128x1xf32>
    %cst_12 = arith.constant 3.200000e+01 : f32
    %18 = vector.broadcast %cst_12 : f32 to vector<128x1xf32>
    %19 = arith.divf %17, %18 : vector<128x1xf32>
    %cst_13 = arith.constant 9.99999974E-6 : f32
    %20 = vector.broadcast %cst_13 : f32 to vector<128x1xf32>
    %21 = arith.addf %19, %20 : vector<128x1xf32>
    %22 = math.rsqrt %21 : vector<128x1xf32>
    %23 = vector.broadcast %22 : vector<128x1xf32> to vector<128x32xf32>
    %24 = arith.mulf %14, %23 : vector<128x32xf32>
    %25 = vector.broadcast %7 : vector<1x32xf32> to vector<128x32xf32>
    %26 = arith.mulf %24, %25 : vector<128x32xf32>
    %27 = vector.broadcast %8 : vector<1x32xf32> to vector<128x32xf32>
    %28 = arith.addf %26, %27 : vector<128x32xf32>
    %c0_14 = arith.constant 0 : index
    %c0_15 = arith.constant 0 : index
    %29 = vector.load %arg6[%c0_14, %c0_15] : memref<128x32xf32, #tpu.memory_space<vmem>>, vector<128x32xf32>
    tpu.vector_store %arg6[%c0_14, %c0_15], %28 {strides = array<i32>} : memref<128x32xf32, #tpu.memory_space<vmem>>, vector<128x32xf32>,
    return
  }
  func.func @transform_0(%arg0: i32) -> (i32, i32) {
    %c0_i32 = arith.constant 0 : i32
    %c0_i32_0 = arith.constant 0 : i32
    return %arg0, %c0_i32 : i32, i32
  }
  func.func @transform_1(%arg0: i32) -> (i32, i32) {
    %c0_i32 = arith.constant 0 : i32
    %c0_i32_0 = arith.constant 0 : i32
    %c0_i32_1 = arith.constant 0 : i32
    return %c0_i32, %c0_i32_0 : i32, i32
  }
  func.func @transform_2(%arg0: i32) -> (i32, i32) {
    %c0_i32 = arith.constant 0 : i32
    %c0_i32_0 = arith.constant 0 : i32
    %c0_i32_1 = arith.constant 0 : i32
    return %c0_i32, %c0_i32_0 : i32, i32
  }
  func.func @transform_3(%arg0: i32) -> (i32, i32) {
    %c0_i32 = arith.constant 0 : i32
    %c0_i32_0 = arith.constant 0 : i32
    %c0_i32_1 = arith.constant 0 : i32
    return %c0_i32, %c0_i32_0 : i32, i32
  }
  func.func @transform_4(%arg0: i32) -> (i32, i32) {
    %c0_i32 = arith.constant 0 : i32
    %c0_i32_0 = arith.constant 0 : i32
    %c0_i32_1 = arith.constant 0 : i32
    return %c0_i32, %c0_i32_0 : i32, i32
  }
  func.func @transform_5(%arg0: i32) -> (i32, i32) {
    %c0_i32 = arith.constant 0 : i32
    %c0_i32_0 = arith.constant 0 : i32
    return %arg0, %c0_i32 : i32, i32
  }
}

module attributes {stable_mosaic.version = 11 : i64} {
  func.func @_attn_mlp1_kernel(%arg0: i32, %arg1: memref<1x64x32xf32, #tpu.memory_space<vmem>>, %arg2: memref<1x32xf32, #tpu.memory_space<vmem>>, %arg3: memref<1x32xf32, #tpu.memory_space<vmem>>, %arg4: memref<32x96xbf16, #tpu.memory_space<vmem>>, %arg5: memref<1x96xf32, #tpu.memory_space<vmem>>, %arg6: memref<2x16x16xf32, #tpu.memory_space<vmem>>, %arg7: memref<32x32xbf16, #tpu.memory_space<vmem>>, %arg8: memref<1x32xf32, #tpu.memory_space<vmem>>, %arg9: memref<1x32xf32, #tpu.memory_space<vmem>>, %arg10: memref<1x32xf32, #tpu.memory_space<vmem>>, %arg11: memref<32x64xbf16, #tpu.memory_space<vmem>>, %arg12: memref<1x64xf32, #tpu.memory_space<vmem>>, %arg13: memref<1x64x32xf32, #tpu.memory_space<vmem>>, %arg14: memref<1x64x64xbf16, #tpu.memory_space<vmem>>) attributes {dimension_semantics = [#tpu.dimension_semantics<parallel>], iteration_bounds = array<i64: 2>, scalar_prefetch = 0 : i64, scratch_operands = 0 : i64, tpu.core_type = #tpu.core_type<tc>, window_params = [{transform_indices = @transform_0, window_bounds = array<i64: 1, 64, 32>}, {pipeline_mode = #tpu.pipeline_mode<synchronous>, transform_indices = @transform_1, window_bounds = array<i64: 1, 32>}, {pipeline_mode = #tpu.pipeline_mode<synchronous>, transform_indices = @transform_2, window_bounds = array<i64: 1, 32>}, {pipeline_mode = #tpu.pipeline_mode<synchronous>, transform_indices = @transform_3, window_bounds = array<i64: 32, 96>}, {pipeline_mode = #tpu.pipeline_mode<synchronous>, transform_indices = @transform_4, window_bounds = array<i64: 1, 96>}, {pipeline_mode = #tpu.pipeline_mode<synchronous>, transform_indices = @transform_5, window_bounds = array<i64: 2, 16, 16>}, {pipeline_mode = #tpu.pipeline_mode<synchronous>, transform_indices = @transform_6, window_bounds = array<i64: 32, 32>}, {pipeline_mode = #tpu.pipeline_mode<synchronous>, transform_indices = @transform_7, window_bounds = array<i64: 1, 32>}, {pipeline_mode = #tpu.pipeline_mode<synchronous>, transform_indices = @transform_8, window_bounds = array<i64: 1, 32>}, {pipeline_mode = #tpu.pipeline_mode<synchronous>, transform_indices = @transform_9, window_bounds = array<i64: 1, 32>}, {pipeline_mode = #tpu.pipeline_mode<synchronous>, transform_indices = @transform_10, window_bounds = array<i64: 32, 64>}, {pipeline_mode = #tpu.pipeline_mode<synchronous>, transform_indices = @transform_11, window_bounds = array<i64: 1, 64>}, {transform_indices = @transform_12, window_bounds = array<i64: 1, 64, 32>}, {transform_indices = @transform_13, window_bounds = array<i64: 1, 64, 64>}]} {
    %c0 = arith.constant 0 : index
    %c0_0 = arith.constant 0 : index
    %c0_1 = arith.constant 0 : index
    %0 = vector.load %arg1[%c0, %c0_0, %c0_1] : memref<1x64x32xf32, #tpu.memory_space<vmem>>, vector<1x64x32xf32>
    %1 = vector.shape_cast %0 : vector<1x64x32xf32> to vector<64x32xf32>
    %c0_2 = arith.constant 0 : index
    %c0_3 = arith.constant 0 : index
    %2 = vector.load %arg2[%c0_2, %c0_3] : memref<1x32xf32, #tpu.memory_space<vmem>>, vector<1x32xf32>
    %c0_4 = arith.constant 0 : index
    %c0_5 = arith.constant 0 : index
    %3 = vector.load %arg3[%c0_4, %c0_5] : memref<1x32xf32, #tpu.memory_space<vmem>>, vector<1x32xf32>
    %cst = arith.constant dense<0.000000e+00> : vector<64xf32>
    %4 = vector.multi_reduction <add>, %1, %cst [1] : vector<64x32xf32> to vector<64xf32>
    %5 = vector.shape_cast %4 : vector<64xf32> to vector<64x1xf32>
    %cst_6 = arith.constant 3.200000e+01 : f32
    %6 = vector.broadcast %cst_6 : f32 to vector<64x1xf32>
    %7 = arith.divf %5, %6 : vector<64x1xf32>
    %8 = vector.broadcast %7 : vector<64x1xf32> to vector<64x32xf32>
    %9 = arith.subf %1, %8 : vector<64x32xf32>
    %10 = arith.mulf %9, %9 : vector<64x32xf32>
    %cst_7 = arith.constant dense<0.000000e+00> : vector<64xf32>
    %11 = vector.multi_reduction <add>, %10, %cst_7 [1] : vector<64x32xf32> to vector<64xf32>
    %12 = vector.shape_cast %11 : vector<64xf32> to vector<64x1xf32>
    %cst_8 = arith.constant 3.200000e+01 : f32
    %13 = vector.broadcast %cst_8 : f32 to vector<64x1xf32>
    %14 = arith.divf %12, %13 : vector<64x1xf32>
    %cst_9 = arith.constant 9.99999974E-6 : f32
    %15 = vector.broadcast %cst_9 : f32 to vector<64x1xf32>
    %16 = arith.addf %14, %15 : vector<64x1xf32>
    %17 = math.rsqrt %16 : vector<64x1xf32>
    %18 = vector.broadcast %17 : vector<64x1xf32> to vector<64x32xf32>
    %19 = arith.mulf %9, %18 : vector<64x32xf32>
    %20 = vector.broadcast %2 : vector<1x32xf32> to vector<64x32xf32>
    %21 = arith.mulf %19, %20 : vector<64x32xf32>
    %22 = vector.broadcast %3 : vector<1x32xf32> to vector<64x32xf32>
    %23 = arith.addf %21, %22 : vector<64x32xf32>
    %24 = arith.truncf %23 : vector<64x32xf32> to vector<64x32xbf16>
    %c0_10 = arith.constant 0 : index
    %c0_11 = arith.constant 0 : index
    %25 = vector.load %arg4[%c0_10, %c0_11] : memref<32x96xbf16, #tpu.memory_space<vmem>>, vector<32x96xbf16>
    %cst_12 = arith.constant dense<0.000000e+00> : vector<64x96xf32>
    %26 = tpu.matmul %24, %25, %cst_12 {dimension_numbers = #tpu.dot_dimension_numbers<[1], [0], [0], [1], [0, 0, 1, 1], [], []>} : vector<64x32xbf16>, vector<32x96xbf16>, vector<64x96xf32> -> vector<64x96xf32>
    %c0_13 = arith.constant 0 : index
    %c0_14 = arith.constant 0 : index
    %27 = vector.load %arg5[%c0_13, %c0_14] : memref<1x96xf32, #tpu.memory_space<vmem>>, vector<1x96xf32>
    %28 = vector.broadcast %27 : vector<1x96xf32> to vector<64x96xf32>
    %29 = arith.addf %26, %28 : vector<64x96xf32>
    %30 = vector.shape_cast %29 : vector<64x96xf32> to vector<4x16x96xf32>
    %c0_15 = arith.constant 0 : index
    %c0_16 = arith.constant 0 : index
    %c0_17 = arith.constant 0 : index
    %31 = vector.load %arg6[%c0_15, %c0_16, %c0_17] : memref<2x16x16xf32, #tpu.memory_space<vmem>>, vector<2x16x16xf32>
    %c0_18 = arith.constant 0 : index
    %c0_19 = arith.constant 0 : index
    %32 = vector.load %arg7[%c0_18, %c0_19] : memref<32x32xbf16, #tpu.memory_space<vmem>>, vector<32x32xbf16>
    %cst_20 = arith.constant 0.000000e+00 : f32
    %33 = vector.broadcast %cst_20 : f32 to vector<64x32xf32>
    %34 = vector.extract_strided_slice %30 {offsets = [0, 0, 0], sizes = [4, 16, 16], strides = [1, 1, 1]} : vector<4x16x96xf32> to vector<4x16x16xf32>
    %35 = vector.extract_strided_slice %30 {offsets = [0, 0, 32], sizes = [4, 16, 16], strides = [1, 1, 1]} : vector<4x16x96xf32> to vector<4x16x16xf32>
    %36 = vector.extract_strided_slice %30 {offsets = [0, 0, 64], sizes = [4, 16, 16], strides = [1, 1, 1]} : vector<4x16x96xf32> to vector<4x16x16xf32>
    %37 = arith.truncf %34 : vector<4x16x16xf32> to vector<4x16x16xbf16>
    %38 = arith.truncf %35 : vector<4x16x16xf32> to vector<4x16x16xbf16>
    "tpu.trace_start"() <{level = 10 : i32, message = "wld,wmd->wlm"}> : () -> ()
    %cst_21 = arith.constant dense<0.000000e+00> : vector<4x16x16xf32>
    %39 = tpu.matmul %37, %38, %cst_21 {dimension_numbers = #tpu.dot_dimension_numbers<[2], [2], [1], [1], [0, 0, 0, 1, 1, 1], [0], [0]>} : vector<4x16x16xbf16>, vector<4x16x16xbf16>, vector<4x16x16xf32> -> vector<4x16x16xf32>
    "tpu.trace_stop"() : () -> ()
    %cst_22 = arith.constant 2.500000e-01 : f32
    %40 = vector.broadcast %cst_22 : f32 to vector<4x16x16xf32>
    %41 = arith.mulf %39, %40 : vector<4x16x16xf32>
    %42 = vector.extract_strided_slice %31 {offsets = [0, 0, 0], sizes = [1, 16, 16], strides = [1, 1, 1]} : vector<2x16x16xf32> to vector<1x16x16xf32>
    %43 = vector.shape_cast %42 : vector<1x16x16xf32> to vector<16x16xf32>
    %44 = vector.shape_cast %43 : vector<16x16xf32> to vector<1x16x16xf32>
    %45 = vector.broadcast %44 : vector<1x16x16xf32> to vector<4x16x16xf32>
    %46 = arith.addf %41, %45 : vector<4x16x16xf32>
    %cst_23 = arith.constant dense<0xFF800000> : vector<4x16xf32>
    %47 = vector.multi_reduction <maximumf>, %46, %cst_23 [2] : vector<4x16x16xf32> to vector<4x16xf32>
    %48 = vector.shape_cast %47 : vector<4x16xf32> to vector<4x16x1xf32>
    %49 = vector.broadcast %48 : vector<4x16x1xf32> to vector<4x16x16xf32>
    %50 = arith.subf %46, %49 : vector<4x16x16xf32>
    %51 = math.exp %50 : vector<4x16x16xf32>
    %cst_24 = arith.constant dense<0.000000e+00> : vector<4x16xf32>
    %52 = vector.multi_reduction <add>, %51, %cst_24 [2] : vector<4x16x16xf32> to vector<4x16xf32>
    %53 = vector.shape_cast %52 : vector<4x16xf32> to vector<4x16x1xf32>
    %54 = tpu.reciprocal %53 {approx = true} : vector<4x16x1xf32> -> vector<4x16x1xf32>
    %55 = vector.broadcast %54 : vector<4x16x1xf32> to vector<4x16x16xf32>
    %56 = arith.mulf %51, %55 : vector<4x16x16xf32>
    %57 = arith.truncf %56 : vector<4x16x16xf32> to vector<4x16x16xbf16>
    %58 = arith.truncf %36 : vector<4x16x16xf32> to vector<4x16x16xbf16>
    "tpu.trace_start"() <{level = 10 : i32, message = "wlm,wmd->wld"}> : () -> ()
    %cst_25 = arith.constant dense<0.000000e+00> : vector<4x16x16xf32>
    %59 = tpu.matmul %57, %58, %cst_25 {dimension_numbers = #tpu.dot_dimension_numbers<[2], [1], [1], [2], [0, 0, 0, 1, 1, 2], [0], [0]>} : vector<4x16x16xbf16>, vector<4x16x16xbf16>, vector<4x16x16xf32> -> vector<4x16x16xf32>
    "tpu.trace_stop"() : () -> ()
    %60 = vector.shape_cast %59 : vector<4x16x16xf32> to vector<64x16xf32>
    %61 = arith.truncf %60 : vector<64x16xf32> to vector<64x16xbf16>
    %62 = vector.extract_strided_slice %32 {offsets = [0, 0], sizes = [16, 32], strides = [1, 1]} : vector<32x32xbf16> to vector<16x32xbf16>
    %cst_26 = arith.constant dense<0.000000e+00> : vector<64x32xf32>
    %63 = tpu.matmul %61, %62, %cst_26 {dimension_numbers = #tpu.dot_dimension_numbers<[1], [0], [0], [1], [0, 0, 1, 1], [], []>} : vector<64x16xbf16>, vector<16x32xbf16>, vector<64x32xf32> -> vector<64x32xf32>
    %64 = arith.addf %33, %63 : vector<64x32xf32>
    %65 = vector.extract_strided_slice %30 {offsets = [0, 0, 16], sizes = [4, 16, 16], strides = [1, 1, 1]} : vector<4x16x96xf32> to vector<4x16x16xf32>
    %66 = vector.extract_strided_slice %30 {offsets = [0, 0, 48], sizes = [4, 16, 16], strides = [1, 1, 1]} : vector<4x16x96xf32> to vector<4x16x16xf32>
    %67 = vector.extract_strided_slice %30 {offsets = [0, 0, 80], sizes = [4, 16, 16], strides = [1, 1, 1]} : vector<4x16x96xf32> to vector<4x16x16xf32>
    %68 = arith.truncf %65 : vector<4x16x16xf32> to vector<4x16x16xbf16>
    %69 = arith.truncf %66 : vector<4x16x16xf32> to vector<4x16x16xbf16>
    "tpu.trace_start"() <{level = 10 : i32, message = "wld,wmd->wlm"}> : () -> ()
    %cst_27 = arith.constant dense<0.000000e+00> : vector<4x16x16xf32>
    %70 = tpu.matmul %68, %69, %cst_27 {dimension_numbers = #tpu.dot_dimension_numbers<[2], [2], [1], [1], [0, 0, 0, 1, 1, 1], [0], [0]>} : vector<4x16x16xbf16>, vector<4x16x16xbf16>, vector<4x16x16xf32> -> vector<4x16x16xf32>
    "tpu.trace_stop"() : () -> ()
    %cst_28 = arith.constant 2.500000e-01 : f32
    %71 = vector.broadcast %cst_28 : f32 to vector<4x16x16xf32>
    %72 = arith.mulf %70, %71 : vector<4x16x16xf32>
    %73 = vector.extract_strided_slice %31 {offsets = [1, 0, 0], sizes = [1, 16, 16], strides = [1, 1, 1]} : vector<2x16x16xf32> to vector<1x16x16xf32>
    %74 = vector.shape_cast %73 : vector<1x16x16xf32> to vector<16x16xf32>
    %75 = vector.shape_cast %74 : vector<16x16xf32> to vector<1x16x16xf32>
    %76 = vector.broadcast %75 : vector<1x16x16xf32> to vector<4x16x16xf32>
    %77 = arith.addf %72, %76 : vector<4x16x16xf32>
    %cst_29 = arith.constant dense<0xFF800000> : vector<4x16xf32>
    %78 = vector.multi_reduction <maximumf>, %77, %cst_29 [2] : vector<4x16x16xf32> to vector<4x16xf32>
    %79 = vector.shape_cast %78 : vector<4x16xf32> to vector<4x16x1xf32>
    %80 = vector.broadcast %79 : vector<4x16x1xf32> to vector<4x16x16xf32>
    %81 = arith.subf %77, %80 : vector<4x16x16xf32>
    %82 = math.exp %81 : vector<4x16x16xf32>
    %cst_30 = arith.constant dense<0.000000e+00> : vector<4x16xf32>
    %83 = vector.multi_reduction <add>, %82, %cst_30 [2] : vector<4x16x16xf32> to vector<4x16xf32>
    %84 = vector.shape_cast %83 : vector<4x16xf32> to vector<4x16x1xf32>
    %85 = tpu.reciprocal %84 {approx = true} : vector<4x16x1xf32> -> vector<4x16x1xf32>
    %86 = vector.broadcast %85 : vector<4x16x1xf32> to vector<4x16x16xf32>
    %87 = arith.mulf %82, %86 : vector<4x16x16xf32>
    %88 = arith.truncf %87 : vector<4x16x16xf32> to vector<4x16x16xbf16>
    %89 = arith.truncf %67 : vector<4x16x16xf32> to vector<4x16x16xbf16>
    "tpu.trace_start"() <{level = 10 : i32, message = "wlm,wmd->wld"}> : () -> ()
    %cst_31 = arith.constant dense<0.000000e+00> : vector<4x16x16xf32>
    %90 = tpu.matmul %88, %89, %cst_31 {dimension_numbers = #tpu.dot_dimension_numbers<[2], [1], [1], [2], [0, 0, 0, 1, 1, 2], [0], [0]>} : vector<4x16x16xbf16>, vector<4x16x16xbf16>, vector<4x16x16xf32> -> vector<4x16x16xf32>
    "tpu.trace_stop"() : () -> ()
    %91 = vector.shape_cast %90 : vector<4x16x16xf32> to vector<64x16xf32>
    %92 = arith.truncf %91 : vector<64x16xf32> to vector<64x16xbf16>
    %93 = vector.extract_strided_slice %32 {offsets = [16, 0], sizes = [16, 32], strides = [1, 1]} : vector<32x32xbf16> to vector<16x32xbf16>
    %cst_32 = arith.constant dense<0.000000e+00> : vector<64x32xf32>
    %94 = tpu.matmul %92, %93, %cst_32 {dimension_numbers = #tpu.dot_dimension_numbers<[1], [0], [0], [1], [0, 0, 1, 1], [], []>} : vector<64x16xbf16>, vector<16x32xbf16>, vector<64x32xf32> -> vector<64x32xf32>
    %95 = arith.addf %64, %94 : vector<64x32xf32>
    %96 = arith.addf %1, %95 : vector<64x32xf32>
    %c0_33 = arith.constant 0 : index
    %c0_34 = arith.constant 0 : index
    %97 = vector.load %arg8[%c0_33, %c0_34] : memref<1x32xf32, #tpu.memory_space<vmem>>, vector<1x32xf32>
    %98 = vector.broadcast %97 : vector<1x32xf32> to vector<64x32xf32>
    %99 = arith.addf %96, %98 : vector<64x32xf32>
    %c0_35 = arith.constant 0 : index
    %c0_36 = arith.constant 0 : index
    %c0_37 = arith.constant 0 : index
    %100 = vector.load %arg13[%c0_35, %c0_36, %c0_37] : memref<1x64x32xf32, #tpu.memory_space<vmem>>, vector<1x64x32xf32>
    %101 = vector.shape_cast %100 : vector<1x64x32xf32> to vector<64x32xf32>
    %102 = vector.shape_cast %99 : vector<64x32xf32> to vector<1x64x32xf32>
    tpu.vector_store %arg13[%c0_35, %c0_36, %c0_37], %102 {strides = array<i32>} : memref<1x64x32xf32, #tpu.memory_space<vmem>>, vector<1x64x32xf32>,
    %c0_38 = arith.constant 0 : index
    %c0_39 = arith.constant 0 : index
    %103 = vector.load %arg9[%c0_38, %c0_39] : memref<1x32xf32, #tpu.memory_space<vmem>>, vector<1x32xf32>
    %c0_40 = arith.constant 0 : index
    %c0_41 = arith.constant 0 : index
    %104 = vector.load %arg10[%c0_40, %c0_41] : memref<1x32xf32, #tpu.memory_space<vmem>>, vector<1x32xf32>
    %cst_42 = arith.constant dense<0.000000e+00> : vector<64xf32>
    %105 = vector.multi_reduction <add>, %99, %cst_42 [1] : vector<64x32xf32> to vector<64xf32>
    %106 = vector.shape_cast %105 : vector<64xf32> to vector<64x1xf32>
    %cst_43 = arith.constant 3.200000e+01 : f32
    %107 = vector.broadcast %cst_43 : f32 to vector<64x1xf32>
    %108 = arith.divf %106, %107 : vector<64x1xf32>
    %109 = vector.broadcast %108 : vector<64x1xf32> to vector<64x32xf32>
    %110 = arith.subf %99, %109 : vector<64x32xf32>
    %111 = arith.mulf %110, %110 : vector<64x32xf32>
    %cst_44 = arith.constant dense<0.000000e+00> : vector<64xf32>
    %112 = vector.multi_reduction <add>, %111, %cst_44 [1] : vector<64x32xf32> to vector<64xf32>
    %113 = vector.shape_cast %112 : vector<64xf32> to vector<64x1xf32>
    %cst_45 = arith.constant 3.200000e+01 : f32
    %114 = vector.broadcast %cst_45 : f32 to vector<64x1xf32>
    %115 = arith.divf %113, %114 : vector<64x1xf32>
    %cst_46 = arith.constant 9.99999974E-6 : f32
    %116 = vector.broadcast %cst_46 : f32 to vector<64x1xf32>
    %117 = arith.addf %115, %116 : vector<64x1xf32>
    %118 = math.rsqrt %117 : vector<64x1xf32>
    %119 = vector.broadcast %118 : vector<64x1xf32> to vector<64x32xf32>
    %120 = arith.mulf %110, %119 : vector<64x32xf32>
    %121 = vector.broadcast %103 : vector<1x32xf32> to vector<64x32xf32>
    %122 = arith.mulf %120, %121 : vector<64x32xf32>
    %123 = vector.broadcast %104 : vector<1x32xf32> to vector<64x32xf32>
    %124 = arith.addf %122, %123 : vector<64x32xf32>
    %125 = arith.truncf %124 : vector<64x32xf32> to vector<64x32xbf16>
    %c0_47 = arith.constant 0 : index
    %c0_48 = arith.constant 0 : index
    %126 = vector.load %arg11[%c0_47, %c0_48] : memref<32x64xbf16, #tpu.memory_space<vmem>>, vector<32x64xbf16>
    %cst_49 = arith.constant dense<0.000000e+00> : vector<64x64xf32>
    %127 = tpu.matmul %125, %126, %cst_49 {dimension_numbers = #tpu.dot_dimension_numbers<[1], [0], [0], [1], [0, 0, 1, 1], [], []>} : vector<64x32xbf16>, vector<32x64xbf16>, vector<64x64xf32> -> vector<64x64xf32>
    %c0_50 = arith.constant 0 : index
    %c0_51 = arith.constant 0 : index
    %128 = vector.load %arg12[%c0_50, %c0_51] : memref<1x64xf32, #tpu.memory_space<vmem>>, vector<1x64xf32>
    %129 = vector.broadcast %128 : vector<1x64xf32> to vector<64x64xf32>
    %130 = arith.addf %127, %129 : vector<64x64xf32>
    %131 = arith.truncf %130 : vector<64x64xf32> to vector<64x64xbf16>
    %c0_52 = arith.constant 0 : index
    %c0_53 = arith.constant 0 : index
    %c0_54 = arith.constant 0 : index
    %132 = vector.load %arg14[%c0_52, %c0_53, %c0_54] : memref<1x64x64xbf16, #tpu.memory_space<vmem>>, vector<1x64x64xbf16>
    %133 = vector.shape_cast %132 : vector<1x64x64xbf16> to vector<64x64xbf16>
    %134 = vector.shape_cast %131 : vector<64x64xbf16> to vector<1x64x64xbf16>
    tpu.vector_store %arg14[%c0_52, %c0_53, %c0_54], %134 {strides = array<i32>} : memref<1x64x64xbf16, #tpu.memory_space<vmem>>, vector<1x64x64xbf16>,
    return
  }
  func.func @transform_0(%arg0: i32) -> (i32, i32, i32) {
    %c0_i32 = arith.constant 0 : i32
    %c0_i32_0 = arith.constant 0 : i32
    %c0_i32_1 = arith.constant 0 : i32
    return %arg0, %c0_i32, %c0_i32_0 : i32, i32, i32
  }
  func.func @transform_1(%arg0: i32) -> (i32, i32) {
    %c0_i32 = arith.constant 0 : i32
    %c0_i32_0 = arith.constant 0 : i32
    %c0_i32_1 = arith.constant 0 : i32
    return %c0_i32, %c0_i32_0 : i32, i32
  }
  func.func @transform_2(%arg0: i32) -> (i32, i32) {
    %c0_i32 = arith.constant 0 : i32
    %c0_i32_0 = arith.constant 0 : i32
    %c0_i32_1 = arith.constant 0 : i32
    return %c0_i32, %c0_i32_0 : i32, i32
  }
  func.func @transform_3(%arg0: i32) -> (i32, i32) {
    %c0_i32 = arith.constant 0 : i32
    %c0_i32_0 = arith.constant 0 : i32
    %c0_i32_1 = arith.constant 0 : i32
    return %c0_i32, %c0_i32_0 : i32, i32
  }
  func.func @transform_4(%arg0: i32) -> (i32, i32) {
    %c0_i32 = arith.constant 0 : i32
    %c0_i32_0 = arith.constant 0 : i32
    %c0_i32_1 = arith.constant 0 : i32
    return %c0_i32, %c0_i32_0 : i32, i32
  }
  func.func @transform_5(%arg0: i32) -> (i32, i32, i32) {
    %c0_i32 = arith.constant 0 : i32
    %c0_i32_0 = arith.constant 0 : i32
    %c0_i32_1 = arith.constant 0 : i32
    %c0_i32_2 = arith.constant 0 : i32
    return %c0_i32, %c0_i32_0, %c0_i32_1 : i32, i32, i32
  }
  func.func @transform_6(%arg0: i32) -> (i32, i32) {
    %c0_i32 = arith.constant 0 : i32
    %c0_i32_0 = arith.constant 0 : i32
    %c0_i32_1 = arith.constant 0 : i32
    return %c0_i32, %c0_i32_0 : i32, i32
  }
  func.func @transform_7(%arg0: i32) -> (i32, i32) {
    %c0_i32 = arith.constant 0 : i32
    %c0_i32_0 = arith.constant 0 : i32
    %c0_i32_1 = arith.constant 0 : i32
    return %c0_i32, %c0_i32_0 : i32, i32
  }
  func.func @transform_8(%arg0: i32) -> (i32, i32) {
    %c0_i32 = arith.constant 0 : i32
    %c0_i32_0 = arith.constant 0 : i32
    %c0_i32_1 = arith.constant 0 : i32
    return %c0_i32, %c0_i32_0 : i32, i32
  }
  func.func @transform_9(%arg0: i32) -> (i32, i32) {
    %c0_i32 = arith.constant 0 : i32
    %c0_i32_0 = arith.constant 0 : i32
    %c0_i32_1 = arith.constant 0 : i32
    return %c0_i32, %c0_i32_0 : i32, i32
  }
  func.func @transform_10(%arg0: i32) -> (i32, i32) {
    %c0_i32 = arith.constant 0 : i32
    %c0_i32_0 = arith.constant 0 : i32
    %c0_i32_1 = arith.constant 0 : i32
    return %c0_i32, %c0_i32_0 : i32, i32
  }
  func.func @transform_11(%arg0: i32) -> (i32, i32) {
    %c0_i32 = arith.constant 0 : i32
    %c0_i32_0 = arith.constant 0 : i32
    %c0_i32_1 = arith.constant 0 : i32
    return %c0_i32, %c0_i32_0 : i32, i32
  }
  func.func @transform_12(%arg0: i32) -> (i32, i32, i32) {
    %c0_i32 = arith.constant 0 : i32
    %c0_i32_0 = arith.constant 0 : i32
    %c0_i32_1 = arith.constant 0 : i32
    return %arg0, %c0_i32, %c0_i32_0 : i32, i32, i32
  }
  func.func @transform_13(%arg0: i32) -> (i32, i32, i32) {
    %c0_i32 = arith.constant 0 : i32
    %c0_i32_0 = arith.constant 0 : i32
    %c0_i32_1 = arith.constant 0 : i32
    return %arg0, %c0_i32, %c0_i32_0 : i32, i32, i32
  }
}

module attributes {stable_mosaic.version = 11 : i64} {
  func.func @_mm_res_kernel(%arg0: i32, %arg1: memref<128x64xbf16, #tpu.memory_space<vmem>>, %arg2: memref<64x32xbf16, #tpu.memory_space<vmem>>, %arg3: memref<1x32xf32, #tpu.memory_space<vmem>>, %arg4: memref<128x32xf32, #tpu.memory_space<vmem>>, %arg5: memref<128x32xf32, #tpu.memory_space<vmem>>) attributes {dimension_semantics = [#tpu.dimension_semantics<parallel>], iteration_bounds = array<i64: 1>, scalar_prefetch = 0 : i64, scratch_operands = 0 : i64, tpu.core_type = #tpu.core_type<tc>, window_params = [{transform_indices = @transform_0, window_bounds = array<i64: 128, 64>}, {pipeline_mode = #tpu.pipeline_mode<synchronous>, transform_indices = @transform_1, window_bounds = array<i64: 64, 32>}, {pipeline_mode = #tpu.pipeline_mode<synchronous>, transform_indices = @transform_2, window_bounds = array<i64: 1, 32>}, {transform_indices = @transform_3, window_bounds = array<i64: 128, 32>}, {transform_indices = @transform_4, window_bounds = array<i64: 128, 32>}]} {
    %c0 = arith.constant 0 : index
    %c0_0 = arith.constant 0 : index
    %0 = vector.load %arg1[%c0, %c0_0] : memref<128x64xbf16, #tpu.memory_space<vmem>>, vector<128x64xbf16>
    %c0_1 = arith.constant 0 : index
    %c0_2 = arith.constant 0 : index
    %1 = vector.load %arg2[%c0_1, %c0_2] : memref<64x32xbf16, #tpu.memory_space<vmem>>, vector<64x32xbf16>
    %cst = arith.constant dense<0.000000e+00> : vector<128x32xf32>
    %2 = tpu.matmul %0, %1, %cst {dimension_numbers = #tpu.dot_dimension_numbers<[1], [0], [0], [1], [0, 0, 1, 1], [], []>} : vector<128x64xbf16>, vector<64x32xbf16>, vector<128x32xf32> -> vector<128x32xf32>
    %c0_3 = arith.constant 0 : index
    %c0_4 = arith.constant 0 : index
    %3 = vector.load %arg3[%c0_3, %c0_4] : memref<1x32xf32, #tpu.memory_space<vmem>>, vector<1x32xf32>
    %4 = vector.broadcast %3 : vector<1x32xf32> to vector<128x32xf32>
    %5 = arith.addf %2, %4 : vector<128x32xf32>
    %c0_5 = arith.constant 0 : index
    %c0_6 = arith.constant 0 : index
    %6 = vector.load %arg4[%c0_5, %c0_6] : memref<128x32xf32, #tpu.memory_space<vmem>>, vector<128x32xf32>
    %7 = arith.addf %6, %5 : vector<128x32xf32>
    %c0_7 = arith.constant 0 : index
    %c0_8 = arith.constant 0 : index
    %8 = vector.load %arg5[%c0_7, %c0_8] : memref<128x32xf32, #tpu.memory_space<vmem>>, vector<128x32xf32>
    tpu.vector_store %arg5[%c0_7, %c0_8], %7 {strides = array<i32>} : memref<128x32xf32, #tpu.memory_space<vmem>>, vector<128x32xf32>,
    return
  }
  func.func @transform_0(%arg0: i32) -> (i32, i32) {
    %c0_i32 = arith.constant 0 : i32
    %c0_i32_0 = arith.constant 0 : i32
    return %arg0, %c0_i32 : i32, i32
  }
  func.func @transform_1(%arg0: i32) -> (i32, i32) {
    %c0_i32 = arith.constant 0 : i32
    %c0_i32_0 = arith.constant 0 : i32
    %c0_i32_1 = arith.constant 0 : i32
    return %c0_i32, %c0_i32_0 : i32, i32
  }
  func.func @transform_2(%arg0: i32) -> (i32, i32) {
    %c0_i32 = arith.constant 0 : i32
    %c0_i32_0 = arith.constant 0 : i32
    %c0_i32_1 = arith.constant 0 : i32
    return %c0_i32, %c0_i32_0 : i32, i32
  }
  func.func @transform_3(%arg0: i32) -> (i32, i32) {
    %c0_i32 = arith.constant 0 : i32
    %c0_i32_0 = arith.constant 0 : i32
    return %arg0, %c0_i32 : i32, i32
  }
  func.func @transform_4(%arg0: i32) -> (i32, i32) {
    %c0_i32 = arith.constant 0 : i32
    %c0_i32_0 = arith.constant 0 : i32
    return %arg0, %c0_i32 : i32, i32
  }
}

module attributes {stable_mosaic.version = 11 : i64} {
  func.func @_attn_mlp1_kernel(%arg0: i32, %arg1: memref<1x64x32xf32, #tpu.memory_space<vmem>>, %arg2: memref<1x32xf32, #tpu.memory_space<vmem>>, %arg3: memref<1x32xf32, #tpu.memory_space<vmem>>, %arg4: memref<32x96xbf16, #tpu.memory_space<vmem>>, %arg5: memref<1x96xf32, #tpu.memory_space<vmem>>, %arg6: memref<2x16x16xf32, #tpu.memory_space<vmem>>, %arg7: memref<4x16x16xf32, #tpu.memory_space<vmem>>, %arg8: memref<32x32xbf16, #tpu.memory_space<vmem>>, %arg9: memref<1x32xf32, #tpu.memory_space<vmem>>, %arg10: memref<1x32xf32, #tpu.memory_space<vmem>>, %arg11: memref<1x32xf32, #tpu.memory_space<vmem>>, %arg12: memref<32x64xbf16, #tpu.memory_space<vmem>>, %arg13: memref<1x64xf32, #tpu.memory_space<vmem>>, %arg14: memref<1x64x32xf32, #tpu.memory_space<vmem>>, %arg15: memref<1x64x64xbf16, #tpu.memory_space<vmem>>) attributes {dimension_semantics = [#tpu.dimension_semantics<parallel>], iteration_bounds = array<i64: 2>, scalar_prefetch = 0 : i64, scratch_operands = 0 : i64, tpu.core_type = #tpu.core_type<tc>, window_params = [{transform_indices = @transform_0, window_bounds = array<i64: 1, 64, 32>}, {pipeline_mode = #tpu.pipeline_mode<synchronous>, transform_indices = @transform_1, window_bounds = array<i64: 1, 32>}, {pipeline_mode = #tpu.pipeline_mode<synchronous>, transform_indices = @transform_2, window_bounds = array<i64: 1, 32>}, {pipeline_mode = #tpu.pipeline_mode<synchronous>, transform_indices = @transform_3, window_bounds = array<i64: 32, 96>}, {pipeline_mode = #tpu.pipeline_mode<synchronous>, transform_indices = @transform_4, window_bounds = array<i64: 1, 96>}, {pipeline_mode = #tpu.pipeline_mode<synchronous>, transform_indices = @transform_5, window_bounds = array<i64: 2, 16, 16>}, {pipeline_mode = #tpu.pipeline_mode<synchronous>, transform_indices = @transform_6, window_bounds = array<i64: 4, 16, 16>}, {pipeline_mode = #tpu.pipeline_mode<synchronous>, transform_indices = @transform_7, window_bounds = array<i64: 32, 32>}, {pipeline_mode = #tpu.pipeline_mode<synchronous>, transform_indices = @transform_8, window_bounds = array<i64: 1, 32>}, {pipeline_mode = #tpu.pipeline_mode<synchronous>, transform_indices = @transform_9, window_bounds = array<i64: 1, 32>}, {pipeline_mode = #tpu.pipeline_mode<synchronous>, transform_indices = @transform_10, window_bounds = array<i64: 1, 32>}, {pipeline_mode = #tpu.pipeline_mode<synchronous>, transform_indices = @transform_11, window_bounds = array<i64: 32, 64>}, {pipeline_mode = #tpu.pipeline_mode<synchronous>, transform_indices = @transform_12, window_bounds = array<i64: 1, 64>}, {transform_indices = @transform_13, window_bounds = array<i64: 1, 64, 32>}, {transform_indices = @transform_14, window_bounds = array<i64: 1, 64, 64>}]} {
    %c0 = arith.constant 0 : index
    %c0_0 = arith.constant 0 : index
    %c0_1 = arith.constant 0 : index
    %0 = vector.load %arg1[%c0, %c0_0, %c0_1] : memref<1x64x32xf32, #tpu.memory_space<vmem>>, vector<1x64x32xf32>
    %1 = vector.shape_cast %0 : vector<1x64x32xf32> to vector<64x32xf32>
    %c0_2 = arith.constant 0 : index
    %c0_3 = arith.constant 0 : index
    %2 = vector.load %arg2[%c0_2, %c0_3] : memref<1x32xf32, #tpu.memory_space<vmem>>, vector<1x32xf32>
    %c0_4 = arith.constant 0 : index
    %c0_5 = arith.constant 0 : index
    %3 = vector.load %arg3[%c0_4, %c0_5] : memref<1x32xf32, #tpu.memory_space<vmem>>, vector<1x32xf32>
    %cst = arith.constant dense<0.000000e+00> : vector<64xf32>
    %4 = vector.multi_reduction <add>, %1, %cst [1] : vector<64x32xf32> to vector<64xf32>
    %5 = vector.shape_cast %4 : vector<64xf32> to vector<64x1xf32>
    %cst_6 = arith.constant 3.200000e+01 : f32
    %6 = vector.broadcast %cst_6 : f32 to vector<64x1xf32>
    %7 = arith.divf %5, %6 : vector<64x1xf32>
    %8 = vector.broadcast %7 : vector<64x1xf32> to vector<64x32xf32>
    %9 = arith.subf %1, %8 : vector<64x32xf32>
    %10 = arith.mulf %9, %9 : vector<64x32xf32>
    %cst_7 = arith.constant dense<0.000000e+00> : vector<64xf32>
    %11 = vector.multi_reduction <add>, %10, %cst_7 [1] : vector<64x32xf32> to vector<64xf32>
    %12 = vector.shape_cast %11 : vector<64xf32> to vector<64x1xf32>
    %cst_8 = arith.constant 3.200000e+01 : f32
    %13 = vector.broadcast %cst_8 : f32 to vector<64x1xf32>
    %14 = arith.divf %12, %13 : vector<64x1xf32>
    %cst_9 = arith.constant 9.99999974E-6 : f32
    %15 = vector.broadcast %cst_9 : f32 to vector<64x1xf32>
    %16 = arith.addf %14, %15 : vector<64x1xf32>
    %17 = math.rsqrt %16 : vector<64x1xf32>
    %18 = vector.broadcast %17 : vector<64x1xf32> to vector<64x32xf32>
    %19 = arith.mulf %9, %18 : vector<64x32xf32>
    %20 = vector.broadcast %2 : vector<1x32xf32> to vector<64x32xf32>
    %21 = arith.mulf %19, %20 : vector<64x32xf32>
    %22 = vector.broadcast %3 : vector<1x32xf32> to vector<64x32xf32>
    %23 = arith.addf %21, %22 : vector<64x32xf32>
    %24 = arith.truncf %23 : vector<64x32xf32> to vector<64x32xbf16>
    %c0_10 = arith.constant 0 : index
    %c0_11 = arith.constant 0 : index
    %25 = vector.load %arg4[%c0_10, %c0_11] : memref<32x96xbf16, #tpu.memory_space<vmem>>, vector<32x96xbf16>
    %cst_12 = arith.constant dense<0.000000e+00> : vector<64x96xf32>
    %26 = tpu.matmul %24, %25, %cst_12 {dimension_numbers = #tpu.dot_dimension_numbers<[1], [0], [0], [1], [0, 0, 1, 1], [], []>} : vector<64x32xbf16>, vector<32x96xbf16>, vector<64x96xf32> -> vector<64x96xf32>
    %c0_13 = arith.constant 0 : index
    %c0_14 = arith.constant 0 : index
    %27 = vector.load %arg5[%c0_13, %c0_14] : memref<1x96xf32, #tpu.memory_space<vmem>>, vector<1x96xf32>
    %28 = vector.broadcast %27 : vector<1x96xf32> to vector<64x96xf32>
    %29 = arith.addf %26, %28 : vector<64x96xf32>
    %30 = vector.shape_cast %29 : vector<64x96xf32> to vector<4x16x96xf32>
    %c0_15 = arith.constant 0 : index
    %c0_16 = arith.constant 0 : index
    %c0_17 = arith.constant 0 : index
    %31 = vector.load %arg6[%c0_15, %c0_16, %c0_17] : memref<2x16x16xf32, #tpu.memory_space<vmem>>, vector<2x16x16xf32>
    %c0_18 = arith.constant 0 : index
    %c0_19 = arith.constant 0 : index
    %c0_20 = arith.constant 0 : index
    %32 = vector.load %arg7[%c0_18, %c0_19, %c0_20] : memref<4x16x16xf32, #tpu.memory_space<vmem>>, vector<4x16x16xf32>
    %c0_21 = arith.constant 0 : index
    %c0_22 = arith.constant 0 : index
    %33 = vector.load %arg8[%c0_21, %c0_22] : memref<32x32xbf16, #tpu.memory_space<vmem>>, vector<32x32xbf16>
    %cst_23 = arith.constant 0.000000e+00 : f32
    %34 = vector.broadcast %cst_23 : f32 to vector<64x32xf32>
    %35 = vector.extract_strided_slice %30 {offsets = [0, 0, 0], sizes = [4, 16, 16], strides = [1, 1, 1]} : vector<4x16x96xf32> to vector<4x16x16xf32>
    %36 = vector.extract_strided_slice %30 {offsets = [0, 0, 32], sizes = [4, 16, 16], strides = [1, 1, 1]} : vector<4x16x96xf32> to vector<4x16x16xf32>
    %37 = vector.extract_strided_slice %30 {offsets = [0, 0, 64], sizes = [4, 16, 16], strides = [1, 1, 1]} : vector<4x16x96xf32> to vector<4x16x16xf32>
    %38 = arith.truncf %35 : vector<4x16x16xf32> to vector<4x16x16xbf16>
    %39 = arith.truncf %36 : vector<4x16x16xf32> to vector<4x16x16xbf16>
    "tpu.trace_start"() <{level = 10 : i32, message = "wld,wmd->wlm"}> : () -> ()
    %cst_24 = arith.constant dense<0.000000e+00> : vector<4x16x16xf32>
    %40 = tpu.matmul %38, %39, %cst_24 {dimension_numbers = #tpu.dot_dimension_numbers<[2], [2], [1], [1], [0, 0, 0, 1, 1, 1], [0], [0]>} : vector<4x16x16xbf16>, vector<4x16x16xbf16>, vector<4x16x16xf32> -> vector<4x16x16xf32>
    "tpu.trace_stop"() : () -> ()
    %cst_25 = arith.constant 2.500000e-01 : f32
    %41 = vector.broadcast %cst_25 : f32 to vector<4x16x16xf32>
    %42 = arith.mulf %40, %41 : vector<4x16x16xf32>
    %43 = vector.extract_strided_slice %31 {offsets = [0, 0, 0], sizes = [1, 16, 16], strides = [1, 1, 1]} : vector<2x16x16xf32> to vector<1x16x16xf32>
    %44 = vector.shape_cast %43 : vector<1x16x16xf32> to vector<16x16xf32>
    %45 = vector.shape_cast %44 : vector<16x16xf32> to vector<1x16x16xf32>
    %46 = vector.broadcast %45 : vector<1x16x16xf32> to vector<4x16x16xf32>
    %47 = arith.addf %42, %46 : vector<4x16x16xf32>
    %48 = arith.addf %47, %32 : vector<4x16x16xf32>
    %cst_26 = arith.constant dense<0xFF800000> : vector<4x16xf32>
    %49 = vector.multi_reduction <maximumf>, %48, %cst_26 [2] : vector<4x16x16xf32> to vector<4x16xf32>
    %50 = vector.shape_cast %49 : vector<4x16xf32> to vector<4x16x1xf32>
    %51 = vector.broadcast %50 : vector<4x16x1xf32> to vector<4x16x16xf32>
    %52 = arith.subf %48, %51 : vector<4x16x16xf32>
    %53 = math.exp %52 : vector<4x16x16xf32>
    %cst_27 = arith.constant dense<0.000000e+00> : vector<4x16xf32>
    %54 = vector.multi_reduction <add>, %53, %cst_27 [2] : vector<4x16x16xf32> to vector<4x16xf32>
    %55 = vector.shape_cast %54 : vector<4x16xf32> to vector<4x16x1xf32>
    %56 = tpu.reciprocal %55 {approx = true} : vector<4x16x1xf32> -> vector<4x16x1xf32>
    %57 = vector.broadcast %56 : vector<4x16x1xf32> to vector<4x16x16xf32>
    %58 = arith.mulf %53, %57 : vector<4x16x16xf32>
    %59 = arith.truncf %58 : vector<4x16x16xf32> to vector<4x16x16xbf16>
    %60 = arith.truncf %37 : vector<4x16x16xf32> to vector<4x16x16xbf16>
    "tpu.trace_start"() <{level = 10 : i32, message = "wlm,wmd->wld"}> : () -> ()
    %cst_28 = arith.constant dense<0.000000e+00> : vector<4x16x16xf32>
    %61 = tpu.matmul %59, %60, %cst_28 {dimension_numbers = #tpu.dot_dimension_numbers<[2], [1], [1], [2], [0, 0, 0, 1, 1, 2], [0], [0]>} : vector<4x16x16xbf16>, vector<4x16x16xbf16>, vector<4x16x16xf32> -> vector<4x16x16xf32>
    "tpu.trace_stop"() : () -> ()
    %62 = vector.shape_cast %61 : vector<4x16x16xf32> to vector<64x16xf32>
    %63 = arith.truncf %62 : vector<64x16xf32> to vector<64x16xbf16>
    %64 = vector.extract_strided_slice %33 {offsets = [0, 0], sizes = [16, 32], strides = [1, 1]} : vector<32x32xbf16> to vector<16x32xbf16>
    %cst_29 = arith.constant dense<0.000000e+00> : vector<64x32xf32>
    %65 = tpu.matmul %63, %64, %cst_29 {dimension_numbers = #tpu.dot_dimension_numbers<[1], [0], [0], [1], [0, 0, 1, 1], [], []>} : vector<64x16xbf16>, vector<16x32xbf16>, vector<64x32xf32> -> vector<64x32xf32>
    %66 = arith.addf %34, %65 : vector<64x32xf32>
    %67 = vector.extract_strided_slice %30 {offsets = [0, 0, 16], sizes = [4, 16, 16], strides = [1, 1, 1]} : vector<4x16x96xf32> to vector<4x16x16xf32>
    %68 = vector.extract_strided_slice %30 {offsets = [0, 0, 48], sizes = [4, 16, 16], strides = [1, 1, 1]} : vector<4x16x96xf32> to vector<4x16x16xf32>
    %69 = vector.extract_strided_slice %30 {offsets = [0, 0, 80], sizes = [4, 16, 16], strides = [1, 1, 1]} : vector<4x16x96xf32> to vector<4x16x16xf32>
    %70 = arith.truncf %67 : vector<4x16x16xf32> to vector<4x16x16xbf16>
    %71 = arith.truncf %68 : vector<4x16x16xf32> to vector<4x16x16xbf16>
    "tpu.trace_start"() <{level = 10 : i32, message = "wld,wmd->wlm"}> : () -> ()
    %cst_30 = arith.constant dense<0.000000e+00> : vector<4x16x16xf32>
    %72 = tpu.matmul %70, %71, %cst_30 {dimension_numbers = #tpu.dot_dimension_numbers<[2], [2], [1], [1], [0, 0, 0, 1, 1, 1], [0], [0]>} : vector<4x16x16xbf16>, vector<4x16x16xbf16>, vector<4x16x16xf32> -> vector<4x16x16xf32>
    "tpu.trace_stop"() : () -> ()
    %cst_31 = arith.constant 2.500000e-01 : f32
    %73 = vector.broadcast %cst_31 : f32 to vector<4x16x16xf32>
    %74 = arith.mulf %72, %73 : vector<4x16x16xf32>
    %75 = vector.extract_strided_slice %31 {offsets = [1, 0, 0], sizes = [1, 16, 16], strides = [1, 1, 1]} : vector<2x16x16xf32> to vector<1x16x16xf32>
    %76 = vector.shape_cast %75 : vector<1x16x16xf32> to vector<16x16xf32>
    %77 = vector.shape_cast %76 : vector<16x16xf32> to vector<1x16x16xf32>
    %78 = vector.broadcast %77 : vector<1x16x16xf32> to vector<4x16x16xf32>
    %79 = arith.addf %74, %78 : vector<4x16x16xf32>
    %80 = arith.addf %79, %32 : vector<4x16x16xf32>
    %cst_32 = arith.constant dense<0xFF800000> : vector<4x16xf32>
    %81 = vector.multi_reduction <maximumf>, %80, %cst_32 [2] : vector<4x16x16xf32> to vector<4x16xf32>
    %82 = vector.shape_cast %81 : vector<4x16xf32> to vector<4x16x1xf32>
    %83 = vector.broadcast %82 : vector<4x16x1xf32> to vector<4x16x16xf32>
    %84 = arith.subf %80, %83 : vector<4x16x16xf32>
    %85 = math.exp %84 : vector<4x16x16xf32>
    %cst_33 = arith.constant dense<0.000000e+00> : vector<4x16xf32>
    %86 = vector.multi_reduction <add>, %85, %cst_33 [2] : vector<4x16x16xf32> to vector<4x16xf32>
    %87 = vector.shape_cast %86 : vector<4x16xf32> to vector<4x16x1xf32>
    %88 = tpu.reciprocal %87 {approx = true} : vector<4x16x1xf32> -> vector<4x16x1xf32>
    %89 = vector.broadcast %88 : vector<4x16x1xf32> to vector<4x16x16xf32>
    %90 = arith.mulf %85, %89 : vector<4x16x16xf32>
    %91 = arith.truncf %90 : vector<4x16x16xf32> to vector<4x16x16xbf16>
    %92 = arith.truncf %69 : vector<4x16x16xf32> to vector<4x16x16xbf16>
    "tpu.trace_start"() <{level = 10 : i32, message = "wlm,wmd->wld"}> : () -> ()
    %cst_34 = arith.constant dense<0.000000e+00> : vector<4x16x16xf32>
    %93 = tpu.matmul %91, %92, %cst_34 {dimension_numbers = #tpu.dot_dimension_numbers<[2], [1], [1], [2], [0, 0, 0, 1, 1, 2], [0], [0]>} : vector<4x16x16xbf16>, vector<4x16x16xbf16>, vector<4x16x16xf32> -> vector<4x16x16xf32>
    "tpu.trace_stop"() : () -> ()
    %94 = vector.shape_cast %93 : vector<4x16x16xf32> to vector<64x16xf32>
    %95 = arith.truncf %94 : vector<64x16xf32> to vector<64x16xbf16>
    %96 = vector.extract_strided_slice %33 {offsets = [16, 0], sizes = [16, 32], strides = [1, 1]} : vector<32x32xbf16> to vector<16x32xbf16>
    %cst_35 = arith.constant dense<0.000000e+00> : vector<64x32xf32>
    %97 = tpu.matmul %95, %96, %cst_35 {dimension_numbers = #tpu.dot_dimension_numbers<[1], [0], [0], [1], [0, 0, 1, 1], [], []>} : vector<64x16xbf16>, vector<16x32xbf16>, vector<64x32xf32> -> vector<64x32xf32>
    %98 = arith.addf %66, %97 : vector<64x32xf32>
    %99 = arith.addf %1, %98 : vector<64x32xf32>
    %c0_36 = arith.constant 0 : index
    %c0_37 = arith.constant 0 : index
    %100 = vector.load %arg9[%c0_36, %c0_37] : memref<1x32xf32, #tpu.memory_space<vmem>>, vector<1x32xf32>
    %101 = vector.broadcast %100 : vector<1x32xf32> to vector<64x32xf32>
    %102 = arith.addf %99, %101 : vector<64x32xf32>
    %c0_38 = arith.constant 0 : index
    %c0_39 = arith.constant 0 : index
    %c0_40 = arith.constant 0 : index
    %103 = vector.load %arg14[%c0_38, %c0_39, %c0_40] : memref<1x64x32xf32, #tpu.memory_space<vmem>>, vector<1x64x32xf32>
    %104 = vector.shape_cast %103 : vector<1x64x32xf32> to vector<64x32xf32>
    %105 = vector.shape_cast %102 : vector<64x32xf32> to vector<1x64x32xf32>
    tpu.vector_store %arg14[%c0_38, %c0_39, %c0_40], %105 {strides = array<i32>} : memref<1x64x32xf32, #tpu.memory_space<vmem>>, vector<1x64x32xf32>,
    %c0_41 = arith.constant 0 : index
    %c0_42 = arith.constant 0 : index
    %106 = vector.load %arg10[%c0_41, %c0_42] : memref<1x32xf32, #tpu.memory_space<vmem>>, vector<1x32xf32>
    %c0_43 = arith.constant 0 : index
    %c0_44 = arith.constant 0 : index
    %107 = vector.load %arg11[%c0_43, %c0_44] : memref<1x32xf32, #tpu.memory_space<vmem>>, vector<1x32xf32>
    %cst_45 = arith.constant dense<0.000000e+00> : vector<64xf32>
    %108 = vector.multi_reduction <add>, %102, %cst_45 [1] : vector<64x32xf32> to vector<64xf32>
    %109 = vector.shape_cast %108 : vector<64xf32> to vector<64x1xf32>
    %cst_46 = arith.constant 3.200000e+01 : f32
    %110 = vector.broadcast %cst_46 : f32 to vector<64x1xf32>
    %111 = arith.divf %109, %110 : vector<64x1xf32>
    %112 = vector.broadcast %111 : vector<64x1xf32> to vector<64x32xf32>
    %113 = arith.subf %102, %112 : vector<64x32xf32>
    %114 = arith.mulf %113, %113 : vector<64x32xf32>
    %cst_47 = arith.constant dense<0.000000e+00> : vector<64xf32>
    %115 = vector.multi_reduction <add>, %114, %cst_47 [1] : vector<64x32xf32> to vector<64xf32>
    %116 = vector.shape_cast %115 : vector<64xf32> to vector<64x1xf32>
    %cst_48 = arith.constant 3.200000e+01 : f32
    %117 = vector.broadcast %cst_48 : f32 to vector<64x1xf32>
    %118 = arith.divf %116, %117 : vector<64x1xf32>
    %cst_49 = arith.constant 9.99999974E-6 : f32
    %119 = vector.broadcast %cst_49 : f32 to vector<64x1xf32>
    %120 = arith.addf %118, %119 : vector<64x1xf32>
    %121 = math.rsqrt %120 : vector<64x1xf32>
    %122 = vector.broadcast %121 : vector<64x1xf32> to vector<64x32xf32>
    %123 = arith.mulf %113, %122 : vector<64x32xf32>
    %124 = vector.broadcast %106 : vector<1x32xf32> to vector<64x32xf32>
    %125 = arith.mulf %123, %124 : vector<64x32xf32>
    %126 = vector.broadcast %107 : vector<1x32xf32> to vector<64x32xf32>
    %127 = arith.addf %125, %126 : vector<64x32xf32>
    %128 = arith.truncf %127 : vector<64x32xf32> to vector<64x32xbf16>
    %c0_50 = arith.constant 0 : index
    %c0_51 = arith.constant 0 : index
    %129 = vector.load %arg12[%c0_50, %c0_51] : memref<32x64xbf16, #tpu.memory_space<vmem>>, vector<32x64xbf16>
    %cst_52 = arith.constant dense<0.000000e+00> : vector<64x64xf32>
    %130 = tpu.matmul %128, %129, %cst_52 {dimension_numbers = #tpu.dot_dimension_numbers<[1], [0], [0], [1], [0, 0, 1, 1], [], []>} : vector<64x32xbf16>, vector<32x64xbf16>, vector<64x64xf32> -> vector<64x64xf32>
    %c0_53 = arith.constant 0 : index
    %c0_54 = arith.constant 0 : index
    %131 = vector.load %arg13[%c0_53, %c0_54] : memref<1x64xf32, #tpu.memory_space<vmem>>, vector<1x64xf32>
    %132 = vector.broadcast %131 : vector<1x64xf32> to vector<64x64xf32>
    %133 = arith.addf %130, %132 : vector<64x64xf32>
    %134 = arith.truncf %133 : vector<64x64xf32> to vector<64x64xbf16>
    %c0_55 = arith.constant 0 : index
    %c0_56 = arith.constant 0 : index
    %c0_57 = arith.constant 0 : index
    %135 = vector.load %arg15[%c0_55, %c0_56, %c0_57] : memref<1x64x64xbf16, #tpu.memory_space<vmem>>, vector<1x64x64xbf16>
    %136 = vector.shape_cast %135 : vector<1x64x64xbf16> to vector<64x64xbf16>
    %137 = vector.shape_cast %134 : vector<64x64xbf16> to vector<1x64x64xbf16>
    tpu.vector_store %arg15[%c0_55, %c0_56, %c0_57], %137 {strides = array<i32>} : memref<1x64x64xbf16, #tpu.memory_space<vmem>>, vector<1x64x64xbf16>,
    return
  }
  func.func @transform_0(%arg0: i32) -> (i32, i32, i32) {
    %c0_i32 = arith.constant 0 : i32
    %c0_i32_0 = arith.constant 0 : i32
    %c0_i32_1 = arith.constant 0 : i32
    return %arg0, %c0_i32, %c0_i32_0 : i32, i32, i32
  }
  func.func @transform_1(%arg0: i32) -> (i32, i32) {
    %c0_i32 = arith.constant 0 : i32
    %c0_i32_0 = arith.constant 0 : i32
    %c0_i32_1 = arith.constant 0 : i32
    return %c0_i32, %c0_i32_0 : i32, i32
  }
  func.func @transform_2(%arg0: i32) -> (i32, i32) {
    %c0_i32 = arith.constant 0 : i32
    %c0_i32_0 = arith.constant 0 : i32
    %c0_i32_1 = arith.constant 0 : i32
    return %c0_i32, %c0_i32_0 : i32, i32
  }
  func.func @transform_3(%arg0: i32) -> (i32, i32) {
    %c0_i32 = arith.constant 0 : i32
    %c0_i32_0 = arith.constant 0 : i32
    %c0_i32_1 = arith.constant 0 : i32
    return %c0_i32, %c0_i32_0 : i32, i32
  }
  func.func @transform_4(%arg0: i32) -> (i32, i32) {
    %c0_i32 = arith.constant 0 : i32
    %c0_i32_0 = arith.constant 0 : i32
    %c0_i32_1 = arith.constant 0 : i32
    return %c0_i32, %c0_i32_0 : i32, i32
  }
  func.func @transform_5(%arg0: i32) -> (i32, i32, i32) {
    %c0_i32 = arith.constant 0 : i32
    %c0_i32_0 = arith.constant 0 : i32
    %c0_i32_1 = arith.constant 0 : i32
    %c0_i32_2 = arith.constant 0 : i32
    return %c0_i32, %c0_i32_0, %c0_i32_1 : i32, i32, i32
  }
  func.func @transform_6(%arg0: i32) -> (i32, i32, i32) {
    %c0_i32 = arith.constant 0 : i32
    %c0_i32_0 = arith.constant 0 : i32
    %c0_i32_1 = arith.constant 0 : i32
    %c0_i32_2 = arith.constant 0 : i32
    return %c0_i32, %c0_i32_0, %c0_i32_1 : i32, i32, i32
  }
  func.func @transform_7(%arg0: i32) -> (i32, i32) {
    %c0_i32 = arith.constant 0 : i32
    %c0_i32_0 = arith.constant 0 : i32
    %c0_i32_1 = arith.constant 0 : i32
    return %c0_i32, %c0_i32_0 : i32, i32
  }
  func.func @transform_8(%arg0: i32) -> (i32, i32) {
    %c0_i32 = arith.constant 0 : i32
    %c0_i32_0 = arith.constant 0 : i32
    %c0_i32_1 = arith.constant 0 : i32
    return %c0_i32, %c0_i32_0 : i32, i32
  }
  func.func @transform_9(%arg0: i32) -> (i32, i32) {
    %c0_i32 = arith.constant 0 : i32
    %c0_i32_0 = arith.constant 0 : i32
    %c0_i32_1 = arith.constant 0 : i32
    return %c0_i32, %c0_i32_0 : i32, i32
  }
  func.func @transform_10(%arg0: i32) -> (i32, i32) {
    %c0_i32 = arith.constant 0 : i32
    %c0_i32_0 = arith.constant 0 : i32
    %c0_i32_1 = arith.constant 0 : i32
    return %c0_i32, %c0_i32_0 : i32, i32
  }
  func.func @transform_11(%arg0: i32) -> (i32, i32) {
    %c0_i32 = arith.constant 0 : i32
    %c0_i32_0 = arith.constant 0 : i32
    %c0_i32_1 = arith.constant 0 : i32
    return %c0_i32, %c0_i32_0 : i32, i32
  }
  func.func @transform_12(%arg0: i32) -> (i32, i32) {
    %c0_i32 = arith.constant 0 : i32
    %c0_i32_0 = arith.constant 0 : i32
    %c0_i32_1 = arith.constant 0 : i32
    return %c0_i32, %c0_i32_0 : i32, i32
  }
  func.func @transform_13(%arg0: i32) -> (i32, i32, i32) {
    %c0_i32 = arith.constant 0 : i32
    %c0_i32_0 = arith.constant 0 : i32
    %c0_i32_1 = arith.constant 0 : i32
    return %arg0, %c0_i32, %c0_i32_0 : i32, i32, i32
  }
  func.func @transform_14(%arg0: i32) -> (i32, i32, i32) {
    %c0_i32 = arith.constant 0 : i32
    %c0_i32_0 = arith.constant 0 : i32
    %c0_i32_1 = arith.constant 0 : i32
    return %arg0, %c0_i32, %c0_i32_0 : i32, i32, i32
  }
}

module attributes {stable_mosaic.version = 11 : i64} {
  func.func @_ln_mm_kernel(%arg0: i32, %arg1: memref<32x128xf32, #tpu.memory_space<vmem>>, %arg2: memref<1x128xf32, #tpu.memory_space<vmem>>, %arg3: memref<1x128xf32, #tpu.memory_space<vmem>>, %arg4: memref<128x64xbf16, #tpu.memory_space<vmem>>, %arg5: memref<32x64xf32, #tpu.memory_space<vmem>>) attributes {dimension_semantics = [#tpu.dimension_semantics<parallel>], iteration_bounds = array<i64: 1>, scalar_prefetch = 0 : i64, scratch_operands = 0 : i64, tpu.core_type = #tpu.core_type<tc>, window_params = [{transform_indices = @transform_0, window_bounds = array<i64: 32, 128>}, {pipeline_mode = #tpu.pipeline_mode<synchronous>, transform_indices = @transform_1, window_bounds = array<i64: 1, 128>}, {pipeline_mode = #tpu.pipeline_mode<synchronous>, transform_indices = @transform_2, window_bounds = array<i64: 1, 128>}, {pipeline_mode = #tpu.pipeline_mode<synchronous>, transform_indices = @transform_3, window_bounds = array<i64: 128, 64>}, {transform_indices = @transform_4, window_bounds = array<i64: 32, 64>}]} {
    %c0 = arith.constant 0 : index
    %c0_0 = arith.constant 0 : index
    %0 = vector.load %arg1[%c0, %c0_0] : memref<32x128xf32, #tpu.memory_space<vmem>>, vector<32x128xf32>
    %c0_1 = arith.constant 0 : index
    %c0_2 = arith.constant 0 : index
    %1 = vector.load %arg2[%c0_1, %c0_2] : memref<1x128xf32, #tpu.memory_space<vmem>>, vector<1x128xf32>
    %c0_3 = arith.constant 0 : index
    %c0_4 = arith.constant 0 : index
    %2 = vector.load %arg3[%c0_3, %c0_4] : memref<1x128xf32, #tpu.memory_space<vmem>>, vector<1x128xf32>
    %cst = arith.constant dense<0.000000e+00> : vector<32xf32>
    %3 = vector.multi_reduction <add>, %0, %cst [1] : vector<32x128xf32> to vector<32xf32>
    %4 = vector.shape_cast %3 : vector<32xf32> to vector<32x1xf32>
    %cst_5 = arith.constant 1.280000e+02 : f32
    %5 = vector.broadcast %cst_5 : f32 to vector<32x1xf32>
    %6 = arith.divf %4, %5 : vector<32x1xf32>
    %7 = vector.broadcast %6 : vector<32x1xf32> to vector<32x128xf32>
    %8 = arith.subf %0, %7 : vector<32x128xf32>
    %9 = arith.mulf %8, %8 : vector<32x128xf32>
    %cst_6 = arith.constant dense<0.000000e+00> : vector<32xf32>
    %10 = vector.multi_reduction <add>, %9, %cst_6 [1] : vector<32x128xf32> to vector<32xf32>
    %11 = vector.shape_cast %10 : vector<32xf32> to vector<32x1xf32>
    %cst_7 = arith.constant 1.280000e+02 : f32
    %12 = vector.broadcast %cst_7 : f32 to vector<32x1xf32>
    %13 = arith.divf %11, %12 : vector<32x1xf32>
    %cst_8 = arith.constant 9.99999974E-6 : f32
    %14 = vector.broadcast %cst_8 : f32 to vector<32x1xf32>
    %15 = arith.addf %13, %14 : vector<32x1xf32>
    %16 = math.rsqrt %15 : vector<32x1xf32>
    %17 = vector.broadcast %16 : vector<32x1xf32> to vector<32x128xf32>
    %18 = arith.mulf %8, %17 : vector<32x128xf32>
    %19 = vector.broadcast %1 : vector<1x128xf32> to vector<32x128xf32>
    %20 = arith.mulf %18, %19 : vector<32x128xf32>
    %21 = vector.broadcast %2 : vector<1x128xf32> to vector<32x128xf32>
    %22 = arith.addf %20, %21 : vector<32x128xf32>
    %23 = arith.truncf %22 : vector<32x128xf32> to vector<32x128xbf16>
    %c0_9 = arith.constant 0 : index
    %c0_10 = arith.constant 0 : index
    %24 = vector.load %arg4[%c0_9, %c0_10] : memref<128x64xbf16, #tpu.memory_space<vmem>>, vector<128x64xbf16>
    %cst_11 = arith.constant dense<0.000000e+00> : vector<32x64xf32>
    %25 = tpu.matmul %23, %24, %cst_11 {dimension_numbers = #tpu.dot_dimension_numbers<[1], [0], [0], [1], [0, 0, 1, 1], [], []>} : vector<32x128xbf16>, vector<128x64xbf16>, vector<32x64xf32> -> vector<32x64xf32>
    %c0_12 = arith.constant 0 : index
    %c0_13 = arith.constant 0 : index
    %26 = vector.load %arg5[%c0_12, %c0_13] : memref<32x64xf32, #tpu.memory_space<vmem>>, vector<32x64xf32>
    tpu.vector_store %arg5[%c0_12, %c0_13], %25 {strides = array<i32>} : memref<32x64xf32, #tpu.memory_space<vmem>>, vector<32x64xf32>,
    return
  }
  func.func @transform_0(%arg0: i32) -> (i32, i32) {
    %c0_i32 = arith.constant 0 : i32
    %c0_i32_0 = arith.constant 0 : i32
    return %arg0, %c0_i32 : i32, i32
  }
  func.func @transform_1(%arg0: i32) -> (i32, i32) {
    %c0_i32 = arith.constant 0 : i32
    %c0_i32_0 = arith.constant 0 : i32
    %c0_i32_1 = arith.constant 0 : i32
    return %c0_i32, %c0_i32_0 : i32, i32
  }
  func.func @transform_2(%arg0: i32) -> (i32, i32) {
    %c0_i32 = arith.constant 0 : i32
    %c0_i32_0 = arith.constant 0 : i32
    %c0_i32_1 = arith.constant 0 : i32
    return %c0_i32, %c0_i32_0 : i32, i32
  }
  func.func @transform_3(%arg0: i32) -> (i32, i32) {
    %c0_i32 = arith.constant 0 : i32
    %c0_i32_0 = arith.constant 0 : i32
    %c0_i32_1 = arith.constant 0 : i32
    return %c0_i32, %c0_i32_0 : i32, i32
  }
  func.func @transform_4(%arg0: i32) -> (i32, i32) {
    %c0_i32 = arith.constant 0 : i32
    %c0_i32_0 = arith.constant 0 : i32
    return %arg0, %c0_i32 : i32, i32
  }
}

module attributes {stable_mosaic.version = 11 : i64} {
  func.func @_attn_mlp1_kernel(%arg0: i32, %arg1: memref<1x16x64xf32, #tpu.memory_space<vmem>>, %arg2: memref<1x64xf32, #tpu.memory_space<vmem>>, %arg3: memref<1x64xf32, #tpu.memory_space<vmem>>, %arg4: memref<64x192xbf16, #tpu.memory_space<vmem>>, %arg5: memref<1x192xf32, #tpu.memory_space<vmem>>, %arg6: memref<4x16x16xf32, #tpu.memory_space<vmem>>, %arg7: memref<64x64xbf16, #tpu.memory_space<vmem>>, %arg8: memref<1x64xf32, #tpu.memory_space<vmem>>, %arg9: memref<1x64xf32, #tpu.memory_space<vmem>>, %arg10: memref<1x64xf32, #tpu.memory_space<vmem>>, %arg11: memref<64x128xbf16, #tpu.memory_space<vmem>>, %arg12: memref<1x128xf32, #tpu.memory_space<vmem>>, %arg13: memref<1x16x64xf32, #tpu.memory_space<vmem>>, %arg14: memref<1x16x128xbf16, #tpu.memory_space<vmem>>) attributes {dimension_semantics = [#tpu.dimension_semantics<parallel>], iteration_bounds = array<i64: 2>, scalar_prefetch = 0 : i64, scratch_operands = 0 : i64, tpu.core_type = #tpu.core_type<tc>, window_params = [{transform_indices = @transform_0, window_bounds = array<i64: 1, 16, 64>}, {pipeline_mode = #tpu.pipeline_mode<synchronous>, transform_indices = @transform_1, window_bounds = array<i64: 1, 64>}, {pipeline_mode = #tpu.pipeline_mode<synchronous>, transform_indices = @transform_2, window_bounds = array<i64: 1, 64>}, {pipeline_mode = #tpu.pipeline_mode<synchronous>, transform_indices = @transform_3, window_bounds = array<i64: 64, 192>}, {pipeline_mode = #tpu.pipeline_mode<synchronous>, transform_indices = @transform_4, window_bounds = array<i64: 1, 192>}, {pipeline_mode = #tpu.pipeline_mode<synchronous>, transform_indices = @transform_5, window_bounds = array<i64: 4, 16, 16>}, {pipeline_mode = #tpu.pipeline_mode<synchronous>, transform_indices = @transform_6, window_bounds = array<i64: 64, 64>}, {pipeline_mode = #tpu.pipeline_mode<synchronous>, transform_indices = @transform_7, window_bounds = array<i64: 1, 64>}, {pipeline_mode = #tpu.pipeline_mode<synchronous>, transform_indices = @transform_8, window_bounds = array<i64: 1, 64>}, {pipeline_mode = #tpu.pipeline_mode<synchronous>, transform_indices = @transform_9, window_bounds = array<i64: 1, 64>}, {pipeline_mode = #tpu.pipeline_mode<synchronous>, transform_indices = @transform_10, window_bounds = array<i64: 64, 128>}, {pipeline_mode = #tpu.pipeline_mode<synchronous>, transform_indices = @transform_11, window_bounds = array<i64: 1, 128>}, {transform_indices = @transform_12, window_bounds = array<i64: 1, 16, 64>}, {transform_indices = @transform_13, window_bounds = array<i64: 1, 16, 128>}]} {
    %c0 = arith.constant 0 : index
    %c0_0 = arith.constant 0 : index
    %c0_1 = arith.constant 0 : index
    %0 = vector.load %arg1[%c0, %c0_0, %c0_1] : memref<1x16x64xf32, #tpu.memory_space<vmem>>, vector<1x16x64xf32>
    %1 = vector.shape_cast %0 : vector<1x16x64xf32> to vector<16x64xf32>
    %c0_2 = arith.constant 0 : index
    %c0_3 = arith.constant 0 : index
    %2 = vector.load %arg2[%c0_2, %c0_3] : memref<1x64xf32, #tpu.memory_space<vmem>>, vector<1x64xf32>
    %c0_4 = arith.constant 0 : index
    %c0_5 = arith.constant 0 : index
    %3 = vector.load %arg3[%c0_4, %c0_5] : memref<1x64xf32, #tpu.memory_space<vmem>>, vector<1x64xf32>
    %cst = arith.constant dense<0.000000e+00> : vector<16xf32>
    %4 = vector.multi_reduction <add>, %1, %cst [1] : vector<16x64xf32> to vector<16xf32>
    %5 = vector.shape_cast %4 : vector<16xf32> to vector<16x1xf32>
    %cst_6 = arith.constant 6.400000e+01 : f32
    %6 = vector.broadcast %cst_6 : f32 to vector<16x1xf32>
    %7 = arith.divf %5, %6 : vector<16x1xf32>
    %8 = vector.broadcast %7 : vector<16x1xf32> to vector<16x64xf32>
    %9 = arith.subf %1, %8 : vector<16x64xf32>
    %10 = arith.mulf %9, %9 : vector<16x64xf32>
    %cst_7 = arith.constant dense<0.000000e+00> : vector<16xf32>
    %11 = vector.multi_reduction <add>, %10, %cst_7 [1] : vector<16x64xf32> to vector<16xf32>
    %12 = vector.shape_cast %11 : vector<16xf32> to vector<16x1xf32>
    %cst_8 = arith.constant 6.400000e+01 : f32
    %13 = vector.broadcast %cst_8 : f32 to vector<16x1xf32>
    %14 = arith.divf %12, %13 : vector<16x1xf32>
    %cst_9 = arith.constant 9.99999974E-6 : f32
    %15 = vector.broadcast %cst_9 : f32 to vector<16x1xf32>
    %16 = arith.addf %14, %15 : vector<16x1xf32>
    %17 = math.rsqrt %16 : vector<16x1xf32>
    %18 = vector.broadcast %17 : vector<16x1xf32> to vector<16x64xf32>
    %19 = arith.mulf %9, %18 : vector<16x64xf32>
    %20 = vector.broadcast %2 : vector<1x64xf32> to vector<16x64xf32>
    %21 = arith.mulf %19, %20 : vector<16x64xf32>
    %22 = vector.broadcast %3 : vector<1x64xf32> to vector<16x64xf32>
    %23 = arith.addf %21, %22 : vector<16x64xf32>
    %24 = arith.truncf %23 : vector<16x64xf32> to vector<16x64xbf16>
    %c0_10 = arith.constant 0 : index
    %c0_11 = arith.constant 0 : index
    %25 = vector.load %arg4[%c0_10, %c0_11] : memref<64x192xbf16, #tpu.memory_space<vmem>>, vector<64x192xbf16>
    %cst_12 = arith.constant dense<0.000000e+00> : vector<16x192xf32>
    %26 = tpu.matmul %24, %25, %cst_12 {dimension_numbers = #tpu.dot_dimension_numbers<[1], [0], [0], [1], [0, 0, 1, 1], [], []>} : vector<16x64xbf16>, vector<64x192xbf16>, vector<16x192xf32> -> vector<16x192xf32>
    %c0_13 = arith.constant 0 : index
    %c0_14 = arith.constant 0 : index
    %27 = vector.load %arg5[%c0_13, %c0_14] : memref<1x192xf32, #tpu.memory_space<vmem>>, vector<1x192xf32>
    %28 = vector.broadcast %27 : vector<1x192xf32> to vector<16x192xf32>
    %29 = arith.addf %26, %28 : vector<16x192xf32>
    %30 = vector.shape_cast %29 : vector<16x192xf32> to vector<1x16x192xf32>
    %c0_15 = arith.constant 0 : index
    %c0_16 = arith.constant 0 : index
    %c0_17 = arith.constant 0 : index
    %31 = vector.load %arg6[%c0_15, %c0_16, %c0_17] : memref<4x16x16xf32, #tpu.memory_space<vmem>>, vector<4x16x16xf32>
    %c0_18 = arith.constant 0 : index
    %c0_19 = arith.constant 0 : index
    %32 = vector.load %arg7[%c0_18, %c0_19] : memref<64x64xbf16, #tpu.memory_space<vmem>>, vector<64x64xbf16>
    %cst_20 = arith.constant 0.000000e+00 : f32
    %33 = vector.broadcast %cst_20 : f32 to vector<16x64xf32>
    %34 = vector.extract_strided_slice %30 {offsets = [0, 0, 0], sizes = [1, 16, 16], strides = [1, 1, 1]} : vector<1x16x192xf32> to vector<1x16x16xf32>
    %35 = vector.extract_strided_slice %30 {offsets = [0, 0, 64], sizes = [1, 16, 16], strides = [1, 1, 1]} : vector<1x16x192xf32> to vector<1x16x16xf32>
    %36 = vector.extract_strided_slice %30 {offsets = [0, 0, 128], sizes = [1, 16, 16], strides = [1, 1, 1]} : vector<1x16x192xf32> to vector<1x16x16xf32>
    %37 = arith.truncf %34 : vector<1x16x16xf32> to vector<1x16x16xbf16>
    %38 = arith.truncf %35 : vector<1x16x16xf32> to vector<1x16x16xbf16>
    "tpu.trace_start"() <{level = 10 : i32, message = "wld,wmd->wlm"}> : () -> ()
    %cst_21 = arith.constant dense<0.000000e+00> : vector<1x16x16xf32>
    %39 = tpu.matmul %37, %38, %cst_21 {dimension_numbers = #tpu.dot_dimension_numbers<[2], [2], [1], [1], [0, 0, 0, 1, 1, 1], [0], [0]>} : vector<1x16x16xbf16>, vector<1x16x16xbf16>, vector<1x16x16xf32> -> vector<1x16x16xf32>
    "tpu.trace_stop"() : () -> ()
    %cst_22 = arith.constant 2.500000e-01 : f32
    %40 = vector.broadcast %cst_22 : f32 to vector<1x16x16xf32>
    %41 = arith.mulf %39, %40 : vector<1x16x16xf32>
    %42 = vector.extract_strided_slice %31 {offsets = [0, 0, 0], sizes = [1, 16, 16], strides = [1, 1, 1]} : vector<4x16x16xf32> to vector<1x16x16xf32>
    %43 = vector.shape_cast %42 : vector<1x16x16xf32> to vector<16x16xf32>
    %44 = vector.shape_cast %43 : vector<16x16xf32> to vector<1x16x16xf32>
    %45 = arith.addf %41, %44 : vector<1x16x16xf32>
    %cst_23 = arith.constant dense<0xFF800000> : vector<1x16xf32>
    %46 = vector.multi_reduction <maximumf>, %45, %cst_23 [2] : vector<1x16x16xf32> to vector<1x16xf32>
    %47 = vector.shape_cast %46 : vector<1x16xf32> to vector<1x16x1xf32>
    %48 = vector.broadcast %47 : vector<1x16x1xf32> to vector<1x16x16xf32>
    %49 = arith.subf %45, %48 : vector<1x16x16xf32>
    %50 = math.exp %49 : vector<1x16x16xf32>
    %cst_24 = arith.constant dense<0.000000e+00> : vector<1x16xf32>
    %51 = vector.multi_reduction <add>, %50, %cst_24 [2] : vector<1x16x16xf32> to vector<1x16xf32>
    %52 = vector.shape_cast %51 : vector<1x16xf32> to vector<1x16x1xf32>
    %53 = tpu.reciprocal %52 {approx = true} : vector<1x16x1xf32> -> vector<1x16x1xf32>
    %54 = vector.broadcast %53 : vector<1x16x1xf32> to vector<1x16x16xf32>
    %55 = arith.mulf %50, %54 : vector<1x16x16xf32>
    %56 = arith.truncf %55 : vector<1x16x16xf32> to vector<1x16x16xbf16>
    %57 = arith.truncf %36 : vector<1x16x16xf32> to vector<1x16x16xbf16>
    "tpu.trace_start"() <{level = 10 : i32, message = "wlm,wmd->wld"}> : () -> ()
    %cst_25 = arith.constant dense<0.000000e+00> : vector<1x16x16xf32>
    %58 = tpu.matmul %56, %57, %cst_25 {dimension_numbers = #tpu.dot_dimension_numbers<[2], [1], [1], [2], [0, 0, 0, 1, 1, 2], [0], [0]>} : vector<1x16x16xbf16>, vector<1x16x16xbf16>, vector<1x16x16xf32> -> vector<1x16x16xf32>
    "tpu.trace_stop"() : () -> ()
    %59 = vector.shape_cast %58 : vector<1x16x16xf32> to vector<16x16xf32>
    %60 = arith.truncf %59 : vector<16x16xf32> to vector<16x16xbf16>
    %61 = vector.extract_strided_slice %32 {offsets = [0, 0], sizes = [16, 64], strides = [1, 1]} : vector<64x64xbf16> to vector<16x64xbf16>
    %cst_26 = arith.constant dense<0.000000e+00> : vector<16x64xf32>
    %62 = tpu.matmul %60, %61, %cst_26 {dimension_numbers = #tpu.dot_dimension_numbers<[1], [0], [0], [1], [0, 0, 1, 1], [], []>} : vector<16x16xbf16>, vector<16x64xbf16>, vector<16x64xf32> -> vector<16x64xf32>
    %63 = arith.addf %33, %62 : vector<16x64xf32>
    %64 = vector.extract_strided_slice %30 {offsets = [0, 0, 16], sizes = [1, 16, 16], strides = [1, 1, 1]} : vector<1x16x192xf32> to vector<1x16x16xf32>
    %65 = vector.extract_strided_slice %30 {offsets = [0, 0, 80], sizes = [1, 16, 16], strides = [1, 1, 1]} : vector<1x16x192xf32> to vector<1x16x16xf32>
    %66 = vector.extract_strided_slice %30 {offsets = [0, 0, 144], sizes = [1, 16, 16], strides = [1, 1, 1]} : vector<1x16x192xf32> to vector<1x16x16xf32>
    %67 = arith.truncf %64 : vector<1x16x16xf32> to vector<1x16x16xbf16>
    %68 = arith.truncf %65 : vector<1x16x16xf32> to vector<1x16x16xbf16>
    "tpu.trace_start"() <{level = 10 : i32, message = "wld,wmd->wlm"}> : () -> ()
    %cst_27 = arith.constant dense<0.000000e+00> : vector<1x16x16xf32>
    %69 = tpu.matmul %67, %68, %cst_27 {dimension_numbers = #tpu.dot_dimension_numbers<[2], [2], [1], [1], [0, 0, 0, 1, 1, 1], [0], [0]>} : vector<1x16x16xbf16>, vector<1x16x16xbf16>, vector<1x16x16xf32> -> vector<1x16x16xf32>
    "tpu.trace_stop"() : () -> ()
    %cst_28 = arith.constant 2.500000e-01 : f32
    %70 = vector.broadcast %cst_28 : f32 to vector<1x16x16xf32>
    %71 = arith.mulf %69, %70 : vector<1x16x16xf32>
    %72 = vector.extract_strided_slice %31 {offsets = [1, 0, 0], sizes = [1, 16, 16], strides = [1, 1, 1]} : vector<4x16x16xf32> to vector<1x16x16xf32>
    %73 = vector.shape_cast %72 : vector<1x16x16xf32> to vector<16x16xf32>
    %74 = vector.shape_cast %73 : vector<16x16xf32> to vector<1x16x16xf32>
    %75 = arith.addf %71, %74 : vector<1x16x16xf32>
    %cst_29 = arith.constant dense<0xFF800000> : vector<1x16xf32>
    %76 = vector.multi_reduction <maximumf>, %75, %cst_29 [2] : vector<1x16x16xf32> to vector<1x16xf32>
    %77 = vector.shape_cast %76 : vector<1x16xf32> to vector<1x16x1xf32>
    %78 = vector.broadcast %77 : vector<1x16x1xf32> to vector<1x16x16xf32>
    %79 = arith.subf %75, %78 : vector<1x16x16xf32>
    %80 = math.exp %79 : vector<1x16x16xf32>
    %cst_30 = arith.constant dense<0.000000e+00> : vector<1x16xf32>
    %81 = vector.multi_reduction <add>, %80, %cst_30 [2] : vector<1x16x16xf32> to vector<1x16xf32>
    %82 = vector.shape_cast %81 : vector<1x16xf32> to vector<1x16x1xf32>
    %83 = tpu.reciprocal %82 {approx = true} : vector<1x16x1xf32> -> vector<1x16x1xf32>
    %84 = vector.broadcast %83 : vector<1x16x1xf32> to vector<1x16x16xf32>
    %85 = arith.mulf %80, %84 : vector<1x16x16xf32>
    %86 = arith.truncf %85 : vector<1x16x16xf32> to vector<1x16x16xbf16>
    %87 = arith.truncf %66 : vector<1x16x16xf32> to vector<1x16x16xbf16>
    "tpu.trace_start"() <{level = 10 : i32, message = "wlm,wmd->wld"}> : () -> ()
    %cst_31 = arith.constant dense<0.000000e+00> : vector<1x16x16xf32>
    %88 = tpu.matmul %86, %87, %cst_31 {dimension_numbers = #tpu.dot_dimension_numbers<[2], [1], [1], [2], [0, 0, 0, 1, 1, 2], [0], [0]>} : vector<1x16x16xbf16>, vector<1x16x16xbf16>, vector<1x16x16xf32> -> vector<1x16x16xf32>
    "tpu.trace_stop"() : () -> ()
    %89 = vector.shape_cast %88 : vector<1x16x16xf32> to vector<16x16xf32>
    %90 = arith.truncf %89 : vector<16x16xf32> to vector<16x16xbf16>
    %91 = vector.extract_strided_slice %32 {offsets = [16, 0], sizes = [16, 64], strides = [1, 1]} : vector<64x64xbf16> to vector<16x64xbf16>
    %cst_32 = arith.constant dense<0.000000e+00> : vector<16x64xf32>
    %92 = tpu.matmul %90, %91, %cst_32 {dimension_numbers = #tpu.dot_dimension_numbers<[1], [0], [0], [1], [0, 0, 1, 1], [], []>} : vector<16x16xbf16>, vector<16x64xbf16>, vector<16x64xf32> -> vector<16x64xf32>
    %93 = arith.addf %63, %92 : vector<16x64xf32>
    %94 = vector.extract_strided_slice %30 {offsets = [0, 0, 32], sizes = [1, 16, 16], strides = [1, 1, 1]} : vector<1x16x192xf32> to vector<1x16x16xf32>
    %95 = vector.extract_strided_slice %30 {offsets = [0, 0, 96], sizes = [1, 16, 16], strides = [1, 1, 1]} : vector<1x16x192xf32> to vector<1x16x16xf32>
    %96 = vector.extract_strided_slice %30 {offsets = [0, 0, 160], sizes = [1, 16, 16], strides = [1, 1, 1]} : vector<1x16x192xf32> to vector<1x16x16xf32>
    %97 = arith.truncf %94 : vector<1x16x16xf32> to vector<1x16x16xbf16>
    %98 = arith.truncf %95 : vector<1x16x16xf32> to vector<1x16x16xbf16>
    "tpu.trace_start"() <{level = 10 : i32, message = "wld,wmd->wlm"}> : () -> ()
    %cst_33 = arith.constant dense<0.000000e+00> : vector<1x16x16xf32>
    %99 = tpu.matmul %97, %98, %cst_33 {dimension_numbers = #tpu.dot_dimension_numbers<[2], [2], [1], [1], [0, 0, 0, 1, 1, 1], [0], [0]>} : vector<1x16x16xbf16>, vector<1x16x16xbf16>, vector<1x16x16xf32> -> vector<1x16x16xf32>
    "tpu.trace_stop"() : () -> ()
    %cst_34 = arith.constant 2.500000e-01 : f32
    %100 = vector.broadcast %cst_34 : f32 to vector<1x16x16xf32>
    %101 = arith.mulf %99, %100 : vector<1x16x16xf32>
    %102 = vector.extract_strided_slice %31 {offsets = [2, 0, 0], sizes = [1, 16, 16], strides = [1, 1, 1]} : vector<4x16x16xf32> to vector<1x16x16xf32>
    %103 = vector.shape_cast %102 : vector<1x16x16xf32> to vector<16x16xf32>
    %104 = vector.shape_cast %103 : vector<16x16xf32> to vector<1x16x16xf32>
    %105 = arith.addf %101, %104 : vector<1x16x16xf32>
    %cst_35 = arith.constant dense<0xFF800000> : vector<1x16xf32>
    %106 = vector.multi_reduction <maximumf>, %105, %cst_35 [2] : vector<1x16x16xf32> to vector<1x16xf32>
    %107 = vector.shape_cast %106 : vector<1x16xf32> to vector<1x16x1xf32>
    %108 = vector.broadcast %107 : vector<1x16x1xf32> to vector<1x16x16xf32>
    %109 = arith.subf %105, %108 : vector<1x16x16xf32>
    %110 = math.exp %109 : vector<1x16x16xf32>
    %cst_36 = arith.constant dense<0.000000e+00> : vector<1x16xf32>
    %111 = vector.multi_reduction <add>, %110, %cst_36 [2] : vector<1x16x16xf32> to vector<1x16xf32>
    %112 = vector.shape_cast %111 : vector<1x16xf32> to vector<1x16x1xf32>
    %113 = tpu.reciprocal %112 {approx = true} : vector<1x16x1xf32> -> vector<1x16x1xf32>
    %114 = vector.broadcast %113 : vector<1x16x1xf32> to vector<1x16x16xf32>
    %115 = arith.mulf %110, %114 : vector<1x16x16xf32>
    %116 = arith.truncf %115 : vector<1x16x16xf32> to vector<1x16x16xbf16>
    %117 = arith.truncf %96 : vector<1x16x16xf32> to vector<1x16x16xbf16>
    "tpu.trace_start"() <{level = 10 : i32, message = "wlm,wmd->wld"}> : () -> ()
    %cst_37 = arith.constant dense<0.000000e+00> : vector<1x16x16xf32>
    %118 = tpu.matmul %116, %117, %cst_37 {dimension_numbers = #tpu.dot_dimension_numbers<[2], [1], [1], [2], [0, 0, 0, 1, 1, 2], [0], [0]>} : vector<1x16x16xbf16>, vector<1x16x16xbf16>, vector<1x16x16xf32> -> vector<1x16x16xf32>
    "tpu.trace_stop"() : () -> ()
    %119 = vector.shape_cast %118 : vector<1x16x16xf32> to vector<16x16xf32>
    %120 = arith.truncf %119 : vector<16x16xf32> to vector<16x16xbf16>
    %121 = vector.extract_strided_slice %32 {offsets = [32, 0], sizes = [16, 64], strides = [1, 1]} : vector<64x64xbf16> to vector<16x64xbf16>
    %cst_38 = arith.constant dense<0.000000e+00> : vector<16x64xf32>
    %122 = tpu.matmul %120, %121, %cst_38 {dimension_numbers = #tpu.dot_dimension_numbers<[1], [0], [0], [1], [0, 0, 1, 1], [], []>} : vector<16x16xbf16>, vector<16x64xbf16>, vector<16x64xf32> -> vector<16x64xf32>
    %123 = arith.addf %93, %122 : vector<16x64xf32>
    %124 = vector.extract_strided_slice %30 {offsets = [0, 0, 48], sizes = [1, 16, 16], strides = [1, 1, 1]} : vector<1x16x192xf32> to vector<1x16x16xf32>
    %125 = vector.extract_strided_slice %30 {offsets = [0, 0, 112], sizes = [1, 16, 16], strides = [1, 1, 1]} : vector<1x16x192xf32> to vector<1x16x16xf32>
    %126 = vector.extract_strided_slice %30 {offsets = [0, 0, 176], sizes = [1, 16, 16], strides = [1, 1, 1]} : vector<1x16x192xf32> to vector<1x16x16xf32>
    %127 = arith.truncf %124 : vector<1x16x16xf32> to vector<1x16x16xbf16>
    %128 = arith.truncf %125 : vector<1x16x16xf32> to vector<1x16x16xbf16>
    "tpu.trace_start"() <{level = 10 : i32, message = "wld,wmd->wlm"}> : () -> ()
    %cst_39 = arith.constant dense<0.000000e+00> : vector<1x16x16xf32>
    %129 = tpu.matmul %127, %128, %cst_39 {dimension_numbers = #tpu.dot_dimension_numbers<[2], [2], [1], [1], [0, 0, 0, 1, 1, 1], [0], [0]>} : vector<1x16x16xbf16>, vector<1x16x16xbf16>, vector<1x16x16xf32> -> vector<1x16x16xf32>
    "tpu.trace_stop"() : () -> ()
    %cst_40 = arith.constant 2.500000e-01 : f32
    %130 = vector.broadcast %cst_40 : f32 to vector<1x16x16xf32>
    %131 = arith.mulf %129, %130 : vector<1x16x16xf32>
    %132 = vector.extract_strided_slice %31 {offsets = [3, 0, 0], sizes = [1, 16, 16], strides = [1, 1, 1]} : vector<4x16x16xf32> to vector<1x16x16xf32>
    %133 = vector.shape_cast %132 : vector<1x16x16xf32> to vector<16x16xf32>
    %134 = vector.shape_cast %133 : vector<16x16xf32> to vector<1x16x16xf32>
    %135 = arith.addf %131, %134 : vector<1x16x16xf32>
    %cst_41 = arith.constant dense<0xFF800000> : vector<1x16xf32>
    %136 = vector.multi_reduction <maximumf>, %135, %cst_41 [2] : vector<1x16x16xf32> to vector<1x16xf32>
    %137 = vector.shape_cast %136 : vector<1x16xf32> to vector<1x16x1xf32>
    %138 = vector.broadcast %137 : vector<1x16x1xf32> to vector<1x16x16xf32>
    %139 = arith.subf %135, %138 : vector<1x16x16xf32>
    %140 = math.exp %139 : vector<1x16x16xf32>
    %cst_42 = arith.constant dense<0.000000e+00> : vector<1x16xf32>
    %141 = vector.multi_reduction <add>, %140, %cst_42 [2] : vector<1x16x16xf32> to vector<1x16xf32>
    %142 = vector.shape_cast %141 : vector<1x16xf32> to vector<1x16x1xf32>
    %143 = tpu.reciprocal %142 {approx = true} : vector<1x16x1xf32> -> vector<1x16x1xf32>
    %144 = vector.broadcast %143 : vector<1x16x1xf32> to vector<1x16x16xf32>
    %145 = arith.mulf %140, %144 : vector<1x16x16xf32>
    %146 = arith.truncf %145 : vector<1x16x16xf32> to vector<1x16x16xbf16>
    %147 = arith.truncf %126 : vector<1x16x16xf32> to vector<1x16x16xbf16>
    "tpu.trace_start"() <{level = 10 : i32, message = "wlm,wmd->wld"}> : () -> ()
    %cst_43 = arith.constant dense<0.000000e+00> : vector<1x16x16xf32>
    %148 = tpu.matmul %146, %147, %cst_43 {dimension_numbers = #tpu.dot_dimension_numbers<[2], [1], [1], [2], [0, 0, 0, 1, 1, 2], [0], [0]>} : vector<1x16x16xbf16>, vector<1x16x16xbf16>, vector<1x16x16xf32> -> vector<1x16x16xf32>
    "tpu.trace_stop"() : () -> ()
    %149 = vector.shape_cast %148 : vector<1x16x16xf32> to vector<16x16xf32>
    %150 = arith.truncf %149 : vector<16x16xf32> to vector<16x16xbf16>
    %151 = vector.extract_strided_slice %32 {offsets = [48, 0], sizes = [16, 64], strides = [1, 1]} : vector<64x64xbf16> to vector<16x64xbf16>
    %cst_44 = arith.constant dense<0.000000e+00> : vector<16x64xf32>
    %152 = tpu.matmul %150, %151, %cst_44 {dimension_numbers = #tpu.dot_dimension_numbers<[1], [0], [0], [1], [0, 0, 1, 1], [], []>} : vector<16x16xbf16>, vector<16x64xbf16>, vector<16x64xf32> -> vector<16x64xf32>
    %153 = arith.addf %123, %152 : vector<16x64xf32>
    %154 = arith.addf %1, %153 : vector<16x64xf32>
    %c0_45 = arith.constant 0 : index
    %c0_46 = arith.constant 0 : index
    %155 = vector.load %arg8[%c0_45, %c0_46] : memref<1x64xf32, #tpu.memory_space<vmem>>, vector<1x64xf32>
    %156 = vector.broadcast %155 : vector<1x64xf32> to vector<16x64xf32>
    %157 = arith.addf %154, %156 : vector<16x64xf32>
    %c0_47 = arith.constant 0 : index
    %c0_48 = arith.constant 0 : index
    %c0_49 = arith.constant 0 : index
    %158 = vector.load %arg13[%c0_47, %c0_48, %c0_49] : memref<1x16x64xf32, #tpu.memory_space<vmem>>, vector<1x16x64xf32>
    %159 = vector.shape_cast %158 : vector<1x16x64xf32> to vector<16x64xf32>
    %160 = vector.shape_cast %157 : vector<16x64xf32> to vector<1x16x64xf32>
    tpu.vector_store %arg13[%c0_47, %c0_48, %c0_49], %160 {strides = array<i32>} : memref<1x16x64xf32, #tpu.memory_space<vmem>>, vector<1x16x64xf32>,
    %c0_50 = arith.constant 0 : index
    %c0_51 = arith.constant 0 : index
    %161 = vector.load %arg9[%c0_50, %c0_51] : memref<1x64xf32, #tpu.memory_space<vmem>>, vector<1x64xf32>
    %c0_52 = arith.constant 0 : index
    %c0_53 = arith.constant 0 : index
    %162 = vector.load %arg10[%c0_52, %c0_53] : memref<1x64xf32, #tpu.memory_space<vmem>>, vector<1x64xf32>
    %cst_54 = arith.constant dense<0.000000e+00> : vector<16xf32>
    %163 = vector.multi_reduction <add>, %157, %cst_54 [1] : vector<16x64xf32> to vector<16xf32>
    %164 = vector.shape_cast %163 : vector<16xf32> to vector<16x1xf32>
    %cst_55 = arith.constant 6.400000e+01 : f32
    %165 = vector.broadcast %cst_55 : f32 to vector<16x1xf32>
    %166 = arith.divf %164, %165 : vector<16x1xf32>
    %167 = vector.broadcast %166 : vector<16x1xf32> to vector<16x64xf32>
    %168 = arith.subf %157, %167 : vector<16x64xf32>
    %169 = arith.mulf %168, %168 : vector<16x64xf32>
    %cst_56 = arith.constant dense<0.000000e+00> : vector<16xf32>
    %170 = vector.multi_reduction <add>, %169, %cst_56 [1] : vector<16x64xf32> to vector<16xf32>
    %171 = vector.shape_cast %170 : vector<16xf32> to vector<16x1xf32>
    %cst_57 = arith.constant 6.400000e+01 : f32
    %172 = vector.broadcast %cst_57 : f32 to vector<16x1xf32>
    %173 = arith.divf %171, %172 : vector<16x1xf32>
    %cst_58 = arith.constant 9.99999974E-6 : f32
    %174 = vector.broadcast %cst_58 : f32 to vector<16x1xf32>
    %175 = arith.addf %173, %174 : vector<16x1xf32>
    %176 = math.rsqrt %175 : vector<16x1xf32>
    %177 = vector.broadcast %176 : vector<16x1xf32> to vector<16x64xf32>
    %178 = arith.mulf %168, %177 : vector<16x64xf32>
    %179 = vector.broadcast %161 : vector<1x64xf32> to vector<16x64xf32>
    %180 = arith.mulf %178, %179 : vector<16x64xf32>
    %181 = vector.broadcast %162 : vector<1x64xf32> to vector<16x64xf32>
    %182 = arith.addf %180, %181 : vector<16x64xf32>
    %183 = arith.truncf %182 : vector<16x64xf32> to vector<16x64xbf16>
    %c0_59 = arith.constant 0 : index
    %c0_60 = arith.constant 0 : index
    %184 = vector.load %arg11[%c0_59, %c0_60] : memref<64x128xbf16, #tpu.memory_space<vmem>>, vector<64x128xbf16>
    %cst_61 = arith.constant dense<0.000000e+00> : vector<16x128xf32>
    %185 = tpu.matmul %183, %184, %cst_61 {dimension_numbers = #tpu.dot_dimension_numbers<[1], [0], [0], [1], [0, 0, 1, 1], [], []>} : vector<16x64xbf16>, vector<64x128xbf16>, vector<16x128xf32> -> vector<16x128xf32>
    %c0_62 = arith.constant 0 : index
    %c0_63 = arith.constant 0 : index
    %186 = vector.load %arg12[%c0_62, %c0_63] : memref<1x128xf32, #tpu.memory_space<vmem>>, vector<1x128xf32>
    %187 = vector.broadcast %186 : vector<1x128xf32> to vector<16x128xf32>
    %188 = arith.addf %185, %187 : vector<16x128xf32>
    %189 = arith.truncf %188 : vector<16x128xf32> to vector<16x128xbf16>
    %c0_64 = arith.constant 0 : index
    %c0_65 = arith.constant 0 : index
    %c0_66 = arith.constant 0 : index
    %190 = vector.load %arg14[%c0_64, %c0_65, %c0_66] : memref<1x16x128xbf16, #tpu.memory_space<vmem>>, vector<1x16x128xbf16>
    %191 = vector.shape_cast %190 : vector<1x16x128xbf16> to vector<16x128xbf16>
    %192 = vector.shape_cast %189 : vector<16x128xbf16> to vector<1x16x128xbf16>
    tpu.vector_store %arg14[%c0_64, %c0_65, %c0_66], %192 {strides = array<i32>} : memref<1x16x128xbf16, #tpu.memory_space<vmem>>, vector<1x16x128xbf16>,
    return
  }
  func.func @transform_0(%arg0: i32) -> (i32, i32, i32) {
    %c0_i32 = arith.constant 0 : i32
    %c0_i32_0 = arith.constant 0 : i32
    %c0_i32_1 = arith.constant 0 : i32
    return %arg0, %c0_i32, %c0_i32_0 : i32, i32, i32
  }
  func.func @transform_1(%arg0: i32) -> (i32, i32) {
    %c0_i32 = arith.constant 0 : i32
    %c0_i32_0 = arith.constant 0 : i32
    %c0_i32_1 = arith.constant 0 : i32
    return %c0_i32, %c0_i32_0 : i32, i32
  }
  func.func @transform_2(%arg0: i32) -> (i32, i32) {
    %c0_i32 = arith.constant 0 : i32
    %c0_i32_0 = arith.constant 0 : i32
    %c0_i32_1 = arith.constant 0 : i32
    return %c0_i32, %c0_i32_0 : i32, i32
  }
  func.func @transform_3(%arg0: i32) -> (i32, i32) {
    %c0_i32 = arith.constant 0 : i32
    %c0_i32_0 = arith.constant 0 : i32
    %c0_i32_1 = arith.constant 0 : i32
    return %c0_i32, %c0_i32_0 : i32, i32
  }
  func.func @transform_4(%arg0: i32) -> (i32, i32) {
    %c0_i32 = arith.constant 0 : i32
    %c0_i32_0 = arith.constant 0 : i32
    %c0_i32_1 = arith.constant 0 : i32
    return %c0_i32, %c0_i32_0 : i32, i32
  }
  func.func @transform_5(%arg0: i32) -> (i32, i32, i32) {
    %c0_i32 = arith.constant 0 : i32
    %c0_i32_0 = arith.constant 0 : i32
    %c0_i32_1 = arith.constant 0 : i32
    %c0_i32_2 = arith.constant 0 : i32
    return %c0_i32, %c0_i32_0, %c0_i32_1 : i32, i32, i32
  }
  func.func @transform_6(%arg0: i32) -> (i32, i32) {
    %c0_i32 = arith.constant 0 : i32
    %c0_i32_0 = arith.constant 0 : i32
    %c0_i32_1 = arith.constant 0 : i32
    return %c0_i32, %c0_i32_0 : i32, i32
  }
  func.func @transform_7(%arg0: i32) -> (i32, i32) {
    %c0_i32 = arith.constant 0 : i32
    %c0_i32_0 = arith.constant 0 : i32
    %c0_i32_1 = arith.constant 0 : i32
    return %c0_i32, %c0_i32_0 : i32, i32
  }
  func.func @transform_8(%arg0: i32) -> (i32, i32) {
    %c0_i32 = arith.constant 0 : i32
    %c0_i32_0 = arith.constant 0 : i32
    %c0_i32_1 = arith.constant 0 : i32
    return %c0_i32, %c0_i32_0 : i32, i32
  }
  func.func @transform_9(%arg0: i32) -> (i32, i32) {
    %c0_i32 = arith.constant 0 : i32
    %c0_i32_0 = arith.constant 0 : i32
    %c0_i32_1 = arith.constant 0 : i32
    return %c0_i32, %c0_i32_0 : i32, i32
  }
  func.func @transform_10(%arg0: i32) -> (i32, i32) {
    %c0_i32 = arith.constant 0 : i32
    %c0_i32_0 = arith.constant 0 : i32
    %c0_i32_1 = arith.constant 0 : i32
    return %c0_i32, %c0_i32_0 : i32, i32
  }
  func.func @transform_11(%arg0: i32) -> (i32, i32) {
    %c0_i32 = arith.constant 0 : i32
    %c0_i32_0 = arith.constant 0 : i32
    %c0_i32_1 = arith.constant 0 : i32
    return %c0_i32, %c0_i32_0 : i32, i32
  }
  func.func @transform_12(%arg0: i32) -> (i32, i32, i32) {
    %c0_i32 = arith.constant 0 : i32
    %c0_i32_0 = arith.constant 0 : i32
    %c0_i32_1 = arith.constant 0 : i32
    return %arg0, %c0_i32, %c0_i32_0 : i32, i32, i32
  }
  func.func @transform_13(%arg0: i32) -> (i32, i32, i32) {
    %c0_i32 = arith.constant 0 : i32
    %c0_i32_0 = arith.constant 0 : i32
    %c0_i32_1 = arith.constant 0 : i32
    return %arg0, %c0_i32, %c0_i32_0 : i32, i32, i32
  }
}

module attributes {stable_mosaic.version = 11 : i64} {
  func.func @_mm_res_kernel(%arg0: i32, %arg1: memref<32x128xbf16, #tpu.memory_space<vmem>>, %arg2: memref<128x64xbf16, #tpu.memory_space<vmem>>, %arg3: memref<1x64xf32, #tpu.memory_space<vmem>>, %arg4: memref<32x64xf32, #tpu.memory_space<vmem>>, %arg5: memref<32x64xf32, #tpu.memory_space<vmem>>) attributes {dimension_semantics = [#tpu.dimension_semantics<parallel>], iteration_bounds = array<i64: 1>, scalar_prefetch = 0 : i64, scratch_operands = 0 : i64, tpu.core_type = #tpu.core_type<tc>, window_params = [{transform_indices = @transform_0, window_bounds = array<i64: 32, 128>}, {pipeline_mode = #tpu.pipeline_mode<synchronous>, transform_indices = @transform_1, window_bounds = array<i64: 128, 64>}, {pipeline_mode = #tpu.pipeline_mode<synchronous>, transform_indices = @transform_2, window_bounds = array<i64: 1, 64>}, {transform_indices = @transform_3, window_bounds = array<i64: 32, 64>}, {transform_indices = @transform_4, window_bounds = array<i64: 32, 64>}]} {
    %c0 = arith.constant 0 : index
    %c0_0 = arith.constant 0 : index
    %0 = vector.load %arg1[%c0, %c0_0] : memref<32x128xbf16, #tpu.memory_space<vmem>>, vector<32x128xbf16>
    %c0_1 = arith.constant 0 : index
    %c0_2 = arith.constant 0 : index
    %1 = vector.load %arg2[%c0_1, %c0_2] : memref<128x64xbf16, #tpu.memory_space<vmem>>, vector<128x64xbf16>
    %cst = arith.constant dense<0.000000e+00> : vector<32x64xf32>
    %2 = tpu.matmul %0, %1, %cst {dimension_numbers = #tpu.dot_dimension_numbers<[1], [0], [0], [1], [0, 0, 1, 1], [], []>} : vector<32x128xbf16>, vector<128x64xbf16>, vector<32x64xf32> -> vector<32x64xf32>
    %c0_3 = arith.constant 0 : index
    %c0_4 = arith.constant 0 : index
    %3 = vector.load %arg3[%c0_3, %c0_4] : memref<1x64xf32, #tpu.memory_space<vmem>>, vector<1x64xf32>
    %4 = vector.broadcast %3 : vector<1x64xf32> to vector<32x64xf32>
    %5 = arith.addf %2, %4 : vector<32x64xf32>
    %c0_5 = arith.constant 0 : index
    %c0_6 = arith.constant 0 : index
    %6 = vector.load %arg4[%c0_5, %c0_6] : memref<32x64xf32, #tpu.memory_space<vmem>>, vector<32x64xf32>
    %7 = arith.addf %6, %5 : vector<32x64xf32>
    %c0_7 = arith.constant 0 : index
    %c0_8 = arith.constant 0 : index
    %8 = vector.load %arg5[%c0_7, %c0_8] : memref<32x64xf32, #tpu.memory_space<vmem>>, vector<32x64xf32>
    tpu.vector_store %arg5[%c0_7, %c0_8], %7 {strides = array<i32>} : memref<32x64xf32, #tpu.memory_space<vmem>>, vector<32x64xf32>,
    return
  }
  func.func @transform_0(%arg0: i32) -> (i32, i32) {
    %c0_i32 = arith.constant 0 : i32
    %c0_i32_0 = arith.constant 0 : i32
    return %arg0, %c0_i32 : i32, i32
  }
  func.func @transform_1(%arg0: i32) -> (i32, i32) {
    %c0_i32 = arith.constant 0 : i32
    %c0_i32_0 = arith.constant 0 : i32
    %c0_i32_1 = arith.constant 0 : i32
    return %c0_i32, %c0_i32_0 : i32, i32
  }
  func.func @transform_2(%arg0: i32) -> (i32, i32) {
    %c0_i32 = arith.constant 0 : i32
    %c0_i32_0 = arith.constant 0 : i32
    %c0_i32_1 = arith.constant 0 : i32
    return %c0_i32, %c0_i32_0 : i32, i32
  }
  func.func @transform_3(%arg0: i32) -> (i32, i32) {
    %c0_i32 = arith.constant 0 : i32
    %c0_i32_0 = arith.constant 0 : i32
    return %arg0, %c0_i32 : i32, i32
  }
  func.func @transform_4(%arg0: i32) -> (i32, i32) {
    %c0_i32 = arith.constant 0 : i32
    %c0_i32_0 = arith.constant 0 : i32
    return %arg0, %c0_i32 : i32, i32
  }
}

module attributes {stable_mosaic.version = 11 : i64} {
  func.func @_mm_res_kernel(%arg0: i32, %arg1: memref<32x128xbf16, #tpu.memory_space<vmem>>, %arg2: memref<128x64xbf16, #tpu.memory_space<vmem>>, %arg3: memref<1x64xf32, #tpu.memory_space<vmem>>, %arg4: memref<32x64xf32, #tpu.memory_space<vmem>>, %arg5: memref<32x64xf32, #tpu.memory_space<vmem>>) attributes {dimension_semantics = [#tpu.dimension_semantics<parallel>], iteration_bounds = array<i64: 1>, scalar_prefetch = 0 : i64, scratch_operands = 0 : i64, tpu.core_type = #tpu.core_type<tc>, window_params = [{transform_indices = @transform_0, window_bounds = array<i64: 32, 128>}, {pipeline_mode = #tpu.pipeline_mode<synchronous>, transform_indices = @transform_1, window_bounds = array<i64: 128, 64>}, {pipeline_mode = #tpu.pipeline_mode<synchronous>, transform_indices = @transform_2, window_bounds = array<i64: 1, 64>}, {transform_indices = @transform_3, window_bounds = array<i64: 32, 64>}, {transform_indices = @transform_4, window_bounds = array<i64: 32, 64>}]} {
    %c0 = arith.constant 0 : index
    %c0_0 = arith.constant 0 : index
    %0 = vector.load %arg1[%c0, %c0_0] : memref<32x128xbf16, #tpu.memory_space<vmem>>, vector<32x128xbf16>
    %c0_1 = arith.constant 0 : index
    %c0_2 = arith.constant 0 : index
    %1 = vector.load %arg2[%c0_1, %c0_2] : memref<128x64xbf16, #tpu.memory_space<vmem>>, vector<128x64xbf16>
    %cst = arith.constant dense<0.000000e+00> : vector<32x64xf32>
    %2 = tpu.matmul %0, %1, %cst {dimension_numbers = #tpu.dot_dimension_numbers<[1], [0], [0], [1], [0, 0, 1, 1], [], []>} : vector<32x128xbf16>, vector<128x64xbf16>, vector<32x64xf32> -> vector<32x64xf32>
    %c0_3 = arith.constant 0 : index
    %c0_4 = arith.constant 0 : index
    %3 = vector.load %arg3[%c0_3, %c0_4] : memref<1x64xf32, #tpu.memory_space<vmem>>, vector<1x64xf32>
    %4 = vector.broadcast %3 : vector<1x64xf32> to vector<32x64xf32>
    %5 = arith.addf %2, %4 : vector<32x64xf32>
    %c0_5 = arith.constant 0 : index
    %c0_6 = arith.constant 0 : index
    %6 = vector.load %arg4[%c0_5, %c0_6] : memref<32x64xf32, #tpu.memory_space<vmem>>, vector<32x64xf32>
    %7 = arith.addf %6, %5 : vector<32x64xf32>
    %c0_7 = arith.constant 0 : index
    %c0_8 = arith.constant 0 : index
    %8 = vector.load %arg5[%c0_7, %c0_8] : memref<32x64xf32, #tpu.memory_space<vmem>>, vector<32x64xf32>
    tpu.vector_store %arg5[%c0_7, %c0_8], %7 {strides = array<i32>} : memref<32x64xf32, #tpu.memory_space<vmem>>, vector<32x64xf32>,
    return
  }
  func.func @transform_0(%arg0: i32) -> (i32, i32) {
    %c0_i32 = arith.constant 0 : i32
    %c0_i32_0 = arith.constant 0 : i32
    return %arg0, %c0_i32 : i32, i32
  }
  func.func @transform_1(%arg0: i32) -> (i32, i32) {
    %c0_i32 = arith.constant 0 : i32
    %c0_i32_0 = arith.constant 0 : i32
    %c0_i32_1 = arith.constant 0 : i32
    return %c0_i32, %c0_i32_0 : i32, i32
  }
  func.func @transform_2(%arg0: i32) -> (i32, i32) {
    %c0_i32 = arith.constant 0 : i32
    %c0_i32_0 = arith.constant 0 : i32
    %c0_i32_1 = arith.constant 0 : i32
    return %c0_i32, %c0_i32_0 : i32, i32
  }
  func.func @transform_3(%arg0: i32) -> (i32, i32) {
    %c0_i32 = arith.constant 0 : i32
    %c0_i32_0 = arith.constant 0 : i32
    return %arg0, %c0_i32 : i32, i32
  }
  func.func @transform_4(%arg0: i32) -> (i32, i32) {
    %c0_i32 = arith.constant 0 : i32
    %c0_i32_0 = arith.constant 0 : i32
    return %arg0, %c0_i32 : i32, i32
  }
}

</mosaic_0001>

<bundles_post_ra>
// kernel: _lambda_.12
= control target key start
LH: loop header
LB: loop body
LE: loop exit
PB: predicated region body
PF: predicated region fallthrough
CT: control target
= control target key end

     0   :  { %vm110_vm0 = vcmask 523264   ;;  %vm216_vm1 = vcmask 261120   ;;  %s520_s1 = inlined_call_operand.vmem [shape: bf16[64,32], index: 1, kind: input, shape index: {}]   ;;  %s521_s2 = inlined_call_operand.vmem [shape: f32[1,32], index: 2, kind: input, shape index: {}]   ;;  %s522_s0 = inlined_call_operand.vmem [shape: bf16[128,64], index: 0, kind: input, shape index: {}]   ;;  %s523_s3 = inlined_call_operand.vmem [shape: f32[128,32], index: 3, kind: input, shape index: {}]   ;;  %s524_s4 = inlined_call_operand.vmem [shape: f32[128,32], index: 4, kind: output, shape index: {}]  }
   0x1   :  { %v304_v0 = vld [vmem:[%s520_s1 + $0x18] sm:$0xff]  ;;  %v303_v1 = vld [vmem:[%s520_s1 + $0x10] sm:$0xff]  ;;  %v302_v2 = vld [vmem:[%s520_s1 + $0x8] sm:$0xff] }
   0x2   :  { %139 = vmatpush.bf16.msra.mxu0 %v304_v0  ;;  %305 = vmatpush.bf16.msra.mxu1 %v304_v0  ;;  %v301_v3 = vld [vmem:[%s520_s1] sm:$0xff]  ;;  %v295_v5 = vld [vmem:[%s522_s0 + $0x10] sm:$0xff]  ;;  %v294_v8 = vld [vmem:[%s522_s0 + $0x8] sm:$0xff] }
   0x3   :  { %306 = vmatpush.bf16.msra.mxu2 %v304_v0  ;;  %307 = vmatpush.bf16.msra.mxu3 %v304_v0  ;;  %v293_v4 = vld [vmem:[%s522_s0] sm:$0xff]  ;;  %v299_v7 = vld [vmem:[%s522_s0 + $0x30] sm:$0xff]  ;;  %v296_v9 = vld [vmem:[%s522_s0 + $0x18] sm:$0xff] }
   0x4   :  { %v297_v6 = vld [vmem:[%s522_s0 + $0x20] sm:$0xff]  ;;  %v298_v10 = vld [vmem:[%s522_s0 + $0x28] sm:$0xff]  ;;  %v300_v11 = vld [vmem:[%s522_s0 + $0x38] sm:$0xff] }
   0x5   :  { %v390_v12 = vld [vmem:[%s521_s2] ss:$0 sm:$0xff]  ;;  %v185_v28 = vld [vmem:[%s523_s3 + $0x8] sm:$0xff]  ;;  %v186_v44 = vld [vmem:[%s523_s3 + $0x10] sm:$0xff] }
   0x6   :  { %140 = vmatpush.bf16.msra.mxu0 %v303_v1  ;;  %308 = vmatpush.bf16.msra.mxu1 %v303_v1  ;;  %v184_v14 = vld [vmem:[%s523_s3] sm:$0xff]  ;;  %v189_v30 = vld [vmem:[%s523_s3 + $0x28] sm:$0xff]  ;;  %v190_v46 = vld [vmem:[%s523_s3 + $0x30] sm:$0xff] }
   0x7   :  { %309 = vmatpush.bf16.msra.mxu2 %v303_v1  ;;  %310 = vmatpush.bf16.msra.mxu3 %v303_v1  ;;  %v188_v16 = vld [vmem:[%s523_s3 + $0x20] sm:$0xff]  ;;  %v193_v38 = vld [vmem:[%s523_s3 + $0x48] sm:$0xff]  ;;  %v194_v54 = vld [vmem:[%s523_s3 + $0x50] sm:$0xff] }
   0x8   :  { %v192_v22 = vld [vmem:[%s523_s3 + $0x40] sm:$0xff]  ;;  %v197_v40 = vld [vmem:[%s523_s3 + $0x68] sm:$0xff]  ;;  %v198_v56 = vld [vmem:[%s523_s3 + $0x70] sm:$0xff] }
   0x9   :  { %v196_v24 = vld [vmem:[%s523_s3 + $0x60] sm:$0xff]  ;;  %v187_v60 = vld [vmem:[%s523_s3 + $0x18] sm:$0xff] }
   0xa   :  { %141 = vmatpush.bf16.msra.mxu0 %v302_v2  ;;  %311 = vmatpush.bf16.msra.mxu1 %v302_v2  ;;  %v191_v62 = vld [vmem:[%s523_s3 + $0x38] sm:$0xff] }
   0xb   :  { %312 = vmatpush.bf16.msra.mxu2 %v302_v2  ;;  %313 = vmatpush.bf16.msra.mxu3 %v302_v2 }
   0xe   :  { %142 = vmatpush.bf16.msra.mxu0 %v301_v3  ;;  %314 = vmatpush.bf16.msra.mxu1 %v301_v3 }
   0xf   :  { %315 = vmatpush.bf16.msra.mxu2 %v301_v3  ;;  %316 = vmatpush.bf16.msra.mxu3 %v301_v3 }
  0x11   :  { %285 = vmatmul.msk.bf16.vlgmr.msra.gmra.mxu0 %vm110_vm0, %v293_v4  ;;  %287 = vmatmul.msk.bf16.vlgmr.msra.gmra.mxu1 %vm110_vm0, %v295_v5 }
  0x12   :  { %289 = vmatmul.msk.bf16.vlgmr.msra.gmra.mxu2 %vm110_vm0, %v297_v6  ;;  %291 = vmatmul.msk.bf16.vlgmr.msra.gmra.mxu3 %vm110_vm0, %v299_v7  ;;  %v195_v6 = vld [vmem:[%s523_s3 + $0x58] sm:$0xff] }
  0x21   :  { %286 = vmatmul.msk.bf16.gmra.mxu0 %vm110_vm0, %v294_v8  ;;  %288 = vmatmul.msk.bf16.gmra.mxu1 %vm110_vm0, %v296_v9  ;;  %v199_v8 = vld [vmem:[%s523_s3 + $0x78] sm:$0xff] }
  0x22   :  { %290 = vmatmul.msk.bf16.gmra.mxu2 %vm110_vm0, %v298_v10  ;;  %292 = vmatmul.msk.bf16.gmra.mxu3 %vm110_vm0, %v300_v11 }
  0x8e   :  { %v144_v13 = vpop.f32.mrf.mxu0  ;;  %v154_v15 = vpop.f32.mrf.mxu1 }
  0x8f   :  { %v145_v17 = vadd.f32 %v390_v12, %v144_v13  ;;  %v155_v18 = vadd.f32 %v390_v12, %v154_v15 }
  0x91   :  { %v200_v19 = vadd.f32 %v184_v14, %v145_v17  ;;  %v204_v20 = vadd.f32 %v188_v16, %v155_v18 }
  0x93   :  { %217 = vst.msk [vmem:[%s524_s4] sm:$0xff] %vm216_vm1, %v200_v19 }
  0x94   :  { %221 = vst.msk [vmem:[%s524_s4 + $0x20] sm:$0xff] %vm216_vm1, %v204_v20 }
  0x95   :  { %v164_v21 = vpop.f32.mrf.mxu2  ;;  %v174_v23 = vpop.f32.mrf.mxu3 }
  0x96   :  { %v165_v25 = vadd.f32 %v390_v12, %v164_v21  ;;  %v175_v26 = vadd.f32 %v390_v12, %v174_v23  ;;  %v146_v27 = vpop.f32.mrf.mxu0  ;;  %v156_v29 = vpop.f32.mrf.mxu1 }
  0x97   :  { %v147_v31 = vadd.f32 %v390_v12, %v146_v27  ;;  %v157_v32 = vadd.f32 %v390_v12, %v156_v29 }
  0x98   :  { %v208_v33 = vadd.f32 %v192_v22, %v165_v25  ;;  %v212_v34 = vadd.f32 %v196_v24, %v175_v26 }
  0x99   :  { %v201_v35 = vadd.f32 %v185_v28, %v147_v31  ;;  %v205_v36 = vadd.f32 %v189_v30, %v157_v32 }
  0x9a   :  { %225 = vst.msk [vmem:[%s524_s4 + $0x40] sm:$0xff] %vm216_vm1, %v208_v33 }
  0x9b   :  { %229 = vst.msk [vmem:[%s524_s4 + $0x60] sm:$0xff] %vm216_vm1, %v212_v34 }
  0x9c   :  { %218 = vst.msk [vmem:[%s524_s4 + $0x8] sm:$0xff] %vm216_vm1, %v201_v35 }
  0x9d   :  { %222 = vst.msk [vmem:[%s524_s4 + $0x28] sm:$0xff] %vm216_vm1, %v205_v36  ;;  %v166_v37 = vpop.f32.mrf.mxu2  ;;  %v176_v39 = vpop.f32.mrf.mxu3 }
  0x9e   :  { %v167_v41 = vadd.f32 %v390_v12, %v166_v37  ;;  %v177_v42 = vadd.f32 %v390_v12, %v176_v39  ;;  %v149_v43 = vpop.f32.mrf.mxu0  ;;  %v159_v45 = vpop.f32.mrf.mxu1 }
  0x9f   :  { %v150_v47 = vadd.f32 %v390_v12, %v149_v43  ;;  %v160_v48 = vadd.f32 %v390_v12, %v159_v45 }
  0xa0   :  { %v209_v49 = vadd.f32 %v193_v38, %v167_v41  ;;  %v213_v50 = vadd.f32 %v197_v40, %v177_v42 }
  0xa1   :  { %v202_v51 = vadd.f32 %v186_v44, %v150_v47  ;;  %v206_v52 = vadd.f32 %v190_v46, %v160_v48 }
  0xa2   :  { %226 = vst.msk [vmem:[%s524_s4 + $0x48] sm:$0xff] %vm216_vm1, %v209_v49 }
  0xa3   :  { %230 = vst.msk [vmem:[%s524_s4 + $0x68] sm:$0xff] %vm216_vm1, %v213_v50 }
  0xa4   :  { %219 = vst.msk [vmem:[%s524_s4 + $0x10] sm:$0xff] %vm216_vm1, %v202_v51 }
  0xa5   :  { %223 = vst.msk [vmem:[%s524_s4 + $0x30] sm:$0xff] %vm216_vm1, %v206_v52  ;;  %v169_v53 = vpop.f32.mrf.mxu2  ;;  %v179_v55 = vpop.f32.mrf.mxu3 }
  0xa6   :  { %v170_v57 = vadd.f32 %v390_v12, %v169_v53  ;;  %v180_v58 = vadd.f32 %v390_v12, %v179_v55  ;;  %v151_v59 = vpop.f32.mrf.mxu0  ;;  %v161_v61 = vpop.f32.mrf.mxu1 }
  0xa7   :  { %v152_v63 = vadd.f32 %v390_v12, %v151_v59  ;;  %v162_v0 = vadd.f32 %v390_v12, %v161_v61 }
  0xa8   :  { %v210_v1 = vadd.f32 %v194_v54, %v170_v57  ;;  %v214_v2 = vadd.f32 %v198_v56, %v180_v58 }
  0xa9   :  { %v203_v3 = vadd.f32 %v187_v60, %v152_v63  ;;  %v207_v4 = vadd.f32 %v191_v62, %v162_v0 }
  0xaa   :  { %227 = vst.msk [vmem:[%s524_s4 + $0x50] sm:$0xff] %vm216_vm1, %v210_v1 }
  0xab   :  { %231 = vst.msk [vmem:[%s524_s4 + $0x70] sm:$0xff] %vm216_vm1, %v214_v2 }
  0xac   :  { %220 = vst.msk [vmem:[%s524_s4 + $0x18] sm:$0xff] %vm216_vm1, %v203_v3 }
  0xad   :  { %224 = vst.msk [vmem:[%s524_s4 + $0x38] sm:$0xff] %vm216_vm1, %v207_v4  ;;  %v171_v5 = vpop.f32.mrf.mxu2  ;;  %v181_v7 = vpop.f32.mrf.mxu3 }
  0xae   :  { %v172_v9 = vadd.f32 %v390_v12, %v171_v5  ;;  %v182_v10 = vadd.f32 %v390_v12, %v181_v7 }
  0xb0   :  { %v211_v11 = vadd.f32 %v195_v6, %v172_v9  ;;  %v215_v13 = vadd.f32 %v199_v8, %v182_v10 }
  0xb2   :  { %228 = vst.msk [vmem:[%s524_s4 + $0x58] sm:$0xff] %vm216_vm1, %v211_v11 }
  0xb3   :  { %232 = vst.msk [vmem:[%s524_s4 + $0x78] sm:$0xff] %vm216_vm1, %v215_v13 }

// kernel: _lambda_.10
= control target key start
LH: loop header
LB: loop body
LE: loop exit
PB: predicated region body
PF: predicated region fallthrough
CT: control target
= control target key end

     0   :  { %vm57_vm0 = vcmask 130048   ;;  %vm133_vm1 = vcmask 261120   ;;  %s1122_s1 = inlined_call_operand.vmem [shape: bf16[16,32], index: 1, kind: input, shape index: {}]   ;;  %s1123_s0 = inlined_call_operand.vmem [shape: f32[128,16], index: 0, kind: input, shape index: {}]   ;;  %s1124_s2 = inlined_call_operand.vmem [shape: f32[1,32], index: 2, kind: input, shape index: {}, may-alias: {2,4}]   ;;  %s1125_s3 = inlined_call_operand.vmem [shape: f32[1,32], index: 3, kind: input, shape index: {}]   ;;  %s1126_s4 = inlined_call_operand.vmem [shape: f32[1,32], index: 4, kind: input, shape index: {}, may-alias: {2,4}]   ;;  %s1127_s5 = inlined_call_operand.vmem [shape: f32[128,32], index: 5, kind: output, shape index: {}]  }
   0x1   :  { %v563_v0 = vld [vmem:[%s1122_s1] sm:$0xff]  ;;  %v22_v2 = vld [vmem:[%s1123_s0 + $0x8] sm:$0xff]  ;;  %v23_v13 = vld [vmem:[%s1123_s0 + $0x10] sm:$0xff] }
   0x2   :  { %v21_v1 = vld [vmem:[%s1123_s0] sm:$0xff]  ;;  %v26_v5 = vld [vmem:[%s1123_s0 + $0x28] sm:$0xff]  ;;  %89 = vmatpush.bf16.msra.mxu0 %v563_v0  ;;  %564 = vmatpush.bf16.msra.mxu1 %v563_v0  ;;  %v24_v14 = vld [vmem:[%s1123_s0 + $0x18] sm:$0xff] }
   0x3   :  { %v37_v3 = vpack.c.bf16 %v22_v2, %v21_v1  ;;  %v25_v4 = vld [vmem:[%s1123_s0 + $0x20] sm:$0xff]  ;;  %v30_v8 = vld [vmem:[%s1123_s0 + $0x48] sm:$0xff]  ;;  %565 = vmatpush.bf16.msra.mxu2 %v563_v0  ;;  %566 = vmatpush.bf16.msra.mxu3 %v563_v0  ;;  %v31_v15 = vld [vmem:[%s1123_s0 + $0x50] sm:$0xff]  ;;  %v38_v21 = vpack.c.bf16 %v24_v14, %v23_v13 }
   0x4   :  { %v29_v6 = vld [vmem:[%s1123_s0 + $0x40] sm:$0xff]  ;;  %v39_v7 = vpack.c.bf16 %v26_v5, %v25_v4  ;;  %v34_v10 = vld [vmem:[%s1123_s0 + $0x68] sm:$0xff]  ;;  %v27_v16 = vld [vmem:[%s1123_s0 + $0x30] sm:$0xff] }
   0x5   :  { %v33_v9 = vld [vmem:[%s1123_s0 + $0x60] sm:$0xff]  ;;  %v41_v11 = vpack.c.bf16 %v30_v8, %v29_v6  ;;  %555 = vmatmul.msk.bf16.vlgmr.msra.gmra.mxu0 %vm57_vm0, %v37_v3  ;;  %v28_v17 = vld [vmem:[%s1123_s0 + $0x38] sm:$0xff]  ;;  %v35_v19 = vld [vmem:[%s1123_s0 + $0x70] sm:$0xff] }
   0x6   :  { %v43_v12 = vpack.c.bf16 %v34_v10, %v33_v9  ;;  %557 = vmatmul.msk.bf16.vlgmr.msra.gmra.mxu1 %vm57_vm0, %v39_v7  ;;  %v32_v18 = vld [vmem:[%s1123_s0 + $0x58] sm:$0xff]  ;;  %v40_v22 = vpack.c.bf16 %v28_v17, %v27_v16  ;;  %v698_v25 = vld [vmem:[%s1124_s2] ss:$0 sm:$0xff]  ;;  %v605_v10 = vmov 32.0  }
   0x7   :  { %559 = vmatmul.msk.bf16.vlgmr.msra.gmra.mxu2 %vm57_vm0, %v41_v11  ;;  %v36_v20 = vld [vmem:[%s1123_s0 + $0x78] sm:$0xff]  ;;  %v42_v23 = vpack.c.bf16 %v32_v18, %v31_v15  ;;  %571 = vrcp.f32 %v605_v10 }
   0x8   :  { %561 = vmatmul.msk.bf16.vlgmr.msra.gmra.mxu3 %vm57_vm0, %v43_v12  ;;  %v44_v24 = vpack.c.bf16 %v36_v20, %v35_v19 }
   0xd   :  { %v572_v11 = vpop.eup %571 }
   0xe   :  { %v183_v12 = vmul.f32 32.0, %v572_v11  ;;  %vm187_vm2 = vweird.f32 %v572_v11 }
  0x10   :  { %v184_v13 = vsub.f32 1.0, %v183_v12 }
  0x12   :  { %v185_v14 = vmul.f32 %v572_v11, %v184_v13 }
  0x14   :  { %v186_v15 = vadd.f32 %v572_v11, %v185_v14 }
  0x15   :  { %556 = vmatmul.msk.bf16.gmra.mxu0 %vm57_vm0, %v38_v21 }
  0x16   :  { %558 = vmatmul.msk.bf16.gmra.mxu1 %vm57_vm0, %v40_v22  ;;  %v780_v16 = vsel %vm187_vm2, %v572_v11, %v186_v15 }
  0x17   :  { %560 = vmatmul.msk.bf16.gmra.mxu2 %vm57_vm0, %v42_v23 }
  0x18   :  { %562 = vmatmul.msk.bf16.gmra.mxu3 %vm57_vm0, %v44_v24 }
  0x82   :  { %v91_v26 = vpop.f32.mrf.mxu0 }
  0x83   :  { %v101_v27 = vpop.f32.mrf.mxu1  ;;  %v701_v28 = vadd.f32 %v698_v25, %v91_v26 }
  0x84   :  { %v704_v29 = vadd.f32 %v698_v25, %v101_v27 }
  0x85   :  { %v134_v31 = vsel %vm133_vm1, %v701_v28, 0.0 }
  0x86   :  { %v146_v30 = vsel %vm133_vm1, %v704_v29, 0.0  ;;  %135 = vadd.xlane.f32.xlu0 %v134_v31 }
  0x87   :  { %147 = vadd.xlane.f32.xlu2 %v146_v30 }
  0x8a   :  { %v111_v32 = vpop.f32.mrf.mxu2  ;;  %v93_v36 = vpop.f32.mrf.mxu0 }
  0x8b   :  { %v121_v33 = vpop.f32.mrf.mxu3  ;;  %v711_v34 = vadd.f32 %v698_v25, %v111_v32  ;;  %v103_v39 = vpop.f32.mrf.mxu1  ;;  %v721_v40 = vadd.f32 %v698_v25, %v93_v36 }
  0x8c   :  { %v714_v35 = vadd.f32 %v698_v25, %v121_v33  ;;  %v724_v41 = vadd.f32 %v698_v25, %v103_v39 }
  0x8d   :  { %v158_v37 = vsel %vm133_vm1, %v711_v34, 0.0  ;;  %v137_v48 = vsel %vm133_vm1, %v721_v40, 0.0 }
  0x8e   :  { %v170_v38 = vsel %vm133_vm1, %v714_v35, 0.0  ;;  %v149_v47 = vsel %vm133_vm1, %v724_v41, 0.0 }
  0x8f   :  { %159 = vadd.xlane.f32.xlu2 %v158_v37  ;;  %171 = vadd.xlane.f32.xlu0 %v170_v38 }
  0x92   :  { %v113_v42 = vpop.f32.mrf.mxu2  ;;  %v96_v46 = vpop.f32.mrf.mxu0 }
  0x93   :  { %v123_v43 = vpop.f32.mrf.mxu3  ;;  %v736_v49 = vadd.f32 %v698_v25, %v96_v46  ;;  %v739_v50 = vadd.f32 %v698_v25, %v113_v42  ;;  %v106_v56 = vpop.f32.mrf.mxu1 }
  0x94   :  { %v727_v44 = vadd.f32 %v698_v25, %v123_v43  ;;  %v749_v57 = vadd.f32 %v698_v25, %v106_v56 }
  0x95   :  { %v140_v52 = vsel %vm133_vm1, %v736_v49, 0.0  ;;  %v161_v54 = vsel %vm133_vm1, %v739_v50, 0.0 }
  0x96   :  { %v173_v45 = vsel %vm133_vm1, %v727_v44, 0.0  ;;  %v152_v61 = vsel %vm133_vm1, %v749_v57, 0.0 }
  0x97   :  { %174 = vadd.xlane.f32.xlu1 %v173_v45  ;;  %150 = vadd.xlane.f32.xlu2 %v149_v47 }
  0x98   :  { %138 = vadd.xlane.f32.xlu0 %v137_v48 }
  0x9a   :  { %v116_v51 = vpop.f32.mrf.mxu2  ;;  %v98_v0 = vpop.f32.mrf.mxu0 }
  0x9b   :  { %v126_v53 = vpop.f32.mrf.mxu3  ;;  %v746_v55 = vadd.f32 %v698_v25, %v116_v51  ;;  %v767_v3 = vadd.f32 %v698_v25, %v98_v0  ;;  %v108_v7 = vpop.f32.mrf.mxu1 }
  0x9c   :  { %v761_v1 = vadd.f32 %v698_v25, %v126_v53  ;;  %v776_v8 = vadd.f32 %v698_v25, %v108_v7 }
  0x9d   :  { %v164_v60 = vsel %vm133_vm1, %v746_v55, 0.0  ;;  %v143_v6 = vsel %vm133_vm1, %v767_v3, 0.0 }
  0x9e   :  { %v176_v4 = vsel %vm133_vm1, %v761_v1, 0.0  ;;  %v155_v9 = vsel %vm133_vm1, %v776_v8, 0.0 }
  0x9f   :  { %141 = vadd.xlane.f32.xlu1 %v140_v52 }
  0xa0   :  { %162 = vadd.xlane.f32.xlu0 %v161_v54 }
  0xa2   :  { %v118_v58 = vpop.f32.mrf.mxu2 }
  0xa3   :  { %v752_v59 = vadd.f32 %v698_v25, %v118_v58  ;;  %v128_v63 = vpop.f32.mrf.mxu3 }
  0xa4   :  { %v764_v2 = vadd.f32 %v698_v25, %v128_v63 }
  0xa5   :  { %v167_v62 = vsel %vm133_vm1, %v752_v59, 0.0 }
  0xa6   :  { %168 = vadd.xlane.f32.xlu2 %v167_v62  ;;  %v179_v5 = vsel %vm133_vm1, %v764_v2, 0.0 }
  0xa7   :  { %165 = vadd.xlane.f32.xlu1 %v164_v60 }
  0xa8   :  { %153 = vadd.xlane.f32.xlu0 %v152_v61 }
  0xae   :  { %177 = vadd.xlane.f32.xlu2 %v176_v4 }
  0xaf   :  { %144 = vadd.xlane.f32.xlu1 %v143_v6 }
  0xb0   :  { %180 = vadd.xlane.f32.xlu0 %v179_v5 }
  0xb7   :  { %156 = vadd.xlane.f32.xlu1 %v155_v9 }
  0xf9   :  { %v136_v18 = vpop.xlane.xlu0 %135 }
  0xfa   :  { %v148_v17 = vpop.xlane.xlu2 %147  ;;  %v189_v20 = vmul.f32 %v780_v16, %v136_v18 }
  0xfb   :  { %v193_v19 = vmul.f32 %v780_v16, %v148_v17 }
  0xfc   :  { %v788_v22 = vsub.f32 %v701_v28, %v189_v20 }
  0xfd   :  { %v785_v21 = vsub.f32 %v704_v29, %v193_v19 }
  0xfe   :  { %v221_v24 = vmul.f32 %v788_v22, %v788_v22 }
  0xff   :  { %v225_v23 = vmul.f32 %v785_v21, %v785_v21 }
 0x100   :  { %v237_v26 = vsel %vm133_vm1, %v221_v24, 0.0 }
 0x101   :  { %v249_v25 = vsel %vm133_vm1, %v225_v23, 0.0  ;;  %238 = vadd.xlane.f32.xlu1 %v237_v26 }
 0x102   :  { %250 = vadd.xlane.f32.xlu2 %v249_v25  ;;  %v160_v27 = vpop.xlane.xlu2 %159  ;;  %v172_v30 = vpop.xlane.xlu0 %171 }
 0x103   :  { %v197_v29 = vmul.f32 %v780_v16, %v160_v27  ;;  %v201_v31 = vmul.f32 %v780_v16, %v172_v30 }
 0x105   :  { %v799_v28 = vsub.f32 %v711_v34, %v197_v29  ;;  %v802_v32 = vsub.f32 %v714_v35, %v201_v31 }
 0x107   :  { %v229_v33 = vmul.f32 %v799_v28, %v799_v28  ;;  %v233_v36 = vmul.f32 %v802_v32, %v802_v32 }
 0x109   :  { %v261_v38 = vsel %vm133_vm1, %v229_v33, 0.0  ;;  %v273_v39 = vsel %vm133_vm1, %v233_v36, 0.0 }
 0x10a   :  { %v808_v37 = vpop.xlane.xlu1 %174  ;;  %v151_v42 = vpop.xlane.xlu2 %150  ;;  %262 = vadd.xlane.f32.xlu0 %v261_v38  ;;  %274 = vadd.xlane.f32.xlu1 %v273_v39 }
 0x10b   :  { %v139_v34 = vpop.xlane.xlu0 %138  ;;  %v194_v43 = vmul.f32 %v780_v16, %v151_v42 }
 0x10c   :  { %v190_v35 = vmul.f32 %v780_v16, %v139_v34 }
 0x10d   :  { %v815_v45 = vsub.f32 %v724_v41, %v194_v43 }
 0x10e   :  { %v818_v46 = vsub.f32 %v721_v40, %v190_v35 }
 0x10f   :  { %v226_v47 = vmul.f32 %v815_v45, %v815_v45 }
 0x110   :  { %v222_v48 = vmul.f32 %v818_v46, %v818_v46 }
 0x111   :  { %v252_v52 = vsel %vm133_vm1, %v226_v47, 0.0 }
 0x112   :  { %v142_v51 = vpop.xlane.xlu1 %141  ;;  %v240_v53 = vsel %vm133_vm1, %v222_v48, 0.0  ;;  %253 = vadd.xlane.f32.xlu0 %v252_v52 }
 0x113   :  { %v191_v54 = vmul.f32 %v780_v16, %v142_v51  ;;  %241 = vadd.xlane.f32.xlu2 %v240_v53  ;;  %v163_v41 = vpop.xlane.xlu0 %162 }
 0x114   :  { %v198_v56 = vmul.f32 %v780_v16, %v163_v41 }
 0x115   :  { %v829_v40 = vsub.f32 %v736_v49, %v191_v54 }
 0x116   :  { %v832_v58 = vsub.f32 %v739_v50, %v198_v56 }
 0x117   :  { %v223_v60 = vmul.f32 %v829_v40, %v829_v40 }
 0x118   :  { %v230_v61 = vmul.f32 %v832_v58, %v832_v58 }
 0x119   :  { %v169_v62 = vpop.xlane.xlu2 %168  ;;  %v243_v0 = vsel %vm133_vm1, %v223_v60, 0.0 }
 0x11a   :  { %v166_v63 = vpop.xlane.xlu1 %165  ;;  %v264_v4 = vsel %vm133_vm1, %v230_v61, 0.0  ;;  %v200_v5 = vmul.f32 %v780_v16, %v169_v62  ;;  %244 = vadd.xlane.f32.xlu0 %v243_v0 }
 0x11b   :  { %v199_v49 = vmul.f32 %v780_v16, %v166_v63  ;;  %265 = vadd.xlane.f32.xlu1 %v264_v4  ;;  %v154_v50 = vpop.xlane.xlu0 %153 }
 0x11c   :  { %v195_v6 = vmul.f32 %v780_v16, %v154_v50  ;;  %v844_v7 = vsub.f32 %v752_v59, %v200_v5 }
 0x11d   :  { %v847_v9 = vsub.f32 %v746_v55, %v199_v49 }
 0x11e   :  { %v850_v10 = vsub.f32 %v749_v57, %v195_v6  ;;  %v232_v12 = vmul.f32 %v844_v7, %v844_v7 }
 0x11f   :  { %v231_v11 = vmul.f32 %v847_v9, %v847_v9 }
 0x120   :  { %v227_v13 = vmul.f32 %v850_v10, %v850_v10  ;;  %v270_v55 = vsel %vm133_vm1, %v232_v12, 0.0 }
 0x121   :  { %v267_v14 = vsel %vm133_vm1, %v231_v11, 0.0  ;;  %v178_v15 = vpop.xlane.xlu2 %177 }
 0x122   :  { %v145_v59 = vpop.xlane.xlu1 %144  ;;  %268 = vadd.xlane.f32.xlu2 %v267_v14  ;;  %v255_v17 = vsel %vm133_vm1, %v227_v13, 0.0  ;;  %v203_v57 = vmul.f32 %v780_v16, %v178_v15  ;;  %271 = vadd.xlane.f32.xlu0 %v270_v55 }
 0x123   :  { %v192_v18 = vmul.f32 %v780_v16, %v145_v59  ;;  %256 = vadd.xlane.f32.xlu1 %v255_v17  ;;  %v181_v19 = vpop.xlane.xlu0 %180 }
 0x124   :  { %v864_v20 = vsub.f32 %v761_v1, %v203_v57  ;;  %v204_v24 = vmul.f32 %v780_v16, %v181_v19  ;;  %v917_v19 = vld [vmem:[%s1125_s3] ss:$0 sm:$0xff] }
 0x125   :  { %v867_v23 = vsub.f32 %v767_v3, %v192_v18  ;;  %v202_v3 = vmul.f32 %v780_v16, %v808_v37 }
 0x126   :  { %v235_v25 = vmul.f32 %v864_v20, %v864_v20  ;;  %v875_v27 = vsub.f32 %v764_v2, %v204_v24 }
 0x127   :  { %v224_v26 = vmul.f32 %v867_v23, %v867_v23  ;;  %v890_v38 = vsub.f32 %v727_v44, %v202_v3 }
 0x128   :  { %v279_v29 = vsel %vm133_vm1, %v235_v25, 0.0  ;;  %v236_v36 = vmul.f32 %v875_v27, %v875_v27 }
 0x129   :  { %v246_v1 = vsel %vm133_vm1, %v224_v26, 0.0  ;;  %v234_v37 = vmul.f32 %v890_v38, %v890_v38 }
 0x12a   :  { %v157_v30 = vpop.xlane.xlu1 %156  ;;  %280 = vadd.xlane.f32.xlu0 %v279_v29  ;;  %v282_v42 = vsel %vm133_vm1, %v236_v36, 0.0  ;;  %v925_v29 = vld [vmem:[%s1126_s4] ss:$0 sm:$0xff] }
 0x12b   :  { %v196_v31 = vmul.f32 %v780_v16, %v157_v30  ;;  %247 = vadd.xlane.f32.xlu1 %v246_v1 }
 0x12d   :  { %v883_v33 = vsub.f32 %v776_v8, %v196_v31  ;;  %v276_v8 = vsel %vm133_vm1, %v234_v37, 0.0 }
 0x12f   :  { %v228_v2 = vmul.f32 %v883_v33, %v883_v33 }
 0x131   :  { %v258_v39 = vsel %vm133_vm1, %v228_v2, 0.0 }
 0x132   :  { %259 = vadd.xlane.f32.xlu2 %v258_v39 }
 0x133   :  { %283 = vadd.xlane.f32.xlu1 %v282_v42 }
 0x13a   :  { %277 = vadd.xlane.f32.xlu2 %v276_v8 }
 0x174   :  { %v239_v43 = vpop.xlane.xlu1 %238 }
 0x175   :  { %v251_v34 = vpop.xlane.xlu2 %250  ;;  %v285_v47 = vmul.f32 %v239_v43, %v780_v16 }
 0x176   :  { %v289_v35 = vmul.f32 %v251_v34, %v780_v16 }
 0x177   :  { %v301_v48 = vadd.f32 1e-05, %v285_v47 }
 0x178   :  { %v305_v44 = vadd.f32 1e-05, %v289_v35 }
 0x179   :  { %vm323_vm7 = vweird.f32 %v301_v48 }
 0x17a   :  { %573 = vrsqrt.f32 %v305_v44  ;;  %vm363_vm5 = vweird.f32 %v305_v44 }
 0x17b   :  { %575 = vrsqrt.f32 %v301_v48 }
 0x17d   :  { %v275_v51 = vpop.xlane.xlu1 %274  ;;  %v263_v52 = vpop.xlane.xlu0 %262 }
 0x17e   :  { %v297_v53 = vmul.f32 %v275_v51, %v780_v16  ;;  %v293_v54 = vmul.f32 %v263_v52, %v780_v16 }
 0x180   :  { %v574_v41 = vpop.eup %573  ;;  %v901_v56 = vadd.f32 1e-05, %v297_v53  ;;  %v903_v60 = vadd.f32 1e-05, %v293_v54 }
 0x181   :  { %v576_v61 = vpop.eup %575  ;;  %v358_v62 = vmul.f32 %v574_v41, %v305_v44  ;;  %vm364_vm3 = vweird.f32 %v574_v41 }
 0x182   :  { %v318_v63 = vmul.f32 %v576_v61, %v301_v48  ;;  %577 = vrsqrt.f32 %v901_v56  ;;  %vm324_vm4 = vweird.f32 %v576_v61  ;;  %vm365_vm6 = vmor %vm363_vm5, %vm364_vm3  ;;  %vm443_vm11 = vweird.f32 %v901_v56 }
 0x183   :  { %v359_v0 = vmul.f32 %v574_v41, %v358_v62  ;;  %579 = vrsqrt.f32 %v903_v60  ;;  %vm325_vm8 = vmor %vm323_vm7, %vm324_vm4  ;;  %vm403_vm13 = vweird.f32 %v903_v60 }
 0x184   :  { %v319_v4 = vmul.f32 %v576_v61, %v318_v63 }
 0x185   :  { %v360_v5 = vmul.f32 0.5, %v359_v0  ;;  %v254_v50 = vpop.xlane.xlu0 %253 }
 0x186   :  { %v242_v49 = vpop.xlane.xlu2 %241  ;;  %v320_v6 = vmul.f32 0.5, %v319_v4  ;;  %v290_v12 = vmul.f32 %v254_v50, %v780_v16 }
 0x187   :  { %v286_v11 = vmul.f32 %v242_v49, %v780_v16  ;;  %v361_v13 = vsub.f32 1.5, %v360_v5 }
 0x188   :  { %v578_v14 = vpop.eup %577  ;;  %v321_v15 = vsub.f32 1.5, %v320_v6  ;;  %v911_v55 = vadd.f32 1e-05, %v290_v12 }
 0x189   :  { %v909_v59 = vadd.f32 1e-05, %v286_v11  ;;  %v580_v17 = vpop.eup %579  ;;  %v362_v57 = vmul.f32 %v574_v41, %v361_v13  ;;  %v438_v18 = vmul.f32 %v578_v14, %v901_v56  ;;  %vm444_vm9 = vweird.f32 %v578_v14 }
 0x18a   :  { %v322_v24 = vmul.f32 %v576_v61, %v321_v15  ;;  %v398_v25 = vmul.f32 %v580_v17, %v903_v60  ;;  %vm404_vm10 = vweird.f32 %v580_v17  ;;  %vm445_vm12 = vmor %vm443_vm11, %vm444_vm9  ;;  %vm373_vm4 = vweird.f32 %v911_v55 }
 0x18b   :  { %581 = vrsqrt.f32 %v909_v59  ;;  %v366_v26 = vsel %vm365_vm6, %v574_v41, %v362_v57  ;;  %v439_v30 = vmul.f32 %v578_v14, %v438_v18  ;;  %vm405_vm14 = vmor %vm403_vm13, %vm404_vm10  ;;  %vm333_vm15 = vweird.f32 %v909_v59 }
 0x18c   :  { %583 = vrsqrt.f32 %v911_v55  ;;  %v481_v1 = vmul.f32 %v366_v26, %v785_v21  ;;  %v326_v31 = vsel %vm325_vm8, %v576_v61, %v322_v24  ;;  %v399_v3 = vmul.f32 %v580_v17, %v398_v25 }
 0x18d   :  { %v477_v36 = vmul.f32 %v326_v31, %v788_v22  ;;  %v440_v2 = vmul.f32 0.5, %v439_v30  ;;  %v245_v42 = vpop.xlane.xlu0 %244 }
 0x18e   :  { %v266_v39 = vpop.xlane.xlu1 %265  ;;  %v500_v37 = vmul.f32 %v917_v19, %v481_v1  ;;  %v400_v8 = vmul.f32 0.5, %v399_v3  ;;  %v287_v43 = vmul.f32 %v245_v42, %v780_v16 }
 0x18f   :  { %v294_v34 = vmul.f32 %v266_v39, %v780_v16  ;;  %v496_v35 = vmul.f32 %v917_v19, %v477_v36  ;;  %v441_v47 = vsub.f32 1.5, %v440_v2 }
 0x190   :  { %v519_v44 = vadd.f32 %v925_v29, %v500_v37  ;;  %v401_v48 = vsub.f32 1.5, %v400_v8  ;;  %v936_v51 = vadd.f32 1e-05, %v287_v43 }
 0x191   :  { %v582_v21 = vpop.eup %581  ;;  %v934_v22 = vadd.f32 1e-05, %v294_v34  ;;  %v515_v53 = vadd.f32 %v925_v29, %v496_v35  ;;  %v442_v54 = vmul.f32 %v578_v14, %v441_v47 }
 0x192   :  { %v584_v52 = vpop.eup %583  ;;  %v328_v41 = vmul.f32 %v582_v21, %v909_v59  ;;  %535 = vst.msk [vmem:[%s1127_s5 + $0x20] sm:$0xff] %vm133_vm1, %v519_v44  ;;  %v402_v61 = vmul.f32 %v580_v17, %v401_v48  ;;  %vm334_vm0 = vweird.f32 %v582_v21  ;;  %vm343_vm10 = vweird.f32 %v936_v51 }
 0x193   :  { %v368_v62 = vmul.f32 %v584_v52, %v911_v55  ;;  %585 = vrsqrt.f32 %v934_v22  ;;  %531 = vst.msk [vmem:[%s1127_s5] sm:$0xff] %vm133_vm1, %v515_v53  ;;  %v446_v56 = vsel %vm445_vm12, %v578_v14, %v442_v54  ;;  %vm374_vm2 = vweird.f32 %v584_v52  ;;  %vm335_vm3 = vmor %vm333_vm15, %vm334_vm0 }
 0x194   :  { %v329_v63 = vmul.f32 %v582_v21, %v328_v41  ;;  %587 = vrsqrt.f32 %v936_v51  ;;  %v489_v0 = vmul.f32 %v446_v56, %v802_v32  ;;  %v406_v4 = vsel %vm405_vm14, %v580_v17, %v402_v61  ;;  %vm375_vm5 = vmor %vm373_vm4, %vm374_vm2 }
 0x195   :  { %v369_v5 = vmul.f32 %v584_v52, %v368_v62  ;;  %v269_v60 = vpop.xlane.xlu2 %268  ;;  %v485_v49 = vmul.f32 %v406_v4, %v799_v28  ;;  %v272_v12 = vpop.xlane.xlu0 %271  ;;  %vm413_vm8 = vweird.f32 %v934_v22 }
 0x196   :  { %v330_v50 = vmul.f32 0.5, %v329_v63  ;;  %v295_v6 = vmul.f32 %v269_v60, %v780_v16  ;;  %v257_v11 = vpop.xlane.xlu1 %256  ;;  %v508_v13 = vmul.f32 %v917_v19, %v489_v0  ;;  %v296_v57 = vmul.f32 %v272_v12, %v780_v16 }
 0x197   :  { %v370_v14 = vmul.f32 0.5, %v369_v5  ;;  %v291_v15 = vmul.f32 %v257_v11, %v780_v16  ;;  %v504_v32 = vmul.f32 %v917_v19, %v485_v49 }
 0x198   :  { %v331_v17 = vsub.f32 1.5, %v330_v50  ;;  %v962_v18 = vadd.f32 1e-05, %v295_v6  ;;  %v527_v24 = vadd.f32 %v925_v29, %v508_v13  ;;  %v969_v36 = vadd.f32 1e-05, %v296_v57 }
 0x199   :  { %v586_v28 = vpop.eup %585  ;;  %v371_v25 = vsub.f32 1.5, %v370_v14  ;;  %v965_v26 = vadd.f32 1e-05, %v291_v15  ;;  %v523_v1 = vadd.f32 %v925_v29, %v504_v32 }
 0x19a   :  { %v588_v30 = vpop.eup %587  ;;  %v332_v31 = vmul.f32 %v582_v21, %v331_v17  ;;  %v408_v3 = vmul.f32 %v586_v28, %v934_v22  ;;  %543 = vst.msk [vmem:[%s1127_s5 + $0x60] sm:$0xff] %vm133_vm1, %v527_v24  ;;  %589 = vrsqrt.f32 %v962_v18  ;;  %vm414_vm6 = vweird.f32 %v586_v28 }
 0x19b   :  { %v372_v2 = vmul.f32 %v584_v52, %v371_v25  ;;  %v338_v39 = vmul.f32 %v588_v30, %v936_v51  ;;  %539 = vst.msk [vmem:[%s1127_s5 + $0x40] sm:$0xff] %vm133_vm1, %v523_v1  ;;  %591 = vrsqrt.f32 %v965_v26  ;;  %vm344_vm7 = vweird.f32 %v588_v30  ;;  %vm415_vm9 = vmor %vm413_vm8, %vm414_vm6 }
 0x19c   :  { %v336_v42 = vsel %vm335_vm3, %v582_v21, %v332_v31  ;;  %v409_v37 = vmul.f32 %v586_v28, %v408_v3  ;;  %593 = vrsqrt.f32 %v969_v36  ;;  %vm345_vm11 = vmor %vm343_vm10, %vm344_vm7  ;;  %vm423_vm12 = vweird.f32 %v962_v18 }
 0x19d   :  { %v478_v59 = vmul.f32 %v336_v42, %v818_v46  ;;  %v376_v8 = vsel %vm375_vm5, %v584_v52, %v372_v2  ;;  %v339_v34 = vmul.f32 %v588_v30, %v338_v39  ;;  %v281_v47 = vpop.xlane.xlu0 %280  ;;  %vm383_vm13 = vweird.f32 %v965_v26 }
 0x19e   :  { %v482_v55 = vmul.f32 %v376_v8, %v815_v45  ;;  %v410_v43 = vmul.f32 0.5, %v409_v37  ;;  %v248_v35 = vpop.xlane.xlu1 %247  ;;  %v299_v53 = vmul.f32 %v281_v47, %v780_v16  ;;  %vm433_vm4 = vweird.f32 %v969_v36 }
 0x19f   :  { %v497_v44 = vmul.f32 %v917_v19, %v478_v59  ;;  %v340_v48 = vmul.f32 0.5, %v339_v34  ;;  %v288_v21 = vmul.f32 %v248_v35, %v780_v16 }
 0x1a0   :  { %v501_v54 = vmul.f32 %v917_v19, %v482_v55  ;;  %v411_v41 = vsub.f32 1.5, %v410_v43  ;;  %v993_v46 = vpop.eup %589  ;;  %v998_v62 = vadd.f32 1e-05, %v299_v53 }
 0x1a1   :  { %v516_v45 = vadd.f32 %v925_v29, %v497_v44  ;;  %v341_v52 = vsub.f32 1.5, %v340_v48  ;;  %v996_v61 = vadd.f32 1e-05, %v288_v21  ;;  %v1000_v56 = vpop.eup %591  ;;  %v418_v4 = vmul.f32 %v993_v46, %v962_v18 }
 0x1a2   :  { %v520_v63 = vadd.f32 %v925_v29, %v501_v54  ;;  %v412_v0 = vmul.f32 %v586_v28, %v411_v41  ;;  %v378_v60 = vmul.f32 %v1000_v56, %v965_v26  ;;  %v594_v49 = vpop.eup %593  ;;  %vm424_vm14 = vweird.f32 %v993_v46 }
 0x1a3   :  { %532 = vst.msk [vmem:[%s1127_s5 + $0x8] sm:$0xff] %vm133_vm1, %v516_v45  ;;  %v342_v5 = vmul.f32 %v588_v30, %v341_v52  ;;  %595 = vrsqrt.f32 %v996_v61  ;;  %v419_v50 = vmul.f32 %v993_v46, %v418_v4  ;;  %v428_v12 = vmul.f32 %v594_v49, %v969_v36  ;;  %vm425_vm0 = vmor %vm423_vm12, %vm424_vm14 }
 0x1a4   :  { %536 = vst.msk [vmem:[%s1127_s5 + $0x28] sm:$0xff] %vm133_vm1, %v520_v63  ;;  %v416_v22 = vsel %vm415_vm9, %v586_v28, %v412_v0  ;;  %597 = vrsqrt.f32 %v998_v62  ;;  %v379_v11 = vmul.f32 %v1000_v56, %v378_v60  ;;  %vm384_vm15 = vweird.f32 %v1000_v56 }
 0x1a5   :  { %v486_v51 = vmul.f32 %v416_v22, %v832_v58  ;;  %v346_v6 = vsel %vm345_vm11, %v588_v30, %v342_v5  ;;  %v260_v13 = vpop.xlane.xlu2 %259  ;;  %v420_v15 = vmul.f32 0.5, %v419_v50  ;;  %v429_v17 = vmul.f32 %v594_v49, %v428_v12  ;;  %vm385_vm3 = vmor %vm383_vm13, %vm384_vm15 }
 0x1a6   :  { %v479_v14 = vmul.f32 %v346_v6, %v829_v40  ;;  %v380_v32 = vmul.f32 0.5, %v379_v11  ;;  %v292_v28 = vmul.f32 %v260_v13, %v780_v16  ;;  %v284_v58 = vpop.xlane.xlu1 %283  ;;  %vm434_vm2 = vweird.f32 %v594_v49 }
 0x1a7   :  { %v505_v57 = vmul.f32 %v917_v19, %v486_v51  ;;  %v421_v25 = vsub.f32 1.5, %v420_v15  ;;  %v430_v31 = vmul.f32 0.5, %v429_v17  ;;  %v300_v59 = vmul.f32 %v284_v58, %v780_v16  ;;  %vm435_vm5 = vmor %vm433_vm4, %vm434_vm2 }
 0x1a8   :  { %v498_v24 = vmul.f32 %v917_v19, %v479_v14  ;;  %v381_v1 = vsub.f32 1.5, %v380_v32  ;;  %v1033_v3 = vadd.f32 1e-05, %v292_v28  ;;  %vm353_vm8 = vweird.f32 %v996_v61 }
 0x1a9   :  { %v596_v40 = vpop.eup %595  ;;  %v524_v30 = vadd.f32 %v925_v29, %v505_v57  ;;  %v422_v42 = vmul.f32 %v993_v46, %v421_v25  ;;  %v431_v34 = vsub.f32 1.5, %v430_v31  ;;  %v316_v41 = vadd.f32 1e-05, %v300_v59 }
 0x1aa   :  { %v598_v2 = vpop.eup %597  ;;  %v517_v39 = vadd.f32 %v925_v29, %v498_v24  ;;  %v348_v37 = vmul.f32 %v596_v40, %v996_v61  ;;  %v382_v8 = vmul.f32 %v1000_v56, %v381_v1  ;;  %599 = vrsqrt.f32 %v1033_v3 }
 0x1ab   :  { %540 = vst.msk [vmem:[%s1127_s5 + $0x48] sm:$0xff] %vm133_vm1, %v524_v30  ;;  %v458_v55 = vmul.f32 %v598_v2, %v998_v62  ;;  %v426_v43 = vsel %vm425_vm0, %v993_v46, %v422_v42  ;;  %v432_v44 = vmul.f32 %v594_v49, %v431_v34  ;;  %vm354_vm6 = vweird.f32 %v596_v40 }
 0x1ac   :  { %533 = vst.msk [vmem:[%s1127_s5 + $0x10] sm:$0xff] %vm133_vm1, %v517_v39  ;;  %v349_v18 = vmul.f32 %v596_v40, %v348_v37  ;;  %v487_v35 = vmul.f32 %v426_v43, %v847_v9  ;;  %v386_v47 = vsel %vm385_vm3, %v1000_v56, %v382_v8  ;;  %601 = vrsqrt.f32 %v316_v41  ;;  %vm355_vm9 = vmor %vm353_vm8, %vm354_vm6 }
 0x1ad   :  { %v459_v48 = vmul.f32 %v598_v2, %v458_v55  ;;  %v278_v21 = vpop.xlane.xlu2 %277  ;;  %v483_v53 = vmul.f32 %v386_v47, %v850_v10  ;;  %v436_v36 = vsel %vm435_vm5, %v594_v49, %v432_v44  ;;  %vm464_vm7 = vweird.f32 %v598_v2 }
 0x1ae   :  { %v350_v54 = vmul.f32 0.5, %v349_v18  ;;  %v298_v26 = vmul.f32 %v278_v21, %v780_v16  ;;  %v506_v46 = vmul.f32 %v917_v19, %v487_v35  ;;  %v488_v9 = vmul.f32 %v436_v36, %v844_v7 }
 0x1af   :  { %v460_v45 = vmul.f32 0.5, %v459_v48  ;;  %v502_v52 = vmul.f32 %v917_v19, %v483_v53  ;;  %vm463_vm10 = vweird.f32 %v998_v62  ;;  %vm393_vm13 = vweird.f32 %v1033_v3 }
 0x1b0   :  { %v351_v56 = vsub.f32 1.5, %v350_v54  ;;  %v525_v63 = vadd.f32 %v925_v29, %v506_v46  ;;  %v314_v10 = vadd.f32 1e-05, %v298_v26  ;;  %v600_v4 = vpop.eup %599  ;;  %v507_v16 = vmul.f32 %v917_v19, %v488_v9  ;;  %vm465_vm11 = vmor %vm463_vm10, %vm464_vm7 }
 0x1b1   :  { %v461_v0 = vsub.f32 1.5, %v460_v45  ;;  %v521_v5 = vadd.f32 %v925_v29, %v502_v52  ;;  %v388_v49 = vmul.f32 %v600_v4, %v1033_v3  ;;  %vm394_vm12 = vweird.f32 %v600_v4 }
 0x1b2   :  { %v352_v60 = vmul.f32 %v596_v40, %v351_v56  ;;  %541 = vst.msk [vmem:[%s1127_s5 + $0x50] sm:$0xff] %vm133_vm1, %v525_v63  ;;  %603 = vrsqrt.f32 %v314_v10  ;;  %v526_v61 = vadd.f32 %v925_v29, %v507_v16  ;;  %v602_v11 = vpop.eup %601  ;;  %vm395_vm14 = vmor %vm393_vm13, %vm394_vm12  ;;  %vm473_vm0 = vweird.f32 %v316_v41 }
 0x1b3   :  { %v462_v7 = vmul.f32 %v598_v2, %v461_v0  ;;  %537 = vst.msk [vmem:[%s1127_s5 + $0x30] sm:$0xff] %vm133_vm1, %v521_v5  ;;  %v389_v6 = vmul.f32 %v600_v4, %v388_v49  ;;  %v468_v14 = vmul.f32 %v602_v11, %v316_v41  ;;  %vm474_vm15 = vweird.f32 %v602_v11 }
 0x1b4   :  { %v356_v22 = vsel %vm355_vm9, %v596_v40, %v352_v60  ;;  %542 = vst.msk [vmem:[%s1127_s5 + $0x58] sm:$0xff] %vm133_vm1, %v526_v61  ;;  %vm475_vm2 = vmor %vm473_vm0, %vm474_vm15  ;;  %vm453_vm4 = vweird.f32 %v314_v10 }
 0x1b5   :  { %v480_v50 = vmul.f32 %v356_v22, %v867_v23  ;;  %v466_v51 = vsel %vm465_vm11, %v598_v2, %v462_v7  ;;  %v390_v13 = vmul.f32 0.5, %v389_v6  ;;  %v469_v17 = vmul.f32 %v602_v11, %v468_v14 }
 0x1b6   :  { %v491_v62 = vmul.f32 %v466_v51, %v864_v20 }
 0x1b7   :  { %v499_v12 = vmul.f32 %v917_v19, %v480_v50  ;;  %v391_v23 = vsub.f32 1.5, %v390_v13  ;;  %v470_v24 = vmul.f32 0.5, %v469_v17 }
 0x1b8   :  { %v510_v15 = vmul.f32 %v917_v19, %v491_v62  ;;  %v604_v57 = vpop.eup %603 }
 0x1b9   :  { %v518_v32 = vadd.f32 %v925_v29, %v499_v12  ;;  %v448_v58 = vmul.f32 %v604_v57, %v314_v10  ;;  %v392_v20 = vmul.f32 %v600_v4, %v391_v23  ;;  %v471_v30 = vsub.f32 1.5, %v470_v24 }
 0x1ba   :  { %v529_v28 = vadd.f32 %v925_v29, %v510_v15  ;;  %vm454_vm3 = vweird.f32 %v604_v57 }
 0x1bb   :  { %534 = vst.msk [vmem:[%s1127_s5 + $0x18] sm:$0xff] %vm133_vm1, %v518_v32  ;;  %v449_v25 = vmul.f32 %v604_v57, %v448_v58  ;;  %v396_v40 = vsel %vm395_vm14, %v600_v4, %v392_v20  ;;  %v472_v2 = vmul.f32 %v602_v11, %v471_v30  ;;  %vm455_vm5 = vmor %vm453_vm4, %vm454_vm3 }
 0x1bc   :  { %545 = vst.msk [vmem:[%s1127_s5 + $0x70] sm:$0xff] %vm133_vm1, %v529_v28  ;;  %v484_v1 = vmul.f32 %v396_v40, %v883_v33 }
 0x1bd   :  { %v450_v31 = vmul.f32 0.5, %v449_v25  ;;  %v476_v42 = vsel %vm475_vm2, %v602_v11, %v472_v2 }
 0x1be   :  { %v503_v39 = vmul.f32 %v917_v19, %v484_v1  ;;  %v492_v59 = vmul.f32 %v476_v42, %v875_v27 }
 0x1bf   :  { %v451_v3 = vsub.f32 1.5, %v450_v31 }
 0x1c0   :  { %v522_v37 = vadd.f32 %v925_v29, %v503_v39  ;;  %v511_v33 = vmul.f32 %v917_v19, %v492_v59 }
 0x1c1   :  { %v452_v8 = vmul.f32 %v604_v57, %v451_v3 }
 0x1c2   :  { %538 = vst.msk [vmem:[%s1127_s5 + $0x38] sm:$0xff] %vm133_vm1, %v522_v37  ;;  %v530_v43 = vadd.f32 %v925_v29, %v511_v33 }
 0x1c3   :  { %v456_v34 = vsel %vm455_vm5, %v604_v57, %v452_v8 }
 0x1c4   :  { %v490_v55 = vmul.f32 %v456_v34, %v890_v38  ;;  %546 = vst.msk [vmem:[%s1127_s5 + $0x78] sm:$0xff] %vm133_vm1, %v530_v43 }
 0x1c6   :  { %v509_v18 = vmul.f32 %v917_v19, %v490_v55 }
 0x1c8   :  { %v528_v27 = vadd.f32 %v925_v29, %v509_v18 }
 0x1ca   :  { %544 = vst.msk [vmem:[%s1127_s5 + $0x68] sm:$0xff] %vm133_vm1, %v528_v27 }

// kernel: _lambda_.11
= control target key start
LH: loop header
LB: loop body
LE: loop exit
PB: predicated region body
PF: predicated region fallthrough
CT: control target
= control target key end

     0   :  { %s2172_s25 = smov 0   ;;  %s2742_s0 = inlined_call_operand.vmem [shape: f32[2,64,32], index: 0, kind: input, shape index: {}]   ;;  %s2743_s1 = inlined_call_operand.vmem [shape: f32[1,32], index: 1, kind: input, shape index: {}, may-alias: {1,8}]   ;;  %s2744_s2 = inlined_call_operand.vmem [shape: f32[1,32], index: 2, kind: input, shape index: {}, may-alias: {2,7,9}]   ;;  %s2745_s3 = inlined_call_operand.vmem [shape: bf16[32,96], index: 3, kind: input, shape index: {}]   ;;  %s2746_s4 = inlined_call_operand.vmem [shape: f32[1,96], index: 4, kind: input, shape index: {}]   ;;  %s2747_s5 = inlined_call_operand.vmem [shape: f32[2,16,16], index: 5, kind: input, shape index: {}]   ;;  %s2748_s6 = inlined_call_operand.vmem [shape: bf16[32,32], index: 6, kind: input, shape index: {}]   ;;  %s2749_s7 = inlined_call_operand.vmem [shape: f32[1,32], index: 7, kind: input, shape index: {}, may-alias: {2,7,9}]   ;;  %s2750_s8 = inlined_call_operand.vmem [shape: f32[1,32], index: 8, kind: input, shape index: {}, may-alias: {1,8}]   ;;  %s2751_s9 = inlined_call_operand.vmem [shape: f32[1,32], index: 9, kind: input, shape index: {}, may-alias: {2,7,9}]   ;;  %s2752_s10 = inlined_call_operand.vmem [shape: bf16[32,64], index: 10, kind: input, shape index: {}]   ;;  %s2753_s11 = inlined_call_operand.vmem [shape: f32[1,64], index: 11, kind: input, shape index: {}]   ;;  %s2754_s12 = inlined_call_operand.vmem [shape: f32[2,64,32], index: 12, kind: output, shape index: {0}]   ;;  %s2755_s13 = inlined_call_operand.vmem [shape: bf16[2,64,64], index: 13, kind: output, shape index: {1}]  }
   0x1 LB: > { %s1881_s26 = sadd.s32 4294967295, %s2094_s25   ;;  %p1885_p0 = scmp.ge.s32.totalorder %s2094_s25, 1  ;;  %s2094_s25 = sphi %s2172_s25, %s24_s25  }
   0x2   : > { %p390_p1 = scmp.lt.s32.totalorder %s2094_s25, 3 }
   0x4   : > { %p391_p2 = pnand %p1885_p0, %p390_p1 }
   0x5   : > { %p439_p3 = scmp.lt.s32.totalorder (!%p391_p2), %s1881_s26, 1  ;;  %s2097_s24 = smov (!%p391_p2), 96  }
   0x6   : > { %394 = sbr.rel (%p391_p2) target bundleno = 2208 (0x8a0), region = 68  ;;  %s2098_s16 = smov (!%p391_p2), 64  }
   0x7   : > { %s2099_s17 = smov (!%p391_p2), 80   ;;  %s2100_s18 = smov (!%p391_p2), 112  }
   0x8   : > { %s2101_s23 = smov (!%p391_p2), 48  }
   0xb   : > { %s2763_s26 = smov (!%p439_p3, %s1881_s26), 1  ;;  %vm465_vm0 = vcmask 261120   ;;  %v2096_v16 = vmov 32.0  }
   0xc   : > { %s1950_s27 = sshll.u32 %s2763_s26, 6  ;;  %1982 = vrcp.f32 %v2096_v16  ;;  %s1952_s15 = sshll.u32 %s2763_s26, 5 }
   0xd   : > { %s2188_s30 = scalar_lea.vmem %s2742_s0, %s1950_s27  ;;  %s2558_s19 = scalar_lea.vmem %s2754_s12, %s1950_s27 }
   0xe   : > { %v459_v0 = vld [vmem:[%s2188_s30 + $0x20] sm:$0xff]  ;;  %v457_v1 = vld [vmem:[%s2188_s30 + $0x10] sm:$0xff]  ;;  %v460_v6 = vld [vmem:[%s2188_s30 + $0x28] sm:$0xff] }
   0xf   : > { %v455_v2 = vld [vmem:[%s2188_s30] sm:$0xff]  ;;  %v478_v3 = vsel %vm465_vm0, %v459_v0, 0.0  ;;  %v472_v4 = vsel %vm465_vm0, %v457_v1, 0.0  ;;  %v458_v7 = vld [vmem:[%s2188_s30 + $0x18] sm:$0xff]  ;;  %v456_v8 = vld [vmem:[%s2188_s30 + $0x8] sm:$0xff]  ;;  %v481_v9 = vsel %vm465_vm0, %v460_v6, 0.0 }
  0x10   : > { %v466_v5 = vsel %vm465_vm0, %v455_v2, 0.0  ;;  %479 = vadd.xlane.f32.xlu2 %v478_v3  ;;  %473 = vadd.xlane.f32.xlu1 %v472_v4  ;;  %v475_v10 = vsel %vm465_vm0, %v458_v7, 0.0  ;;  %v469_v11 = vsel %vm465_vm0, %v456_v8, 0.0  ;;  %v462_v12 = vld [vmem:[%s2188_s30 + $0x38] sm:$0xff]  ;;  %v461_v13 = vld [vmem:[%s2188_s30 + $0x30] sm:$0xff]  ;;  %v1954_v3 = vld [vmem:[%s2745_s3 + $0x8] sm:$0xff] }
  0x11   : > { %467 = vadd.xlane.f32.xlu0 %v466_v5  ;;  %v487_v14 = vsel %vm465_vm0, %v462_v12, 0.0  ;;  %v484_v15 = vsel %vm465_vm0, %v461_v13, 0.0  ;;  %713 = vmatpush.bf16.msra.mxu0 %v1954_v3 }
  0x12   : > { %v1983_v17 = vpop.eup %1982  ;;  %1959 = vmatpush.bf16.msra.mxu3 %v1954_v3 }
  0x13   : > { %v491_v18 = vmul.f32 32.0, %v1983_v17  ;;  %vm495_vm1 = vweird.f32 %v1983_v17 }
  0x15   : > { %v492_v19 = vsub.f32 1.0, %v491_v18 }
  0x17   : > { %v493_v20 = vmul.f32 %v1983_v17, %v492_v19 }
  0x18   : > { %482 = vadd.xlane.f32.xlu2 %v481_v9  ;;  %476 = vadd.xlane.f32.xlu1 %v475_v10 }
  0x19   : > { %470 = vadd.xlane.f32.xlu0 %v469_v11  ;;  %v494_v21 = vadd.f32 %v1983_v17, %v493_v20 }
  0x1b   : > { %v2206_v22 = vsel %vm495_vm1, %v1983_v17, %v494_v21 }
  0x20   : > { %488 = vadd.xlane.f32.xlu1 %v487_v14 }
  0x21   : > { %485 = vadd.xlane.f32.xlu0 %v484_v15 }
  0x83   : > { %v480_v23 = vpop.xlane.xlu2 %479  ;;  %v474_v24 = vpop.xlane.xlu1 %473 }
  0x84   : > { %v499_v25 = vmul.f32 %v2206_v22, %v474_v24  ;;  %v468_v26 = vpop.xlane.xlu0 %467  ;;  %v501_v39 = vmul.f32 %v2206_v22, %v480_v23 }
  0x85   : > { %v497_v27 = vmul.f32 %v2206_v22, %v468_v26 }
  0x86   : > { %v2210_v28 = vsub.f32 %v457_v1, %v499_v25  ;;  %v2234_v46 = vsub.f32 %v459_v0, %v501_v39 }
  0x87   : > { %v2212_v29 = vsub.f32 %v455_v2, %v497_v27 }
  0x88   : > { %v515_v30 = vmul.f32 %v2210_v28, %v2210_v28  ;;  %v517_v55 = vmul.f32 %v2234_v46, %v2234_v46 }
  0x89   : > { %v513_v31 = vmul.f32 %v2212_v29, %v2212_v29 }
  0x8a   : > { %v527_v32 = vsel %vm465_vm0, %v515_v30, 0.0  ;;  %v533_v58 = vsel %vm465_vm0, %v517_v55, 0.0 }
  0x8b   : > { %v483_v33 = vpop.xlane.xlu2 %482  ;;  %528 = vadd.xlane.f32.xlu1 %v527_v32  ;;  %v477_v34 = vpop.xlane.xlu1 %476  ;;  %v521_v35 = vsel %vm465_vm0, %v513_v31, 0.0 }
  0x8c   : > { %v502_v36 = vmul.f32 %v2206_v22, %v483_v33  ;;  %v500_v37 = vmul.f32 %v2206_v22, %v477_v34  ;;  %522 = vadd.xlane.f32.xlu2 %v521_v35  ;;  %v471_v38 = vpop.xlane.xlu0 %470 }
  0x8d   : > { %v498_v40 = vmul.f32 %v2206_v22, %v471_v38 }
  0x8e   : > { %v2224_v41 = vsub.f32 %v460_v6, %v502_v36  ;;  %v2226_v42 = vsub.f32 %v458_v7, %v500_v37  ;;  %v1953_v6 = vld [vmem:[%s2745_s3] sm:$0xff] }
  0x8f   : > { %v2228_v43 = vsub.f32 %v456_v8, %v498_v40  ;;  %714 = vmatpush.bf16.msra.mxu0 %v1953_v6  ;;  %1960 = vmatpush.bf16.msra.mxu3 %v1953_v6 }
  0x90   : > { %v518_v44 = vmul.f32 %v2224_v41, %v2224_v41  ;;  %v516_v45 = vmul.f32 %v2226_v42, %v2226_v42 }
  0x91   : > { %v514_v47 = vmul.f32 %v2228_v43, %v2228_v43 }
  0x92   : > { %v536_v48 = vsel %vm465_vm0, %v518_v44, 0.0  ;;  %v530_v49 = vsel %vm465_vm0, %v516_v45, 0.0 }
  0x93   : > { %537 = vadd.xlane.f32.xlu1 %v536_v48  ;;  %v524_v50 = vsel %vm465_vm0, %v514_v47, 0.0  ;;  %v489_v51 = vpop.xlane.xlu1 %488 }
  0x94   : > { %531 = vadd.xlane.f32.xlu2 %v530_v49  ;;  %525 = vadd.xlane.f32.xlu0 %v524_v50  ;;  %v486_v52 = vpop.xlane.xlu0 %485  ;;  %v504_v54 = vmul.f32 %v2206_v22, %v489_v51 }
  0x95   : > { %v503_v53 = vmul.f32 %v2206_v22, %v486_v52 }
  0x96   : > { %v2247_v57 = vsub.f32 %v462_v12, %v504_v54 }
  0x97   : > { %v2245_v56 = vsub.f32 %v461_v13, %v503_v53 }
  0x98   : > { %v520_v61 = vmul.f32 %v2247_v57, %v2247_v57 }
  0x99   : > { %v519_v59 = vmul.f32 %v2245_v56, %v2245_v56 }
  0x9a   : > { %v542_v62 = vsel %vm465_vm0, %v520_v61, 0.0 }
  0x9b   : > { %v539_v60 = vsel %vm465_vm0, %v519_v59, 0.0 }
  0x9c   : > { %534 = vadd.xlane.f32.xlu0 %v533_v58  ;;  %540 = vadd.xlane.f32.xlu2 %v539_v60 }
  0xa4   : > { %543 = vadd.xlane.f32.xlu0 %v542_v62 }
  0xfe   : > { %v529_v63 = vpop.xlane.xlu1 %528 }
  0xff   : > { %v547_v0 = vmul.f32 %v529_v63, %v2206_v22  ;;  %v523_v1 = vpop.xlane.xlu2 %522 }
 0x100   : > { %v545_v2 = vmul.f32 %v523_v1, %v2206_v22 }
 0x101   : > { %v555_v4 = vadd.f32 1e-05, %v547_v0 }
 0x102   : > { %v553_v5 = vadd.f32 1e-05, %v545_v2  ;;  %v2301_v2 = vld [vmem:[%s2743_s1] ss:$0 sm:$0xff] }
 0x103   : > { %1984 = vrsqrt.f32 %v555_v4  ;;  %vm587_vm2 = vweird.f32 %v555_v4 }
 0x104   : > { %1986 = vrsqrt.f32 %v553_v5  ;;  %vm567_vm6 = vweird.f32 %v553_v5 }
 0x106   : > { %v538_v7 = vpop.xlane.xlu1 %537 }
 0x107   : > { %v550_v8 = vmul.f32 %v538_v7, %v2206_v22  ;;  %v532_v9 = vpop.xlane.xlu2 %531  ;;  %v526_v10 = vpop.xlane.xlu0 %525 }
 0x108   : > { %v548_v11 = vmul.f32 %v532_v9, %v2206_v22  ;;  %v546_v12 = vmul.f32 %v526_v10, %v2206_v22  ;;  %v1976_v10 = vld [vmem:[%s2744_s2] ss:$0 sm:$0xff] }
 0x109   : > { %v1985_v13 = vpop.eup %1984  ;;  %v2267_v14 = vadd.f32 1e-05, %v550_v8 }
 0x10a   : > { %v1987_v15 = vpop.eup %1986  ;;  %v582_v16 = vmul.f32 %v1985_v13, %v555_v4  ;;  %v556_v17 = vadd.f32 1e-05, %v548_v11  ;;  %v554_v18 = vadd.f32 1e-05, %v546_v12  ;;  %vm588_vm3 = vweird.f32 %v1985_v13 }
 0x10b   : > { %v562_v19 = vmul.f32 %v1987_v15, %v553_v5  ;;  %1988 = vrsqrt.f32 %v2267_v14  ;;  %vm2276_vm4 = vmor %vm587_vm2, %vm588_vm3  ;;  %vm568_vm5 = vweird.f32 %v1987_v15  ;;  %vm617_vm14 = vweird.f32 %v2267_v14 }
 0x10c   : > { %v583_v20 = vmul.f32 %v1985_v13, %v582_v16  ;;  %1990 = vrsqrt.f32 %v556_v17  ;;  %vm597_vm7 = vweird.f32 %v556_v17  ;;  %vm569_vm8 = vmor %vm567_vm6, %vm568_vm5  ;;  %vm577_vm12 = vweird.f32 %v554_v18 }
 0x10d   : > { %v563_v21 = vmul.f32 %v1987_v15, %v562_v19  ;;  %1992 = vrsqrt.f32 %v554_v18 }
 0x10e   : > { %v584_v23 = vmul.f32 0.5, %v583_v20 }
 0x10f   : > { %v564_v24 = vmul.f32 0.5, %v563_v21  ;;  %v541_v25 = vpop.xlane.xlu2 %540  ;;  %v535_v26 = vpop.xlane.xlu0 %534 }
 0x110   : > { %v585_v27 = vsub.f32 1.5, %v584_v23  ;;  %v549_v30 = vmul.f32 %v535_v26, %v2206_v22  ;;  %v551_v34 = vmul.f32 %v541_v25, %v2206_v22 }
 0x111   : > { %v2271_v31 = vpop.eup %1988  ;;  %v565_v32 = vsub.f32 1.5, %v564_v24 }
 0x112   : > { %v1991_v33 = vpop.eup %1990  ;;  %v586_v36 = vmul.f32 %v1985_v13, %v585_v27  ;;  %v2274_v38 = vadd.f32 1e-05, %v549_v30  ;;  %v612_v44 = vmul.f32 %v2271_v31, %v2267_v14  ;;  %v2282_v49 = vadd.f32 1e-05, %v551_v34 }
 0x113   : > { %v1993_v35 = vpop.eup %1992  ;;  %v592_v37 = vmul.f32 %v1991_v33, %v556_v17  ;;  %v566_v40 = vmul.f32 %v1987_v15, %v565_v32  ;;  %vm598_vm9 = vweird.f32 %v1991_v33  ;;  %vm618_vm15 = vweird.f32 %v2271_v31 }
 0x114   : > { %v572_v45 = vmul.f32 %v1993_v35, %v554_v18  ;;  %v590_v50 = vsel %vm2276_vm4, %v1985_v13, %v586_v36  ;;  %1994 = vrsqrt.f32 %v2274_v38  ;;  %v613_v54 = vmul.f32 %v2271_v31, %v612_v44  ;;  %vm2289_vm10 = vmor %vm597_vm7, %vm598_vm9 }
 0x115   : > { %v593_v47 = vmul.f32 %v1991_v33, %v592_v37  ;;  %v570_v53 = vsel %vm569_vm8, %v1987_v15, %v566_v40  ;;  %vm578_vm11 = vweird.f32 %v1993_v35  ;;  %v643_v63 = vmul.f32 %v590_v50, %v2210_v28  ;;  %vm2320_vm3 = vmor %vm617_vm14, %vm618_vm15 }
 0x116   : > { %v573_v48 = vmul.f32 %v1993_v35, %v572_v45  ;;  %v641_v0 = vmul.f32 %v570_v53, %v2212_v29  ;;  %1996 = vrsqrt.f32 %v2282_v49  ;;  %v614_v3 = vmul.f32 0.5, %v613_v54  ;;  %vm579_vm13 = vmor %vm577_vm12, %vm578_vm11 }
 0x117   : > { %v594_v51 = vmul.f32 0.5, %v593_v47  ;;  %v544_v52 = vpop.xlane.xlu0 %543  ;;  %v654_v11 = vmul.f32 %v2301_v2, %v643_v63  ;;  %vm607_vm1 = vweird.f32 %v2274_v38  ;;  %vm627_vm7 = vweird.f32 %v2282_v49  ;;  %v1977_v63 = vld [vmem:[%s2746_s4] ss:$0 sm:$0xff] }
 0x118   : > { %v574_v55 = vmul.f32 0.5, %v573_v48  ;;  %v552_v58 = vmul.f32 %v544_v52, %v2206_v22  ;;  %v652_v9 = vmul.f32 %v2301_v2, %v641_v0  ;;  %v615_v12 = vsub.f32 1.5, %v614_v3 }
 0x119   : > { %v595_v59 = vsub.f32 1.5, %v594_v51  ;;  %v665_v21 = vadd.f32 %v1976_v10, %v654_v11  ;;  %vm759_vm11 = vcmask 130048  }
 0x11a   : > { %v575_v61 = vsub.f32 1.5, %v574_v55  ;;  %v2293_v62 = vadd.f32 1e-05, %v552_v58  ;;  %v1995_v5 = vpop.eup %1994  ;;  %v663_v19 = vadd.f32 %v1976_v10, %v652_v9  ;;  %v616_v23 = vmul.f32 %v2271_v31, %v615_v12 }
 0x11b   : > { %v596_v1 = vmul.f32 %v1991_v33, %v595_v59  ;;  %v602_v7 = vmul.f32 %v1995_v5, %v2274_v38  ;;  %vm608_vm2 = vweird.f32 %v1995_v5 }
 0x11c   : > { %v576_v4 = vmul.f32 %v1993_v35, %v575_v61  ;;  %1998 = vrsqrt.f32 %v2293_v62  ;;  %v1997_v16 = vpop.eup %1996  ;;  %vm609_vm4 = vmor %vm607_vm1, %vm608_vm2  ;;  %v620_v34 = vsel %vm2320_vm3, %v2271_v31, %v616_v23  ;;  %vm637_vm5 = vweird.f32 %v2293_v62 }
 0x11d   : > { %v600_v6 = vsel %vm2289_vm10, %v1991_v33, %v596_v1  ;;  %v603_v13 = vmul.f32 %v1995_v5, %v602_v7  ;;  %v622_v14 = vmul.f32 %v1997_v16, %v2282_v49  ;;  %v646_v39 = vmul.f32 %v620_v34, %v2224_v41 }
 0x11e   : > { %v644_v28 = vmul.f32 %v600_v6, %v2226_v42  ;;  %v580_v29 = vsel %vm579_vm13, %v1993_v35, %v576_v4  ;;  %vm628_vm8 = vweird.f32 %v1997_v16 }
 0x11f   : > { %v642_v8 = vmul.f32 %v580_v29, %v2228_v43  ;;  %v604_v43 = vmul.f32 0.5, %v603_v13  ;;  %v623_v35 = vmul.f32 %v1997_v16, %v622_v14  ;;  %v657_v47 = vmul.f32 %v2301_v2, %v646_v39  ;;  %vm629_vm10 = vmor %vm627_vm7, %vm628_vm8 }
 0x120   : > { %v655_v15 = vmul.f32 %v2301_v2, %v644_v28 }
 0x121   : > { %v653_v42 = vmul.f32 %v2301_v2, %v642_v8  ;;  %v605_v25 = vsub.f32 1.5, %v604_v43  ;;  %v624_v40 = vmul.f32 0.5, %v623_v35 }
 0x122   : > { %v666_v17 = vadd.f32 %v1976_v10, %v655_v15  ;;  %v1999_v18 = vpop.eup %1998 }
 0x123   : > { %v664_v20 = vadd.f32 %v1976_v10, %v653_v42  ;;  %v632_v26 = vmul.f32 %v1999_v18, %v2293_v62  ;;  %v606_v32 = vmul.f32 %v1995_v5, %v605_v25  ;;  %v625_v48 = vsub.f32 1.5, %v624_v40 }
 0x124   : > { %v672_v30 = vpack.c.bf16 %v666_v17, %v665_v21  ;;  %vm638_vm6 = vweird.f32 %v1999_v18 }
 0x125   : > { %v671_v27 = vpack.c.bf16 %v664_v20, %v663_v19  ;;  %v633_v33 = vmul.f32 %v1999_v18, %v632_v26  ;;  %v610_v36 = vsel %vm609_vm4, %v1995_v5, %v606_v32  ;;  %vm639_vm9 = vmor %vm637_vm5, %vm638_vm6  ;;  %v626_v51 = vmul.f32 %v1997_v16, %v625_v48 }
 0x126   : > { %1901 = vmatmul.msk.bf16.vlgmr.msra.gmra.mxu3 %vm465_vm0, %v672_v30  ;;  %v645_v37 = vmul.f32 %v610_v36, %v2234_v46  ;;  %v668_v46 = vadd.f32 %v1976_v10, %v657_v47 }
 0x127   : > { %1900 = vmatmul.msk.bf16.vlgmr.msra.gmra.mxu0 %vm465_vm0, %v671_v27  ;;  %v634_v38 = vmul.f32 0.5, %v633_v33  ;;  %v630_v53 = vsel %vm629_vm10, %v1997_v16, %v626_v51 }
 0x128   : > { %v656_v44 = vmul.f32 %v2301_v2, %v645_v37  ;;  %v647_v55 = vmul.f32 %v630_v53, %v2245_v56 }
 0x129   : > { %v635_v45 = vsub.f32 1.5, %v634_v38 }
 0x12a   : > { %v667_v50 = vadd.f32 %v1976_v10, %v656_v44  ;;  %v658_v59 = vmul.f32 %v2301_v2, %v647_v55 }
 0x12b   : > { %v636_v31 = vmul.f32 %v1999_v18, %v635_v45  ;;  %v736_v45 = vld [vmem:[%s2747_s5] sm:$0xff] }
 0x12c   : > { %v673_v41 = vpack.c.bf16 %v668_v46, %v667_v50  ;;  %v669_v60 = vadd.f32 %v1976_v10, %v658_v59  ;;  %v737_v46 = vld [vmem:[%s2747_s5 + $0x8] sm:$0xff] }
 0x12d   : > { %v640_v52 = vsel %vm639_vm9, %v1999_v18, %v636_v31 }
 0x12e   : > { %v648_v54 = vmul.f32 %v640_v52, %v2247_v57 }
 0x130   : > { %v659_v58 = vmul.f32 %v2301_v2, %v648_v54 }
 0x132   : > { %v670_v49 = vadd.f32 %v1976_v10, %v659_v58 }
 0x134   : > { %v674_v61 = vpack.c.bf16 %v670_v49, %v669_v60 }
 0x136   : > { %1902 = vmatmul.msk.bf16.gmra.mxu3 %vm465_vm0, %v673_v41 }
 0x146   : > { %1903 = vmatmul.msk.bf16.gmra.mxu3 %vm465_vm0, %v674_v61 }
 0x1a4   : > { %v716_v62 = vpop.f32.mrf.mxu0 }
 0x1a5   : > { %v717_v0 = vadd.f32 %v1977_v63, %v716_v62 }
 0x1a7   : > { %v744_v57 = vpack.c.bf16 %v717_v0, %v717_v0 }
 0x1a9   : > { %v721_v1 = vpop.f32.mrf.mxu3  ;;  %v754_v6 = vunpack.c.l.b16 %v744_v57 }
 0x1aa   : > { %v722_v56 = vadd.f32 %v1977_v63, %v721_v1 }
 0x1ac   : > { %v718_v3 = vpop.f32.mrf.mxu0  ;;  %v746_v29 = vpack.c.bf16 %v722_v56, %v722_v56 }
 0x1ad   : > { %v719_v4 = vadd.f32 %v1977_v63, %v718_v3 }
 0x1ae   : > { %v782_v10 = vunpack.c.l.b16 %v746_v29 }
 0x1af   : > { %v745_v5 = vpack.c.bf16 %v719_v4, %v719_v4 }
 0x1b1   : > { %v755_v28 = vunpack.c.l.b16 %v745_v5  ;;  %v723_v2 = vpop.f32.mrf.mxu3 }
 0x1b2   : > { %v724_v8 = vadd.f32 %v1977_v63, %v723_v2 }
 0x1b3   : > { %v2346_v7 = vpack.c.b16 %v755_v28, %v754_v6 }
 0x1b4   : > { %v747_v9 = vpack.c.bf16 %v724_v8, %v724_v8 }
 0x1b5   : > { %757 = vrot.lane.b32.xlu1 %v2346_v7, %s2097_s24 }
 0x1b6   : > { %v783_v11 = vunpack.c.l.b16 %v747_v9 }
 0x1b8   : > { %v2349_v12 = vpack.c.b16 %v783_v11, %v782_v10 }
 0x1b9   : > { %v726_v13 = vpop.f32.mrf.mxu3 }
 0x1ba   : > { %785 = vrot.lane.b32.xlu2 %v2349_v12, %s2097_s24  ;;  %v727_v15 = vadd.f32 %v1977_v63, %v726_v13 }
 0x1bc   : > { %v748_v42 = vpack.c.bf16 %v727_v15, %v727_v15 }
 0x1be   : > { %v809_v18 = vunpack.c.l.b16 %v748_v42 }
 0x1c1   : > { %v728_v16 = vpop.f32.mrf.mxu3 }
 0x1c2   : > { %v729_v43 = vadd.f32 %v1977_v63, %v728_v16 }
 0x1c4   : > { %v749_v17 = vpack.c.bf16 %v729_v43, %v729_v43 }
 0x1c6   : > { %v810_v19 = vunpack.c.l.b16 %v749_v17 }
 0x1c8   : > { %v2352_v20 = vpack.c.b16 %v810_v19, %v809_v18 }
 0x1c9   : > { %v731_v21 = vpop.f32.mrf.mxu3 }
 0x1ca   : > { %812 = vrot.lane.b32.xlu0 %v2352_v20, %s2097_s24  ;;  %v732_v23 = vadd.f32 %v1977_v63, %v731_v21 }
 0x1cc   : > { %v750_v14 = vpack.c.bf16 %v732_v23, %v732_v23 }
 0x1ce   : > { %v836_v27 = vunpack.c.l.b16 %v750_v14 }
 0x1d1   : > { %v733_v24 = vpop.f32.mrf.mxu3 }
 0x1d2   : > { %v734_v25 = vadd.f32 %v1977_v63, %v733_v24 }
 0x1d4   : > { %v751_v26 = vpack.c.bf16 %v734_v25, %v734_v25 }
 0x1d6   : > { %v837_v30 = vunpack.c.l.b16 %v751_v26 }
 0x1d8   : > { %v2355_v32 = vpack.c.b16 %v837_v30, %v836_v27 }
 0x1da   : > { %839 = vrot.lane.b32.xlu2 %v2355_v32, %s2097_s24 }
 0x214   : > { %v786_v33 = vpop.permute.xlu2 %785 }
 0x215   : > { %v791_v36 = vsel %vm759_vm11, %v786_v33, 0 }
 0x227   : > { %v758_v34 = vpop.permute.xlu1 %757 }
 0x228   : > { %v764_v35 = vsel %vm759_vm11, %v758_v34, 0 }
 0x229   : > { %773 = vmatpush.bf16.xpose.msrb.mxu0 %v764_v35 }
 0x230   : > { %1904 = vmatmul.msk.bf16.vlgmr.msrb.gmra.mxu0 %vm759_vm11, %v2346_v7 }
 0x231   : > { %800 = vmatpush.bf16.xpose.msra.mxu0 %v791_v36 }
 0x234   : > { %v840_v37 = vpop.permute.xlu2 %839 }
 0x235   : > { %v845_v38 = vsel %vm759_vm11, %v840_v37, 0 }
 0x236   : > { %854 = vmatpush.bf16.xpose.msra.mxu1 %v845_v38 }
 0x23c   : > { %v813_v39 = vpop.permute.xlu0 %812 }
 0x23d   : > { %1907 = vmatmul.msk.bf16.vlgmr.msra.gmra.mxu1 %vm759_vm11, %v2355_v32  ;;  %v818_v40 = vsel %vm759_vm11, %v813_v39, 0 }
 0x23e   : > { %827 = vmatpush.bf16.xpose.msrb.mxu3 %v818_v40 }
 0x240   : > { %1905 = vmatmul.msk.bf16.vlgmr.msra.gmra.mxu0 %vm759_vm11, %v2349_v12 }
 0x245   : > { %1906 = vmatmul.msk.bf16.vlgmr.msrb.gmra.mxu3 %vm759_vm11, %v2352_v20 }
 0x2ad   : > { %v775_v44 = vpop.f32.mrf.mxu0 }
 0x2ae   : > { %v861_v47 = vmul.f32 0.25, %v775_v44 }
 0x2b0   : > { %v869_v48 = vadd.f32 %v861_v47, %v736_v45 }
 0x2b2   : > { %v877_v50 = vsel %vm759_vm11, %v869_v48, -inf }
 0x2b3   : > { %878 = vmax.xlane.f32.xlu2 %v877_v50 }
 0x2b5   : > { %v777_v31 = vpop.f32.mrf.mxu0 }
 0x2b6   : > { %v862_v51 = vmul.f32 0.25, %v777_v31 }
 0x2b8   : > { %v870_v41 = vadd.f32 %v862_v51, %v737_v46 }
 0x2ba   : > { %v880_v52 = vsel %vm759_vm11, %v870_v41, -inf  ;;  %v856_v55 = vpop.f32.mrf.mxu1 }
 0x2bb   : > { %881 = vmax.xlane.f32.xlu1 %v880_v52  ;;  %v867_v59 = vmul.f32 0.25, %v856_v55 }
 0x2bd   : > { %v802_v53 = vpop.f32.mrf.mxu0  ;;  %v875_v62 = vadd.f32 %v867_v59, %v736_v45 }
 0x2be   : > { %v863_v54 = vmul.f32 0.25, %v802_v53 }
 0x2bf   : > { %v895_v57 = vsel %vm759_vm11, %v875_v62, -inf }
 0x2c0   : > { %v871_v58 = vadd.f32 %v863_v54, %v736_v45 }
 0x2c2   : > { %v883_v49 = vsel %vm759_vm11, %v871_v58, -inf  ;;  %v858_v56 = vpop.f32.mrf.mxu1 }
 0x2c3   : > { %884 = vmax.xlane.f32.xlu1 %v883_v49  ;;  %v868_v6 = vmul.f32 0.25, %v858_v56 }
 0x2c5   : > { %v804_v60 = vpop.f32.mrf.mxu0  ;;  %v876_v9 = vadd.f32 %v868_v6, %v737_v46 }
 0x2c6   : > { %v864_v61 = vmul.f32 0.25, %v804_v60 }
 0x2c7   : > { %v898_v10 = vsel %vm759_vm11, %v876_v9, -inf }
 0x2c8   : > { %v872_v63 = vadd.f32 %v864_v61, %v737_v46  ;;  %v829_v0 = vpop.f32.mrf.mxu3 }
 0x2c9   : > { %v865_v1 = vmul.f32 0.25, %v829_v0 }
 0x2ca   : > { %v886_v3 = vsel %vm759_vm11, %v872_v63, -inf }
 0x2cb   : > { %887 = vmax.xlane.f32.xlu0 %v886_v3  ;;  %896 = vmax.xlane.f32.xlu1 %v895_v57  ;;  %v873_v4 = vadd.f32 %v865_v1, %v736_v45 }
 0x2cd   : > { %v889_v2 = vsel %vm759_vm11, %v873_v4, -inf }
 0x2d0   : > { %v831_v5 = vpop.f32.mrf.mxu3 }
 0x2d1   : > { %v866_v28 = vmul.f32 0.25, %v831_v5 }
 0x2d3   : > { %890 = vmax.xlane.f32.xlu0 %v889_v2  ;;  %v2382_v29 = vadd.f32 %v866_v28, %v737_v46 }
 0x2d5   : > { %v892_v8 = vsel %vm759_vm11, %v2382_v29, -inf }
 0x2d6   : > { %893 = vmax.xlane.f32.xlu2 %v892_v8 }
 0x2db   : > { %899 = vmax.xlane.f32.xlu0 %v898_v10 }
 0x2e4   : > { %1003 = vrot.lane.b32.xlu1 %v2349_v12, %s2098_s16 }
 0x2ee   : > { %1079 = vrot.lane.b32.xlu2 %v2346_v7, %s2099_s17 }
 0x2ef   : > { %978 = vrot.lane.b32.xlu0 %v2346_v7, %s2098_s16 }
 0x2f6   : > { %1077 = vrot.lane.b32.xlu2 %v2346_v7, %s2100_s18 }
 0x2fe   : > { %1028 = vrot.lane.b32.xlu2 %v2352_v20, %s2098_s16 }
 0x306   : > { %1053 = vrot.lane.b32.xlu2 %v2355_v32, %s2098_s16 }
 0x326   : > { %v879_v11 = vpop.xlane.xlu2 %878 }
 0x327   : > { %v901_v13 = vsub.f32 %v869_v48, %v879_v11 }
 0x329   : > { %v909_v15 = vmul.f32 1.442695, %v901_v13 }
 0x32b   : > { %2000 = vpow2.f32 %v909_v15 }
 0x32e   : > { %v882_v16 = vpop.xlane.xlu1 %881 }
 0x32f   : > { %v902_v42 = vsub.f32 %v870_v41, %v882_v16 }
 0x331   : > { %v2395_v43 = vpop.eup %2000  ;;  %v911_v17 = vmul.f32 1.442695, %v902_v42 }
 0x332   : > { %v925_v18 = vsel %vm759_vm11, %v2395_v43, 0.0 }
 0x333   : > { %2002 = vpow2.f32 %v911_v17  ;;  %926 = vadd.xlane.f32.xlu0 %v925_v18 }
 0x336   : > { %v885_v19 = vpop.xlane.xlu1 %884 }
 0x337   : > { %v903_v21 = vsub.f32 %v871_v58, %v885_v19 }
 0x339   : > { %v2399_v23 = vpop.eup %2002  ;;  %v913_v24 = vmul.f32 1.442695, %v903_v21 }
 0x33a   : > { %v928_v14 = vsel %vm759_vm11, %v2399_v23, 0.0 }
 0x33b   : > { %2004 = vpow2.f32 %v913_v24  ;;  %929 = vadd.xlane.f32.xlu2 %v928_v14 }
 0x33e   : > { %v888_v25 = vpop.xlane.xlu0 %887  ;;  %v897_v26 = vpop.xlane.xlu1 %896 }
 0x33f   : > { %v904_v27 = vsub.f32 %v872_v63, %v888_v25  ;;  %v907_v34 = vsub.f32 %v875_v62, %v897_v26 }
 0x341   : > { %v2403_v30 = vpop.eup %2004  ;;  %v915_v33 = vmul.f32 1.442695, %v904_v27  ;;  %v921_v36 = vmul.f32 1.442695, %v907_v34 }
 0x342   : > { %v931_v35 = vsel %vm759_vm11, %v2403_v30, 0.0 }
 0x343   : > { %932 = vadd.xlane.f32.xlu2 %v931_v35  ;;  %2006 = vpow2.f32 %v915_v33 }
 0x344   : > { %2008 = vpow2.f32 %v921_v36 }
 0x346   : > { %v891_v37 = vpop.xlane.xlu0 %890 }
 0x347   : > { %v905_v38 = vsub.f32 %v873_v4, %v891_v37 }
 0x349   : > { %v917_v39 = vmul.f32 1.442695, %v905_v38  ;;  %v2407_v40 = vpop.eup %2006  ;;  %v894_v44 = vpop.xlane.xlu2 %893 }
 0x34a   : > { %v934_v45 = vsel %vm759_vm11, %v2407_v40, 0.0  ;;  %v2411_v50 = vpop.eup %2008  ;;  %v906_v62 = vsub.f32 %v2382_v29, %v894_v44 }
 0x34b   : > { %2010 = vpow2.f32 %v917_v39  ;;  %935 = vadd.xlane.f32.xlu1 %v934_v45  ;;  %v943_v52 = vsel %vm759_vm11, %v2411_v50, 0.0 }
 0x34c   : > { %v919_v63 = vmul.f32 1.442695, %v906_v62 }
 0x34e   : > { %v900_v47 = vpop.xlane.xlu0 %899 }
 0x34f   : > { %v908_v48 = vsub.f32 %v876_v9, %v900_v47 }
 0x351   : > { %v2413_v31 = vpop.eup %2010  ;;  %v923_v46 = vmul.f32 1.442695, %v908_v48  ;;  %v1080_v51 = vpop.permute.xlu2 %1079 }
 0x352   : > { %v937_v41 = vsel %vm759_vm11, %v2413_v31, 0.0  ;;  %v1085_v54 = vsel %vm759_vm11, %v1080_v51, 0 }
 0x353   : > { %2012 = vpow2.f32 %v923_v46  ;;  %938 = vadd.xlane.f32.xlu0 %v937_v41  ;;  %944 = vadd.xlane.f32.xlu1 %v943_v52 }
 0x354   : > { %2014 = vpow2.f32 %v919_v63 }
 0x356   : > { %v1004_v53 = vpop.permute.xlu1 %1003 }
 0x357   : > { %1016 = vmatpush.bf16.msra.mxu3 %v1004_v53 }
 0x359   : > { %v2013_v55 = vpop.eup %2012  ;;  %v2420_v58 = vpop.permute.xlu2 %1077 }
 0x35a   : > { %v946_v59 = vsel %vm759_vm11, %v2013_v55, 0.0  ;;  %v2430_v0 = vpop.eup %2014 }
 0x35b   : > { %1094 = vmatpush.bf16.xpose.msrb.mxu3 %v1085_v54  ;;  %1103 = vrot.lane.b32.xlu2 %v2349_v12, %s2099_s17  ;;  %v940_v1 = vsel %vm759_vm11, %v2430_v0, 0.0 }
 0x35c   : > { %947 = vadd.xlane.f32.xlu0 %v946_v59 }
 0x361   : > { %v979_v49 = vpop.permute.xlu0 %978  ;;  %v1029_v60 = vpop.permute.xlu2 %1028 }
 0x362   : > { %991 = vmatpush.bf16.msra.mxu2 %v979_v49  ;;  %1041 = vmatpush.bf16.msrb.mxu1 %v1029_v60 }
 0x369   : > { %v1054_v61 = vpop.permute.xlu2 %1053 }
 0x36a   : > { %1066 = vmatpush.bf16.msrb.mxu2 %v1054_v61 }
 0x36c   : > { %1127 = vrot.lane.b32.xlu1 %v2352_v20, %s2099_s17 }
 0x370   : > { %1125 = vrot.lane.b32.xlu0 %v2352_v20, %s2100_s18 }
 0x384   : > { %941 = vadd.xlane.f32.xlu2 %v940_v1 }
 0x39c   : > { %1101 = vrot.lane.b32.xlu2 %v2349_v12, %s2100_s18 }
 0x3a4   : > { %1151 = vrot.lane.b32.xlu2 %v2355_v32, %s2099_s17 }
 0x3a6   : > { %v927_v3 = vpop.xlane.xlu0 %926 }
 0x3a7   : > { %2016 = vrcp.f32 %v927_v3 }
 0x3ac   : > { %1149 = vrot.lane.b32.xlu2 %v2355_v32, %s2100_s18  ;;  %s2721_s18 = scalar_lea.vmem %s2755_s13, %s1952_s15 }
 0x3ad   : > { %v2017_v4 = vpop.eup %2016 }
 0x3ae   : > { %v930_v57 = vpop.xlane.xlu2 %929  ;;  %v957_v56 = vmul.f32 %v2017_v4, %v2395_v43  ;;  %v738_v4 = vld [vmem:[%s2747_s5 + $0x10] sm:$0xff] }
 0x3af   : > { %2018 = vrcp.f32 %v930_v57 }
 0x3b0   : > { %v965_v2 = vpack.c.bf16 %v957_v56, %v957_v56 }
 0x3b2   : > { %v975_v8 = vunpack.c.l.b16 %v965_v2 }
 0x3b5   : > { %v2019_v5 = vpop.eup %2018 }
 0x3b6   : > { %v933_v6 = vpop.xlane.xlu2 %932  ;;  %v958_v28 = vmul.f32 %v2019_v5, %v2399_v23 }
 0x3b7   : > { %2020 = vrcp.f32 %v933_v6 }
 0x3b8   : > { %v966_v29 = vpack.c.bf16 %v958_v28, %v958_v28 }
 0x3ba   : > { %v976_v9 = vunpack.c.l.b16 %v966_v29 }
 0x3bc   : > { %v977_v10 = vpack.c.b16 %v976_v9, %v975_v8  ;;  %v739_v8 = vld [vmem:[%s2747_s5 + $0x18] sm:$0xff] }
 0x3bd   : > { %v2021_v16 = vpop.eup %2020 }
 0x3be   : > { %v1104_v11 = vpop.permute.xlu2 %1103  ;;  %1908 = vmatmul.msk.bf16.vlgmr.msra.gmra.mxu2 %vm759_vm11, %v977_v10  ;;  %v936_v15 = vpop.xlane.xlu1 %935  ;;  %v959_v42 = vmul.f32 %v2021_v16, %v2403_v30 }
 0x3bf   : > { %v1109_v13 = vsel %vm759_vm11, %v1104_v11, 0  ;;  %2022 = vrcp.f32 %v936_v15 }
 0x3c0   : > { %1118 = vmatpush.bf16.xpose.msra.mxu1 %v1109_v13  ;;  %v967_v18 = vpack.c.bf16 %v959_v42, %v959_v42 }
 0x3c2   : > { %v1000_v24 = vunpack.c.l.b16 %v967_v18 }
 0x3c5   : > { %v2023_v43 = vpop.eup %2022 }
 0x3c6   : > { %v939_v17 = vpop.xlane.xlu0 %938  ;;  %v960_v19 = vmul.f32 %v2023_v43, %v2407_v40  ;;  %v945_v21 = vpop.xlane.xlu1 %944 }
 0x3c7   : > { %2024 = vrcp.f32 %v945_v21 }
 0x3c8   : > { %v968_v23 = vpack.c.bf16 %v960_v19, %v960_v19 }
 0x3ca   : > { %v1001_v14 = vunpack.c.l.b16 %v968_v23 }
 0x3cc   : > { %v1002_v25 = vpack.c.b16 %v1001_v14, %v1000_v24 }
 0x3cd   : > { %v2025_v27 = vpop.eup %2024 }
 0x3ce   : > { %1909 = vmatmul.msk.bf16.vlgmr.msra.gmra.mxu3 %vm759_vm11, %v1002_v25  ;;  %v963_v33 = vmul.f32 %v2025_v27, %v2411_v50 }
 0x3cf   : > { %v948_v26 = vpop.xlane.xlu0 %947 }
 0x3d0   : > { %2026 = vrcp.f32 %v948_v26  ;;  %v971_v30 = vpack.c.bf16 %v963_v33, %v963_v33 }
 0x3d1   : > { %2028 = vrcp.f32 %v939_v17 }
 0x3d2   : > { %v1050_v37 = vunpack.c.l.b16 %v971_v30 }
 0x3d6   : > { %v2027_v34 = vpop.eup %2026 }
 0x3d7   : > { %v964_v35 = vmul.f32 %v2027_v34, %v2013_v55  ;;  %v2029_v48 = vpop.eup %2028 }
 0x3d8   : > { %v961_v50 = vmul.f32 %v2029_v48, %v2413_v31 }
 0x3d9   : > { %v972_v36 = vpack.c.bf16 %v964_v35, %v964_v35 }
 0x3da   : > { %v969_v51 = vpack.c.bf16 %v961_v50, %v961_v50 }
 0x3db   : > { %v1051_v38 = vunpack.c.l.b16 %v972_v36 }
 0x3dc   : > { %v1025_v54 = vunpack.c.l.b16 %v969_v51 }
 0x3dd   : > { %v1052_v39 = vpack.c.b16 %v1051_v38, %v1050_v37 }
 0x3de   : > { %1912 = vmatmul.msk.bf16.vlgmr.msrb.gmra.mxu3 %vm759_vm11, %v2420_v58  ;;  %v1128_v40 = vpop.permute.xlu1 %1127 }
 0x3df   : > { %1911 = vmatmul.msk.bf16.vlgmr.msrb.gmra.mxu2 %vm759_vm11, %v1052_v39  ;;  %v1133_v44 = vsel %vm759_vm11, %v1128_v40, 0 }
 0x3e0   : > { %1142 = vmatpush.bf16.xpose.msra.mxu2 %v1133_v44 }
 0x3e2   : > { %v1126_v45 = vpop.permute.xlu0 %1125 }
 0x3ef   : > { %1914 = vmatmul.msk.bf16.vlgmr.msra.gmra.mxu2 %vm759_vm11, %v1126_v45 }
 0x3f7   : > { %v942_v47 = vpop.xlane.xlu2 %941 }
 0x3f8   : > { %2030 = vrcp.f32 %v942_v47 }
 0x3fe   : > { %v2031_v46 = vpop.eup %2030 }
 0x3ff   : > { %v962_v41 = vmul.f32 %v2031_v46, %v2430_v0  ;;  %v1102_v52 = vpop.permute.xlu2 %1101 }
 0x401   : > { %v970_v53 = vpack.c.bf16 %v962_v41, %v962_v41 }
 0x403   : > { %v1026_v55 = vunpack.c.l.b16 %v970_v53 }
 0x405   : > { %v1027_v58 = vpack.c.b16 %v1026_v55, %v1025_v54 }
 0x407   : > { %v1152_v59 = vpop.permute.xlu2 %1151  ;;  %1910 = vmatmul.msk.bf16.vlgmr.msrb.gmra.mxu1 %vm759_vm11, %v1027_v58 }
 0x408   : > { %v1157_v49 = vsel %vm759_vm11, %v1152_v59, 0 }
 0x409   : > { %1166 = vmatpush.bf16.xpose.msra.mxu3 %v1157_v49 }
 0x40f   : > { %v1150_v60 = vpop.permute.xlu2 %1149 }
 0x410   : > { %1915 = vmatmul.msk.bf16.vlgmr.msra.gmra.mxu3 %vm759_vm11, %v1150_v60 }
 0x417   : > { %1913 = vmatmul.msk.bf16.vlgmr.msra.gmra.mxu1 %vm759_vm11, %v1102_v52 }
 0x441   : > { %v2459_v31 = vpop.f32.mrf.mxu2 }
 0x449   : > { %v2461_v61 = vpop.f32.mrf.mxu2 }
 0x44a   : > { %v1073_v62 = vpack.c.bf16 %v2461_v61, %v2459_v31 }
 0x451   : > { %v2465_v63 = vpop.f32.mrf.mxu3 }
 0x459   : > { %v2467_v0 = vpop.f32.mrf.mxu3 }
 0x45a   : > { %v1074_v1 = vpack.c.bf16 %v2467_v0, %v2465_v63 }
 0x461   : > { %v1096_v57 = vpop.f32.mrf.mxu3 }
 0x462   : > { %v2471_v3 = vpop.f32.mrf.mxu2  ;;  %v1173_v56 = vmul.f32 0.25, %v1096_v57 }
 0x464   : > { %v1181_v5 = vadd.f32 %v1173_v56, %v738_v4 }
 0x466   : > { %v1189_v6 = vsel %vm759_vm11, %v1181_v5, -inf }
 0x467   : > { %1190 = vmax.xlane.f32.xlu1 %v1189_v6 }
 0x469   : > { %v1098_v29 = vpop.f32.mrf.mxu3 }
 0x46a   : > { %v2477_v28 = vpop.f32.mrf.mxu2  ;;  %v1174_v9 = vmul.f32 0.25, %v1098_v29 }
 0x46b   : > { %v1076_v2 = vpack.c.bf16 %v2477_v28, %v2471_v3 }
 0x46c   : > { %v1182_v10 = vadd.f32 %v1174_v9, %v739_v8 }
 0x46e   : > { %v1192_v11 = vsel %vm759_vm11, %v1182_v10, -inf }
 0x46f   : > { %1193 = vmax.xlane.f32.xlu0 %v1192_v11 }
 0x472   : > { %v1144_v15 = vpop.f32.mrf.mxu2 }
 0x473   : > { %v1177_v30 = vmul.f32 0.25, %v1144_v15 }
 0x475   : > { %v1185_v37 = vadd.f32 %v1177_v30, %v738_v4 }
 0x477   : > { %v1201_v40 = vsel %vm759_vm11, %v1185_v37, -inf }
 0x47a   : > { %v1146_v18 = vpop.f32.mrf.mxu2 }
 0x47b   : > { %v1178_v21 = vmul.f32 0.25, %v1146_v18 }
 0x47d   : > { %v1186_v25 = vadd.f32 %v1178_v21, %v739_v8 }
 0x47f   : > { %v1204_v34 = vsel %vm759_vm11, %v1186_v25, -inf }
 0x483   : > { %1290 = vrot.lane.b32.xlu0 %v2346_v7, %s2101_s23 }
 0x484   : > { %v2487_v13 = vpop.f32.mrf.mxu1 }
 0x48c   : > { %v2489_v16 = vpop.f32.mrf.mxu1 }
 0x48d   : > { %v1075_v42 = vpack.c.bf16 %v2489_v16, %v2487_v13 }
 0x493   : > { %v1168_v7 = vpop.f32.mrf.mxu3 }
 0x494   : > { %v1120_v43 = vpop.f32.mrf.mxu1  ;;  %v1179_v27 = vmul.f32 0.25, %v1168_v7 }
 0x495   : > { %v1175_v17 = vmul.f32 0.25, %v1120_v43 }
 0x496   : > { %v1187_v35 = vadd.f32 %v1179_v27, %v738_v4 }
 0x497   : > { %v1183_v19 = vadd.f32 %v1175_v17, %v738_v4 }
 0x498   : > { %v1207_v36 = vsel %vm759_vm11, %v1187_v35, -inf }
 0x499   : > { %v1195_v23 = vsel %vm759_vm11, %v1183_v19, -inf }
 0x49a   : > { %1196 = vmax.xlane.f32.xlu2 %v1195_v23 }
 0x49b   : > { %v1170_v38 = vpop.f32.mrf.mxu3 }
 0x49c   : > { %v1122_v24 = vpop.f32.mrf.mxu1  ;;  %v1180_v39 = vmul.f32 0.25, %v1170_v38 }
 0x49d   : > { %v1176_v14 = vmul.f32 0.25, %v1122_v24 }
 0x49e   : > { %v1188_v44 = vadd.f32 %v1180_v39, %v739_v8 }
 0x49f   : > { %v1184_v26 = vadd.f32 %v1176_v14, %v739_v8 }
 0x4a0   : > { %v1210_v45 = vsel %vm759_vm11, %v1188_v44, -inf }
 0x4a1   : > { %v1198_v33 = vsel %vm759_vm11, %v1184_v26, -inf }
 0x4a2   : > { %1199 = vmax.xlane.f32.xlu1 %v1198_v33  ;;  %1205 = vmax.xlane.f32.xlu2 %v1204_v34 }
 0x4aa   : > { %1208 = vmax.xlane.f32.xlu1 %v1207_v36 }
 0x4ad   : > { %1202 = vmax.xlane.f32.xlu0 %v1201_v40 }
 0x4b5   : > { %1211 = vmax.xlane.f32.xlu0 %v1210_v45 }
 0x4c9   : > { %1340 = vrot.lane.b32.xlu0 %v2352_v20, %s2101_s23 }
 0x4da   : > { %v1191_v47 = vpop.xlane.xlu1 %1190 }
 0x4db   : > { %v1213_v48 = vsub.f32 %v1181_v5, %v1191_v47 }
 0x4dd   : > { %v1221_v50 = vmul.f32 1.442695, %v1213_v48 }
 0x4df   : > { %2032 = vpow2.f32 %v1221_v50 }
 0x4e2   : > { %v1194_v46 = vpop.xlane.xlu0 %1193 }
 0x4e3   : > { %v1214_v51 = vsub.f32 %v1182_v10, %v1194_v46 }
 0x4e5   : > { %v2033_v41 = vpop.eup %2032  ;;  %v1223_v52 = vmul.f32 1.442695, %v1214_v51 }
 0x4e6   : > { %v1237_v53 = vsel %vm759_vm11, %v2033_v41, 0.0 }
 0x4e7   : > { %2034 = vpow2.f32 %v1223_v52  ;;  %1238 = vadd.xlane.f32.xlu2 %v1237_v53 }
 0x4ed   : > { %v2035_v54 = vpop.eup %2034 }
 0x4ee   : > { %v1240_v55 = vsel %vm759_vm11, %v2035_v54, 0.0 }
 0x4ef   : > { %1241 = vadd.xlane.f32.xlu1 %v1240_v55 }
 0x4f5   : > { %v1291_v58 = vpop.permute.xlu0 %1290 }
 0x4f6   : > { %1303 = vmatpush.bf16.msrb.mxu0 %v1291_v58 }
 0x50d   : > { %v1197_v59 = vpop.xlane.xlu2 %1196 }
 0x50e   : > { %v1215_v20 = vsub.f32 %v1183_v19, %v1197_v59 }
 0x510   : > { %v1225_v49 = vmul.f32 1.442695, %v1215_v20 }
 0x512   : > { %2036 = vpow2.f32 %v1225_v49 }
 0x515   : > { %v1200_v60 = vpop.xlane.xlu1 %1199  ;;  %v1206_v6 = vpop.xlane.xlu2 %1205 }
 0x516   : > { %v1216_v57 = vsub.f32 %v1184_v26, %v1200_v60  ;;  %v1218_v10 = vsub.f32 %v1186_v25, %v1206_v6  ;;  %v1955_v60 = vld [vmem:[%s2748_s6] sm:$0xff] }
 0x518   : > { %v2037_v4 = vpop.eup %2036  ;;  %v1227_v56 = vmul.f32 1.442695, %v1216_v57  ;;  %v1231_v18 = vmul.f32 1.442695, %v1218_v10 }
 0x519   : > { %v1243_v5 = vsel %vm759_vm11, %v2037_v4, 0.0 }
 0x51a   : > { %2038 = vpow2.f32 %v1227_v56  ;;  %1244 = vadd.xlane.f32.xlu2 %v1243_v5 }
 0x51d   : > { %v1209_v29 = vpop.xlane.xlu1 %1208 }
 0x51e   : > { %v1219_v8 = vsub.f32 %v1187_v35, %v1209_v29 }
 0x520   : > { %v2039_v9 = vpop.eup %2038  ;;  %v1233_v11 = vmul.f32 1.442695, %v1219_v8  ;;  %v1203_v15 = vpop.xlane.xlu0 %1202 }
 0x521   : > { %v1246_v43 = vsel %vm759_vm11, %v2039_v9, 0.0  ;;  %v1217_v17 = vsub.f32 %v1185_v37, %v1203_v15 }
 0x522   : > { %2040 = vpow2.f32 %v1233_v11  ;;  %1247 = vadd.xlane.f32.xlu1 %v1246_v43 }
 0x523   : > { %v1229_v19 = vmul.f32 1.442695, %v1217_v17 }
 0x525   : > { %2042 = vpow2.f32 %v1229_v19 }
 0x526   : > { %2044 = vpow2.f32 %v1231_v18 }
 0x528   : > { %v2505_v21 = vpop.eup %2040  ;;  %v1212_v23 = vpop.xlane.xlu0 %1211 }
 0x529   : > { %v1255_v24 = vsel %vm759_vm11, %v2505_v21, 0.0  ;;  %v1220_v14 = vsub.f32 %v1188_v44, %v1212_v23 }
 0x52a   : > { %1256 = vadd.xlane.f32.xlu1 %v1255_v24 }
 0x52b   : > { %v2043_v25 = vpop.eup %2042  ;;  %v1235_v7 = vmul.f32 1.442695, %v1220_v14 }
 0x52c   : > { %v1249_v26 = vsel %vm759_vm11, %v2043_v25, 0.0  ;;  %v2045_v27 = vpop.eup %2044 }
 0x52d   : > { %2046 = vpow2.f32 %v1235_v7  ;;  %1250 = vadd.xlane.f32.xlu2 %v1249_v26  ;;  %v1252_v33 = vsel %vm759_vm11, %v2045_v27, 0.0 }
 0x532   : > { %1253 = vadd.xlane.f32.xlu1 %v1252_v33 }
 0x533   : > { %v2047_v34 = vpop.eup %2046 }
 0x534   : > { %v1258_v30 = vsel %vm759_vm11, %v2047_v34, 0.0 }
 0x535   : > { %1259 = vadd.xlane.f32.xlu0 %v1258_v30 }
 0x53b   : > { %v1341_v35 = vpop.permute.xlu0 %1340 }
 0x53c   : > { %1353 = vmatpush.bf16.msrb.mxu2 %v1341_v35 }
 0x545   : > { %1315 = vrot.lane.b32.xlu2 %v2349_v12, %s2101_s23 }
 0x54b   : > { %1365 = vrot.lane.b32.xlu1 %v2355_v32, %s2101_s23 }
 0x55a   : > { %v1239_v36 = vpop.xlane.xlu2 %1238 }
 0x55b   : > { %2048 = vrcp.f32 %v1239_v36  ;;  %v2550_v36 = vld [vmem:[%s2749_s7] ss:$0 sm:$0xff] }
 0x561   : > { %v2049_v38 = vpop.eup %2048 }
 0x562   : > { %v1242_v37 = vpop.xlane.xlu1 %1241  ;;  %v1269_v39 = vmul.f32 %v2049_v38, %v2033_v41 }
 0x563   : > { %2050 = vrcp.f32 %v1242_v37  ;;  %v2080_v37 = vld [vmem:[%s2188_s30] sm:$0xff] }
 0x564   : > { %v1277_v44 = vpack.c.bf16 %v1269_v39, %v1269_v39 }
 0x566   : > { %v1287_v48 = vunpack.c.l.b16 %v1277_v44 }
 0x569   : > { %v2051_v40 = vpop.eup %2050 }
 0x56a   : > { %v1270_v45 = vmul.f32 %v2051_v40, %v2035_v54 }
 0x56c   : > { %v1278_v47 = vpack.c.bf16 %v1270_v45, %v1270_v45 }
 0x56e   : > { %v1288_v50 = vunpack.c.l.b16 %v1278_v47 }
 0x570   : > { %v1289_v46 = vpack.c.b16 %v1288_v50, %v1287_v48  ;;  %v2081_v48 = vld [vmem:[%s2188_s30 + $0x8] sm:$0xff] }
 0x572   : > { %1916 = vmatmul.msk.bf16.vlgmr.msrb.gmra.mxu0 %vm759_vm11, %v1289_v46 }
 0x58d   : > { %v1245_v51 = vpop.xlane.xlu2 %1244 }
 0x595   : > { %v1248_v12 = vpop.xlane.xlu1 %1247 }
 0x596   : > { %2052 = vrcp.f32 %v1248_v12 }
 0x597   : > { %2054 = vrcp.f32 %v1245_v51 }
 0x59c   : > { %v2053_v32 = vpop.eup %2052 }
 0x59d   : > { %v1257_v52 = vpop.xlane.xlu1 %1256  ;;  %v2055_v53 = vpop.eup %2054  ;;  %v1272_v55 = vmul.f32 %v2053_v32, %v2039_v9 }
 0x59e   : > { %v1271_v58 = vmul.f32 %v2055_v53, %v2037_v4 }
 0x59f   : > { %v1280_v41 = vpack.c.bf16 %v1272_v55, %v1272_v55  ;;  %v2082_v55 = vld [vmem:[%s2188_s30 + $0x10] sm:$0xff] }
 0x5a0   : > { %v1251_v59 = vpop.xlane.xlu2 %1250  ;;  %v1279_v20 = vpack.c.bf16 %v1271_v58, %v1271_v58 }
 0x5a1   : > { %2056 = vrcp.f32 %v1251_v59  ;;  %v1313_v49 = vunpack.c.l.b16 %v1280_v41 }
 0x5a2   : > { %v1312_v56 = vunpack.c.l.b16 %v1279_v20 }
 0x5a4   : > { %v1314_v8 = vpack.c.b16 %v1313_v49, %v1312_v56 }
 0x5a5   : > { %v1254_v54 = vpop.xlane.xlu1 %1253 }
 0x5a6   : > { %2058 = vrcp.f32 %v1254_v54 }
 0x5a7   : > { %v2057_v57 = vpop.eup %2056 }
 0x5a8   : > { %v1273_v5 = vmul.f32 %v2057_v57, %v2043_v25  ;;  %v1316_v6 = vpop.permute.xlu2 %1315  ;;  %v1260_v29 = vpop.xlane.xlu0 %1259 }
 0x5a9   : > { %2060 = vrcp.f32 %v1260_v29  ;;  %1328 = vmatpush.bf16.msrb.mxu1 %v1316_v6 }
 0x5aa   : > { %2062 = vrcp.f32 %v1257_v52  ;;  %v1281_v9 = vpack.c.bf16 %v1273_v5, %v1273_v5 }
 0x5ac   : > { %v2059_v4 = vpop.eup %2058  ;;  %1917 = vmatmul.msk.bf16.vlgmr.msrb.gmra.mxu1 %vm759_vm11, %v1314_v8  ;;  %v1337_v43 = vunpack.c.l.b16 %v1281_v9  ;;  %v2084_v8 = vld [vmem:[%s2188_s30 + $0x20] sm:$0xff] }
 0x5ad   : > { %1461 = vmatpush.bf16.msra.mxu1 %v1955_v60  ;;  %v1274_v10 = vmul.f32 %v2059_v4, %v2045_v27  ;;  %v2083_v60 = vld [vmem:[%s2188_s30 + $0x18] sm:$0xff] }
 0x5af   : > { %v1282_v11 = vpack.c.bf16 %v1274_v10, %v1274_v10  ;;  %v2061_v15 = vpop.eup %2060 }
 0x5b0   : > { %v2063_v18 = vpop.eup %2062  ;;  %v1276_v23 = vmul.f32 %v2061_v15, %v2047_v34 }
 0x5b1   : > { %v1338_v17 = vunpack.c.l.b16 %v1282_v11  ;;  %v1275_v24 = vmul.f32 %v2063_v18, %v2505_v21  ;;  %v1956_v21 = vld [vmem:[%s2748_s6 + $0x8] sm:$0xff] }
 0x5b2   : > { %v1284_v14 = vpack.c.bf16 %v1276_v23, %v1276_v23  ;;  %1414 = vmatpush.bf16.msra.mxu0 %v1956_v21 }
 0x5b3   : > { %v1339_v19 = vpack.c.b16 %v1338_v17, %v1337_v43  ;;  %v1283_v25 = vpack.c.bf16 %v1275_v24, %v1275_v24  ;;  %v2085_v17 = vld [vmem:[%s2188_s30 + $0x28] sm:$0xff] }
 0x5b4   : > { %v1363_v7 = vunpack.c.l.b16 %v1284_v14 }
 0x5b5   : > { %1918 = vmatmul.msk.bf16.vlgmr.msrb.gmra.mxu2 %vm759_vm11, %v1339_v19  ;;  %v1362_v26 = vunpack.c.l.b16 %v1283_v25 }
 0x5b7   : > { %v1364_v33 = vpack.c.b16 %v1363_v7, %v1362_v26  ;;  %v2086_v7 = vld [vmem:[%s2188_s30 + $0x30] sm:$0xff] }
 0x5bc   : > { %1932 = vmatmul.msk.bf16.vlgmr.msra.gmra.mxu1 %vm759_vm11, %v1073_v62 }
 0x5bd   : > { %v1366_v27 = vpop.permute.xlu1 %1365 }
 0x5be   : > { %1378 = vmatpush.bf16.msrb.mxu3 %v1366_v27 }
 0x5c1   : > { %1919 = vmatmul.msk.bf16.vlgmr.msrb.gmra.mxu3 %vm759_vm11, %v1364_v33 }
 0x5cc   : > { %1933 = vmatmul.msk.bf16.gmra.mxu1 %vm759_vm11, %v1074_v1 }
 0x5dc   : > { %1934 = vmatmul.msk.bf16.gmra.mxu1 %vm759_vm11, %v1075_v42 }
 0x5ec   : > { %1935 = vmatmul.msk.bf16.gmra.mxu1 %vm759_vm11, %v1076_v2 }
 0x5ef   : > { %v1305_v31 = vpop.f32.mrf.mxu0 }
 0x5f7   : > { %v1307_v61 = vpop.f32.mrf.mxu0 }
 0x5f8   : > { %v1385_v62 = vpack.c.bf16 %v1307_v61, %v1305_v31  ;;  %v2087_v61 = vld [vmem:[%s2188_s30 + $0x38] sm:$0xff] }
 0x5fa   : > { %1924 = vmatmul.msk.bf16.vlgmr.msra.gmra.mxu0 %vm759_vm11, %v1385_v62 }
 0x629   : > { %v1330_v63 = vpop.f32.mrf.mxu1 }
 0x631   : > { %v1332_v0 = vpop.f32.mrf.mxu1 }
 0x632   : > { %v1386_v1 = vpack.c.bf16 %v1332_v0, %v1330_v63 }
 0x634   : > { %1925 = vmatmul.msk.bf16.gmra.mxu0 %vm759_vm11, %v1386_v1 }
 0x638   : > { %v1355_v13 = vpop.f32.mrf.mxu2 }
 0x639   : > { %v1463_v34 = vpop.f32.mrf.mxu1 }
 0x640   : > { %v1357_v16 = vpop.f32.mrf.mxu2 }
 0x641   : > { %v1387_v42 = vpack.c.bf16 %v1357_v16, %v1355_v13  ;;  %v1465_v44 = vpop.f32.mrf.mxu1 }
 0x644   : > { %1926 = vmatmul.msk.bf16.gmra.mxu0 %vm759_vm11, %v1387_v42  ;;  %v1380_v3 = vpop.f32.mrf.mxu3 }
 0x649   : > { %v1468_v12 = vpop.f32.mrf.mxu1 }
 0x64c   : > { %v1382_v28 = vpop.f32.mrf.mxu3 }
 0x64d   : > { %v1388_v2 = vpack.c.bf16 %v1382_v28, %v1380_v3 }
 0x651   : > { %v1470_v32 = vpop.f32.mrf.mxu1 }
 0x654   : > { %1927 = vmatmul.msk.bf16.gmra.mxu0 %vm759_vm11, %v1388_v2 }
 0x659   : > { %v1473_v49 = vpop.f32.mrf.mxu1 }
 0x661   : > { %v1475_v9 = vpop.f32.mrf.mxu1 }
 0x669   : > { %v1478_v23 = vpop.f32.mrf.mxu1 }
 0x671   : > { %v1480_v33 = vpop.f32.mrf.mxu1 }
 0x677   : > { %v1416_v30 = vpop.f32.mrf.mxu0 }
 0x678   : > { %v1464_v35 = vadd.f32 %v1463_v34, %v1416_v30 }
 0x67a   : > { %v1483_v38 = vadd.f32 %v2080_v37, %v1464_v35 }
 0x67c   : > { %v2561_v39 = vadd.f32 %v2550_v36, %v1483_v38 }
 0x67e   : > { %1503 = vst.msk [vmem:[%s2558_s19] sm:$0xff] %vm465_vm0, %v2561_v39  ;;  %v1513_v40 = vsel %vm465_vm0, %v2561_v39, 0.0 }
 0x67f   : > { %v1418_v45 = vpop.f32.mrf.mxu0  ;;  %1514 = vadd.xlane.f32.xlu2 %v1513_v40 }
 0x680   : > { %v1466_v47 = vadd.f32 %v1465_v44, %v1418_v45 }
 0x682   : > { %v1484_v50 = vadd.f32 %v2081_v48, %v1466_v47 }
 0x684   : > { %v2570_v46 = vadd.f32 %v2550_v36, %v1484_v50 }
 0x686   : > { %1504 = vst.msk [vmem:[%s2558_s19 + $0x8] sm:$0xff] %vm465_vm0, %v2570_v46  ;;  %v1516_v51 = vsel %vm465_vm0, %v2570_v46, 0.0 }
 0x687   : > { %1517 = vadd.xlane.f32.xlu1 %v1516_v51 }
 0x6b1   : > { %v1421_v52 = vpop.f32.mrf.mxu0 }
 0x6b2   : > { %v1469_v53 = vadd.f32 %v1468_v12, %v1421_v52 }
 0x6b4   : > { %v1485_v58 = vadd.f32 %v2082_v55, %v1469_v53 }
 0x6b6   : > { %v1497_v59 = vadd.f32 %v2550_v36, %v1485_v58 }
 0x6b8   : > { %1505 = vst.msk [vmem:[%s2558_s19 + $0x10] sm:$0xff] %vm465_vm0, %v1497_v59  ;;  %v1519_v41 = vsel %vm465_vm0, %v1497_v59, 0.0 }
 0x6b9   : > { %v1423_v20 = vpop.f32.mrf.mxu0  ;;  %1520 = vadd.xlane.f32.xlu0 %v1519_v41 }
 0x6ba   : > { %v1471_v54 = vadd.f32 %v1470_v32, %v1423_v20 }
 0x6bc   : > { %v1486_v57 = vadd.f32 %v2083_v60, %v1471_v54 }
 0x6be   : > { %v1498_v56 = vadd.f32 %v2550_v36, %v1486_v57 }
 0x6c0   : > { %1506 = vst.msk [vmem:[%s2558_s19 + $0x18] sm:$0xff] %vm465_vm0, %v1498_v56  ;;  %v1522_v5 = vsel %vm465_vm0, %v1498_v56, 0.0 }
 0x6c1   : > { %1523 = vadd.xlane.f32.xlu0 %v1522_v5  ;;  %v1426_v6 = vpop.f32.mrf.mxu0  ;;  %v1958_v5 = vld [vmem:[%s2752_s10 + $0x8] sm:$0xff] }
 0x6c2   : > { %v1474_v29 = vadd.f32 %v1473_v49, %v1426_v6  ;;  %1753 = vmatpush.bf16.msra.mxu2 %v1958_v5 }
 0x6c4   : > { %v1487_v4 = vadd.f32 %v2084_v8, %v1474_v29 }
 0x6c6   : > { %v1499_v10 = vadd.f32 %v2550_v36, %v1487_v4  ;;  %v1957_v4 = vld [vmem:[%s2752_s10] sm:$0xff] }
 0x6c7   : > { %1754 = vmatpush.bf16.msra.mxu2 %v1957_v4 }
 0x6c8   : > { %1507 = vst.msk [vmem:[%s2558_s19 + $0x20] sm:$0xff] %vm465_vm0, %v1499_v10  ;;  %v1525_v11 = vsel %vm465_vm0, %v1499_v10, 0.0 }
 0x6c9   : > { %1526 = vadd.xlane.f32.xlu2 %v1525_v11  ;;  %v1428_v15 = vpop.f32.mrf.mxu0 }
 0x6ca   : > { %v1476_v43 = vadd.f32 %v1475_v9, %v1428_v15 }
 0x6cc   : > { %v1488_v18 = vadd.f32 %v2085_v17, %v1476_v43 }
 0x6ce   : > { %v1500_v19 = vadd.f32 %v2550_v36, %v1488_v18 }
 0x6d0   : > { %1508 = vst.msk [vmem:[%s2558_s19 + $0x28] sm:$0xff] %vm465_vm0, %v1500_v19  ;;  %v1528_v24 = vsel %vm465_vm0, %v1500_v19, 0.0 }
 0x6d1   : > { %1529 = vadd.xlane.f32.xlu0 %v1528_v24  ;;  %v1431_v14 = vpop.f32.mrf.mxu0 }
 0x6d2   : > { %v1479_v25 = vadd.f32 %v1478_v23, %v1431_v14 }
 0x6d4   : > { %v1489_v26 = vadd.f32 %v2086_v7, %v1479_v25 }
 0x6d6   : > { %v2599_v27 = vadd.f32 %v2550_v36, %v1489_v26 }
 0x6d8   : > { %1509 = vst.msk [vmem:[%s2558_s19 + $0x30] sm:$0xff] %vm465_vm0, %v2599_v27 }
 0x6d9   : > { %v1433_v21 = vpop.f32.mrf.mxu0 }
 0x6da   : > { %v1481_v31 = vadd.f32 %v1480_v33, %v1433_v21 }
 0x6dc   : > { %v1490_v62 = vadd.f32 %v2087_v61, %v1481_v31 }
 0x6de   : > { %v1502_v63 = vadd.f32 %v2550_v36, %v1490_v62  ;;  %v1531_v36 = vsel %vm465_vm0, %v2599_v27, 0.0 }
 0x6e0   : > { %1510 = vst.msk [vmem:[%s2558_s19 + $0x38] sm:$0xff] %vm465_vm0, %v1502_v63  ;;  %v1534_v0 = vsel %vm465_vm0, %v1502_v63, 0.0 }
 0x6e1   : > { %1535 = vadd.xlane.f32.xlu1 %v1534_v0 }
 0x6f2   : > { %v1515_v1 = vpop.xlane.xlu2 %1514 }
 0x6f3   : > { %v1537_v13 = vmul.f32 %v1515_v1, %v2206_v22 }
 0x6f5   : > { %v2611_v16 = vsub.f32 %v2561_v39, %v1537_v13 }
 0x6f7   : > { %v1553_v42 = vmul.f32 %v2611_v16, %v2611_v16 }
 0x6f9   : > { %v1561_v3 = vsel %vm465_vm0, %v1553_v42, 0.0  ;;  %v2679_v42 = vld [vmem:[%s2751_s9] ss:$0 sm:$0xff] }
 0x6fa   : > { %v1518_v28 = vpop.xlane.xlu1 %1517  ;;  %1562 = vadd.xlane.f32.xlu2 %v1561_v3 }
 0x6fb   : > { %v1538_v2 = vmul.f32 %v1518_v28, %v2206_v22 }
 0x6fd   : > { %v2618_v34 = vsub.f32 %v2570_v46, %v1538_v2 }
 0x6ff   : > { %v1554_v30 = vmul.f32 %v2618_v34, %v2618_v34 }
 0x701   : > { %v1564_v35 = vsel %vm465_vm0, %v1554_v30, 0.0 }
 0x702   : > { %1565 = vadd.xlane.f32.xlu0 %v1564_v35  ;;  %1532 = vadd.xlane.f32.xlu2 %v1531_v36 }
 0x72c   : > { %v1521_v37 = vpop.xlane.xlu0 %1520 }
 0x72d   : > { %v1539_v38 = vmul.f32 %v1521_v37, %v2206_v22 }
 0x72f   : > { %v2626_v39 = vsub.f32 %v1497_v59, %v1539_v38 }
 0x731   : > { %v1555_v40 = vmul.f32 %v2626_v39, %v2626_v39 }
 0x733   : > { %v1567_v44 = vsel %vm465_vm0, %v1555_v40, 0.0 }
 0x734   : > { %1568 = vadd.xlane.f32.xlu0 %v1567_v44  ;;  %v1524_v45 = vpop.xlane.xlu0 %1523 }
 0x735   : > { %v1540_v47 = vmul.f32 %v1524_v45, %v2206_v22 }
 0x737   : > { %v2632_v48 = vsub.f32 %v1498_v56, %v1540_v47 }
 0x739   : > { %v1556_v50 = vmul.f32 %v2632_v48, %v2632_v48 }
 0x73b   : > { %v1570_v46 = vsel %vm465_vm0, %v1556_v50, 0.0 }
 0x73c   : > { %v1527_v51 = vpop.xlane.xlu2 %1526  ;;  %1571 = vadd.xlane.f32.xlu2 %v1570_v46 }
 0x73d   : > { %v1541_v12 = vmul.f32 %v1527_v51, %v2206_v22 }
 0x73f   : > { %v2638_v32 = vsub.f32 %v1499_v10, %v1541_v12 }
 0x741   : > { %v1557_v52 = vmul.f32 %v2638_v32, %v2638_v32 }
 0x743   : > { %v1573_v53 = vsel %vm465_vm0, %v1557_v52, 0.0 }
 0x744   : > { %1574 = vadd.xlane.f32.xlu1 %v1573_v53  ;;  %v1530_v55 = vpop.xlane.xlu0 %1529 }
 0x745   : > { %v1542_v58 = vmul.f32 %v1530_v55, %v2206_v22 }
 0x747   : > { %v2644_v59 = vsub.f32 %v1500_v19, %v1542_v58 }
 0x749   : > { %v1558_v41 = vmul.f32 %v2644_v59, %v2644_v59 }
 0x74b   : > { %v1576_v20 = vsel %vm465_vm0, %v1558_v41, 0.0 }
 0x74c   : > { %1577 = vadd.xlane.f32.xlu0 %v1576_v20 }
 0x754   : > { %v1536_v54 = vpop.xlane.xlu1 %1535 }
 0x755   : > { %v1544_v49 = vmul.f32 %v1536_v54, %v2206_v22 }
 0x757   : > { %v2650_v60 = vsub.f32 %v1502_v63, %v1544_v49  ;;  %v2673_v63 = vld [vmem:[%s2750_s8] ss:$0 sm:$0xff] }
 0x759   : > { %v1560_v57 = vmul.f32 %v2650_v60, %v2650_v60 }
 0x75b   : > { %v1582_v56 = vsel %vm465_vm0, %v1560_v57, 0.0 }
 0x75c   : > { %1583 = vadd.xlane.f32.xlu1 %v1582_v56 }
 0x76d   : > { %v1563_v6 = vpop.xlane.xlu2 %1562 }
 0x76e   : > { %v1585_v29 = vmul.f32 %v1563_v6, %v2206_v22 }
 0x770   : > { %v1593_v8 = vadd.f32 1e-05, %v1585_v29 }
 0x772   : > { %2064 = vrsqrt.f32 %v1593_v8  ;;  %vm1607_vm13 = vweird.f32 %v1593_v8 }
 0x775   : > { %v1533_v9 = vpop.xlane.xlu2 %1532  ;;  %v1566_v10 = vpop.xlane.xlu0 %1565 }
 0x776   : > { %v1543_v11 = vmul.f32 %v1533_v9, %v2206_v22  ;;  %v1586_v15 = vmul.f32 %v1566_v10, %v2206_v22 }
 0x778   : > { %v2065_v43 = vpop.eup %2064  ;;  %v2665_v17 = vsub.f32 %v2599_v27, %v1543_v11  ;;  %v1594_v18 = vadd.f32 1e-05, %v1586_v15 }
 0x779   : > { %v1602_v19 = vmul.f32 %v2065_v43, %v1593_v8  ;;  %vm1608_vm12 = vweird.f32 %v2065_v43 }
 0x77a   : > { %2066 = vrsqrt.f32 %v1594_v18  ;;  %v1559_v23 = vmul.f32 %v2665_v17, %v2665_v17  ;;  %vm1609_vm14 = vmor %vm1607_vm13, %vm1608_vm12  ;;  %vm1617_vm1 = vweird.f32 %v1594_v18 }
 0x77b   : > { %v1603_v24 = vmul.f32 %v2065_v43, %v1602_v19 }
 0x77c   : > { %v1579_v14 = vsel %vm465_vm0, %v1559_v23, 0.0 }
 0x77d   : > { %v1604_v25 = vmul.f32 0.5, %v1603_v24  ;;  %1580 = vadd.xlane.f32.xlu2 %v1579_v14 }
 0x77f   : > { %v1605_v7 = vsub.f32 1.5, %v1604_v25 }
 0x780   : > { %v2067_v26 = vpop.eup %2066 }
 0x781   : > { %v1606_v33 = vmul.f32 %v2065_v43, %v1605_v7  ;;  %v1612_v21 = vmul.f32 %v2067_v26, %v1594_v18  ;;  %vm1618_vm15 = vweird.f32 %v2067_v26 }
 0x782   : > { %vm1619_vm2 = vmor %vm1617_vm1, %vm1618_vm15 }
 0x783   : > { %v1613_v31 = vmul.f32 %v2067_v26, %v1612_v21  ;;  %v1610_v27 = vsel %vm1609_vm14, %v2065_v43, %v1606_v33 }
 0x784   : > { %v1681_v0 = vmul.f32 %v1610_v27, %v2611_v16 }
 0x785   : > { %v1614_v61 = vmul.f32 0.5, %v1613_v31 }
 0x786   : > { %v1692_v3 = vmul.f32 %v2673_v63, %v1681_v0 }
 0x787   : > { %v1615_v62 = vsub.f32 1.5, %v1614_v61 }
 0x788   : > { %v1703_v30 = vadd.f32 %v2679_v42, %v1692_v3 }
 0x789   : > { %v1616_v1 = vmul.f32 %v2067_v26, %v1615_v62 }
 0x78b   : > { %v1620_v13 = vsel %vm1619_vm2, %v2067_v26, %v1616_v1 }
 0x78c   : > { %v1682_v28 = vmul.f32 %v1620_v13, %v2618_v34 }
 0x78e   : > { %v1693_v2 = vmul.f32 %v2673_v63, %v1682_v28 }
 0x790   : > { %v1704_v35 = vadd.f32 %v2679_v42, %v1693_v2 }
 0x792   : > { %v1711_v16 = vpack.c.bf16 %v1704_v35, %v1703_v30 }
 0x794   : > { %1944 = vmatmul.msk.bf16.vlgmr.msra.gmra.mxu2 %vm465_vm0, %v1711_v16 }
 0x7a7   : > { %v1569_v36 = vpop.xlane.xlu0 %1568 }
 0x7a8   : > { %v1587_v37 = vmul.f32 %v1569_v36, %v2206_v22 }
 0x7aa   : > { %v1595_v38 = vadd.f32 1e-05, %v1587_v37 }
 0x7ac   : > { %2068 = vrsqrt.f32 %v1595_v38  ;;  %vm1627_vm4 = vweird.f32 %v1595_v38 }
 0x7af   : > { %v1572_v40 = vpop.xlane.xlu2 %1571 }
 0x7b0   : > { %v1588_v44 = vmul.f32 %v1572_v40, %v2206_v22 }
 0x7b2   : > { %v2069_v45 = vpop.eup %2068  ;;  %v1596_v47 = vadd.f32 1e-05, %v1588_v44 }
 0x7b3   : > { %v1622_v34 = vmul.f32 %v2069_v45, %v1595_v38  ;;  %vm1628_vm3 = vweird.f32 %v2069_v45 }
 0x7b4   : > { %2070 = vrsqrt.f32 %v1596_v47  ;;  %vm1629_vm5 = vmor %vm1627_vm4, %vm1628_vm3  ;;  %vm1637_vm7 = vweird.f32 %v1596_v47 }
 0x7b5   : > { %v1623_v50 = vmul.f32 %v2069_v45, %v1622_v34 }
 0x7b7   : > { %v1624_v46 = vmul.f32 0.5, %v1623_v50  ;;  %v1575_v51 = vpop.xlane.xlu1 %1574 }
 0x7b8   : > { %v1589_v12 = vmul.f32 %v1575_v51, %v2206_v22 }
 0x7b9   : > { %v1625_v52 = vsub.f32 1.5, %v1624_v46 }
 0x7ba   : > { %v2071_v53 = vpop.eup %2070  ;;  %v1597_v55 = vadd.f32 1e-05, %v1589_v12 }
 0x7bb   : > { %v1626_v58 = vmul.f32 %v2069_v45, %v1625_v52  ;;  %v1632_v41 = vmul.f32 %v2071_v53, %v1596_v47  ;;  %vm1638_vm6 = vweird.f32 %v2071_v53 }
 0x7bc   : > { %2072 = vrsqrt.f32 %v1597_v55  ;;  %vm1639_vm8 = vmor %vm1637_vm7, %vm1638_vm6  ;;  %vm1647_vm10 = vweird.f32 %v1597_v55  ;;  %vm1784_vm6 = vcmask 519168  }
 0x7bd   : > { %v1633_v20 = vmul.f32 %v2071_v53, %v1632_v41  ;;  %v1630_v54 = vsel %vm1629_vm5, %v2069_v45, %v1626_v58 }
 0x7be   : > { %v1683_v29 = vmul.f32 %v1630_v54, %v2626_v39 }
 0x7bf   : > { %v1634_v49 = vmul.f32 0.5, %v1633_v20  ;;  %v1578_v57 = vpop.xlane.xlu0 %1577 }
 0x7c0   : > { %v1590_v56 = vmul.f32 %v1578_v57, %v2206_v22  ;;  %v1694_v43 = vmul.f32 %v2673_v63, %v1683_v29 }
 0x7c1   : > { %v1635_v5 = vsub.f32 1.5, %v1634_v49 }
 0x7c2   : > { %v2073_v6 = vpop.eup %2072  ;;  %v1598_v8 = vadd.f32 1e-05, %v1590_v56  ;;  %v1705_v14 = vadd.f32 %v2679_v42, %v1694_v43 }
 0x7c3   : > { %v1636_v4 = vmul.f32 %v2071_v53, %v1635_v5  ;;  %v1642_v9 = vmul.f32 %v2073_v6, %v1597_v55  ;;  %vm1648_vm9 = vweird.f32 %v2073_v6 }
 0x7c4   : > { %2074 = vrsqrt.f32 %v1598_v8  ;;  %vm1649_vm11 = vmor %vm1647_vm10, %vm1648_vm9  ;;  %vm1657_vm13 = vweird.f32 %v1598_v8 }
 0x7c5   : > { %v1640_v10 = vsel %vm1639_vm8, %v2071_v53, %v1636_v4  ;;  %v1643_v11 = vmul.f32 %v2073_v6, %v1642_v9 }
 0x7c6   : > { %v1684_v15 = vmul.f32 %v1640_v10, %v2632_v48 }
 0x7c7   : > { %v1644_v18 = vmul.f32 0.5, %v1643_v11 }
 0x7c8   : > { %v1695_v19 = vmul.f32 %v2673_v63, %v1684_v15 }
 0x7c9   : > { %v1645_v23 = vsub.f32 1.5, %v1644_v18 }
 0x7ca   : > { %v2075_v24 = vpop.eup %2074  ;;  %v1706_v39 = vadd.f32 %v2679_v42, %v1695_v19 }
 0x7cb   : > { %v1646_v25 = vmul.f32 %v2073_v6, %v1645_v23  ;;  %v1652_v7 = vmul.f32 %v2075_v24, %v1598_v8  ;;  %vm1658_vm12 = vweird.f32 %v2075_v24 }
 0x7cc   : > { %v1712_v26 = vpack.c.bf16 %v1706_v39, %v1705_v14  ;;  %vm1659_vm14 = vmor %vm1657_vm13, %vm1658_vm12 }
 0x7cd   : > { %v1653_v33 = vmul.f32 %v2075_v24, %v1652_v7  ;;  %v1650_v48 = vsel %vm1649_vm11, %v2073_v6, %v1646_v25 }
 0x7ce   : > { %1945 = vmatmul.msk.bf16.gmra.mxu2 %vm465_vm0, %v1712_v26  ;;  %v1685_v27 = vmul.f32 %v1650_v48, %v2638_v32 }
 0x7cf   : > { %v1654_v21 = vmul.f32 0.5, %v1653_v33  ;;  %v1584_v13 = vpop.xlane.xlu1 %1583 }
 0x7d0   : > { %v1696_v1 = vmul.f32 %v2673_v63, %v1685_v27  ;;  %v1592_v30 = vmul.f32 %v1584_v13, %v2206_v22 }
 0x7d1   : > { %v1655_v31 = vsub.f32 1.5, %v1654_v21 }
 0x7d2   : > { %v1707_v28 = vadd.f32 %v2679_v42, %v1696_v1  ;;  %v1600_v32 = vadd.f32 1e-05, %v1592_v30 }
 0x7d3   : > { %v1656_v61 = vmul.f32 %v2075_v24, %v1655_v31 }
 0x7d4   : > { %2076 = vrsqrt.f32 %v1600_v32  ;;  %vm1677_vm1 = vweird.f32 %v1600_v32 }
 0x7d5   : > { %v1660_v62 = vsel %vm1659_vm14, %v2075_v24, %v1656_v61 }
 0x7d6   : > { %v1686_v0 = vmul.f32 %v1660_v62, %v2644_v59 }
 0x7d8   : > { %v1697_v3 = vmul.f32 %v2673_v63, %v1686_v0 }
 0x7da   : > { %v1708_v2 = vadd.f32 %v2679_v42, %v1697_v3  ;;  %v2077_v16 = vpop.eup %2076 }
 0x7db   : > { %v1672_v36 = vmul.f32 %v2077_v16, %v1600_v32  ;;  %vm1678_vm15 = vweird.f32 %v2077_v16 }
 0x7dc   : > { %v1713_v35 = vpack.c.bf16 %v1708_v2, %v1707_v28  ;;  %vm1679_vm2 = vmor %vm1677_vm1, %vm1678_vm15 }
 0x7dd   : > { %v1673_v37 = vmul.f32 %v2077_v16, %v1672_v36 }
 0x7de   : > { %1946 = vmatmul.msk.bf16.gmra.mxu2 %vm465_vm0, %v1713_v35 }
 0x7df   : > { %v1674_v44 = vmul.f32 0.5, %v1673_v37 }
 0x7e1   : > { %v1675_v45 = vsub.f32 1.5, %v1674_v44 }
 0x7e3   : > { %v1676_v34 = vmul.f32 %v2077_v16, %v1675_v45 }
 0x7e5   : > { %v1680_v51 = vsel %vm1679_vm2, %v2077_v16, %v1676_v34 }
 0x7e6   : > { %v1688_v53 = vmul.f32 %v1680_v51, %v2650_v60  ;;  %v1981_v60 = vld [vmem:[%s2753_s11] ss:$0 sm:$0xff] }
 0x7e8   : > { %v1699_v41 = vmul.f32 %v2673_v63, %v1688_v53 }
 0x7ea   : > { %v1710_v49 = vadd.f32 %v2679_v42, %v1699_v41 }
 0x7f0   : > { %v1581_v59 = vpop.xlane.xlu2 %1580 }
 0x7f1   : > { %v1591_v38 = vmul.f32 %v1581_v59, %v2206_v22 }
 0x7f3   : > { %v1599_v40 = vadd.f32 1e-05, %v1591_v38 }
 0x7f5   : > { %2078 = vrsqrt.f32 %v1599_v40  ;;  %vm1667_vm4 = vweird.f32 %v1599_v40 }
 0x7fb   : > { %v2079_v47 = vpop.eup %2078 }
 0x7fc   : > { %v1662_v50 = vmul.f32 %v2079_v47, %v1599_v40  ;;  %vm1668_vm3 = vweird.f32 %v2079_v47 }
 0x7fd   : > { %vm1669_vm5 = vmor %vm1667_vm4, %vm1668_vm3 }
 0x7fe   : > { %v1663_v46 = vmul.f32 %v2079_v47, %v1662_v50 }
 0x800   : > { %v1664_v12 = vmul.f32 0.5, %v1663_v46 }
 0x802   : > { %v1665_v52 = vsub.f32 1.5, %v1664_v12 }
 0x804   : > { %v1666_v55 = vmul.f32 %v2079_v47, %v1665_v52 }
 0x806   : > { %v1670_v22 = vsel %vm1669_vm5, %v2079_v47, %v1666_v55 }
 0x807   : > { %v1687_v58 = vmul.f32 %v1670_v22, %v2665_v17 }
 0x809   : > { %v1698_v20 = vmul.f32 %v2673_v63, %v1687_v58 }
 0x80b   : > { %v1709_v54 = vadd.f32 %v2679_v42, %v1698_v20 }
 0x80d   : > { %v1714_v57 = vpack.c.bf16 %v1710_v49, %v1709_v54 }
 0x80f   : > { %1947 = vmatmul.msk.bf16.gmra.mxu2 %vm465_vm0, %v1714_v57 }
 0x817   : > { %v1756_v56 = vpop.f32.mrf.mxu2 }
 0x818   : > { %v1757_v5 = vadd.f32 %v1981_v60, %v1756_v56 }
 0x81a   : > { %v1776_v17 = vpack.c.bf16 %v1757_v5, %v1757_v5 }
 0x81c   : > { %1785 = vst.msk [vmem:[%s2721_s18] sm:$0xf] %vm1784_vm6, %v1776_v17 }
 0x81f   : > { %v1758_v63 = vpop.f32.mrf.mxu2 }
 0x820   : > { %v1759_v42 = vadd.f32 %v1981_v60, %v1758_v63 }
 0x822   : > { %v1777_v6 = vpack.c.bf16 %v1759_v42, %v1759_v42 }
 0x824   : > { %1786 = vst.msk [vmem:[%s2721_s18 + $0x4] sm:$0xf] %vm1784_vm6, %v1777_v6 }
 0x851   : > { %v1761_v29 = vpop.f32.mrf.mxu2 }
 0x852   : > { %v1762_v8 = vadd.f32 %v1981_v60, %v1761_v29 }
 0x854   : > { %v1778_v4 = vpack.c.bf16 %v1762_v8, %v1762_v8 }
 0x856   : > { %1787 = vst.msk [vmem:[%s2721_s18 + $0x8] sm:$0xf] %vm1784_vm6, %v1778_v4 }
 0x859   : > { %v1763_v9 = vpop.f32.mrf.mxu2 }
 0x85a   : > { %v1764_v10 = vadd.f32 %v1981_v60, %v1763_v9 }
 0x85c   : > { %v1779_v11 = vpack.c.bf16 %v1764_v10, %v1764_v10 }
 0x85e   : > { %1788 = vst.msk [vmem:[%s2721_s18 + $0xc] sm:$0xf] %vm1784_vm6, %v1779_v11 }
 0x861   : > { %v1766_v15 = vpop.f32.mrf.mxu2 }
 0x862   : > { %v1767_v43 = vadd.f32 %v1981_v60, %v1766_v15 }
 0x864   : > { %v1780_v18 = vpack.c.bf16 %v1767_v43, %v1767_v43 }
 0x866   : > { %1789 = vst.msk [vmem:[%s2721_s18 + $0x10] sm:$0xf] %vm1784_vm6, %v1780_v18 }
 0x869   : > { %v1768_v19 = vpop.f32.mrf.mxu2 }
 0x86a   : > { %v1769_v23 = vadd.f32 %v1981_v60, %v1768_v19 }
 0x86c   : > { %v1781_v24 = vpack.c.bf16 %v1769_v23, %v1769_v23 }
 0x86e   : > { %1790 = vst.msk [vmem:[%s2721_s18 + $0x14] sm:$0xf] %vm1784_vm6, %v1781_v24 }
 0x892   : > { %v1771_v14 = vpop.f32.mrf.mxu2 }
 0x893   : > { %v1772_v39 = vadd.f32 %v1981_v60, %v1771_v14 }
 0x895   : > { %v1782_v25 = vpack.c.bf16 %v1772_v39, %v1772_v39 }
 0x897   : > { %1791 = vst.msk [vmem:[%s2721_s18 + $0x18] sm:$0xf] %vm1784_vm6, %v1782_v25 }
 0x89a   : > { %v1773_v7 = vpop.f32.mrf.mxu2 }
 0x89b   : > { %v1774_v26 = vadd.f32 %v1981_v60, %v1773_v7 }
 0x89d   : > { %v1783_v33 = vpack.c.bf16 %v1774_v26, %v1774_v26 }
 0x89f   : > { %1792 = vst.msk [vmem:[%s2721_s18 + $0x1c] sm:$0xf] %vm1784_vm6, %v1783_v33 }
 0x8a0 PF: > { %s24_s25 = sadd.s32 1, %s2094_s25  }
 0x8a1   : > { %p21_p4 = scmp.ge.s32.totalorder %s24_s25, 4  }
 0x8a3   :  { %23 = sbr.rel (!%p21_p4) target bundleno = 1 (0x1), region = 110 }

// kernel: _lambda_.15
= control target key start
LH: loop header
LB: loop body
LE: loop exit
PB: predicated region body
PF: predicated region fallthrough
CT: control target
= control target key end

     0   :  { %v279_v4 = vmov 128.0   ;;  %vm209_vm13 = vcmask 523264   ;;  %s379_s0 = inlined_call_operand.vmem [shape: f32[32,128], index: 0, kind: input, shape index: {}]   ;;  %s380_s1 = inlined_call_operand.vmem [shape: f32[1,128], index: 1, kind: input, shape index: {}]   ;;  %s381_s2 = inlined_call_operand.vmem [shape: f32[1,128], index: 2, kind: input, shape index: {}]   ;;  %s382_s3 = inlined_call_operand.vmem [shape: bf16[128,64], index: 3, kind: input, shape index: {}]   ;;  %s383_s4 = inlined_call_operand.vmem [shape: f32[32,64], index: 4, kind: output, shape index: {}]  }
   0x1   :  { %v19_v0 = vld [vmem:[%s379_s0 + $0x10] sm:$0xff]  ;;  %v17_v1 = vld [vmem:[%s379_s0] sm:$0xff]  ;;  %v20_v2 = vld [vmem:[%s379_s0 + $0x18] sm:$0xff]  ;;  %269 = vrcp.f32 %v279_v4 }
   0x2   :  { %27 = vadd.xlane.f32.xlu1 %v19_v0  ;;  %23 = vadd.xlane.f32.xlu0 %v17_v1  ;;  %v18_v3 = vld [vmem:[%s379_s0 + $0x8] sm:$0xff]  ;;  %v257_v27 = vld [vmem:[%s382_s3 + $0x38] sm:$0xff]  ;;  %v256_v28 = vld [vmem:[%s382_s3 + $0x30] sm:$0xff] }
   0x3   :  { %190 = vmatpush.bf16.msra.mxu0 %v257_v27  ;;  %258 = vmatpush.bf16.msra.mxu1 %v257_v27  ;;  %v255_v29 = vld [vmem:[%s382_s3 + $0x28] sm:$0xff]  ;;  %v254_v30 = vld [vmem:[%s382_s3 + $0x20] sm:$0xff]  ;;  %v253_v31 = vld [vmem:[%s382_s3 + $0x18] sm:$0xff] }
   0x4   :  { %v252_v32 = vld [vmem:[%s382_s3 + $0x10] sm:$0xff]  ;;  %v251_v33 = vld [vmem:[%s382_s3 + $0x8] sm:$0xff]  ;;  %v250_v38 = vld [vmem:[%s382_s3] sm:$0xff] }
   0x7   :  { %v270_v5 = vpop.eup %269  ;;  %191 = vmatpush.bf16.msra.mxu0 %v256_v28  ;;  %259 = vmatpush.bf16.msra.mxu1 %v256_v28 }
   0x8   :  { %v32_v6 = vmul.f32 128.0, %v270_v5  ;;  %vm36_vm0 = vweird.f32 %v270_v5 }
   0xa   :  { %29 = vadd.xlane.f32.xlu1 %v20_v2  ;;  %25 = vadd.xlane.f32.xlu0 %v18_v3  ;;  %v33_v7 = vsub.f32 1.0, %v32_v6 }
   0xb   :  { %192 = vmatpush.bf16.msra.mxu0 %v255_v29  ;;  %260 = vmatpush.bf16.msra.mxu1 %v255_v29 }
   0xc   :  { %v34_v8 = vmul.f32 %v270_v5, %v33_v7  ;;  %v267_v7 = vld [vmem:[%s380_s1] ss:$0 sm:$0xff] }
   0xe   :  { %v35_v9 = vadd.f32 %v270_v5, %v34_v8 }
   0xf   :  { %193 = vmatpush.bf16.msra.mxu0 %v254_v30  ;;  %261 = vmatpush.bf16.msra.mxu1 %v254_v30 }
  0x10   :  { %v37_v10 = vsel %vm36_vm0, %v270_v5, %v35_v9 }
  0x13   :  { %194 = vmatpush.bf16.msra.mxu0 %v253_v31  ;;  %262 = vmatpush.bf16.msra.mxu1 %v253_v31 }
  0x17   :  { %195 = vmatpush.bf16.msra.mxu0 %v252_v32  ;;  %263 = vmatpush.bf16.msra.mxu1 %v252_v32 }
  0x1b   :  { %196 = vmatpush.bf16.msra.mxu0 %v251_v33  ;;  %264 = vmatpush.bf16.msra.mxu1 %v251_v33 }
  0x1f   :  { %197 = vmatpush.bf16.msra.mxu0 %v250_v38  ;;  %265 = vmatpush.bf16.msra.mxu1 %v250_v38 }
  0x75   :  { %v28_v11 = vpop.xlane.xlu1 %27  ;;  %v24_v12 = vpop.xlane.xlu0 %23 }
  0x76   :  { %v40_v13 = vmul.f32 %v37_v10, %v28_v11  ;;  %v38_v14 = vmul.f32 %v37_v10, %v24_v12 }
  0x78   :  { %v317_v15 = vsub.f32 %v19_v0, %v40_v13  ;;  %v319_v16 = vsub.f32 %v17_v1, %v38_v14  ;;  %v268_v14 = vld [vmem:[%s381_s2] ss:$0 sm:$0xff] }
  0x7a   :  { %v48_v17 = vmul.f32 %v317_v15, %v317_v15  ;;  %v46_v18 = vmul.f32 %v319_v16, %v319_v16 }
  0x7c   :  { %54 = vadd.xlane.f32.xlu0 %v48_v17  ;;  %50 = vadd.xlane.f32.xlu2 %v46_v18 }
  0x7d   :  { %v30_v19 = vpop.xlane.xlu1 %29  ;;  %v26_v20 = vpop.xlane.xlu0 %25 }
  0x7e   :  { %v41_v21 = vmul.f32 %v37_v10, %v30_v19  ;;  %v39_v22 = vmul.f32 %v37_v10, %v26_v20 }
  0x80   :  { %v325_v23 = vsub.f32 %v20_v2, %v41_v21  ;;  %v327_v24 = vsub.f32 %v18_v3, %v39_v22 }
  0x82   :  { %v49_v25 = vmul.f32 %v325_v23, %v325_v23  ;;  %v47_v26 = vmul.f32 %v327_v24, %v327_v24 }
  0x84   :  { %56 = vadd.xlane.f32.xlu1 %v49_v25  ;;  %52 = vadd.xlane.f32.xlu2 %v47_v26 }
  0xef   :  { %v51_v34 = vpop.xlane.xlu2 %50  ;;  %v55_v35 = vpop.xlane.xlu0 %54 }
  0xf0   :  { %v58_v36 = vmul.f32 %v51_v34, %v37_v10  ;;  %v60_v37 = vmul.f32 %v55_v35, %v37_v10 }
  0xf2   :  { %v62_v39 = vadd.f32 1e-05, %v58_v36  ;;  %v64_v40 = vadd.f32 1e-05, %v60_v37 }
  0xf4   :  { %271 = vrsqrt.f32 %v62_v39  ;;  %vm92_vm3 = vweird.f32 %v64_v40  ;;  %vm72_vm4 = vweird.f32 %v62_v39 }
  0xf5   :  { %273 = vrsqrt.f32 %v64_v40 }
  0xf7   :  { %v57_v41 = vpop.xlane.xlu1 %56  ;;  %v53_v42 = vpop.xlane.xlu2 %52 }
  0xf8   :  { %v61_v43 = vmul.f32 %v57_v41, %v37_v10  ;;  %v59_v44 = vmul.f32 %v53_v42, %v37_v10 }
  0xfa   :  { %v272_v45 = vpop.eup %271  ;;  %v65_v46 = vadd.f32 1e-05, %v61_v43  ;;  %v63_v47 = vadd.f32 1e-05, %v59_v44 }
  0xfb   :  { %v274_v48 = vpop.eup %273  ;;  %v67_v49 = vmul.f32 %v272_v45, %v62_v39  ;;  %vm73_vm2 = vweird.f32 %v272_v45 }
  0xfc   :  { %v87_v50 = vmul.f32 %v274_v48, %v64_v40  ;;  %275 = vrsqrt.f32 %v65_v46  ;;  %vm93_vm1 = vweird.f32 %v274_v48  ;;  %vm74_vm6 = vmor %vm72_vm4, %vm73_vm2  ;;  %vm102_vm9 = vweird.f32 %v65_v46 }
  0xfd   :  { %v68_v51 = vmul.f32 %v272_v45, %v67_v49  ;;  %277 = vrsqrt.f32 %v63_v47  ;;  %vm94_vm5 = vmor %vm92_vm3, %vm93_vm1  ;;  %vm82_vm11 = vweird.f32 %v63_v47 }
  0xfe   :  { %v88_v52 = vmul.f32 %v274_v48, %v87_v50 }
  0xff   :  { %v69_v53 = vmul.f32 0.5, %v68_v51 }
 0x100   :  { %v89_v54 = vmul.f32 0.5, %v88_v52 }
 0x101   :  { %v70_v55 = vsub.f32 1.5, %v69_v53 }
 0x102   :  { %v276_v56 = vpop.eup %275  ;;  %v90_v57 = vsub.f32 1.5, %v89_v54 }
 0x103   :  { %v278_v58 = vpop.eup %277  ;;  %v97_v59 = vmul.f32 %v276_v56, %v65_v46  ;;  %v71_v60 = vmul.f32 %v272_v45, %v70_v55  ;;  %vm103_vm7 = vweird.f32 %v276_v56 }
 0x104   :  { %v91_v61 = vmul.f32 %v274_v48, %v90_v57  ;;  %v77_v62 = vmul.f32 %v278_v58, %v63_v47  ;;  %vm83_vm8 = vweird.f32 %v278_v58  ;;  %vm104_vm10 = vmor %vm102_vm9, %vm103_vm7 }
 0x105   :  { %v98_v63 = vmul.f32 %v276_v56, %v97_v59  ;;  %v75_v4 = vsel %vm74_vm6, %v272_v45, %v71_v60  ;;  %vm84_vm12 = vmor %vm82_vm11, %vm83_vm8 }
 0x106   :  { %v78_v0 = vmul.f32 %v278_v58, %v77_v62  ;;  %v95_v2 = vsel %vm94_vm5, %v274_v48, %v91_v61  ;;  %v106_v10 = vmul.f32 %v75_v4, %v319_v16 }
 0x107   :  { %v99_v1 = vmul.f32 0.5, %v98_v63  ;;  %v108_v8 = vmul.f32 %v95_v2, %v317_v15 }
 0x108   :  { %v79_v3 = vmul.f32 0.5, %v78_v0  ;;  %v113_v15 = vmul.f32 %v267_v7, %v106_v10 }
 0x109   :  { %v100_v5 = vsub.f32 1.5, %v99_v1  ;;  %v115_v18 = vmul.f32 %v267_v7, %v108_v8 }
 0x10a   :  { %v80_v6 = vsub.f32 1.5, %v79_v3  ;;  %v120_v25 = vadd.f32 %v268_v14, %v113_v15 }
 0x10b   :  { %v101_v9 = vmul.f32 %v276_v56, %v100_v5  ;;  %v122_v22 = vadd.f32 %v268_v14, %v115_v18 }
 0x10c   :  { %v81_v11 = vmul.f32 %v278_v58, %v80_v6 }
 0x10d   :  { %v105_v12 = vsel %vm104_vm10, %v276_v56, %v101_v9 }
 0x10e   :  { %v85_v13 = vsel %vm84_vm12, %v278_v58, %v81_v11  ;;  %v109_v17 = vmul.f32 %v105_v12, %v325_v23 }
 0x10f   :  { %v107_v19 = vmul.f32 %v85_v13, %v327_v24 }
 0x110   :  { %v116_v20 = vmul.f32 %v267_v7, %v109_v17 }
 0x111   :  { %v114_v21 = vmul.f32 %v267_v7, %v107_v19 }
 0x112   :  { %v123_v16 = vadd.f32 %v268_v14, %v116_v20 }
 0x113   :  { %v121_v26 = vadd.f32 %v268_v14, %v114_v21 }
 0x114   :  { %v125_v27 = vpack.c.bf16 %v123_v16, %v122_v22 }
 0x115   :  { %v124_v28 = vpack.c.bf16 %v121_v26, %v120_v25 }
 0x116   :  { %203 = vmatmul.bf16.vlgmr.msra.gmra.mxu1 %v125_v27 }
 0x117   :  { %198 = vmatmul.bf16.vlgmr.msra.gmra.mxu0 %v124_v28 }
 0x193   :  { %v204_v29 = vpop.f32.mrf.mxu1 }
 0x194   :  { %v199_v30 = vpop.f32.mrf.mxu0  ;;  %212 = vst.msk [vmem:[%s383_s4 + $0x10] sm:$0xff] %vm209_vm13, %v204_v29 }
 0x195   :  { %210 = vst.msk [vmem:[%s383_s4] sm:$0xff] %vm209_vm13, %v199_v30 }
 0x19b   :  { %v206_v23 = vpop.f32.mrf.mxu1 }
 0x19c   :  { %v201_v24 = vpop.f32.mrf.mxu0  ;;  %213 = vst.msk [vmem:[%s383_s4 + $0x18] sm:$0xff] %vm209_vm13, %v206_v23 }
 0x19d   :  { %211 = vst.msk [vmem:[%s383_s4 + $0x8] sm:$0xff] %vm209_vm13, %v201_v24 }

// kernel: _lambda_.17
= control target key start
LH: loop header
LB: loop body
LE: loop exit
PB: predicated region body
PF: predicated region fallthrough
CT: control target
= control target key end

     0   :  { %vm128_vm0 = vcmask 523264   ;;  %s278_s1 = inlined_call_operand.vmem [shape: bf16[128,64], index: 1, kind: input, shape index: {}]   ;;  %s279_s2 = inlined_call_operand.vmem [shape: f32[1,64], index: 2, kind: input, shape index: {}]   ;;  %s280_s0 = inlined_call_operand.vmem [shape: bf16[32,128], index: 0, kind: input, shape index: {}]   ;;  %s281_s3 = inlined_call_operand.vmem [shape: f32[32,64], index: 3, kind: input, shape index: {}]   ;;  %s282_s4 = inlined_call_operand.vmem [shape: f32[32,64], index: 4, kind: output, shape index: {}]  }
   0x1   :  { %v186_v0 = vld [vmem:[%s278_s1 + $0x38] sm:$0xff]  ;;  %v185_v1 = vld [vmem:[%s278_s1 + $0x30] sm:$0xff]  ;;  %v184_v2 = vld [vmem:[%s278_s1 + $0x28] sm:$0xff] }
   0x2   :  { %101 = vmatpush.bf16.msra.mxu0 %v186_v0  ;;  %187 = vmatpush.bf16.msra.mxu1 %v186_v0  ;;  %v183_v3 = vld [vmem:[%s278_s1 + $0x20] sm:$0xff]  ;;  %v182_v4 = vld [vmem:[%s278_s1 + $0x18] sm:$0xff]  ;;  %v181_v5 = vld [vmem:[%s278_s1 + $0x10] sm:$0xff] }
   0x3   :  { %v180_v6 = vld [vmem:[%s278_s1 + $0x8] sm:$0xff]  ;;  %v179_v7 = vld [vmem:[%s278_s1] sm:$0xff]  ;;  %v122_v14 = vld [vmem:[%s281_s3 + $0x10] sm:$0xff] }
   0x4   :  { %v177_v8 = vld [vmem:[%s280_s0] sm:$0xff]  ;;  %v178_v9 = vld [vmem:[%s280_s0 + $0x8] sm:$0xff]  ;;  %v123_v22 = vld [vmem:[%s281_s3 + $0x18] sm:$0xff] }
   0x5   :  { %v195_v10 = vld [vmem:[%s279_s2] ss:$0 sm:$0xff]  ;;  %v121_v20 = vld [vmem:[%s281_s3 + $0x8] sm:$0xff] }
   0x6   :  { %102 = vmatpush.bf16.msra.mxu0 %v185_v1  ;;  %188 = vmatpush.bf16.msra.mxu1 %v185_v1  ;;  %v120_v12 = vld [vmem:[%s281_s3] sm:$0xff] }
   0xa   :  { %103 = vmatpush.bf16.msra.mxu0 %v184_v2  ;;  %189 = vmatpush.bf16.msra.mxu1 %v184_v2 }
   0xe   :  { %104 = vmatpush.bf16.msra.mxu0 %v183_v3  ;;  %190 = vmatpush.bf16.msra.mxu1 %v183_v3 }
  0x12   :  { %105 = vmatpush.bf16.msra.mxu0 %v182_v4  ;;  %191 = vmatpush.bf16.msra.mxu1 %v182_v4 }
  0x16   :  { %106 = vmatpush.bf16.msra.mxu0 %v181_v5  ;;  %192 = vmatpush.bf16.msra.mxu1 %v181_v5 }
  0x1a   :  { %107 = vmatpush.bf16.msra.mxu0 %v180_v6  ;;  %193 = vmatpush.bf16.msra.mxu1 %v180_v6 }
  0x1e   :  { %108 = vmatpush.bf16.msra.mxu0 %v179_v7  ;;  %194 = vmatpush.bf16.msra.mxu1 %v179_v7 }
  0x21   :  { %109 = vmatmul.bf16.vlgmr.msra.gmra.mxu0 %v177_v8  ;;  %114 = vmatmul.bf16.vlgmr.msra.gmra.mxu1 %v178_v9 }
  0x9e   :  { %v110_v11 = vpop.f32.mrf.mxu0  ;;  %v115_v13 = vpop.f32.mrf.mxu1 }
  0x9f   :  { %v111_v15 = vadd.f32 %v195_v10, %v110_v11  ;;  %v116_v16 = vadd.f32 %v195_v10, %v115_v13 }
  0xa1   :  { %v124_v17 = vadd.f32 %v120_v12, %v111_v15  ;;  %v126_v18 = vadd.f32 %v122_v14, %v116_v16 }
  0xa3   :  { %129 = vst.msk [vmem:[%s282_s4] sm:$0xff] %vm128_vm0, %v124_v17 }
  0xa4   :  { %131 = vst.msk [vmem:[%s282_s4 + $0x10] sm:$0xff] %vm128_vm0, %v126_v18 }
  0xa6   :  { %v112_v19 = vpop.f32.mrf.mxu0  ;;  %v117_v21 = vpop.f32.mrf.mxu1 }
  0xa7   :  { %v113_v23 = vadd.f32 %v195_v10, %v112_v19  ;;  %v118_v24 = vadd.f32 %v195_v10, %v117_v21 }
  0xa9   :  { %v125_v25 = vadd.f32 %v121_v20, %v113_v23  ;;  %v127_v26 = vadd.f32 %v123_v22, %v118_v24 }
  0xab   :  { %130 = vst.msk [vmem:[%s282_s4 + $0x8] sm:$0xff] %vm128_vm0, %v125_v25 }
  0xac   :  { %132 = vst.msk [vmem:[%s282_s4 + $0x18] sm:$0xff] %vm128_vm0, %v127_v26 }

// kernel: _lambda_.13
= control target key start
LH: loop header
LB: loop body
LE: loop exit
PB: predicated region body
PF: predicated region fallthrough
CT: control target
= control target key end

     0   :  { %s2228_s29 = smov 0   ;;  %s2862_s0 = inlined_call_operand.vmem [shape: f32[2,64,32], index: 0, kind: input, shape index: {}]   ;;  %s2863_s1 = inlined_call_operand.vmem [shape: f32[1,32], index: 1, kind: input, shape index: {}, may-alias: {1,9}]   ;;  %s2864_s2 = inlined_call_operand.vmem [shape: f32[1,32], index: 2, kind: input, shape index: {}, may-alias: {2,8,10}]   ;;  %s2865_s3 = inlined_call_operand.vmem [shape: bf16[32,96], index: 3, kind: input, shape index: {}]   ;;  %s2866_s4 = inlined_call_operand.vmem [shape: f32[1,96], index: 4, kind: input, shape index: {}]   ;;  %s2867_s5 = inlined_call_operand.vmem [shape: f32[2,16,16], index: 5, kind: input, shape index: {}]   ;;  %s2868_s6 = inlined_call_operand.vmem [shape: f32[4,16,16], index: 6, kind: input, shape index: {}]   ;;  %s2869_s7 = inlined_call_operand.vmem [shape: bf16[32,32], index: 7, kind: input, shape index: {}]   ;;  %s2870_s8 = inlined_call_operand.vmem [shape: f32[1,32], index: 8, kind: input, shape index: {}, may-alias: {2,8,10}]   ;;  %s2871_s9 = inlined_call_operand.vmem [shape: f32[1,32], index: 9, kind: input, shape index: {}, may-alias: {1,9}]   ;;  %s2872_s10 = inlined_call_operand.vmem [shape: f32[1,32], index: 10, kind: input, shape index: {}, may-alias: {2,8,10}]   ;;  %s2873_s11 = inlined_call_operand.vmem [shape: bf16[32,64], index: 11, kind: input, shape index: {}]   ;;  %s2874_s12 = inlined_call_operand.vmem [shape: f32[1,64], index: 12, kind: input, shape index: {}]   ;;  %s2875_s13 = inlined_call_operand.vmem [shape: f32[2,64,32], index: 13, kind: output, shape index: {0}]   ;;  %s2876_s14 = inlined_call_operand.vmem [shape: bf16[2,64,64], index: 14, kind: output, shape index: {1}]  }
   0x1 LB: > { %s1932_s30 = sadd.s32 4294967295, %s2145_s29   ;;  %p1936_p0 = scmp.ge.s32.totalorder %s2145_s29, 1  ;;  %s2145_s29 = sphi %s2228_s29, %s25_s29  }
   0x2   : > { %p415_p1 = scmp.lt.s32.totalorder %s2145_s29, 3 }
   0x4   : > { %p416_p2 = pnand %p1936_p0, %p415_p1 }
   0x5   : > { %p466_p3 = scmp.lt.s32.totalorder (!%p416_p2), %s1932_s30, 1  ;;  %s2148_s16 = smov (!%p416_p2), 96  }
   0x6   : > { %419 = sbr.rel (%p416_p2) target bundleno = 2212 (0x8a4), region = 72  ;;  %s2149_s26 = smov (!%p416_p2), 64  }
   0x7   : > { %s2150_s27 = smov (!%p416_p2), 80   ;;  %s2151_s28 = smov (!%p416_p2), 112  }
   0x8   : > { %s2152_s21 = smov (!%p416_p2), 48  }
   0xb   : > { %s2884_s30 = smov (!%p466_p3, %s1932_s30), 1  ;;  %vm492_vm0 = vcmask 261120   ;;  %v2147_v16 = vmov 32.0  }
   0xc   : > { %s2001_s15 = sshll.u32 %s2884_s30, 6  ;;  %2033 = vrcp.f32 %v2147_v16 }
   0xd   : > { %s2244_s18 = scalar_lea.vmem %s2862_s0, %s2001_s15  ;;  %s2678_s17 = scalar_lea.vmem %s2875_s13, %s2001_s15 }
   0xe   : > { %v486_v0 = vld [vmem:[%s2244_s18 + $0x20] sm:$0xff]  ;;  %v484_v1 = vld [vmem:[%s2244_s18 + $0x10] sm:$0xff]  ;;  %v487_v6 = vld [vmem:[%s2244_s18 + $0x28] sm:$0xff] }
   0xf   : > { %v482_v2 = vld [vmem:[%s2244_s18] sm:$0xff]  ;;  %v505_v3 = vsel %vm492_vm0, %v486_v0, 0.0  ;;  %v499_v4 = vsel %vm492_vm0, %v484_v1, 0.0  ;;  %v485_v7 = vld [vmem:[%s2244_s18 + $0x18] sm:$0xff]  ;;  %v483_v8 = vld [vmem:[%s2244_s18 + $0x8] sm:$0xff]  ;;  %v508_v9 = vsel %vm492_vm0, %v487_v6, 0.0 }
  0x10   : > { %v493_v5 = vsel %vm492_vm0, %v482_v2, 0.0  ;;  %506 = vadd.xlane.f32.xlu2 %v505_v3  ;;  %500 = vadd.xlane.f32.xlu1 %v499_v4  ;;  %v502_v10 = vsel %vm492_vm0, %v485_v7, 0.0  ;;  %v496_v11 = vsel %vm492_vm0, %v483_v8, 0.0  ;;  %v489_v12 = vld [vmem:[%s2244_s18 + $0x38] sm:$0xff]  ;;  %v488_v13 = vld [vmem:[%s2244_s18 + $0x30] sm:$0xff]  ;;  %v2005_v3 = vld [vmem:[%s2865_s3 + $0x8] sm:$0xff] }
  0x11   : > { %494 = vadd.xlane.f32.xlu0 %v493_v5  ;;  %v514_v14 = vsel %vm492_vm0, %v489_v12, 0.0  ;;  %v511_v15 = vsel %vm492_vm0, %v488_v13, 0.0  ;;  %740 = vmatpush.bf16.msra.mxu0 %v2005_v3 }
  0x12   : > { %v2034_v17 = vpop.eup %2033  ;;  %2010 = vmatpush.bf16.msra.mxu3 %v2005_v3 }
  0x13   : > { %v518_v18 = vmul.f32 32.0, %v2034_v17  ;;  %vm522_vm1 = vweird.f32 %v2034_v17 }
  0x15   : > { %v519_v19 = vsub.f32 1.0, %v518_v18 }
  0x17   : > { %v520_v20 = vmul.f32 %v2034_v17, %v519_v19 }
  0x18   : > { %509 = vadd.xlane.f32.xlu2 %v508_v9  ;;  %503 = vadd.xlane.f32.xlu1 %v502_v10 }
  0x19   : > { %497 = vadd.xlane.f32.xlu0 %v496_v11  ;;  %v521_v21 = vadd.f32 %v2034_v17, %v520_v20 }
  0x1b   : > { %v2262_v22 = vsel %vm522_vm1, %v2034_v17, %v521_v21 }
  0x20   : > { %515 = vadd.xlane.f32.xlu1 %v514_v14 }
  0x21   : > { %512 = vadd.xlane.f32.xlu0 %v511_v15 }
  0x83   : > { %v507_v23 = vpop.xlane.xlu2 %506  ;;  %v501_v24 = vpop.xlane.xlu1 %500 }
  0x84   : > { %v526_v25 = vmul.f32 %v2262_v22, %v501_v24  ;;  %v495_v26 = vpop.xlane.xlu0 %494  ;;  %v528_v39 = vmul.f32 %v2262_v22, %v507_v23 }
  0x85   : > { %v524_v27 = vmul.f32 %v2262_v22, %v495_v26 }
  0x86   : > { %v2266_v28 = vsub.f32 %v484_v1, %v526_v25  ;;  %v2290_v46 = vsub.f32 %v486_v0, %v528_v39 }
  0x87   : > { %v2268_v29 = vsub.f32 %v482_v2, %v524_v27 }
  0x88   : > { %v542_v30 = vmul.f32 %v2266_v28, %v2266_v28  ;;  %v544_v55 = vmul.f32 %v2290_v46, %v2290_v46 }
  0x89   : > { %v540_v31 = vmul.f32 %v2268_v29, %v2268_v29 }
  0x8a   : > { %v554_v32 = vsel %vm492_vm0, %v542_v30, 0.0  ;;  %v560_v58 = vsel %vm492_vm0, %v544_v55, 0.0 }
  0x8b   : > { %v510_v33 = vpop.xlane.xlu2 %509  ;;  %555 = vadd.xlane.f32.xlu1 %v554_v32  ;;  %v504_v34 = vpop.xlane.xlu1 %503  ;;  %v548_v35 = vsel %vm492_vm0, %v540_v31, 0.0 }
  0x8c   : > { %v529_v36 = vmul.f32 %v2262_v22, %v510_v33  ;;  %v527_v37 = vmul.f32 %v2262_v22, %v504_v34  ;;  %549 = vadd.xlane.f32.xlu2 %v548_v35  ;;  %v498_v38 = vpop.xlane.xlu0 %497 }
  0x8d   : > { %v525_v40 = vmul.f32 %v2262_v22, %v498_v38 }
  0x8e   : > { %v2280_v41 = vsub.f32 %v487_v6, %v529_v36  ;;  %v2282_v42 = vsub.f32 %v485_v7, %v527_v37  ;;  %v2004_v6 = vld [vmem:[%s2865_s3] sm:$0xff] }
  0x8f   : > { %v2284_v43 = vsub.f32 %v483_v8, %v525_v40  ;;  %741 = vmatpush.bf16.msra.mxu0 %v2004_v6  ;;  %2011 = vmatpush.bf16.msra.mxu3 %v2004_v6 }
  0x90   : > { %v545_v44 = vmul.f32 %v2280_v41, %v2280_v41  ;;  %v543_v45 = vmul.f32 %v2282_v42, %v2282_v42 }
  0x91   : > { %v541_v47 = vmul.f32 %v2284_v43, %v2284_v43 }
  0x92   : > { %v563_v48 = vsel %vm492_vm0, %v545_v44, 0.0  ;;  %v557_v49 = vsel %vm492_vm0, %v543_v45, 0.0 }
  0x93   : > { %564 = vadd.xlane.f32.xlu1 %v563_v48  ;;  %v551_v50 = vsel %vm492_vm0, %v541_v47, 0.0  ;;  %v516_v51 = vpop.xlane.xlu1 %515 }
  0x94   : > { %558 = vadd.xlane.f32.xlu2 %v557_v49  ;;  %552 = vadd.xlane.f32.xlu0 %v551_v50  ;;  %v513_v52 = vpop.xlane.xlu0 %512  ;;  %v531_v54 = vmul.f32 %v2262_v22, %v516_v51 }
  0x95   : > { %v530_v53 = vmul.f32 %v2262_v22, %v513_v52 }
  0x96   : > { %v2303_v57 = vsub.f32 %v489_v12, %v531_v54 }
  0x97   : > { %v2301_v56 = vsub.f32 %v488_v13, %v530_v53 }
  0x98   : > { %v547_v61 = vmul.f32 %v2303_v57, %v2303_v57 }
  0x99   : > { %v546_v59 = vmul.f32 %v2301_v56, %v2301_v56 }
  0x9a   : > { %v569_v62 = vsel %vm492_vm0, %v547_v61, 0.0 }
  0x9b   : > { %v566_v60 = vsel %vm492_vm0, %v546_v59, 0.0 }
  0x9c   : > { %561 = vadd.xlane.f32.xlu0 %v560_v58  ;;  %567 = vadd.xlane.f32.xlu2 %v566_v60 }
  0xa4   : > { %570 = vadd.xlane.f32.xlu0 %v569_v62 }
  0xfe   : > { %v556_v63 = vpop.xlane.xlu1 %555 }
  0xff   : > { %v574_v0 = vmul.f32 %v556_v63, %v2262_v22  ;;  %v550_v1 = vpop.xlane.xlu2 %549 }
 0x100   : > { %v572_v2 = vmul.f32 %v550_v1, %v2262_v22 }
 0x101   : > { %v582_v4 = vadd.f32 1e-05, %v574_v0 }
 0x102   : > { %v580_v5 = vadd.f32 1e-05, %v572_v2  ;;  %v2357_v2 = vld [vmem:[%s2863_s1] ss:$0 sm:$0xff] }
 0x103   : > { %2035 = vrsqrt.f32 %v582_v4  ;;  %vm614_vm2 = vweird.f32 %v582_v4 }
 0x104   : > { %2037 = vrsqrt.f32 %v580_v5  ;;  %vm594_vm6 = vweird.f32 %v580_v5 }
 0x106   : > { %v565_v7 = vpop.xlane.xlu1 %564 }
 0x107   : > { %v577_v8 = vmul.f32 %v565_v7, %v2262_v22  ;;  %v559_v9 = vpop.xlane.xlu2 %558  ;;  %v553_v10 = vpop.xlane.xlu0 %552 }
 0x108   : > { %v575_v11 = vmul.f32 %v559_v9, %v2262_v22  ;;  %v573_v12 = vmul.f32 %v553_v10, %v2262_v22  ;;  %v2027_v10 = vld [vmem:[%s2864_s2] ss:$0 sm:$0xff] }
 0x109   : > { %v2036_v13 = vpop.eup %2035  ;;  %v2323_v14 = vadd.f32 1e-05, %v577_v8 }
 0x10a   : > { %v2038_v15 = vpop.eup %2037  ;;  %v609_v16 = vmul.f32 %v2036_v13, %v582_v4  ;;  %v583_v17 = vadd.f32 1e-05, %v575_v11  ;;  %v581_v18 = vadd.f32 1e-05, %v573_v12  ;;  %vm615_vm3 = vweird.f32 %v2036_v13 }
 0x10b   : > { %v589_v19 = vmul.f32 %v2038_v15, %v580_v5  ;;  %2039 = vrsqrt.f32 %v2323_v14  ;;  %vm2332_vm4 = vmor %vm614_vm2, %vm615_vm3  ;;  %vm595_vm5 = vweird.f32 %v2038_v15  ;;  %vm644_vm14 = vweird.f32 %v2323_v14 }
 0x10c   : > { %v610_v20 = vmul.f32 %v2036_v13, %v609_v16  ;;  %2041 = vrsqrt.f32 %v583_v17  ;;  %vm624_vm7 = vweird.f32 %v583_v17  ;;  %vm596_vm8 = vmor %vm594_vm6, %vm595_vm5  ;;  %vm604_vm12 = vweird.f32 %v581_v18 }
 0x10d   : > { %v590_v21 = vmul.f32 %v2038_v15, %v589_v19  ;;  %2043 = vrsqrt.f32 %v581_v18 }
 0x10e   : > { %v611_v23 = vmul.f32 0.5, %v610_v20 }
 0x10f   : > { %v591_v24 = vmul.f32 0.5, %v590_v21  ;;  %v568_v25 = vpop.xlane.xlu2 %567  ;;  %v562_v26 = vpop.xlane.xlu0 %561 }
 0x110   : > { %v612_v27 = vsub.f32 1.5, %v611_v23  ;;  %v576_v30 = vmul.f32 %v562_v26, %v2262_v22  ;;  %v578_v34 = vmul.f32 %v568_v25, %v2262_v22 }
 0x111   : > { %v2327_v31 = vpop.eup %2039  ;;  %v592_v32 = vsub.f32 1.5, %v591_v24 }
 0x112   : > { %v2042_v33 = vpop.eup %2041  ;;  %v613_v36 = vmul.f32 %v2036_v13, %v612_v27  ;;  %v2330_v38 = vadd.f32 1e-05, %v576_v30  ;;  %v639_v44 = vmul.f32 %v2327_v31, %v2323_v14  ;;  %v2338_v49 = vadd.f32 1e-05, %v578_v34 }
 0x113   : > { %v2044_v35 = vpop.eup %2043  ;;  %v619_v37 = vmul.f32 %v2042_v33, %v583_v17  ;;  %v593_v40 = vmul.f32 %v2038_v15, %v592_v32  ;;  %vm625_vm9 = vweird.f32 %v2042_v33  ;;  %vm645_vm15 = vweird.f32 %v2327_v31 }
 0x114   : > { %v599_v45 = vmul.f32 %v2044_v35, %v581_v18  ;;  %v617_v50 = vsel %vm2332_vm4, %v2036_v13, %v613_v36  ;;  %2045 = vrsqrt.f32 %v2330_v38  ;;  %v640_v54 = vmul.f32 %v2327_v31, %v639_v44  ;;  %vm2345_vm10 = vmor %vm624_vm7, %vm625_vm9 }
 0x115   : > { %v620_v47 = vmul.f32 %v2042_v33, %v619_v37  ;;  %v597_v53 = vsel %vm596_vm8, %v2038_v15, %v593_v40  ;;  %vm605_vm11 = vweird.f32 %v2044_v35  ;;  %v670_v63 = vmul.f32 %v617_v50, %v2266_v28  ;;  %vm2376_vm3 = vmor %vm644_vm14, %vm645_vm15 }
 0x116   : > { %v600_v48 = vmul.f32 %v2044_v35, %v599_v45  ;;  %v668_v0 = vmul.f32 %v597_v53, %v2268_v29  ;;  %2047 = vrsqrt.f32 %v2338_v49  ;;  %v641_v3 = vmul.f32 0.5, %v640_v54  ;;  %vm606_vm13 = vmor %vm604_vm12, %vm605_vm11 }
 0x117   : > { %v621_v51 = vmul.f32 0.5, %v620_v47  ;;  %v571_v52 = vpop.xlane.xlu0 %570  ;;  %v681_v11 = vmul.f32 %v2357_v2, %v670_v63  ;;  %vm634_vm1 = vweird.f32 %v2330_v38  ;;  %vm654_vm7 = vweird.f32 %v2338_v49  ;;  %v2028_v63 = vld [vmem:[%s2866_s4] ss:$0 sm:$0xff] }
 0x118   : > { %v601_v55 = vmul.f32 0.5, %v600_v48  ;;  %v579_v58 = vmul.f32 %v571_v52, %v2262_v22  ;;  %v679_v9 = vmul.f32 %v2357_v2, %v668_v0  ;;  %v642_v12 = vsub.f32 1.5, %v641_v3 }
 0x119   : > { %v622_v59 = vsub.f32 1.5, %v621_v51  ;;  %v692_v21 = vadd.f32 %v2027_v10, %v681_v11  ;;  %vm794_vm11 = vcmask 130048  }
 0x11a   : > { %v602_v61 = vsub.f32 1.5, %v601_v55  ;;  %v2349_v62 = vadd.f32 1e-05, %v579_v58  ;;  %v2046_v5 = vpop.eup %2045  ;;  %v690_v19 = vadd.f32 %v2027_v10, %v679_v9  ;;  %v643_v23 = vmul.f32 %v2327_v31, %v642_v12 }
 0x11b   : > { %v623_v1 = vmul.f32 %v2042_v33, %v622_v59  ;;  %v629_v7 = vmul.f32 %v2046_v5, %v2330_v38  ;;  %vm635_vm2 = vweird.f32 %v2046_v5 }
 0x11c   : > { %v603_v4 = vmul.f32 %v2044_v35, %v602_v61  ;;  %2049 = vrsqrt.f32 %v2349_v62  ;;  %v2048_v16 = vpop.eup %2047  ;;  %vm636_vm4 = vmor %vm634_vm1, %vm635_vm2  ;;  %v647_v34 = vsel %vm2376_vm3, %v2327_v31, %v643_v23  ;;  %vm664_vm5 = vweird.f32 %v2349_v62 }
 0x11d   : > { %v627_v6 = vsel %vm2345_vm10, %v2042_v33, %v623_v1  ;;  %v630_v13 = vmul.f32 %v2046_v5, %v629_v7  ;;  %v649_v14 = vmul.f32 %v2048_v16, %v2338_v49  ;;  %v673_v39 = vmul.f32 %v647_v34, %v2280_v41 }
 0x11e   : > { %v671_v28 = vmul.f32 %v627_v6, %v2282_v42  ;;  %v607_v29 = vsel %vm606_vm13, %v2044_v35, %v603_v4  ;;  %vm655_vm8 = vweird.f32 %v2048_v16 }
 0x11f   : > { %v669_v8 = vmul.f32 %v607_v29, %v2284_v43  ;;  %v631_v43 = vmul.f32 0.5, %v630_v13  ;;  %v650_v35 = vmul.f32 %v2048_v16, %v649_v14  ;;  %v684_v47 = vmul.f32 %v2357_v2, %v673_v39  ;;  %vm656_vm10 = vmor %vm654_vm7, %vm655_vm8 }
 0x120   : > { %v682_v15 = vmul.f32 %v2357_v2, %v671_v28 }
 0x121   : > { %v680_v42 = vmul.f32 %v2357_v2, %v669_v8  ;;  %v632_v25 = vsub.f32 1.5, %v631_v43  ;;  %v651_v40 = vmul.f32 0.5, %v650_v35 }
 0x122   : > { %v693_v17 = vadd.f32 %v2027_v10, %v682_v15  ;;  %v2050_v18 = vpop.eup %2049 }
 0x123   : > { %v691_v20 = vadd.f32 %v2027_v10, %v680_v42  ;;  %v659_v26 = vmul.f32 %v2050_v18, %v2349_v62  ;;  %v633_v32 = vmul.f32 %v2046_v5, %v632_v25  ;;  %v652_v48 = vsub.f32 1.5, %v651_v40 }
 0x124   : > { %v699_v30 = vpack.c.bf16 %v693_v17, %v692_v21  ;;  %vm665_vm6 = vweird.f32 %v2050_v18 }
 0x125   : > { %v698_v27 = vpack.c.bf16 %v691_v20, %v690_v19  ;;  %v660_v33 = vmul.f32 %v2050_v18, %v659_v26  ;;  %v637_v36 = vsel %vm636_vm4, %v2046_v5, %v633_v32  ;;  %vm666_vm9 = vmor %vm664_vm5, %vm665_vm6  ;;  %v653_v51 = vmul.f32 %v2048_v16, %v652_v48  ;;  %v2432_v48 = vld [vmem:[%s2868_s6] sm:$0xff] }
 0x126   : > { %1952 = vmatmul.msk.bf16.vlgmr.msra.gmra.mxu3 %vm492_vm0, %v699_v30  ;;  %v672_v37 = vmul.f32 %v637_v36, %v2290_v46  ;;  %v695_v46 = vadd.f32 %v2027_v10, %v684_v47 }
 0x127   : > { %1951 = vmatmul.msk.bf16.vlgmr.msra.gmra.mxu0 %vm492_vm0, %v698_v27  ;;  %v661_v38 = vmul.f32 0.5, %v660_v33  ;;  %v657_v53 = vsel %vm656_vm10, %v2048_v16, %v653_v51  ;;  %v764_v51 = vld [vmem:[%s2867_s5 + $0x8] sm:$0xff] }
 0x128   : > { %v683_v44 = vmul.f32 %v2357_v2, %v672_v37  ;;  %v674_v55 = vmul.f32 %v657_v53, %v2301_v56  ;;  %v2445_v53 = vld [vmem:[%s2868_s6 + $0x8] sm:$0xff] }
 0x129   : > { %v662_v45 = vsub.f32 1.5, %v661_v38 }
 0x12a   : > { %v694_v50 = vadd.f32 %v2027_v10, %v683_v44  ;;  %v685_v59 = vmul.f32 %v2357_v2, %v674_v55  ;;  %v763_v44 = vld [vmem:[%s2867_s5] sm:$0xff] }
 0x12b   : > { %v663_v31 = vmul.f32 %v2050_v18, %v662_v45 }
 0x12c   : > { %v700_v41 = vpack.c.bf16 %v695_v46, %v694_v50  ;;  %v696_v60 = vadd.f32 %v2027_v10, %v685_v59 }
 0x12d   : > { %v667_v52 = vsel %vm666_vm9, %v2050_v18, %v663_v31 }
 0x12e   : > { %v675_v54 = vmul.f32 %v667_v52, %v2303_v57 }
 0x130   : > { %v686_v58 = vmul.f32 %v2357_v2, %v675_v54 }
 0x132   : > { %v697_v49 = vadd.f32 %v2027_v10, %v686_v58 }
 0x134   : > { %v701_v61 = vpack.c.bf16 %v697_v49, %v696_v60 }
 0x136   : > { %1953 = vmatmul.msk.bf16.gmra.mxu3 %vm492_vm0, %v700_v41 }
 0x146   : > { %1954 = vmatmul.msk.bf16.gmra.mxu3 %vm492_vm0, %v701_v61  ;;  %v2452_v61 = vld [vmem:[%s2868_s6 + $0x10] sm:$0xff] }
 0x1a4   : > { %v743_v62 = vpop.f32.mrf.mxu0 }
 0x1a5   : > { %v744_v0 = vadd.f32 %v2028_v63, %v743_v62 }
 0x1a7   : > { %v779_v57 = vpack.c.bf16 %v744_v0, %v744_v0 }
 0x1a9   : > { %v748_v1 = vpop.f32.mrf.mxu3  ;;  %v789_v6 = vunpack.c.l.b16 %v779_v57 }
 0x1aa   : > { %v749_v56 = vadd.f32 %v2028_v63, %v748_v1 }
 0x1ac   : > { %v745_v3 = vpop.f32.mrf.mxu0  ;;  %v781_v29 = vpack.c.bf16 %v749_v56, %v749_v56 }
 0x1ad   : > { %v746_v4 = vadd.f32 %v2028_v63, %v745_v3 }
 0x1ae   : > { %v817_v10 = vunpack.c.l.b16 %v781_v29 }
 0x1af   : > { %v780_v5 = vpack.c.bf16 %v746_v4, %v746_v4  ;;  %v2459_v4 = vld [vmem:[%s2868_s6 + $0x30] sm:$0xff] }
 0x1b1   : > { %v790_v28 = vunpack.c.l.b16 %v780_v5  ;;  %v750_v2 = vpop.f32.mrf.mxu3  ;;  %v2464_v5 = vld [vmem:[%s2868_s6 + $0x18] sm:$0xff] }
 0x1b2   : > { %v751_v8 = vadd.f32 %v2028_v63, %v750_v2 }
 0x1b3   : > { %v2402_v7 = vpack.c.b16 %v790_v28, %v789_v6 }
 0x1b4   : > { %v782_v9 = vpack.c.bf16 %v751_v8, %v751_v8 }
 0x1b5   : > { %792 = vrot.lane.b32.xlu1 %v2402_v7, %s2148_s16 }
 0x1b6   : > { %v818_v11 = vunpack.c.l.b16 %v782_v9 }
 0x1b8   : > { %v2405_v12 = vpack.c.b16 %v818_v11, %v817_v10 }
 0x1b9   : > { %v753_v13 = vpop.f32.mrf.mxu3 }
 0x1ba   : > { %820 = vrot.lane.b32.xlu2 %v2405_v12, %s2148_s16  ;;  %v754_v15 = vadd.f32 %v2028_v63, %v753_v13 }
 0x1bc   : > { %v783_v42 = vpack.c.bf16 %v754_v15, %v754_v15  ;;  %v2476_v15 = vld [vmem:[%s2868_s6 + $0x20] sm:$0xff] }
 0x1be   : > { %v844_v18 = vunpack.c.l.b16 %v783_v42 }
 0x1c1   : > { %v755_v16 = vpop.f32.mrf.mxu3 }
 0x1c2   : > { %v756_v43 = vadd.f32 %v2028_v63, %v755_v16 }
 0x1c4   : > { %v784_v17 = vpack.c.bf16 %v756_v43, %v756_v43 }
 0x1c6   : > { %v845_v19 = vunpack.c.l.b16 %v784_v17 }
 0x1c8   : > { %v2408_v20 = vpack.c.b16 %v845_v19, %v844_v18  ;;  %v2482_v18 = vld [vmem:[%s2868_s6 + $0x28] sm:$0xff] }
 0x1c9   : > { %v758_v21 = vpop.f32.mrf.mxu3 }
 0x1ca   : > { %847 = vrot.lane.b32.xlu0 %v2408_v20, %s2148_s16  ;;  %v759_v23 = vadd.f32 %v2028_v63, %v758_v21 }
 0x1cc   : > { %v785_v14 = vpack.c.bf16 %v759_v23, %v759_v23 }
 0x1ce   : > { %v871_v27 = vunpack.c.l.b16 %v785_v14 }
 0x1d1   : > { %v760_v24 = vpop.f32.mrf.mxu3 }
 0x1d2   : > { %v761_v25 = vadd.f32 %v2028_v63, %v760_v24  ;;  %v2488_v24 = vld [vmem:[%s2868_s6 + $0x38] sm:$0xff] }
 0x1d4   : > { %v786_v26 = vpack.c.bf16 %v761_v25, %v761_v25 }
 0x1d6   : > { %v872_v30 = vunpack.c.l.b16 %v786_v26 }
 0x1d8   : > { %v2411_v32 = vpack.c.b16 %v872_v30, %v871_v27 }
 0x1da   : > { %874 = vrot.lane.b32.xlu2 %v2411_v32, %s2148_s16 }
 0x214   : > { %v821_v33 = vpop.permute.xlu2 %820 }
 0x215   : > { %v826_v36 = vsel %vm794_vm11, %v821_v33, 0 }
 0x227   : > { %v793_v34 = vpop.permute.xlu1 %792 }
 0x228   : > { %v799_v35 = vsel %vm794_vm11, %v793_v34, 0 }
 0x229   : > { %808 = vmatpush.bf16.xpose.msrb.mxu0 %v799_v35 }
 0x230   : > { %1955 = vmatmul.msk.bf16.vlgmr.msrb.gmra.mxu0 %vm794_vm11, %v2402_v7 }
 0x231   : > { %835 = vmatpush.bf16.xpose.msra.mxu0 %v826_v36 }
 0x234   : > { %v875_v37 = vpop.permute.xlu2 %874 }
 0x235   : > { %v880_v38 = vsel %vm794_vm11, %v875_v37, 0 }
 0x236   : > { %889 = vmatpush.bf16.xpose.msra.mxu1 %v880_v38 }
 0x23c   : > { %v848_v39 = vpop.permute.xlu0 %847 }
 0x23d   : > { %1958 = vmatmul.msk.bf16.vlgmr.msra.gmra.mxu1 %vm794_vm11, %v2411_v32  ;;  %v853_v40 = vsel %vm794_vm11, %v848_v39, 0 }
 0x23e   : > { %862 = vmatpush.bf16.xpose.msrb.mxu3 %v853_v40 }
 0x240   : > { %1956 = vmatmul.msk.bf16.vlgmr.msra.gmra.mxu0 %vm794_vm11, %v2405_v12 }
 0x245   : > { %1957 = vmatmul.msk.bf16.vlgmr.msrb.gmra.mxu3 %vm794_vm11, %v2408_v20 }
 0x2ad   : > { %v810_v45 = vpop.f32.mrf.mxu0 }
 0x2ae   : > { %v896_v47 = vmul.f32 0.25, %v810_v45 }
 0x2b0   : > { %v904_v50 = vadd.f32 %v896_v47, %v763_v44 }
 0x2b2   : > { %v2435_v31 = vadd.f32 %v904_v50, %v2432_v48 }
 0x2b4   : > { %v920_v46 = vsel %vm794_vm11, %v2435_v31, -inf }
 0x2b5   : > { %v812_v41 = vpop.f32.mrf.mxu0  ;;  %921 = vmax.xlane.f32.xlu2 %v920_v46 }
 0x2b6   : > { %v897_v52 = vmul.f32 0.25, %v812_v41 }
 0x2b8   : > { %v905_v54 = vadd.f32 %v897_v52, %v764_v51 }
 0x2ba   : > { %v913_v55 = vadd.f32 %v905_v54, %v2445_v53  ;;  %v891_v59 = vpop.f32.mrf.mxu1 }
 0x2bb   : > { %v902_v62 = vmul.f32 0.25, %v891_v59 }
 0x2bc   : > { %v923_v58 = vsel %vm794_vm11, %v913_v55, -inf }
 0x2bd   : > { %924 = vmax.xlane.f32.xlu1 %v923_v58  ;;  %v837_v49 = vpop.f32.mrf.mxu0  ;;  %v910_v1 = vadd.f32 %v902_v62, %v763_v44 }
 0x2be   : > { %v898_v60 = vmul.f32 0.25, %v837_v49 }
 0x2bf   : > { %v2467_v28 = vadd.f32 %v910_v1, %v2459_v4 }
 0x2c0   : > { %v906_v63 = vadd.f32 %v898_v60, %v763_v44 }
 0x2c1   : > { %v938_v11 = vsel %vm794_vm11, %v2467_v28, -inf }
 0x2c2   : > { %v914_v0 = vadd.f32 %v906_v63, %v2452_v61  ;;  %v893_v13 = vpop.f32.mrf.mxu1 }
 0x2c3   : > { %v903_v16 = vmul.f32 0.25, %v893_v13 }
 0x2c4   : > { %v926_v3 = vsel %vm794_vm11, %v914_v0, -inf }
 0x2c5   : > { %927 = vmax.xlane.f32.xlu1 %v926_v3  ;;  %v839_v57 = vpop.f32.mrf.mxu0  ;;  %v911_v19 = vadd.f32 %v903_v16, %v764_v51 }
 0x2c6   : > { %v899_v56 = vmul.f32 0.25, %v839_v57 }
 0x2c7   : > { %v919_v26 = vadd.f32 %v911_v19, %v2488_v24 }
 0x2c8   : > { %v907_v6 = vadd.f32 %v899_v56, %v764_v51  ;;  %v864_v2 = vpop.f32.mrf.mxu3 }
 0x2c9   : > { %v900_v29 = vmul.f32 0.25, %v864_v2  ;;  %v941_v27 = vsel %vm794_vm11, %v919_v26, -inf }
 0x2ca   : > { %v915_v8 = vadd.f32 %v907_v6, %v2464_v5 }
 0x2cb   : > { %v908_v9 = vadd.f32 %v900_v29, %v763_v44 }
 0x2cc   : > { %v929_v10 = vsel %vm794_vm11, %v915_v8, -inf }
 0x2cd   : > { %930 = vmax.xlane.f32.xlu0 %v929_v10  ;;  %939 = vmax.xlane.f32.xlu1 %v938_v11  ;;  %v916_v42 = vadd.f32 %v908_v9, %v2476_v15 }
 0x2cf   : > { %v932_v23 = vsel %vm794_vm11, %v916_v42, -inf }
 0x2d0   : > { %v866_v43 = vpop.f32.mrf.mxu3 }
 0x2d1   : > { %v901_v17 = vmul.f32 0.25, %v866_v43 }
 0x2d3   : > { %v909_v21 = vadd.f32 %v901_v17, %v764_v51 }
 0x2d5   : > { %933 = vmax.xlane.f32.xlu0 %v932_v23  ;;  %v2491_v14 = vadd.f32 %v909_v21, %v2482_v18 }
 0x2d7   : > { %v935_v25 = vsel %vm794_vm11, %v2491_v14, -inf }
 0x2d8   : > { %936 = vmax.xlane.f32.xlu2 %v935_v25 }
 0x2dd   : > { %942 = vmax.xlane.f32.xlu0 %v941_v27 }
 0x2e6   : > { %1046 = vrot.lane.b32.xlu1 %v2405_v12, %s2149_s26 }
 0x2f0   : > { %1122 = vrot.lane.b32.xlu2 %v2402_v7, %s2150_s27 }
 0x2f1   : > { %1021 = vrot.lane.b32.xlu0 %v2402_v7, %s2149_s26 }
 0x2f8   : > { %1120 = vrot.lane.b32.xlu2 %v2402_v7, %s2151_s28 }
 0x300   : > { %1071 = vrot.lane.b32.xlu2 %v2408_v20, %s2149_s26 }
 0x308   : > { %1096 = vrot.lane.b32.xlu2 %v2411_v32, %s2149_s26 }
 0x328   : > { %v922_v30 = vpop.xlane.xlu2 %921 }
 0x329   : > { %v944_v33 = vsub.f32 %v2435_v31, %v922_v30 }
 0x32b   : > { %v952_v34 = vmul.f32 1.442695, %v944_v33 }
 0x32d   : > { %2051 = vpow2.f32 %v952_v34 }
 0x330   : > { %v925_v35 = vpop.xlane.xlu1 %924 }
 0x331   : > { %v945_v36 = vsub.f32 %v913_v55, %v925_v35 }
 0x333   : > { %v2506_v37 = vpop.eup %2051  ;;  %v954_v38 = vmul.f32 1.442695, %v945_v36 }
 0x334   : > { %v968_v39 = vsel %vm794_vm11, %v2506_v37, 0.0 }
 0x335   : > { %2053 = vpow2.f32 %v954_v38  ;;  %969 = vadd.xlane.f32.xlu0 %v968_v39 }
 0x338   : > { %v928_v40 = vpop.xlane.xlu1 %927 }
 0x339   : > { %v946_v44 = vsub.f32 %v914_v0, %v928_v40 }
 0x33b   : > { %v2510_v45 = vpop.eup %2053  ;;  %v956_v47 = vmul.f32 1.442695, %v946_v44 }
 0x33c   : > { %v971_v50 = vsel %vm794_vm11, %v2510_v45, 0.0 }
 0x33d   : > { %2055 = vpow2.f32 %v956_v47  ;;  %972 = vadd.xlane.f32.xlu2 %v971_v50 }
 0x340   : > { %v931_v31 = vpop.xlane.xlu0 %930  ;;  %v940_v46 = vpop.xlane.xlu1 %939 }
 0x341   : > { %v947_v51 = vsub.f32 %v915_v8, %v931_v31  ;;  %v950_v54 = vsub.f32 %v2467_v28, %v940_v46 }
 0x343   : > { %v2514_v41 = vpop.eup %2055  ;;  %v958_v52 = vmul.f32 1.442695, %v947_v51  ;;  %v964_v58 = vmul.f32 1.442695, %v950_v54 }
 0x344   : > { %v974_v55 = vsel %vm794_vm11, %v2514_v41, 0.0 }
 0x345   : > { %975 = vadd.xlane.f32.xlu2 %v974_v55  ;;  %2057 = vpow2.f32 %v958_v52 }
 0x346   : > { %2059 = vpow2.f32 %v964_v58 }
 0x348   : > { %v934_v59 = vpop.xlane.xlu0 %933 }
 0x349   : > { %v948_v49 = vsub.f32 %v916_v42, %v934_v59 }
 0x34b   : > { %v960_v60 = vmul.f32 1.442695, %v948_v49  ;;  %v2519_v62 = vpop.eup %2057  ;;  %v937_v63 = vpop.xlane.xlu2 %936 }
 0x34c   : > { %v977_v0 = vsel %vm794_vm11, %v2519_v62, 0.0  ;;  %v2523_v57 = vpop.eup %2059  ;;  %v949_v17 = vsub.f32 %v2491_v14, %v937_v63 }
 0x34d   : > { %2061 = vpow2.f32 %v960_v60  ;;  %978 = vadd.xlane.f32.xlu1 %v977_v0  ;;  %v986_v29 = vsel %vm794_vm11, %v2523_v57, 0.0 }
 0x34e   : > { %v962_v19 = vmul.f32 1.442695, %v949_v17 }
 0x350   : > { %v943_v1 = vpop.xlane.xlu0 %942 }
 0x351   : > { %v951_v3 = vsub.f32 %v919_v26, %v943_v1 }
 0x353   : > { %v2525_v56 = vpop.eup %2061  ;;  %v966_v6 = vmul.f32 1.442695, %v951_v3  ;;  %v1123_v28 = vpop.permute.xlu2 %1122 }
 0x354   : > { %v980_v2 = vsel %vm794_vm11, %v2525_v56, 0.0  ;;  %v1128_v9 = vsel %vm794_vm11, %v1123_v28, 0 }
 0x355   : > { %2063 = vpow2.f32 %v966_v6  ;;  %981 = vadd.xlane.f32.xlu0 %v980_v2  ;;  %987 = vadd.xlane.f32.xlu1 %v986_v29 }
 0x356   : > { %2065 = vpow2.f32 %v962_v19 }
 0x358   : > { %v1047_v8 = vpop.permute.xlu1 %1046 }
 0x359   : > { %1059 = vmatpush.bf16.msra.mxu3 %v1047_v8 }
 0x35b   : > { %v2064_v10 = vpop.eup %2063  ;;  %v2532_v11 = vpop.permute.xlu2 %1120 }
 0x35c   : > { %v989_v13 = vsel %vm794_vm11, %v2064_v10, 0.0  ;;  %v2542_v21 = vpop.eup %2065 }
 0x35d   : > { %1137 = vmatpush.bf16.xpose.msrb.mxu3 %v1128_v9  ;;  %1146 = vrot.lane.b32.xlu2 %v2405_v12, %s2150_s27  ;;  %v983_v23 = vsel %vm794_vm11, %v2542_v21, 0.0 }
 0x35e   : > { %990 = vadd.xlane.f32.xlu0 %v989_v13 }
 0x363   : > { %v1022_v16 = vpop.permute.xlu0 %1021  ;;  %v1072_v42 = vpop.permute.xlu2 %1071 }
 0x364   : > { %1034 = vmatpush.bf16.msra.mxu2 %v1022_v16  ;;  %1084 = vmatpush.bf16.msrb.mxu1 %v1072_v42 }
 0x36b   : > { %v1097_v43 = vpop.permute.xlu2 %1096 }
 0x36c   : > { %1109 = vmatpush.bf16.msrb.mxu2 %v1097_v43 }
 0x36e   : > { %1170 = vrot.lane.b32.xlu1 %v2408_v20, %s2150_s27 }
 0x372   : > { %1168 = vrot.lane.b32.xlu0 %v2408_v20, %s2151_s28 }
 0x386   : > { %984 = vadd.xlane.f32.xlu2 %v983_v23 }
 0x39e   : > { %1144 = vrot.lane.b32.xlu2 %v2405_v12, %s2151_s28 }
 0x3a6   : > { %1194 = vrot.lane.b32.xlu2 %v2411_v32, %s2150_s27  ;;  %s2003_s27 = sshll.u32 %s2884_s30, 5 }
 0x3a8   : > { %v970_v25 = vpop.xlane.xlu0 %969 }
 0x3a9   : > { %2067 = vrcp.f32 %v970_v25 }
 0x3ae   : > { %1192 = vrot.lane.b32.xlu2 %v2411_v32, %s2151_s28 }
 0x3af   : > { %v2068_v26 = vpop.eup %2067 }
 0x3b0   : > { %v973_v14 = vpop.xlane.xlu2 %972  ;;  %v1000_v27 = vmul.f32 %v2068_v26, %v2506_v37 }
 0x3b1   : > { %2069 = vrcp.f32 %v973_v14 }
 0x3b2   : > { %v1008_v35 = vpack.c.bf16 %v1000_v27, %v1000_v27 }
 0x3b4   : > { %v1018_v38 = vunpack.c.l.b16 %v1008_v35 }
 0x3b7   : > { %v2070_v30 = vpop.eup %2069 }
 0x3b8   : > { %v976_v33 = vpop.xlane.xlu2 %975  ;;  %v1001_v34 = vmul.f32 %v2070_v30, %v2510_v45 }
 0x3b9   : > { %2071 = vrcp.f32 %v976_v33 }
 0x3ba   : > { %v1009_v36 = vpack.c.bf16 %v1001_v34, %v1001_v34 }
 0x3bc   : > { %v1019_v39 = vunpack.c.l.b16 %v1009_v36 }
 0x3be   : > { %v1020_v40 = vpack.c.b16 %v1019_v39, %v1018_v38  ;;  %v765_v38 = vld [vmem:[%s2867_s5 + $0x10] sm:$0xff] }
 0x3bf   : > { %v2072_v31 = vpop.eup %2071 }
 0x3c0   : > { %v1147_v44 = vpop.permute.xlu2 %1146  ;;  %1959 = vmatmul.msk.bf16.vlgmr.msra.gmra.mxu2 %vm794_vm11, %v1020_v40  ;;  %v979_v50 = vpop.xlane.xlu1 %978  ;;  %v1002_v37 = vmul.f32 %v2072_v31, %v2514_v41 }
 0x3c1   : > { %v1152_v47 = vsel %vm794_vm11, %v1147_v44, 0  ;;  %2073 = vrcp.f32 %v979_v50 }
 0x3c2   : > { %1161 = vmatpush.bf16.xpose.msra.mxu1 %v1152_v47  ;;  %v1010_v45 = vpack.c.bf16 %v1002_v37, %v1002_v37 }
 0x3c4   : > { %v1043_v58 = vunpack.c.l.b16 %v1010_v45 }
 0x3c7   : > { %v2074_v46 = vpop.eup %2073 }
 0x3c8   : > { %v982_v51 = vpop.xlane.xlu0 %981  ;;  %v1003_v52 = vmul.f32 %v2074_v46, %v2519_v62  ;;  %v988_v54 = vpop.xlane.xlu1 %987  ;;  %v766_v46 = vld [vmem:[%s2867_s5 + $0x18] sm:$0xff] }
 0x3c9   : > { %2075 = vrcp.f32 %v988_v54 }
 0x3ca   : > { %v1011_v55 = vpack.c.bf16 %v1003_v52, %v1003_v52 }
 0x3cc   : > { %v1044_v59 = vunpack.c.l.b16 %v1011_v55 }
 0x3ce   : > { %v1045_v49 = vpack.c.b16 %v1044_v59, %v1043_v58 }
 0x3cf   : > { %v2076_v63 = vpop.eup %2075 }
 0x3d0   : > { %1960 = vmatmul.msk.bf16.vlgmr.msra.gmra.mxu3 %vm794_vm11, %v1045_v49  ;;  %v1006_v0 = vmul.f32 %v2076_v63, %v2523_v57 }
 0x3d1   : > { %v991_v60 = vpop.xlane.xlu0 %990 }
 0x3d2   : > { %2077 = vrcp.f32 %v991_v60  ;;  %v1014_v41 = vpack.c.bf16 %v1006_v0, %v1006_v0 }
 0x3d3   : > { %2079 = vrcp.f32 %v982_v51 }
 0x3d4   : > { %v1093_v28 = vunpack.c.l.b16 %v1014_v41 }
 0x3d8   : > { %v2078_v1 = vpop.eup %2077 }
 0x3d9   : > { %v1007_v3 = vmul.f32 %v2078_v1, %v2064_v10  ;;  %v2080_v13 = vpop.eup %2079 }
 0x3da   : > { %v1004_v10 = vmul.f32 %v2080_v13, %v2525_v56 }
 0x3db   : > { %v1015_v6 = vpack.c.bf16 %v1007_v3, %v1007_v3 }
 0x3dc   : > { %v1012_v42 = vpack.c.bf16 %v1004_v10, %v1004_v10 }
 0x3dd   : > { %v1094_v2 = vunpack.c.l.b16 %v1015_v6 }
 0x3df   : > { %v1095_v62 = vpack.c.b16 %v1094_v2, %v1093_v28 }
 0x3e0   : > { %1963 = vmatmul.msk.bf16.vlgmr.msrb.gmra.mxu3 %vm794_vm11, %v2532_v11  ;;  %v1171_v29 = vpop.permute.xlu1 %1170  ;;  %v1068_v11 = vunpack.c.l.b16 %v1012_v42 }
 0x3e1   : > { %1962 = vmatmul.msk.bf16.vlgmr.msrb.gmra.mxu2 %vm794_vm11, %v1095_v62  ;;  %v1176_v8 = vsel %vm794_vm11, %v1171_v29, 0 }
 0x3e2   : > { %1185 = vmatpush.bf16.xpose.msra.mxu2 %v1176_v8 }
 0x3e4   : > { %v1169_v9 = vpop.permute.xlu0 %1168 }
 0x3f1   : > { %1965 = vmatmul.msk.bf16.vlgmr.msra.gmra.mxu2 %vm794_vm11, %v1169_v9 }
 0x3f9   : > { %v985_v57 = vpop.xlane.xlu2 %984 }
 0x3fa   : > { %2081 = vrcp.f32 %v985_v57 }
 0x400   : > { %v2082_v16 = vpop.eup %2081 }
 0x401   : > { %v1005_v43 = vmul.f32 %v2082_v16, %v2542_v21  ;;  %v1145_v17 = vpop.permute.xlu2 %1144 }
 0x403   : > { %v1013_v19 = vpack.c.bf16 %v1005_v43, %v1005_v43 }
 0x405   : > { %v1069_v23 = vunpack.c.l.b16 %v1013_v19 }
 0x407   : > { %v1070_v25 = vpack.c.b16 %v1069_v23, %v1068_v11 }
 0x409   : > { %v1195_v14 = vpop.permute.xlu2 %1194  ;;  %1961 = vmatmul.msk.bf16.vlgmr.msrb.gmra.mxu1 %vm794_vm11, %v1070_v25 }
 0x40a   : > { %v1200_v26 = vsel %vm794_vm11, %v1195_v14, 0 }
 0x40b   : > { %1209 = vmatpush.bf16.xpose.msra.mxu3 %v1200_v26 }
 0x411   : > { %v1193_v27 = vpop.permute.xlu2 %1192 }
 0x412   : > { %1966 = vmatmul.msk.bf16.vlgmr.msra.gmra.mxu3 %vm794_vm11, %v1193_v27 }
 0x419   : > { %1964 = vmatmul.msk.bf16.vlgmr.msra.gmra.mxu1 %vm794_vm11, %v1145_v17 }
 0x443   : > { %v2571_v56 = vpop.f32.mrf.mxu2 }
 0x44b   : > { %v2573_v30 = vpop.f32.mrf.mxu2 }
 0x44c   : > { %v1116_v21 = vpack.c.bf16 %v2573_v30, %v2571_v56 }
 0x453   : > { %v2577_v33 = vpop.f32.mrf.mxu3 }
 0x45b   : > { %v2579_v34 = vpop.f32.mrf.mxu3 }
 0x45c   : > { %v1117_v35 = vpack.c.bf16 %v2579_v34, %v2577_v33 }
 0x463   : > { %v1139_v39 = vpop.f32.mrf.mxu3 }
 0x464   : > { %v2583_v36 = vpop.f32.mrf.mxu2  ;;  %v1216_v40 = vmul.f32 0.25, %v1139_v39 }
 0x466   : > { %v1224_v44 = vadd.f32 %v1216_v40, %v765_v38 }
 0x468   : > { %v1232_v47 = vadd.f32 %v1224_v44, %v2432_v48 }
 0x46a   : > { %v1240_v50 = vsel %vm794_vm11, %v1232_v47, -inf }
 0x46b   : > { %1241 = vmax.xlane.f32.xlu1 %v1240_v50  ;;  %v1141_v51 = vpop.f32.mrf.mxu3 }
 0x46c   : > { %v2590_v31 = vpop.f32.mrf.mxu2  ;;  %v1217_v45 = vmul.f32 0.25, %v1141_v51 }
 0x46d   : > { %v1119_v37 = vpack.c.bf16 %v2590_v31, %v2583_v36 }
 0x46e   : > { %v1225_v52 = vadd.f32 %v1217_v45, %v766_v46 }
 0x470   : > { %v1233_v54 = vadd.f32 %v1225_v52, %v2445_v53 }
 0x472   : > { %v1243_v55 = vsel %vm794_vm11, %v1233_v54, -inf }
 0x473   : > { %1244 = vmax.xlane.f32.xlu0 %v1243_v55 }
 0x474   : > { %v1187_v58 = vpop.f32.mrf.mxu2 }
 0x475   : > { %v1220_v57 = vmul.f32 0.25, %v1187_v58 }
 0x47c   : > { %v1189_v60 = vpop.f32.mrf.mxu2 }
 0x47d   : > { %v1221_v1 = vmul.f32 0.25, %v1189_v60 }
 0x47f   : > { %v1229_v3 = vadd.f32 %v1221_v1, %v766_v46 }
 0x481   : > { %v1237_v8 = vadd.f32 %v1229_v3, %v2482_v18 }
 0x483   : > { %v1255_v16 = vsel %vm794_vm11, %v1237_v8, -inf }
 0x486   : > { %v2599_v48 = vpop.f32.mrf.mxu1 }
 0x487   : > { %1341 = vrot.lane.b32.xlu0 %v2402_v7, %s2152_s21 }
 0x48e   : > { %v2603_v59 = vpop.f32.mrf.mxu1 }
 0x48f   : > { %v1118_v49 = vpack.c.bf16 %v2603_v59, %v2599_v48 }
 0x495   : > { %v1211_v28 = vpop.f32.mrf.mxu3 }
 0x496   : > { %v1163_v63 = vpop.f32.mrf.mxu1  ;;  %v1222_v62 = vmul.f32 0.25, %v1211_v28 }
 0x497   : > { %v1218_v0 = vmul.f32 0.25, %v1163_v63 }
 0x498   : > { %v1230_v13 = vadd.f32 %v1222_v62, %v765_v38 }
 0x499   : > { %v1226_v53 = vadd.f32 %v1218_v0, %v765_v38 }
 0x49a   : > { %v1238_v42 = vadd.f32 %v1230_v13, %v2459_v4 }
 0x49b   : > { %v1234_v41 = vadd.f32 %v1226_v53, %v2452_v61  ;;  %v1228_v61 = vadd.f32 %v1220_v57, %v765_v38 }
 0x49c   : > { %v1258_v19 = vsel %vm794_vm11, %v1238_v42, -inf }
 0x49d   : > { %v1246_v6 = vsel %vm794_vm11, %v1234_v41, -inf  ;;  %v1213_v43 = vpop.f32.mrf.mxu3  ;;  %v1236_v11 = vadd.f32 %v1228_v61, %v2476_v15 }
 0x49e   : > { %1247 = vmax.xlane.f32.xlu2 %v1246_v6  ;;  %v1165_v2 = vpop.f32.mrf.mxu1  ;;  %v1223_v17 = vmul.f32 0.25, %v1213_v43 }
 0x49f   : > { %v1219_v7 = vmul.f32 0.25, %v1165_v2 }
 0x4a0   : > { %v1231_v18 = vadd.f32 %v1223_v17, %v766_v46 }
 0x4a1   : > { %v1227_v29 = vadd.f32 %v1219_v7, %v766_v46 }
 0x4a2   : > { %v1239_v23 = vadd.f32 %v1231_v18, %v2488_v24 }
 0x4a3   : > { %v1235_v9 = vadd.f32 %v1227_v29, %v2464_v5  ;;  %v1252_v5 = vsel %vm794_vm11, %v1236_v11, -inf }
 0x4a4   : > { %v1261_v25 = vsel %vm794_vm11, %v1239_v23, -inf }
 0x4a5   : > { %v1249_v10 = vsel %vm794_vm11, %v1235_v9, -inf }
 0x4a6   : > { %1250 = vmax.xlane.f32.xlu1 %v1249_v10  ;;  %1256 = vmax.xlane.f32.xlu2 %v1255_v16 }
 0x4ae   : > { %1259 = vmax.xlane.f32.xlu1 %v1258_v19 }
 0x4b1   : > { %1253 = vmax.xlane.f32.xlu0 %v1252_v5 }
 0x4b9   : > { %1262 = vmax.xlane.f32.xlu0 %v1261_v25 }
 0x4cd   : > { %1391 = vrot.lane.b32.xlu0 %v2408_v20, %s2152_s21 }
 0x4de   : > { %v1242_v4 = vpop.xlane.xlu1 %1241 }
 0x4df   : > { %v1264_v14 = vsub.f32 %v1232_v47, %v1242_v4 }
 0x4e1   : > { %v1272_v26 = vmul.f32 1.442695, %v1264_v14 }
 0x4e3   : > { %2083 = vpow2.f32 %v1272_v26 }
 0x4e6   : > { %v1245_v27 = vpop.xlane.xlu0 %1244 }
 0x4e7   : > { %v1265_v38 = vsub.f32 %v1233_v54, %v1245_v27 }
 0x4e9   : > { %v2084_v15 = vpop.eup %2083  ;;  %v1274_v39 = vmul.f32 1.442695, %v1265_v38 }
 0x4ea   : > { %v1288_v40 = vsel %vm794_vm11, %v2084_v15, 0.0 }
 0x4eb   : > { %2085 = vpow2.f32 %v1274_v39  ;;  %1289 = vadd.xlane.f32.xlu2 %v1288_v40 }
 0x4f1   : > { %v2086_v44 = vpop.eup %2085 }
 0x4f2   : > { %v1291_v24 = vsel %vm794_vm11, %v2086_v44, 0.0 }
 0x4f3   : > { %1292 = vadd.xlane.f32.xlu1 %v1291_v24 }
 0x4f9   : > { %v1342_v50 = vpop.permute.xlu0 %1341 }
 0x4fa   : > { %1354 = vmatpush.bf16.msrb.mxu0 %v1342_v50 }
 0x511   : > { %v1248_v46 = vpop.xlane.xlu2 %1247 }
 0x512   : > { %v1266_v20 = vsub.f32 %v1234_v41, %v1248_v46 }
 0x514   : > { %v1276_v51 = vmul.f32 1.442695, %v1266_v20 }
 0x516   : > { %2087 = vpow2.f32 %v1276_v51 }
 0x519   : > { %v1251_v47 = vpop.xlane.xlu1 %1250  ;;  %v1257_v58 = vpop.xlane.xlu2 %1256 }
 0x51a   : > { %v1267_v45 = vsub.f32 %v1235_v9, %v1251_v47  ;;  %v1269_v1 = vsub.f32 %v1237_v8, %v1257_v58  ;;  %v2006_v47 = vld [vmem:[%s2869_s7] sm:$0xff] }
 0x51c   : > { %v2088_v52 = vpop.eup %2087  ;;  %v1278_v54 = vmul.f32 1.442695, %v1267_v45  ;;  %v1282_v28 = vmul.f32 1.442695, %v1269_v1 }
 0x51d   : > { %v1294_v55 = vsel %vm794_vm11, %v2088_v52, 0.0 }
 0x51e   : > { %2089 = vpow2.f32 %v1278_v54  ;;  %1295 = vadd.xlane.f32.xlu2 %v1294_v55 }
 0x521   : > { %v1260_v60 = vpop.xlane.xlu1 %1259 }
 0x522   : > { %v1270_v63 = vsub.f32 %v1238_v42, %v1260_v60 }
 0x524   : > { %v2090_v0 = vpop.eup %2089  ;;  %v1284_v53 = vmul.f32 1.442695, %v1270_v63  ;;  %v1254_v3 = vpop.xlane.xlu0 %1253 }
 0x525   : > { %v1297_v6 = vsel %vm794_vm11, %v2090_v0, 0.0  ;;  %v1268_v41 = vsub.f32 %v1236_v11, %v1254_v3 }
 0x526   : > { %2091 = vpow2.f32 %v1284_v53  ;;  %1298 = vadd.xlane.f32.xlu1 %v1297_v6 }
 0x527   : > { %v1280_v2 = vmul.f32 1.442695, %v1268_v41 }
 0x529   : > { %2093 = vpow2.f32 %v1280_v2 }
 0x52a   : > { %2095 = vpow2.f32 %v1282_v28 }
 0x52c   : > { %v2625_v7 = vpop.eup %2091  ;;  %v1263_v62 = vpop.xlane.xlu0 %1262 }
 0x52d   : > { %v1306_v29 = vsel %vm794_vm11, %v2625_v7, 0.0  ;;  %v1271_v9 = vsub.f32 %v1239_v23, %v1263_v62 }
 0x52e   : > { %1307 = vadd.xlane.f32.xlu1 %v1306_v29 }
 0x52f   : > { %v2094_v8 = vpop.eup %2093  ;;  %v1286_v57 = vmul.f32 1.442695, %v1271_v9 }
 0x530   : > { %v1300_v13 = vsel %vm794_vm11, %v2094_v8, 0.0  ;;  %v2096_v10 = vpop.eup %2095 }
 0x531   : > { %2097 = vpow2.f32 %v1286_v57  ;;  %1301 = vadd.xlane.f32.xlu2 %v1300_v13  ;;  %v1303_v16 = vsel %vm794_vm11, %v2096_v10, 0.0 }
 0x536   : > { %1304 = vadd.xlane.f32.xlu1 %v1303_v16 }
 0x537   : > { %v2098_v61 = vpop.eup %2097 }
 0x538   : > { %v1309_v42 = vsel %vm794_vm11, %v2098_v61, 0.0 }
 0x539   : > { %1310 = vadd.xlane.f32.xlu0 %v1309_v42 }
 0x53f   : > { %v1392_v43 = vpop.permute.xlu0 %1391 }
 0x540   : > { %1404 = vmatpush.bf16.msrb.mxu2 %v1392_v43 }
 0x549   : > { %1366 = vrot.lane.b32.xlu2 %v2405_v12, %s2152_s21 }
 0x54f   : > { %1416 = vrot.lane.b32.xlu1 %v2411_v32, %s2152_s21 }
 0x55e   : > { %v1290_v17 = vpop.xlane.xlu2 %1289 }
 0x55f   : > { %2099 = vrcp.f32 %v1290_v17  ;;  %v2670_v17 = vld [vmem:[%s2870_s8] ss:$0 sm:$0xff] }
 0x565   : > { %v2100_v11 = vpop.eup %2099 }
 0x566   : > { %v1293_v19 = vpop.xlane.xlu1 %1292  ;;  %v1320_v18 = vmul.f32 %v2100_v11, %v2084_v15 }
 0x567   : > { %2101 = vrcp.f32 %v1293_v19  ;;  %v2131_v19 = vld [vmem:[%s2244_s18] sm:$0xff] }
 0x568   : > { %v1328_v23 = vpack.c.bf16 %v1320_v18, %v1320_v18 }
 0x56a   : > { %v1338_v14 = vunpack.c.l.b16 %v1328_v23 }
 0x56d   : > { %v2102_v5 = vpop.eup %2101 }
 0x56e   : > { %v1321_v25 = vmul.f32 %v2102_v5, %v2086_v44 }
 0x570   : > { %v1329_v4 = vpack.c.bf16 %v1321_v25, %v1321_v25 }
 0x572   : > { %v1339_v26 = vunpack.c.l.b16 %v1329_v4 }
 0x574   : > { %v1340_v27 = vpack.c.b16 %v1339_v26, %v1338_v14  ;;  %v2132_v14 = vld [vmem:[%s2244_s18 + $0x8] sm:$0xff] }
 0x576   : > { %1967 = vmatmul.msk.bf16.vlgmr.msrb.gmra.mxu0 %vm794_vm11, %v1340_v27 }
 0x591   : > { %v1296_v38 = vpop.xlane.xlu2 %1295 }
 0x599   : > { %v1299_v12 = vpop.xlane.xlu1 %1298 }
 0x59a   : > { %2103 = vrcp.f32 %v1299_v12 }
 0x59b   : > { %2105 = vrcp.f32 %v1296_v38 }
 0x5a0   : > { %v2104_v32 = vpop.eup %2103 }
 0x5a1   : > { %v1308_v39 = vpop.xlane.xlu1 %1307  ;;  %v2106_v40 = vpop.eup %2105  ;;  %v1323_v24 = vmul.f32 %v2104_v32, %v2090_v0 }
 0x5a2   : > { %v1322_v50 = vmul.f32 %v2106_v40, %v2088_v52 }
 0x5a3   : > { %v1331_v15 = vpack.c.bf16 %v1323_v24, %v1323_v24  ;;  %v2133_v24 = vld [vmem:[%s2244_s18 + $0x10] sm:$0xff] }
 0x5a4   : > { %v1302_v46 = vpop.xlane.xlu2 %1301  ;;  %v1330_v20 = vpack.c.bf16 %v1322_v50, %v1322_v50 }
 0x5a5   : > { %2107 = vrcp.f32 %v1302_v46  ;;  %v1364_v51 = vunpack.c.l.b16 %v1331_v15 }
 0x5a6   : > { %v1363_v54 = vunpack.c.l.b16 %v1330_v20 }
 0x5a8   : > { %v1365_v63 = vpack.c.b16 %v1364_v51, %v1363_v54 }
 0x5a9   : > { %v1305_v44 = vpop.xlane.xlu1 %1304 }
 0x5aa   : > { %2109 = vrcp.f32 %v1305_v44 }
 0x5ab   : > { %v2108_v45 = vpop.eup %2107 }
 0x5ac   : > { %v1324_v55 = vmul.f32 %v2108_v45, %v2094_v8  ;;  %v1367_v58 = vpop.permute.xlu2 %1366  ;;  %v1311_v60 = vpop.xlane.xlu0 %1310 }
 0x5ad   : > { %2111 = vrcp.f32 %v1311_v60  ;;  %1379 = vmatpush.bf16.msrb.mxu1 %v1367_v58 }
 0x5ae   : > { %2113 = vrcp.f32 %v1308_v39  ;;  %v1332_v0 = vpack.c.bf16 %v1324_v55, %v1324_v55 }
 0x5b0   : > { %v2110_v52 = vpop.eup %2109  ;;  %1968 = vmatmul.msk.bf16.vlgmr.msrb.gmra.mxu1 %vm794_vm11, %v1365_v63  ;;  %v1388_v6 = vunpack.c.l.b16 %v1332_v0  ;;  %v2135_v63 = vld [vmem:[%s2244_s18 + $0x20] sm:$0xff] }
 0x5b1   : > { %1512 = vmatpush.bf16.msra.mxu1 %v2006_v47  ;;  %v1325_v1 = vmul.f32 %v2110_v52, %v2096_v10  ;;  %v2134_v47 = vld [vmem:[%s2244_s18 + $0x18] sm:$0xff] }
 0x5b3   : > { %v1333_v53 = vpack.c.bf16 %v1325_v1, %v1325_v1  ;;  %v2112_v3 = vpop.eup %2111 }
 0x5b4   : > { %v2114_v28 = vpop.eup %2113  ;;  %v1327_v62 = vmul.f32 %v2112_v3, %v2098_v61 }
 0x5b5   : > { %v1389_v41 = vunpack.c.l.b16 %v1333_v53  ;;  %v1326_v29 = vmul.f32 %v2114_v28, %v2625_v7  ;;  %v2007_v7 = vld [vmem:[%s2869_s7 + $0x8] sm:$0xff] }
 0x5b6   : > { %v1335_v9 = vpack.c.bf16 %v1327_v62, %v1327_v62  ;;  %1465 = vmatpush.bf16.msra.mxu0 %v2007_v7 }
 0x5b7   : > { %v1390_v2 = vpack.c.b16 %v1389_v41, %v1388_v6  ;;  %v1334_v8 = vpack.c.bf16 %v1326_v29, %v1326_v29  ;;  %v2136_v41 = vld [vmem:[%s2244_s18 + $0x28] sm:$0xff] }
 0x5b8   : > { %v1414_v57 = vunpack.c.l.b16 %v1335_v9 }
 0x5b9   : > { %1969 = vmatmul.msk.bf16.vlgmr.msrb.gmra.mxu2 %vm794_vm11, %v1390_v2  ;;  %v1413_v13 = vunpack.c.l.b16 %v1334_v8 }
 0x5bb   : > { %v1415_v16 = vpack.c.b16 %v1414_v57, %v1413_v13  ;;  %v2137_v57 = vld [vmem:[%s2244_s18 + $0x30] sm:$0xff] }
 0x5c0   : > { %1983 = vmatmul.msk.bf16.vlgmr.msra.gmra.mxu1 %vm794_vm11, %v1116_v21 }
 0x5c1   : > { %v1417_v10 = vpop.permute.xlu1 %1416 }
 0x5c2   : > { %1429 = vmatpush.bf16.msrb.mxu3 %v1417_v10 }
 0x5c5   : > { %1970 = vmatmul.msk.bf16.vlgmr.msrb.gmra.mxu3 %vm794_vm11, %v1415_v16 }
 0x5d0   : > { %1984 = vmatmul.msk.bf16.gmra.mxu1 %vm794_vm11, %v1117_v35 }
 0x5e0   : > { %1985 = vmatmul.msk.bf16.gmra.mxu1 %vm794_vm11, %v1118_v49 }
 0x5f0   : > { %1986 = vmatmul.msk.bf16.gmra.mxu1 %vm794_vm11, %v1119_v37 }
 0x5f3   : > { %v1356_v56 = vpop.f32.mrf.mxu0 }
 0x5fb   : > { %v1358_v30 = vpop.f32.mrf.mxu0 }
 0x5fc   : > { %v1436_v21 = vpack.c.bf16 %v1358_v30, %v1356_v56  ;;  %v2138_v30 = vld [vmem:[%s2244_s18 + $0x38] sm:$0xff] }
 0x5fe   : > { %1975 = vmatmul.msk.bf16.vlgmr.msra.gmra.mxu0 %vm794_vm11, %v1436_v21 }
 0x62d   : > { %v1381_v33 = vpop.f32.mrf.mxu1 }
 0x635   : > { %v1383_v34 = vpop.f32.mrf.mxu1 }
 0x636   : > { %v1437_v35 = vpack.c.bf16 %v1383_v34, %v1381_v33 }
 0x638   : > { %1976 = vmatmul.msk.bf16.gmra.mxu0 %vm794_vm11, %v1437_v35 }
 0x63c   : > { %v1406_v48 = vpop.f32.mrf.mxu2 }
 0x63d   : > { %v1514_v61 = vpop.f32.mrf.mxu1 }
 0x644   : > { %v1408_v59 = vpop.f32.mrf.mxu2 }
 0x645   : > { %v1438_v49 = vpack.c.bf16 %v1408_v59, %v1406_v48  ;;  %v1516_v23 = vpop.f32.mrf.mxu1 }
 0x648   : > { %1977 = vmatmul.msk.bf16.gmra.mxu0 %vm794_vm11, %v1438_v49  ;;  %v1431_v36 = vpop.f32.mrf.mxu3 }
 0x64d   : > { %v1519_v12 = vpop.f32.mrf.mxu1 }
 0x650   : > { %v1433_v31 = vpop.f32.mrf.mxu3 }
 0x651   : > { %v1439_v37 = vpack.c.bf16 %v1433_v31, %v1431_v36 }
 0x655   : > { %v1521_v32 = vpop.f32.mrf.mxu1 }
 0x658   : > { %1978 = vmatmul.msk.bf16.gmra.mxu0 %vm794_vm11, %v1439_v37 }
 0x65d   : > { %v1524_v51 = vpop.f32.mrf.mxu1 }
 0x665   : > { %v1526_v0 = vpop.f32.mrf.mxu1 }
 0x66d   : > { %v1529_v62 = vpop.f32.mrf.mxu1 }
 0x675   : > { %v1531_v16 = vpop.f32.mrf.mxu1 }
 0x67b   : > { %v1467_v42 = vpop.f32.mrf.mxu0 }
 0x67c   : > { %v1515_v43 = vadd.f32 %v1514_v61, %v1467_v42 }
 0x67e   : > { %v1534_v11 = vadd.f32 %v2131_v19, %v1515_v43 }
 0x680   : > { %v2681_v18 = vadd.f32 %v2670_v17, %v1534_v11 }
 0x682   : > { %1554 = vst.msk [vmem:[%s2678_s17] sm:$0xff] %vm492_vm0, %v2681_v18  ;;  %v1564_v5 = vsel %vm492_vm0, %v2681_v18, 0.0 }
 0x683   : > { %v1469_v25 = vpop.f32.mrf.mxu0  ;;  %1565 = vadd.xlane.f32.xlu2 %v1564_v5 }
 0x684   : > { %v1517_v4 = vadd.f32 %v1516_v23, %v1469_v25 }
 0x686   : > { %v1535_v26 = vadd.f32 %v2132_v14, %v1517_v4 }
 0x688   : > { %v2690_v27 = vadd.f32 %v2670_v17, %v1535_v26 }
 0x68a   : > { %1555 = vst.msk [vmem:[%s2678_s17 + $0x8] sm:$0xff] %vm492_vm0, %v2690_v27  ;;  %v1567_v38 = vsel %vm492_vm0, %v2690_v27, 0.0 }
 0x68b   : > { %1568 = vadd.xlane.f32.xlu1 %v1567_v38 }
 0x6b5   : > { %v1472_v39 = vpop.f32.mrf.mxu0 }
 0x6b6   : > { %v1520_v40 = vadd.f32 %v1519_v12, %v1472_v39 }
 0x6b8   : > { %v1536_v50 = vadd.f32 %v2133_v24, %v1520_v40 }
 0x6ba   : > { %v1548_v46 = vadd.f32 %v2670_v17, %v1536_v50 }
 0x6bc   : > { %1556 = vst.msk [vmem:[%s2678_s17 + $0x10] sm:$0xff] %vm492_vm0, %v1548_v46  ;;  %v1570_v15 = vsel %vm492_vm0, %v1548_v46, 0.0 }
 0x6bd   : > { %v1474_v20 = vpop.f32.mrf.mxu0  ;;  %1571 = vadd.xlane.f32.xlu0 %v1570_v15 }
 0x6be   : > { %v1522_v44 = vadd.f32 %v1521_v32, %v1474_v20 }
 0x6c0   : > { %v1537_v45 = vadd.f32 %v2134_v47, %v1522_v44 }
 0x6c2   : > { %v1549_v54 = vadd.f32 %v2670_v17, %v1537_v45 }
 0x6c4   : > { %1557 = vst.msk [vmem:[%s2678_s17 + $0x18] sm:$0xff] %vm492_vm0, %v1549_v54  ;;  %v1573_v55 = vsel %vm492_vm0, %v1549_v54, 0.0 }
 0x6c5   : > { %1574 = vadd.xlane.f32.xlu0 %v1573_v55  ;;  %v1477_v58 = vpop.f32.mrf.mxu0  ;;  %v2009_v55 = vld [vmem:[%s2873_s11 + $0x8] sm:$0xff] }
 0x6c6   : > { %v1525_v60 = vadd.f32 %v1524_v51, %v1477_v58  ;;  %1804 = vmatpush.bf16.msra.mxu2 %v2009_v55 }
 0x6c8   : > { %v1538_v52 = vadd.f32 %v2135_v63, %v1525_v60 }
 0x6ca   : > { %v1550_v1 = vadd.f32 %v2670_v17, %v1538_v52  ;;  %v2008_v52 = vld [vmem:[%s2873_s11] sm:$0xff] }
 0x6cb   : > { %1805 = vmatpush.bf16.msra.mxu2 %v2008_v52 }
 0x6cc   : > { %1558 = vst.msk [vmem:[%s2678_s17 + $0x20] sm:$0xff] %vm492_vm0, %v1550_v1  ;;  %v1576_v53 = vsel %vm492_vm0, %v1550_v1, 0.0 }
 0x6cd   : > { %1577 = vadd.xlane.f32.xlu2 %v1576_v53  ;;  %v1479_v3 = vpop.f32.mrf.mxu0 }
 0x6ce   : > { %v1527_v6 = vadd.f32 %v1526_v0, %v1479_v3 }
 0x6d0   : > { %v1539_v28 = vadd.f32 %v2136_v41, %v1527_v6 }
 0x6d2   : > { %v1551_v2 = vadd.f32 %v2670_v17, %v1539_v28 }
 0x6d4   : > { %1559 = vst.msk [vmem:[%s2678_s17 + $0x28] sm:$0xff] %vm492_vm0, %v1551_v2  ;;  %v1579_v29 = vsel %vm492_vm0, %v1551_v2, 0.0 }
 0x6d5   : > { %1580 = vadd.xlane.f32.xlu0 %v1579_v29  ;;  %v1482_v9 = vpop.f32.mrf.mxu0 }
 0x6d6   : > { %v1530_v8 = vadd.f32 %v1529_v62, %v1482_v9 }
 0x6d8   : > { %v1540_v13 = vadd.f32 %v2137_v57, %v1530_v8 }
 0x6da   : > { %v2719_v10 = vadd.f32 %v2670_v17, %v1540_v13 }
 0x6dc   : > { %1560 = vst.msk [vmem:[%s2678_s17 + $0x30] sm:$0xff] %vm492_vm0, %v2719_v10 }
 0x6dd   : > { %v1484_v7 = vpop.f32.mrf.mxu0 }
 0x6de   : > { %v1532_v56 = vadd.f32 %v1531_v16, %v1484_v7 }
 0x6e0   : > { %v1541_v21 = vadd.f32 %v2138_v30, %v1532_v56 }
 0x6e2   : > { %v1553_v33 = vadd.f32 %v2670_v17, %v1541_v21  ;;  %v1582_v17 = vsel %vm492_vm0, %v2719_v10, 0.0 }
 0x6e4   : > { %1561 = vst.msk [vmem:[%s2678_s17 + $0x38] sm:$0xff] %vm492_vm0, %v1553_v33  ;;  %v1585_v34 = vsel %vm492_vm0, %v1553_v33, 0.0  ;;  %s2841_s17 = scalar_lea.vmem %s2876_s14, %s2003_s27 }
 0x6e5   : > { %1586 = vadd.xlane.f32.xlu1 %v1585_v34 }
 0x6f6   : > { %v1566_v35 = vpop.xlane.xlu2 %1565 }
 0x6f7   : > { %v1588_v48 = vmul.f32 %v1566_v35, %v2262_v22 }
 0x6f9   : > { %v2731_v59 = vsub.f32 %v2681_v18, %v1588_v48 }
 0x6fb   : > { %v1604_v49 = vmul.f32 %v2731_v59, %v2731_v59 }
 0x6fd   : > { %v1612_v36 = vsel %vm492_vm0, %v1604_v49, 0.0  ;;  %v2799_v49 = vld [vmem:[%s2872_s10] ss:$0 sm:$0xff] }
 0x6fe   : > { %v1569_v31 = vpop.xlane.xlu1 %1568  ;;  %1613 = vadd.xlane.f32.xlu2 %v1612_v36 }
 0x6ff   : > { %v1589_v37 = vmul.f32 %v1569_v31, %v2262_v22 }
 0x701   : > { %v2738_v61 = vsub.f32 %v2690_v27, %v1589_v37 }
 0x703   : > { %v1605_v42 = vmul.f32 %v2738_v61, %v2738_v61 }
 0x705   : > { %v1615_v43 = vsel %vm492_vm0, %v1605_v42, 0.0 }
 0x706   : > { %1616 = vadd.xlane.f32.xlu0 %v1615_v43  ;;  %1583 = vadd.xlane.f32.xlu2 %v1582_v17 }
 0x730   : > { %v1572_v19 = vpop.xlane.xlu0 %1571 }
 0x731   : > { %v1590_v11 = vmul.f32 %v1572_v19, %v2262_v22 }
 0x733   : > { %v2746_v18 = vsub.f32 %v1548_v46, %v1590_v11 }
 0x735   : > { %v1606_v5 = vmul.f32 %v2746_v18, %v2746_v18 }
 0x737   : > { %v1618_v23 = vsel %vm492_vm0, %v1606_v5, 0.0 }
 0x738   : > { %1619 = vadd.xlane.f32.xlu0 %v1618_v23  ;;  %v1575_v25 = vpop.xlane.xlu0 %1574 }
 0x739   : > { %v1591_v4 = vmul.f32 %v1575_v25, %v2262_v22 }
 0x73b   : > { %v2752_v14 = vsub.f32 %v1549_v54, %v1591_v4 }
 0x73d   : > { %v1607_v26 = vmul.f32 %v2752_v14, %v2752_v14 }
 0x73f   : > { %v1621_v27 = vsel %vm492_vm0, %v1607_v26, 0.0 }
 0x740   : > { %v1578_v38 = vpop.xlane.xlu2 %1577  ;;  %1622 = vadd.xlane.f32.xlu2 %v1621_v27 }
 0x741   : > { %v1592_v12 = vmul.f32 %v1578_v38, %v2262_v22 }
 0x743   : > { %v2758_v32 = vsub.f32 %v1550_v1, %v1592_v12 }
 0x745   : > { %v1608_v39 = vmul.f32 %v2758_v32, %v2758_v32 }
 0x747   : > { %v1624_v40 = vsel %vm492_vm0, %v1608_v39, 0.0 }
 0x748   : > { %1625 = vadd.xlane.f32.xlu1 %v1624_v40  ;;  %v1581_v24 = vpop.xlane.xlu0 %1580 }
 0x749   : > { %v1593_v50 = vmul.f32 %v1581_v24, %v2262_v22 }
 0x74b   : > { %v2764_v46 = vsub.f32 %v1551_v2, %v1593_v50 }
 0x74d   : > { %v1609_v15 = vmul.f32 %v2764_v46, %v2764_v46 }
 0x74f   : > { %v1627_v20 = vsel %vm492_vm0, %v1609_v15, 0.0 }
 0x750   : > { %1628 = vadd.xlane.f32.xlu0 %v1627_v20 }
 0x758   : > { %v1587_v44 = vpop.xlane.xlu1 %1586 }
 0x759   : > { %v1595_v51 = vmul.f32 %v1587_v44, %v2262_v22 }
 0x75b   : > { %v2770_v47 = vsub.f32 %v1553_v33, %v1595_v51  ;;  %v2793_v33 = vld [vmem:[%s2871_s9] ss:$0 sm:$0xff] }
 0x75d   : > { %v1611_v45 = vmul.f32 %v2770_v47, %v2770_v47 }
 0x75f   : > { %v1633_v54 = vsel %vm492_vm0, %v1611_v45, 0.0 }
 0x760   : > { %1634 = vadd.xlane.f32.xlu1 %v1633_v54 }
 0x771   : > { %v1614_v58 = vpop.xlane.xlu2 %1613 }
 0x772   : > { %v1636_v60 = vmul.f32 %v1614_v58, %v2262_v22 }
 0x774   : > { %v1644_v63 = vadd.f32 1e-05, %v1636_v60 }
 0x776   : > { %2115 = vrsqrt.f32 %v1644_v63  ;;  %vm1658_vm13 = vweird.f32 %v1644_v63 }
 0x779   : > { %v1584_v0 = vpop.xlane.xlu2 %1583  ;;  %v1617_v1 = vpop.xlane.xlu0 %1616 }
 0x77a   : > { %v1594_v53 = vmul.f32 %v1584_v0, %v2262_v22  ;;  %v1637_v3 = vmul.f32 %v1617_v1, %v2262_v22 }
 0x77c   : > { %v2116_v6 = vpop.eup %2115  ;;  %v2785_v41 = vsub.f32 %v2719_v10, %v1594_v53  ;;  %v1645_v28 = vadd.f32 1e-05, %v1637_v3 }
 0x77d   : > { %v1653_v2 = vmul.f32 %v2116_v6, %v1644_v63  ;;  %vm1659_vm12 = vweird.f32 %v2116_v6 }
 0x77e   : > { %2117 = vrsqrt.f32 %v1645_v28  ;;  %v1610_v62 = vmul.f32 %v2785_v41, %v2785_v41  ;;  %vm1660_vm14 = vmor %vm1658_vm13, %vm1659_vm12  ;;  %vm1668_vm1 = vweird.f32 %v1645_v28 }
 0x77f   : > { %v1654_v29 = vmul.f32 %v2116_v6, %v1653_v2 }
 0x780   : > { %v1630_v9 = vsel %vm492_vm0, %v1610_v62, 0.0 }
 0x781   : > { %v1655_v8 = vmul.f32 0.5, %v1654_v29  ;;  %1631 = vadd.xlane.f32.xlu2 %v1630_v9 }
 0x783   : > { %v1656_v57 = vsub.f32 1.5, %v1655_v8 }
 0x784   : > { %v2118_v13 = vpop.eup %2117 }
 0x785   : > { %v1657_v16 = vmul.f32 %v2116_v6, %v1656_v57  ;;  %v1663_v7 = vmul.f32 %v2118_v13, %v1645_v28  ;;  %vm1669_vm15 = vweird.f32 %v2118_v13 }
 0x786   : > { %vm1670_vm2 = vmor %vm1668_vm1, %vm1669_vm15 }
 0x787   : > { %v1664_v56 = vmul.f32 %v2118_v13, %v1663_v7  ;;  %v1661_v10 = vsel %vm1660_vm14, %v2116_v6, %v1657_v16 }
 0x788   : > { %v1732_v34 = vmul.f32 %v1661_v10, %v2731_v59 }
 0x789   : > { %v1665_v30 = vmul.f32 0.5, %v1664_v56 }
 0x78a   : > { %v1743_v36 = vmul.f32 %v2793_v33, %v1732_v34 }
 0x78b   : > { %v1666_v21 = vsub.f32 1.5, %v1665_v30 }
 0x78c   : > { %v1754_v42 = vadd.f32 %v2799_v49, %v1743_v36 }
 0x78d   : > { %v1667_v35 = vmul.f32 %v2118_v13, %v1666_v21 }
 0x78f   : > { %v1671_v48 = vsel %vm1670_vm2, %v2118_v13, %v1667_v35 }
 0x790   : > { %v1733_v31 = vmul.f32 %v1671_v48, %v2738_v61 }
 0x792   : > { %v1744_v37 = vmul.f32 %v2793_v33, %v1733_v31 }
 0x794   : > { %v1755_v43 = vadd.f32 %v2799_v49, %v1744_v37 }
 0x796   : > { %v1762_v59 = vpack.c.bf16 %v1755_v43, %v1754_v42 }
 0x798   : > { %1995 = vmatmul.msk.bf16.vlgmr.msra.gmra.mxu2 %vm492_vm0, %v1762_v59 }
 0x7ab   : > { %v1620_v17 = vpop.xlane.xlu0 %1619 }
 0x7ac   : > { %v1638_v19 = vmul.f32 %v1620_v17, %v2262_v22 }
 0x7ae   : > { %v1646_v11 = vadd.f32 1e-05, %v1638_v19 }
 0x7b0   : > { %2119 = vrsqrt.f32 %v1646_v11  ;;  %vm1678_vm4 = vweird.f32 %v1646_v11 }
 0x7b3   : > { %v1623_v5 = vpop.xlane.xlu2 %1622 }
 0x7b4   : > { %v1639_v23 = vmul.f32 %v1623_v5, %v2262_v22 }
 0x7b6   : > { %v2120_v25 = vpop.eup %2119  ;;  %v1647_v4 = vadd.f32 1e-05, %v1639_v23 }
 0x7b7   : > { %v1673_v61 = vmul.f32 %v2120_v25, %v1646_v11  ;;  %vm1679_vm3 = vweird.f32 %v2120_v25 }
 0x7b8   : > { %2121 = vrsqrt.f32 %v1647_v4  ;;  %vm1680_vm5 = vmor %vm1678_vm4, %vm1679_vm3  ;;  %vm1688_vm7 = vweird.f32 %v1647_v4 }
 0x7b9   : > { %v1674_v26 = vmul.f32 %v2120_v25, %v1673_v61 }
 0x7bb   : > { %v1675_v27 = vmul.f32 0.5, %v1674_v26  ;;  %v1626_v38 = vpop.xlane.xlu1 %1625 }
 0x7bc   : > { %v1640_v12 = vmul.f32 %v1626_v38, %v2262_v22 }
 0x7bd   : > { %v1676_v39 = vsub.f32 1.5, %v1675_v27 }
 0x7be   : > { %v2122_v40 = vpop.eup %2121  ;;  %v1648_v24 = vadd.f32 1e-05, %v1640_v12 }
 0x7bf   : > { %v1677_v50 = vmul.f32 %v2120_v25, %v1676_v39  ;;  %v1683_v15 = vmul.f32 %v2122_v40, %v1647_v4  ;;  %vm1689_vm6 = vweird.f32 %v2122_v40 }
 0x7c0   : > { %2123 = vrsqrt.f32 %v1648_v24  ;;  %vm1690_vm8 = vmor %vm1688_vm7, %vm1689_vm6  ;;  %vm1698_vm10 = vweird.f32 %v1648_v24  ;;  %vm1835_vm6 = vcmask 519168  }
 0x7c1   : > { %v1684_v20 = vmul.f32 %v2122_v40, %v1683_v15  ;;  %v1681_v44 = vsel %vm1680_vm5, %v2120_v25, %v1677_v50 }
 0x7c2   : > { %v1734_v60 = vmul.f32 %v1681_v44, %v2746_v18 }
 0x7c3   : > { %v1685_v51 = vmul.f32 0.5, %v1684_v20  ;;  %v1629_v45 = vpop.xlane.xlu0 %1628 }
 0x7c4   : > { %v1641_v54 = vmul.f32 %v1629_v45, %v2262_v22  ;;  %v1745_v6 = vmul.f32 %v2793_v33, %v1734_v60 }
 0x7c5   : > { %v1686_v55 = vsub.f32 1.5, %v1685_v51 }
 0x7c6   : > { %v2124_v58 = vpop.eup %2123  ;;  %v1649_v63 = vadd.f32 1e-05, %v1641_v54  ;;  %v1756_v9 = vadd.f32 %v2799_v49, %v1745_v6 }
 0x7c7   : > { %v1687_v52 = vmul.f32 %v2122_v40, %v1686_v55  ;;  %v1693_v0 = vmul.f32 %v2124_v58, %v1648_v24  ;;  %vm1699_vm9 = vweird.f32 %v2124_v58 }
 0x7c8   : > { %2125 = vrsqrt.f32 %v1649_v63  ;;  %vm1700_vm11 = vmor %vm1698_vm10, %vm1699_vm9  ;;  %vm1708_vm13 = vweird.f32 %v1649_v63 }
 0x7c9   : > { %v1691_v1 = vsel %vm1690_vm8, %v2122_v40, %v1687_v52  ;;  %v1694_v53 = vmul.f32 %v2124_v58, %v1693_v0 }
 0x7ca   : > { %v1735_v3 = vmul.f32 %v1691_v1, %v2752_v14 }
 0x7cb   : > { %v1695_v28 = vmul.f32 0.5, %v1694_v53 }
 0x7cc   : > { %v1746_v2 = vmul.f32 %v2793_v33, %v1735_v3 }
 0x7cd   : > { %v1696_v62 = vsub.f32 1.5, %v1695_v28 }
 0x7ce   : > { %v2126_v29 = vpop.eup %2125  ;;  %v1757_v18 = vadd.f32 %v2799_v49, %v1746_v2 }
 0x7cf   : > { %v1697_v8 = vmul.f32 %v2124_v58, %v1696_v62  ;;  %v1703_v57 = vmul.f32 %v2126_v29, %v1649_v63  ;;  %vm1709_vm12 = vweird.f32 %v2126_v29 }
 0x7d0   : > { %v1763_v13 = vpack.c.bf16 %v1757_v18, %v1756_v9  ;;  %vm1710_vm14 = vmor %vm1708_vm13, %vm1709_vm12 }
 0x7d1   : > { %v1704_v16 = vmul.f32 %v2126_v29, %v1703_v57  ;;  %v1701_v14 = vsel %vm1700_vm11, %v2124_v58, %v1697_v8 }
 0x7d2   : > { %1996 = vmatmul.msk.bf16.gmra.mxu2 %vm492_vm0, %v1763_v13  ;;  %v1736_v10 = vmul.f32 %v1701_v14, %v2758_v32 }
 0x7d3   : > { %v1705_v7 = vmul.f32 0.5, %v1704_v16  ;;  %v1635_v48 = vpop.xlane.xlu1 %1634 }
 0x7d4   : > { %v1747_v35 = vmul.f32 %v2793_v33, %v1736_v10  ;;  %v1643_v42 = vmul.f32 %v1635_v48, %v2262_v22 }
 0x7d5   : > { %v1706_v56 = vsub.f32 1.5, %v1705_v7 }
 0x7d6   : > { %v1758_v31 = vadd.f32 %v2799_v49, %v1747_v35  ;;  %v1651_v32 = vadd.f32 1e-05, %v1643_v42 }
 0x7d7   : > { %v1707_v30 = vmul.f32 %v2126_v29, %v1706_v56 }
 0x7d8   : > { %2127 = vrsqrt.f32 %v1651_v32  ;;  %vm1728_vm1 = vweird.f32 %v1651_v32 }
 0x7d9   : > { %v1711_v21 = vsel %vm1710_vm14, %v2126_v29, %v1707_v30 }
 0x7da   : > { %v1737_v34 = vmul.f32 %v1711_v21, %v2764_v46 }
 0x7dc   : > { %v1748_v36 = vmul.f32 %v2793_v33, %v1737_v34 }
 0x7de   : > { %v1759_v37 = vadd.f32 %v2799_v49, %v1748_v36  ;;  %v2128_v59 = vpop.eup %2127 }
 0x7df   : > { %v1723_v17 = vmul.f32 %v2128_v59, %v1651_v32  ;;  %vm1729_vm15 = vweird.f32 %v2128_v59 }
 0x7e0   : > { %v1764_v43 = vpack.c.bf16 %v1759_v37, %v1758_v31  ;;  %vm1730_vm2 = vmor %vm1728_vm1, %vm1729_vm15 }
 0x7e1   : > { %v1724_v19 = vmul.f32 %v2128_v59, %v1723_v17 }
 0x7e2   : > { %1997 = vmatmul.msk.bf16.gmra.mxu2 %vm492_vm0, %v1764_v43 }
 0x7e3   : > { %v1725_v23 = vmul.f32 0.5, %v1724_v19 }
 0x7e5   : > { %v1726_v25 = vsub.f32 1.5, %v1725_v23 }
 0x7e7   : > { %v1727_v61 = vmul.f32 %v2128_v59, %v1726_v25 }
 0x7e9   : > { %v1731_v38 = vsel %vm1730_vm2, %v2128_v59, %v1727_v61 }
 0x7ea   : > { %v1739_v40 = vmul.f32 %v1731_v38, %v2770_v47  ;;  %v2032_v47 = vld [vmem:[%s2874_s12] ss:$0 sm:$0xff] }
 0x7ec   : > { %v1750_v15 = vmul.f32 %v2793_v33, %v1739_v40 }
 0x7ee   : > { %v1761_v51 = vadd.f32 %v2799_v49, %v1750_v15 }
 0x7f4   : > { %v1632_v46 = vpop.xlane.xlu2 %1631 }
 0x7f5   : > { %v1642_v11 = vmul.f32 %v1632_v46, %v2262_v22 }
 0x7f7   : > { %v1650_v5 = vadd.f32 1e-05, %v1642_v11 }
 0x7f9   : > { %2129 = vrsqrt.f32 %v1650_v5  ;;  %vm1718_vm4 = vweird.f32 %v1650_v5 }
 0x7ff   : > { %v2130_v4 = vpop.eup %2129 }
 0x800   : > { %v1713_v26 = vmul.f32 %v2130_v4, %v1650_v5  ;;  %vm1719_vm3 = vweird.f32 %v2130_v4 }
 0x801   : > { %vm1720_vm5 = vmor %vm1718_vm4, %vm1719_vm3 }
 0x802   : > { %v1714_v27 = vmul.f32 %v2130_v4, %v1713_v26 }
 0x804   : > { %v1715_v12 = vmul.f32 0.5, %v1714_v27 }
 0x806   : > { %v1716_v39 = vsub.f32 1.5, %v1715_v12 }
 0x808   : > { %v1717_v24 = vmul.f32 %v2130_v4, %v1716_v39 }
 0x80a   : > { %v1721_v22 = vsel %vm1720_vm5, %v2130_v4, %v1717_v24 }
 0x80b   : > { %v1738_v50 = vmul.f32 %v1721_v22, %v2785_v41 }
 0x80d   : > { %v1749_v20 = vmul.f32 %v2793_v33, %v1738_v50 }
 0x80f   : > { %v1760_v44 = vadd.f32 %v2799_v49, %v1749_v20 }
 0x811   : > { %v1765_v45 = vpack.c.bf16 %v1761_v51, %v1760_v44 }
 0x813   : > { %1998 = vmatmul.msk.bf16.gmra.mxu2 %vm492_vm0, %v1765_v45 }
 0x81b   : > { %v1807_v54 = vpop.f32.mrf.mxu2 }
 0x81c   : > { %v1808_v55 = vadd.f32 %v2032_v47, %v1807_v54 }
 0x81e   : > { %v1827_v41 = vpack.c.bf16 %v1808_v55, %v1808_v55 }
 0x820   : > { %1836 = vst.msk [vmem:[%s2841_s17] sm:$0xf] %vm1835_vm6, %v1827_v41 }
 0x823   : > { %v1809_v33 = vpop.f32.mrf.mxu2 }
 0x824   : > { %v1810_v49 = vadd.f32 %v2032_v47, %v1809_v33 }
 0x826   : > { %v1828_v58 = vpack.c.bf16 %v1810_v49, %v1810_v49 }
 0x828   : > { %1837 = vst.msk [vmem:[%s2841_s17 + $0x4] sm:$0xf] %vm1835_vm6, %v1828_v58 }
 0x855   : > { %v1812_v60 = vpop.f32.mrf.mxu2 }
 0x856   : > { %v1813_v63 = vadd.f32 %v2032_v47, %v1812_v60 }
 0x858   : > { %v1829_v52 = vpack.c.bf16 %v1813_v63, %v1813_v63 }
 0x85a   : > { %1838 = vst.msk [vmem:[%s2841_s17 + $0x8] sm:$0xf] %vm1835_vm6, %v1829_v52 }
 0x85d   : > { %v1814_v0 = vpop.f32.mrf.mxu2 }
 0x85e   : > { %v1815_v1 = vadd.f32 %v2032_v47, %v1814_v0 }
 0x860   : > { %v1830_v53 = vpack.c.bf16 %v1815_v1, %v1815_v1 }
 0x862   : > { %1839 = vst.msk [vmem:[%s2841_s17 + $0xc] sm:$0xf] %vm1835_vm6, %v1830_v53 }
 0x865   : > { %v1817_v3 = vpop.f32.mrf.mxu2 }
 0x866   : > { %v1818_v6 = vadd.f32 %v2032_v47, %v1817_v3 }
 0x868   : > { %v1831_v28 = vpack.c.bf16 %v1818_v6, %v1818_v6 }
 0x86a   : > { %1840 = vst.msk [vmem:[%s2841_s17 + $0x10] sm:$0xf] %vm1835_vm6, %v1831_v28 }
 0x86d   : > { %v1819_v2 = vpop.f32.mrf.mxu2 }
 0x86e   : > { %v1820_v62 = vadd.f32 %v2032_v47, %v1819_v2 }
 0x870   : > { %v1832_v29 = vpack.c.bf16 %v1820_v62, %v1820_v62 }
 0x872   : > { %1841 = vst.msk [vmem:[%s2841_s17 + $0x14] sm:$0xf] %vm1835_vm6, %v1832_v29 }
 0x896   : > { %v1822_v9 = vpop.f32.mrf.mxu2 }
 0x897   : > { %v1823_v18 = vadd.f32 %v2032_v47, %v1822_v9 }
 0x899   : > { %v1833_v8 = vpack.c.bf16 %v1823_v18, %v1823_v18 }
 0x89b   : > { %1842 = vst.msk [vmem:[%s2841_s17 + $0x18] sm:$0xf] %vm1835_vm6, %v1833_v8 }
 0x89e   : > { %v1824_v57 = vpop.f32.mrf.mxu2 }
 0x89f   : > { %v1825_v13 = vadd.f32 %v2032_v47, %v1824_v57 }
 0x8a1   : > { %v1834_v16 = vpack.c.bf16 %v1825_v13, %v1825_v13 }
 0x8a3   : > { %1843 = vst.msk [vmem:[%s2841_s17 + $0x1c] sm:$0xf] %vm1835_vm6, %v1834_v16 }
 0x8a4 PF: > { %s25_s29 = sadd.s32 1, %s2145_s29  }
 0x8a5   : > { %p22_p4 = scmp.ge.s32.totalorder %s25_s29, 4  }
 0x8a7   :  { %24 = sbr.rel (!%p22_p4) target bundleno = 1 (0x1), region = 114 }

// kernel: _lambda_.19
= control target key start
LH: loop header
LB: loop body
LE: loop exit
PB: predicated region body
PF: predicated region fallthrough
CT: control target
= control target key end

     0   :  { %s320_s0 = inlined_call_operand.vmem [shape: bf16[32,128], index: 0, kind: input, shape index: {}]   ;;  %s321_s1 = inlined_call_operand.vmem [shape: bf16[128,64], index: 1, kind: input, shape index: {}]   ;;  %s322_s2 = inlined_call_operand.vmem [shape: f32[1,64], index: 2, kind: input, shape index: {}]   ;;  %s323_s3 = inlined_call_operand.vmem [shape: f32[32,64], index: 3, kind: input, shape index: {}]   ;;  %s324_s4 = inlined_call_operand.hbm [shape: f32[32,64], index: 4, kind: output, shape index: {}]  }
   0x1   :  { %v201_v0 = vld [vmem:[%s321_s1 + $0x38] sm:$0xff]  ;;  %v200_v1 = vld [vmem:[%s321_s1 + $0x30] sm:$0xff] }
   0x2   :  { %102 = vmatpush.bf16.msra.mxu0 %v201_v0  ;;  %202 = vmatpush.bf16.msra.mxu1 %v201_v0 }
   0x3   :  { %9 = vsyncpa [#allocation3], 0  ;;  %v199_v2 = vld [vmem:[%s321_s1 + $0x28] sm:$0xff]  ;;  %v198_v3 = vld [vmem:[%s321_s1 + $0x20] sm:$0xff]  ;;  %vm129_vm0 = vcmask 523264   ;;  %s240_s16 = smov [#allocation2]  }
   0x4   :  { %v197_v4 = vld [vmem:[%s321_s1 + $0x18] sm:$0xff]  ;;  %v196_v5 = vld [vmem:[%s321_s1 + $0x10] sm:$0xff]  ;;  %v195_v6 = vld [vmem:[%s321_s1 + $0x8] sm:$0xff]  ;;  %s138_s17 = sshll.u32 %s240_s16, 4  ;;  %s140_s20 = sshll.u32 %s324_s4, 4  ;;  %s139_s17 = int_to_ptr.vmem [resolvable:$true] %s138_s17  ;;  %s141_s20 = int_to_ptr.hbm [resolvable:$true] %s140_s20 }
   0x5   :  { %v194_v7 = vld [vmem:[%s321_s1] sm:$0xff]  ;;  %v193_v9 = vld [vmem:[%s320_s0 + $0x8] sm:$0xff]  ;;  %v123_v14 = vld [vmem:[%s323_s3 + $0x10] sm:$0xff]  ;;  %s241_s21 = smov 128   ;;  %s242_s22 = smov 8  }
   0x6   :  { %103 = vmatpush.bf16.msra.mxu0 %v200_v1  ;;  %203 = vmatpush.bf16.msra.mxu1 %v200_v1  ;;  %v192_v8 = vld [vmem:[%s320_s0] sm:$0xff]  ;;  %v122_v20 = vld [vmem:[%s323_s3 + $0x8] sm:$0xff]  ;;  %v124_v22 = vld [vmem:[%s323_s3 + $0x18] sm:$0xff] }
   0x7   :  { %v213_v10 = vld [vmem:[%s322_s2] ss:$0 sm:$0xff] }
   0x8   :  { %v121_v12 = vld [vmem:[%s323_s3] sm:$0xff] }
   0xa   :  { %104 = vmatpush.bf16.msra.mxu0 %v199_v2  ;;  %204 = vmatpush.bf16.msra.mxu1 %v199_v2 }
   0xe   :  { %105 = vmatpush.bf16.msra.mxu0 %v198_v3  ;;  %205 = vmatpush.bf16.msra.mxu1 %v198_v3 }
  0x12   :  { %106 = vmatpush.bf16.msra.mxu0 %v197_v4  ;;  %206 = vmatpush.bf16.msra.mxu1 %v197_v4 }
  0x16   :  { %107 = vmatpush.bf16.msra.mxu0 %v196_v5  ;;  %207 = vmatpush.bf16.msra.mxu1 %v196_v5 }
  0x1a   :  { %108 = vmatpush.bf16.msra.mxu0 %v195_v6  ;;  %208 = vmatpush.bf16.msra.mxu1 %v195_v6 }
  0x1e   :  { %109 = vmatpush.bf16.msra.mxu0 %v194_v7  ;;  %209 = vmatpush.bf16.msra.mxu1 %v194_v7 }
  0x21   :  { %110 = vmatmul.bf16.vlgmr.msra.gmra.mxu0 %v192_v8  ;;  %115 = vmatmul.bf16.vlgmr.msra.gmra.mxu1 %v193_v9 }
  0x9e   :  { %v111_v11 = vpop.f32.mrf.mxu0  ;;  %v116_v13 = vpop.f32.mrf.mxu1 }
  0x9f   :  { %v112_v15 = vadd.f32 %v213_v10, %v111_v11  ;;  %v117_v16 = vadd.f32 %v213_v10, %v116_v13 }
  0xa1   :  { %v125_v17 = vadd.f32 %v121_v12, %v112_v15  ;;  %v127_v18 = vadd.f32 %v123_v14, %v117_v16 }
  0xa3   :  { %130 = vst.msk [vmem:[#allocation2] sm:$0xff] %vm129_vm0, %v125_v17 }
  0xa4   :  { %132 = vst.msk [vmem:[#allocation2 + $0x10] sm:$0xff] %vm129_vm0, %v127_v18 }
  0xa6   :  { %v113_v19 = vpop.f32.mrf.mxu0  ;;  %v118_v21 = vpop.f32.mrf.mxu1 }
  0xa7   :  { %v114_v23 = vadd.f32 %v213_v10, %v113_v19  ;;  %v119_v24 = vadd.f32 %v213_v10, %v118_v21 }
  0xa9   :  { %v126_v25 = vadd.f32 %v122_v20, %v114_v23  ;;  %v128_v26 = vadd.f32 %v124_v22, %v119_v24 }
  0xab   :  { %131 = vst.msk [vmem:[#allocation2 + $0x8] sm:$0xff] %vm129_vm0, %v126_v25 }
  0xac   :  { %133 = vst.msk [vmem:[#allocation2 + $0x18] sm:$0xff] %vm129_vm0, %v128_v26 }
  0xad   :  { %146 = dma.vmem_to_hbm [thread:$0]  %s139_s17, 512, %s141_s20, [#allocation3], %s241_s21, %s241_s21, %s242_s22  }
  0xae   :  { %238 = dma.done.wait [#allocation3], 512  }
  0xaf   :  { %239 = vsyncadd [#allocation3], 4294966784 }
  0xb0   :  { %151 = vsyncpa [#allocation3], 1 }

// kernel: _lambda_.16
= control target key start
LH: loop header
LB: loop body
LE: loop exit
PB: predicated region body
PF: predicated region fallthrough
CT: control target
= control target key end

     0   :  { %s1520_s25 = smov 0   ;;  %s1758_s0 = inlined_call_operand.vmem [shape: f32[2,16,64], index: 0, kind: input, shape index: {}]   ;;  %s1759_s1 = inlined_call_operand.vmem [shape: f32[1,64], index: 1, kind: input, shape index: {}, may-alias: {1,8}]   ;;  %s1760_s2 = inlined_call_operand.vmem [shape: f32[1,64], index: 2, kind: input, shape index: {}, may-alias: {2,7,9}]   ;;  %s1761_s3 = inlined_call_operand.vmem [shape: bf16[64,192], index: 3, kind: input, shape index: {}]   ;;  %s1762_s4 = inlined_call_operand.vmem [shape: f32[1,192], index: 4, kind: input, shape index: {}]   ;;  %s1763_s5 = inlined_call_operand.vmem [shape: f32[4,16,16], index: 5, kind: input, shape index: {}]   ;;  %s1764_s6 = inlined_call_operand.vmem [shape: bf16[64,64], index: 6, kind: input, shape index: {}]   ;;  %s1765_s7 = inlined_call_operand.vmem [shape: f32[1,64], index: 7, kind: input, shape index: {}, may-alias: {2,7,9}]   ;;  %s1766_s8 = inlined_call_operand.vmem [shape: f32[1,64], index: 8, kind: input, shape index: {}, may-alias: {1,8}]   ;;  %s1767_s9 = inlined_call_operand.vmem [shape: f32[1,64], index: 9, kind: input, shape index: {}, may-alias: {2,7,9}]   ;;  %s1768_s10 = inlined_call_operand.vmem [shape: bf16[64,128], index: 10, kind: input, shape index: {}]   ;;  %s1769_s11 = inlined_call_operand.vmem [shape: f32[1,128], index: 11, kind: input, shape index: {}]   ;;  %s1770_s12 = inlined_call_operand.vmem [shape: f32[2,16,64], index: 12, kind: output, shape index: {0}]   ;;  %s1771_s13 = inlined_call_operand.vmem [shape: bf16[2,16,128], index: 13, kind: output, shape index: {1}]  }
   0x1 LB: > { %s1254_s26 = sadd.s32 4294967295, %s1440_s25   ;;  %p1258_p0 = scmp.ge.s32.totalorder %s1440_s25, 1  ;;  %s1440_s25 = sphi %s1520_s25, %s24_s25  }
   0x2   : > { %p390_p1 = scmp.lt.s32.totalorder %s1440_s25, 3 }
   0x4   : > { %p391_p2 = pnand %p1258_p0, %p390_p1 }
   0x5   : > { %p439_p3 = scmp.lt.s32.totalorder (!%p391_p2), %s1254_s26, 1  ;;  %s1443_s24 = smov (!%p391_p2), 64  }
   0x6   : > { %394 = sbr.rel (%p391_p2) target bundleno = 2207 (0x89f), region = 68  ;;  %s1444_s15 = smov (!%p391_p2), 16  }
   0x7   : > { %s1445_s18 = smov (!%p391_p2), 48   ;;  %s1446_s19 = smov (!%p391_p2), 112  }
   0x8   : > { %s1447_s20 = smov (!%p391_p2), 32   ;;  %s1448_s21 = smov (!%p391_p2), 96  }
   0x9   : > { %s1449_s22 = smov (!%p391_p2), 80  }
   0xb   : > { %s1773_s26 = smov (!%p439_p3, %s1254_s26), 1  ;;  %vm459_vm0 = vcmask 523264   ;;  %v1442_v4 = vmov 64.0   ;;  %v1291_v21 = vld [vmem:[%s1761_s3 + $0x30] sm:$0xf]  ;;  %vm632_vm8 = vcmask 130048  }
   0xc   : > { %s1346_s27 = sshll.u32 %s1773_s26, 4  ;;  %1392 = vrcp.f32 %v1442_v4  ;;  %v1356_v22 = vld [vmem:[%s1761_s3 + $0x34] sm:$0xf0]  ;;  %v1355_v23 = vld [vmem:[%s1761_s3 + $0x34] sm:$0xf] }
   0xd   : > { %s443_s30 = scalar_lea.vmem %s1758_s0, %s1346_s27  ;;  %v1292_v24 = vor.u32 %v1356_v22, %v1291_v21  ;;  %v1293_v25 = vld [vmem:[%s1761_s3 + $0x38] sm:$0xf0]  ;;  %v1283_v27 = vld [vmem:[%s1761_s3 + $0x20] sm:$0xf]  ;;  %v1354_v28 = vld [vmem:[%s1761_s3 + $0x24] sm:$0xf0]  ;;  %s448_s17 = scalar_lea.vmem %s1770_s12, %s1346_s27 }
   0xe   : > { %v1536_v0 = vld [vmem:[%s443_s30] sm:$0xff]  ;;  %v1540_v2 = vld [vmem:[%s443_s30 + $0x8] sm:$0xff]  ;;  %v1296_v26 = vor.u32 %v1355_v23, %v1293_v25  ;;  %v1284_v30 = vor.u32 %v1354_v28, %v1283_v27  ;;  %v1275_v33 = vld [vmem:[%s1761_s3 + $0x10] sm:$0xf] }
   0xf   : > { %v460_v1 = vsel %vm459_vm0, %v1536_v0, 0.0  ;;  %v463_v3 = vsel %vm459_vm0, %v1540_v2, 0.0  ;;  %583 = vmatpush.bf16.msra.mxu0 %v1292_v24  ;;  %v1353_v29 = vld [vmem:[%s1761_s3 + $0x24] sm:$0xf]  ;;  %v1285_v31 = vld [vmem:[%s1761_s3 + $0x28] sm:$0xf0] }
  0x10   : > { %461 = vadd.xlane.f32.xlu0 %v460_v1  ;;  %597 = vmatpush.bf16.msra.mxu1 %v1296_v26  ;;  %v1288_v32 = vor.u32 %v1353_v29, %v1285_v31  ;;  %v1352_v34 = vld [vmem:[%s1761_s3 + $0x14] sm:$0xf0]  ;;  %v1351_v35 = vld [vmem:[%s1761_s3 + $0x14] sm:$0xf]  ;;  %v1277_v37 = vld [vmem:[%s1761_s3 + $0x18] sm:$0xf0] }
  0x11   : > { %v1276_v36 = vor.u32 %v1352_v34, %v1275_v33  ;;  %v1280_v38 = vor.u32 %v1351_v35, %v1277_v37  ;;  %v1267_v39 = vld [vmem:[%s1761_s3] sm:$0xf]  ;;  %v1350_v40 = vld [vmem:[%s1761_s3 + $0x4] sm:$0xf0]  ;;  %v1349_v41 = vld [vmem:[%s1761_s3 + $0x4] sm:$0xf] }
  0x12   : > { %v1393_v5 = vpop.eup %1392  ;;  %v1268_v43 = vor.u32 %v1350_v40, %v1267_v39  ;;  %v1269_v44 = vld [vmem:[%s1761_s3 + $0x8] sm:$0xf0]  ;;  %v1386_v1 = vld [vmem:[%s1759_s1] ss:$0 sm:$0xff] }
  0x13   : > { %v467_v6 = vmul.f32 64.0, %v1393_v5  ;;  %vm471_vm1 = vweird.f32 %v1393_v5  ;;  %584 = vmatpush.bf16.msra.mxu0 %v1284_v30  ;;  %v1272_v46 = vor.u32 %v1349_v41, %v1269_v44  ;;  %v607_v37 = vld [vmem:[%s1763_s5] sm:$0xff] }
  0x14   : > { %598 = vmatpush.bf16.msra.mxu1 %v1288_v32 }
  0x15   : > { %v468_v7 = vsub.f32 1.0, %v467_v6 }
  0x17   : > { %v469_v8 = vmul.f32 %v1393_v5, %v468_v7  ;;  %585 = vmatpush.bf16.msra.mxu0 %v1276_v36  ;;  %v1387_v7 = vld [vmem:[%s1760_s2] ss:$0 sm:$0xff] }
  0x18   : > { %464 = vadd.xlane.f32.xlu0 %v463_v3  ;;  %599 = vmatpush.bf16.msra.mxu1 %v1280_v38 }
  0x19   : > { %v470_v9 = vadd.f32 %v1393_v5, %v469_v8 }
  0x1b   : > { %v1544_v10 = vsel %vm471_vm1, %v1393_v5, %v470_v9  ;;  %586 = vmatpush.bf16.msra.mxu0 %v1268_v43 }
  0x1c   : > { %600 = vmatpush.bf16.msra.mxu1 %v1272_v46  ;;  %v1357_v46 = vld [vmem:[%s1764_s6] sm:$0xff] }
  0x20   : > { %829 = vmatpush.bf16.msrb.mxu1 %v1357_v46 }
  0x83   : > { %v462_v11 = vpop.xlane.xlu0 %461 }
  0x84   : > { %v473_v12 = vmul.f32 %v1544_v10, %v462_v11 }
  0x86   : > { %v1548_v13 = vsub.f32 %v1536_v0, %v473_v12 }
  0x88   : > { %v477_v14 = vmul.f32 %v1548_v13, %v1548_v13 }
  0x8a   : > { %v479_v15 = vsel %vm459_vm0, %v477_v14, 0.0 }
  0x8b   : > { %480 = vadd.xlane.f32.xlu1 %v479_v15  ;;  %v465_v16 = vpop.xlane.xlu0 %464 }
  0x8c   : > { %v474_v17 = vmul.f32 %v1544_v10, %v465_v16 }
  0x8e   : > { %v1555_v18 = vsub.f32 %v1540_v2, %v474_v17 }
  0x90   : > { %v478_v19 = vmul.f32 %v1555_v18, %v1555_v18 }
  0x92   : > { %v482_v20 = vsel %vm459_vm0, %v478_v19, 0.0 }
  0x93   : > { %483 = vadd.xlane.f32.xlu1 %v482_v20 }
  0xfe   : > { %v481_v42 = vpop.xlane.xlu1 %480 }
  0xff   : > { %v485_v45 = vmul.f32 %v481_v42, %v1544_v10  ;;  %v608_v42 = vld [vmem:[%s1763_s5 + $0x8] sm:$0xff] }
 0x101   : > { %v487_v47 = vadd.f32 1e-05, %v485_v45 }
 0x103   : > { %1394 = vrsqrt.f32 %v487_v47  ;;  %vm495_vm3 = vweird.f32 %v487_v47 }
 0x106   : > { %v484_v48 = vpop.xlane.xlu1 %483 }
 0x107   : > { %v486_v49 = vmul.f32 %v484_v48, %v1544_v10 }
 0x109   : > { %v1395_v50 = vpop.eup %1394  ;;  %v488_v51 = vadd.f32 1e-05, %v486_v49 }
 0x10a   : > { %v490_v52 = vmul.f32 %v1395_v50, %v487_v47  ;;  %vm496_vm2 = vweird.f32 %v1395_v50 }
 0x10b   : > { %1396 = vrsqrt.f32 %v488_v51  ;;  %vm497_vm4 = vmor %vm495_vm3, %vm496_vm2  ;;  %vm505_vm6 = vweird.f32 %v488_v51 }
 0x10c   : > { %v491_v53 = vmul.f32 %v1395_v50, %v490_v52 }
 0x10e   : > { %v492_v54 = vmul.f32 0.5, %v491_v53 }
 0x110   : > { %v493_v55 = vsub.f32 1.5, %v492_v54 }
 0x111   : > { %v1397_v56 = vpop.eup %1396 }
 0x112   : > { %v494_v57 = vmul.f32 %v1395_v50, %v493_v55  ;;  %v500_v58 = vmul.f32 %v1397_v56, %v488_v51  ;;  %vm506_vm5 = vweird.f32 %v1397_v56 }
 0x113   : > { %vm507_vm7 = vmor %vm505_vm6, %vm506_vm5 }
 0x114   : > { %v501_v59 = vmul.f32 %v1397_v56, %v500_v58  ;;  %v498_v60 = vsel %vm497_vm4, %v1395_v50, %v494_v57 }
 0x115   : > { %v509_v63 = vmul.f32 %v498_v60, %v1548_v13  ;;  %v530_v13 = vld [vmem:[%s1762_s4] sm:$0x3] }
 0x116   : > { %v502_v61 = vmul.f32 0.5, %v501_v59  ;;  %v532_v16 = vperm.slane %v530_v13, 0  ;;  %v533_v17 = vperm.slane %v530_v13, 1 }
 0x117   : > { %v514_v6 = vmul.f32 %v1386_v1, %v509_v63 }
 0x118   : > { %v503_v62 = vsub.f32 1.5, %v502_v61 }
 0x119   : > { %v519_v9 = vadd.f32 %v1387_v7, %v514_v6 }
 0x11a   : > { %v504_v3 = vmul.f32 %v1397_v56, %v503_v62 }
 0x11c   : > { %v508_v4 = vsel %vm507_vm7, %v1397_v56, %v504_v3 }
 0x11d   : > { %v510_v5 = vmul.f32 %v508_v4, %v1555_v18 }
 0x11f   : > { %v515_v8 = vmul.f32 %v1386_v1, %v510_v5 }
 0x121   : > { %v520_v11 = vadd.f32 %v1387_v7, %v515_v8 }
 0x123   : > { %v521_v12 = vpack.c.bf16 %v520_v11, %v519_v9 }
 0x125   : > { %1297 = vmatmul.msk.bf16.vlgmr.msra.gmra.mxu0 %vm459_vm0, %v521_v12  ;;  %1298 = vmatmul.msk.bf16.vlgmr.msra.gmra.mxu1 %vm459_vm0, %v521_v12 }
 0x1a2   : > { %v588_v14 = vpop.f32.mrf.mxu0  ;;  %v602_v15 = vpop.f32.mrf.mxu1 }
 0x1a3   : > { %v589_v18 = vadd.f32 %v588_v14, %v532_v16  ;;  %v603_v19 = vadd.f32 %v602_v15, %v533_v17 }
 0x1a5   : > { %v623_v22 = vpack.c.bf16 %v589_v18, %v589_v18  ;;  %v681_v23 = vpack.c.bf16 %v603_v19, %v603_v19  ;;  %v609_v19 = vld [vmem:[%s1763_s5 + $0x10] sm:$0xff] }
 0x1a7   : > { %v627_v28 = vunpack.c.l.b16 %v623_v22  ;;  %v690_v29 = vunpack.c.l.b16 %v681_v23 }
 0x1aa   : > { %v590_v20 = vpop.f32.mrf.mxu0  ;;  %v604_v21 = vpop.f32.mrf.mxu1 }
 0x1ab   : > { %v591_v24 = vadd.f32 %v590_v20, %v532_v16  ;;  %v605_v25 = vadd.f32 %v604_v21, %v533_v17 }
 0x1ad   : > { %v624_v26 = vpack.c.bf16 %v591_v24, %v591_v24  ;;  %v682_v27 = vpack.c.bf16 %v605_v25, %v605_v25  ;;  %v610_v24 = vld [vmem:[%s1763_s5 + $0x18] sm:$0xff] }
 0x1af   : > { %v628_v30 = vunpack.c.l.b16 %v624_v26  ;;  %v691_v31 = vunpack.c.l.b16 %v682_v27 }
 0x1b1   : > { %v629_v32 = vpack.c.b16 %v628_v30, %v627_v28  ;;  %v1623_v33 = vpack.c.b16 %v691_v31, %v690_v29  ;;  %v611_v30 = vld [vmem:[%s1763_s5 + $0x20] sm:$0xff] }
 0x1b3   : > { %704 = vmatpush.bf16.msra.mxu3 %v1623_v33  ;;  %630 = vrot.lane.b32.xlu2 %v629_v32, %s1443_s24 }
 0x20d   : > { %v631_v34 = vpop.permute.xlu2 %630 }
 0x20e   : > { %v637_v35 = vsel %vm632_vm8, %v631_v34, 0 }
 0x20f   : > { %646 = vmatpush.bf16.xpose.msra.mxu2 %v637_v35 }
 0x216   : > { %1299 = vmatmul.msk.bf16.vlgmr.msra.gmra.mxu2 %vm632_vm8, %v629_v32 }
 0x299   : > { %v648_v36 = vpop.f32.mrf.mxu2 }
 0x29a   : > { %v653_v38 = vmul.f32 0.25, %v648_v36 }
 0x29c   : > { %v655_v39 = vadd.f32 %v653_v38, %v607_v37 }
 0x29e   : > { %v657_v40 = vsel %vm632_vm8, %v655_v39, -inf }
 0x29f   : > { %658 = vmax.xlane.f32.xlu2 %v657_v40 }
 0x2a1   : > { %v650_v41 = vpop.f32.mrf.mxu2 }
 0x2a2   : > { %v654_v43 = vmul.f32 0.25, %v650_v41 }
 0x2a4   : > { %v656_v44 = vadd.f32 %v654_v43, %v608_v42 }
 0x2a6   : > { %v660_v45 = vsel %vm632_vm8, %v656_v44, -inf }
 0x2a7   : > { %661 = vmax.xlane.f32.xlu0 %v660_v45 }
 0x2b7   : > { %941 = vrot.lane.b32.xlu2 %v629_v32, %s1444_s15 }
 0x312   : > { %v659_v47 = vpop.xlane.xlu2 %658 }
 0x313   : > { %v663_v48 = vsub.f32 %v655_v39, %v659_v47 }
 0x315   : > { %v665_v49 = vmul.f32 1.442695, %v663_v48 }
 0x317   : > { %1398 = vpow2.f32 %v665_v49 }
 0x31a   : > { %v942_v50 = vpop.permute.xlu2 %941  ;;  %v662_v51 = vpop.xlane.xlu0 %661 }
 0x31b   : > { %v947_v52 = vsel %vm632_vm8, %v942_v50, 0  ;;  %v664_v53 = vsub.f32 %v656_v44, %v662_v51  ;;  %v613_v44 = vld [vmem:[%s1763_s5 + $0x30] sm:$0xff]  ;;  %v614_v50 = vld [vmem:[%s1763_s5 + $0x38] sm:$0xff] }
 0x31c   : > { %956 = vmatpush.bf16.xpose.msra.mxu1 %v947_v52 }
 0x31d   : > { %v1399_v54 = vpop.eup %1398  ;;  %v667_v55 = vmul.f32 1.442695, %v664_v53 }
 0x31e   : > { %v669_v56 = vsel %vm632_vm8, %v1399_v54, 0.0 }
 0x31f   : > { %1400 = vpow2.f32 %v667_v55  ;;  %670 = vadd.xlane.f32.xlu1 %v669_v56 }
 0x325   : > { %v1401_v57 = vpop.eup %1400 }
 0x326   : > { %v672_v58 = vsel %vm632_vm8, %v1401_v57, 0.0 }
 0x327   : > { %673 = vadd.xlane.f32.xlu0 %v672_v58 }
 0x338   : > { %714 = vrot.lane.b32.xlu1 %v629_v32, %s1445_s18 }
 0x33b   : > { %712 = vrot.lane.b32.xlu0 %v629_v32, %s1446_s19 }
 0x340   : > { %838 = vrot.lane.b32.xlu1 %v629_v32, %s1447_s20 }
 0x343   : > { %836 = vrot.lane.b32.xlu0 %v629_v32, %s1448_s21 }
 0x348   : > { %939 = vrot.lane.b32.xlu1 %v629_v32, %s1449_s22 }
 0x392   : > { %v671_v59 = vpop.xlane.xlu1 %670 }
 0x393   : > { %1402 = vrcp.f32 %v671_v59 }
 0x399   : > { %v1403_v61 = vpop.eup %1402 }
 0x39a   : > { %v674_v60 = vpop.xlane.xlu0 %673  ;;  %v677_v62 = vmul.f32 %v1403_v61, %v1399_v54  ;;  %v612_v61 = vld [vmem:[%s1763_s5 + $0x28] sm:$0xff] }
 0x39b   : > { %1404 = vrcp.f32 %v674_v60 }
 0x39c   : > { %v679_v3 = vpack.c.bf16 %v677_v62, %v677_v62 }
 0x39e   : > { %v685_v5 = vunpack.c.l.b16 %v679_v3 }
 0x3a1   : > { %v1405_v63 = vpop.eup %1404 }
 0x3a2   : > { %v678_v1 = vmul.f32 %v1405_v63, %v1401_v57 }
 0x3a4   : > { %v680_v4 = vpack.c.bf16 %v678_v1, %v678_v1 }
 0x3a6   : > { %v686_v6 = vunpack.c.l.b16 %v680_v4 }
 0x3a8   : > { %v687_v7 = vpack.c.b16 %v686_v6, %v685_v5 }
 0x3aa   : > { %v715_v8 = vpop.permute.xlu1 %714  ;;  %1300 = vmatmul.msk.bf16.vlgmr.msra.gmra.mxu3 %vm632_vm8, %v687_v7 }
 0x3ab   : > { %v720_v9 = vsel %vm632_vm8, %v715_v8, 0 }
 0x3ac   : > { %729 = vmatpush.bf16.xpose.msrb.mxu3 %v720_v9 }
 0x3ad   : > { %v713_v13 = vpop.permute.xlu0 %712 }
 0x3b2   : > { %v839_v11 = vpop.permute.xlu1 %838 }
 0x3b3   : > { %v844_v12 = vsel %vm632_vm8, %v839_v11, 0 }
 0x3b4   : > { %853 = vmatpush.bf16.xpose.msra.mxu3 %v844_v12 }
 0x3b5   : > { %v837_v14 = vpop.permute.xlu0 %836 }
 0x3ba   : > { %1301 = vmatmul.msk.bf16.vlgmr.msrb.gmra.mxu3 %vm632_vm8, %v713_v13  ;;  %v940_v26 = vpop.permute.xlu1 %939 }
 0x3ca   : > { %1313 = vmatmul.msk.bf16.vlgmr.msra.gmra.mxu3 %vm632_vm8, %v837_v14 }
 0x42d   : > { %v706_v15 = vpop.f32.mrf.mxu3 }
 0x435   : > { %v708_v16 = vpop.f32.mrf.mxu3 }
 0x436   : > { %v711_v17 = vpack.c.bf16 %v708_v16, %v706_v15 }
 0x438   : > { %1312 = vmatmul.msk.bf16.vlgmr.msrb.gmra.mxu1 %vm632_vm8, %v711_v17 }
 0x43d   : > { %v731_v18 = vpop.f32.mrf.mxu3 }
 0x43e   : > { %v736_v20 = vmul.f32 0.25, %v731_v18 }
 0x440   : > { %v738_v21 = vadd.f32 %v736_v20, %v609_v19 }
 0x442   : > { %v740_v22 = vsel %vm632_vm8, %v738_v21, -inf }
 0x443   : > { %741 = vmax.xlane.f32.xlu0 %v740_v22 }
 0x445   : > { %v733_v23 = vpop.f32.mrf.mxu3 }
 0x446   : > { %v737_v25 = vmul.f32 0.25, %v733_v23 }
 0x448   : > { %1320 = vmatmul.msk.bf16.vlgmr.msra.gmra.mxu1 %vm632_vm8, %v940_v26  ;;  %v739_v27 = vadd.f32 %v737_v25, %v610_v24 }
 0x44a   : > { %v743_v28 = vsel %vm632_vm8, %v739_v27, -inf }
 0x44b   : > { %744 = vmax.xlane.f32.xlu1 %v743_v28 }
 0x44d   : > { %v855_v29 = vpop.f32.mrf.mxu3 }
 0x44e   : > { %v860_v31 = vmul.f32 0.25, %v855_v29 }
 0x450   : > { %v862_v32 = vadd.f32 %v860_v31, %v611_v30 }
 0x452   : > { %v864_v34 = vsel %vm632_vm8, %v862_v32, -inf }
 0x453   : > { %865 = vmax.xlane.f32.xlu1 %v864_v34 }
 0x455   : > { %v857_v55 = vpop.f32.mrf.mxu3 }
 0x456   : > { %v861_v58 = vmul.f32 0.25, %v857_v55 }
 0x458   : > { %v863_v63 = vadd.f32 %v861_v58, %v612_v61 }
 0x45a   : > { %v867_v1 = vsel %vm632_vm8, %v863_v63, -inf }
 0x4b5   : > { %v1664_v35 = vpop.f32.mrf.mxu1 }
 0x4b6   : > { %v742_v37 = vpop.xlane.xlu0 %741 }
 0x4b7   : > { %v746_v40 = vsub.f32 %v738_v21, %v742_v37  ;;  %v1358_v37 = vld [vmem:[%s1764_s6 + $0x8] sm:$0xff] }
 0x4b8   : > { %806 = vmatpush.bf16.msrb.mxu0 %v1358_v37 }
 0x4b9   : > { %v748_v42 = vmul.f32 1.442695, %v746_v40 }
 0x4bd   : > { %v1666_v36 = vpop.f32.mrf.mxu1 }
 0x4be   : > { %v745_v38 = vpop.xlane.xlu1 %744 }
 0x4bf   : > { %v747_v39 = vsub.f32 %v739_v27, %v745_v38 }
 0x4c1   : > { %v750_v41 = vmul.f32 1.442695, %v747_v39 }
 0x4c3   : > { %1406 = vpow2.f32 %v750_v41 }
 0x4c4   : > { %1408 = vpow2.f32 %v748_v42 }
 0x4c5   : > { %v958_v43 = vpop.f32.mrf.mxu1 }
 0x4c6   : > { %v963_v45 = vmul.f32 0.25, %v958_v43  ;;  %v866_v52 = vpop.xlane.xlu1 %865 }
 0x4c7   : > { %v870_v57 = vsub.f32 %v862_v32, %v866_v52 }
 0x4c8   : > { %v965_v46 = vadd.f32 %v963_v45, %v613_v44 }
 0x4c9   : > { %v1407_v47 = vpop.eup %1406  ;;  %v872_v62 = vmul.f32 1.442695, %v870_v57 }
 0x4ca   : > { %v967_v48 = vsel %vm632_vm8, %v965_v46, -inf  ;;  %v755_v49 = vsel %vm632_vm8, %v1407_v47, 0.0  ;;  %v1409_v54 = vpop.eup %1408 }
 0x4cb   : > { %968 = vmax.xlane.f32.xlu2 %v967_v48  ;;  %756 = vadd.xlane.f32.xlu1 %v755_v49  ;;  %v752_v60 = vsel %vm632_vm8, %v1409_v54, 0.0  ;;  %1410 = vpow2.f32 %v872_v62 }
 0x4cd   : > { %v960_v51 = vpop.f32.mrf.mxu1 }
 0x4ce   : > { %v964_v53 = vmul.f32 0.25, %v960_v51 }
 0x4d0   : > { %v966_v56 = vadd.f32 %v964_v53, %v614_v50 }
 0x4d1   : > { %v1411_v3 = vpop.eup %1410 }
 0x4d2   : > { %v970_v59 = vsel %vm632_vm8, %v966_v56, -inf  ;;  %v876_v4 = vsel %vm632_vm8, %v1411_v3, 0.0 }
 0x4d3   : > { %971 = vmax.xlane.f32.xlu0 %v970_v59  ;;  %753 = vadd.xlane.f32.xlu2 %v752_v60 }
 0x4db   : > { %868 = vmax.xlane.f32.xlu0 %v867_v1  ;;  %v1359_v1 = vld [vmem:[%s1764_s6 + $0x10] sm:$0xff] }
 0x4dc   : > { %930 = vmatpush.bf16.msra.mxu0 %v1359_v1 }
 0x4e3   : > { %877 = vadd.xlane.f32.xlu0 %v876_v4 }
 0x4e4   : > { %769 = vrot.lane.b32.xlu1 %v1623_v33, %s1446_s19 }
 0x53e   : > { %v969_v5 = vpop.xlane.xlu2 %968  ;;  %v757_v8 = vpop.xlane.xlu1 %756 }
 0x53f   : > { %v973_v6 = vsub.f32 %v965_v46, %v969_v5 }
 0x541   : > { %v975_v7 = vmul.f32 1.442695, %v973_v6 }
 0x543   : > { %1412 = vpow2.f32 %v975_v7 }
 0x544   : > { %1414 = vrcp.f32 %v757_v8 }
 0x546   : > { %v754_v9 = vpop.xlane.xlu2 %753  ;;  %v972_v11 = vpop.xlane.xlu0 %971 }
 0x547   : > { %1416 = vrcp.f32 %v754_v9  ;;  %v974_v21 = vsub.f32 %v966_v56, %v972_v11 }
 0x549   : > { %v1413_v12 = vpop.eup %1412  ;;  %v977_v25 = vmul.f32 1.442695, %v974_v21 }
 0x54a   : > { %v979_v13 = vsel %vm632_vm8, %v1413_v12, 0.0  ;;  %v1415_v14 = vpop.eup %1414 }
 0x54b   : > { %980 = vadd.xlane.f32.xlu0 %v979_v13  ;;  %v761_v16 = vmul.f32 %v1415_v14, %v1407_v47 }
 0x54d   : > { %v1417_v15 = vpop.eup %1416  ;;  %v763_v23 = vpack.c.bf16 %v761_v16, %v761_v16 }
 0x54e   : > { %v760_v17 = vmul.f32 %v1417_v15, %v1409_v54  ;;  %v869_v18 = vpop.xlane.xlu0 %868 }
 0x54f   : > { %v871_v19 = vsub.f32 %v863_v63, %v869_v18  ;;  %v767_v26 = vunpack.c.l.b16 %v763_v23  ;;  %v1360_v63 = vld [vmem:[%s1764_s6 + $0x18] sm:$0xff] }
 0x550   : > { %v762_v20 = vpack.c.bf16 %v760_v17, %v760_v17  ;;  %v1388_v17 = vld [vmem:[%s1765_s7] ss:$0 sm:$0xff] }
 0x551   : > { %v874_v22 = vmul.f32 1.442695, %v871_v19 }
 0x552   : > { %v766_v24 = vunpack.c.l.b16 %v762_v20 }
 0x553   : > { %1418 = vpow2.f32 %v874_v22 }
 0x554   : > { %v768_v28 = vpack.c.b16 %v767_v26, %v766_v24  ;;  %1420 = vpow2.f32 %v977_v25 }
 0x556   : > { %v770_v27 = vpop.permute.xlu1 %769  ;;  %v878_v34 = vpop.xlane.xlu0 %877 }
 0x557   : > { %782 = vmatpush.bf16.msrb.mxu2 %v770_v27  ;;  %1422 = vrcp.f32 %v878_v34 }
 0x559   : > { %v1419_v29 = vpop.eup %1418 }
 0x55a   : > { %1302 = vmatmul.msk.bf16.vlgmr.msrb.gmra.mxu2 %vm632_vm8, %v768_v28  ;;  %v879_v30 = vsel %vm632_vm8, %v1419_v29, 0.0  ;;  %v1421_v31 = vpop.eup %1420 }
 0x55b   : > { %880 = vadd.xlane.f32.xlu2 %v879_v30  ;;  %v982_v32 = vsel %vm632_vm8, %v1421_v31, 0.0 }
 0x55d   : > { %v1423_v41 = vpop.eup %1422 }
 0x55e   : > { %v884_v43 = vmul.f32 %v1423_v41, %v1411_v3 }
 0x55f   : > { %996 = vrot.lane.b32.xlu0 %v1623_v33, %s1449_s22 }
 0x560   : > { %v886_v47 = vpack.c.bf16 %v884_v43, %v884_v43  ;;  %v1361_v43 = vld [vmem:[%s1768_s10] sm:$0xff] }
 0x562   : > { %v890_v52 = vunpack.c.l.b16 %v886_v47 }
 0x563   : > { %983 = vadd.xlane.f32.xlu2 %v982_v32 }
 0x57b   : > { %893 = vrot.lane.b32.xlu2 %v1623_v33, %s1448_s21 }
 0x5be   : > { %v981_v38 = vpop.xlane.xlu0 %980 }
 0x5ce   : > { %v881_v39 = vpop.xlane.xlu2 %880 }
 0x5cf   : > { %1424 = vrcp.f32 %v881_v39  ;;  %v1363_v39 = vld [vmem:[%s1768_s10 + $0x10] sm:$0xff] }
 0x5d0   : > { %1426 = vrcp.f32 %v981_v38  ;;  %v1364_v38 = vld [vmem:[%s1768_s10 + $0x18] sm:$0xff] }
 0x5d1   : > { %v997_v40 = vpop.permute.xlu0 %996 }
 0x5d2   : > { %1009 = vmatpush.bf16.msrb.mxu3 %v997_v40  ;;  %v1362_v40 = vld [vmem:[%s1768_s10 + $0x8] sm:$0xff] }
 0x5d5   : > { %v1425_v42 = vpop.eup %1424 }
 0x5d6   : > { %v885_v44 = vmul.f32 %v1425_v42, %v1419_v29  ;;  %v984_v45 = vpop.xlane.xlu2 %983  ;;  %v1427_v46 = vpop.eup %1426 }
 0x5d7   : > { %1428 = vrcp.f32 %v984_v45  ;;  %v987_v48 = vmul.f32 %v1427_v46, %v1413_v12 }
 0x5d8   : > { %v887_v33 = vpack.c.bf16 %v885_v44, %v885_v44 }
 0x5d9   : > { %v989_v53 = vpack.c.bf16 %v987_v48, %v987_v48 }
 0x5da   : > { %v891_v49 = vunpack.c.l.b16 %v887_v33 }
 0x5db   : > { %v993_v58 = vunpack.c.l.b16 %v989_v53 }
 0x5dc   : > { %v892_v56 = vpack.c.b16 %v891_v49, %v890_v52 }
 0x5dd   : > { %v1429_v50 = vpop.eup %1428  ;;  %v784_v51 = vpop.f32.mrf.mxu2 }
 0x5de   : > { %v988_v54 = vmul.f32 %v1429_v50, %v1421_v31  ;;  %v894_v55 = vpop.permute.xlu2 %893 }
 0x5df   : > { %906 = vmatpush.bf16.msra.mxu2 %v894_v55 }
 0x5e0   : > { %v990_v57 = vpack.c.bf16 %v988_v54, %v988_v54 }
 0x5e2   : > { %v994_v59 = vunpack.c.l.b16 %v990_v57  ;;  %1314 = vmatmul.msk.bf16.vlgmr.msra.gmra.mxu2 %vm632_vm8, %v892_v56 }
 0x5e3   : > { %1033 = vmatpush.bf16.msrb.mxu2 %v1360_v63 }
 0x5e4   : > { %v995_v60 = vpack.c.b16 %v994_v59, %v993_v58 }
 0x5e5   : > { %v786_v61 = vpop.f32.mrf.mxu2 }
 0x5e6   : > { %v789_v62 = vpack.c.bf16 %v786_v61, %v784_v51  ;;  %1321 = vmatmul.msk.bf16.vlgmr.msrb.gmra.mxu3 %vm632_vm8, %v995_v60 }
 0x5e8   : > { %1307 = vmatmul.msk.bf16.vlgmr.msrb.gmra.mxu0 %vm632_vm8, %v789_v62  ;;  %v1390_v62 = vld [vmem:[%s1767_s9] ss:$0 sm:$0xff] }
 0x5e9   : > { %1152 = vmatpush.bf16.msrb.mxu0 %v1364_v38 }
 0x5ed   : > { %1153 = vmatpush.bf16.msrb.mxu0 %v1363_v39 }
 0x5f1   : > { %1154 = vmatpush.bf16.msrb.mxu0 %v1362_v40 }
 0x5f5   : > { %1155 = vmatpush.bf16.msrb.mxu0 %v1361_v43 }
 0x665   : > { %v908_v3 = vpop.f32.mrf.mxu2  ;;  %v808_v9 = vpop.f32.mrf.mxu0 }
 0x666   : > { %v832_v13 = vadd.f32 %v1664_v35, %v808_v9 }
 0x669   : > { %v1011_v4 = vpop.f32.mrf.mxu3 }
 0x66d   : > { %v910_v5 = vpop.f32.mrf.mxu2  ;;  %v810_v11 = vpop.f32.mrf.mxu0 }
 0x66e   : > { %v913_v6 = vpack.c.bf16 %v910_v5, %v908_v3  ;;  %v834_v20 = vadd.f32 %v1666_v36, %v810_v11 }
 0x670   : > { %1319 = vmatmul.msk.bf16.vlgmr.msra.gmra.mxu0 %vm632_vm8, %v913_v6 }
 0x671   : > { %v1013_v7 = vpop.f32.mrf.mxu3 }
 0x672   : > { %v1016_v8 = vpack.c.bf16 %v1013_v7, %v1011_v4 }
 0x674   : > { %1326 = vmatmul.msk.bf16.vlgmr.msrb.gmra.mxu2 %vm632_vm8, %v1016_v8  ;;  %v1391_v8 = vld [vmem:[%s1769_s11] ss:$0 sm:$0xff] }
 0x6ed   : > { %v932_v12 = vpop.f32.mrf.mxu0 }
 0x6ee   : > { %v937_v14 = vadd.f32 %v932_v12, %v832_v13 }
 0x6f5   : > { %v934_v19 = vpop.f32.mrf.mxu0 }
 0x6f6   : > { %v938_v22 = vadd.f32 %v934_v19, %v834_v20 }
 0x6f7   : > { %v1035_v15 = vpop.f32.mrf.mxu2 }
 0x6f8   : > { %v1040_v16 = vadd.f32 %v1035_v15, %v937_v14 }
 0x6fa   : > { %v1042_v18 = vadd.f32 %v1040_v16, %v1536_v0 }
 0x6fc   : > { %v1048_v21 = vadd.f32 %v1388_v17, %v1042_v18 }
 0x6fe   : > { %1050 = vst.msk [vmem:[%s448_s17] sm:$0xff] %vm459_vm0, %v1048_v21  ;;  %v1054_v35 = vsel %vm459_vm0, %v1048_v21, 0.0 }
 0x6ff   : > { %1055 = vadd.xlane.f32.xlu1 %v1054_v35  ;;  %v1037_v23 = vpop.f32.mrf.mxu2 }
 0x700   : > { %v1041_v24 = vadd.f32 %v1037_v23, %v938_v22 }
 0x702   : > { %v1043_v25 = vadd.f32 %v1041_v24, %v1540_v2 }
 0x704   : > { %v1049_v0 = vadd.f32 %v1388_v17, %v1043_v25 }
 0x706   : > { %1051 = vst.msk [vmem:[%s448_s17 + $0x8] sm:$0xff] %vm459_vm0, %v1049_v0  ;;  %v1057_v26 = vsel %vm459_vm0, %v1049_v0, 0.0  ;;  %s1348_s17 = sshll.u32 %s1773_s26, 3 }
 0x707   : > { %1058 = vadd.xlane.f32.xlu0 %v1057_v26  ;;  %s453_s20 = scalar_lea.vmem %s1771_s13, %s1348_s17 }
 0x772   : > { %v1056_v27 = vpop.xlane.xlu1 %1055 }
 0x773   : > { %v1060_v36 = vmul.f32 %v1056_v27, %v1544_v10 }
 0x775   : > { %v1062_v28 = vsub.f32 %v1048_v21, %v1060_v36 }
 0x777   : > { %v1064_v29 = vmul.f32 %v1062_v28, %v1062_v28 }
 0x779   : > { %v1066_v30 = vsel %vm459_vm0, %v1064_v29, 0.0 }
 0x77a   : > { %1067 = vadd.xlane.f32.xlu2 %v1066_v30  ;;  %v1059_v31 = vpop.xlane.xlu0 %1058 }
 0x77b   : > { %v1061_v32 = vmul.f32 %v1059_v31, %v1544_v10 }
 0x77d   : > { %v1063_v34 = vsub.f32 %v1049_v0, %v1061_v32 }
 0x77f   : > { %v1065_v37 = vmul.f32 %v1063_v34, %v1063_v34 }
 0x781   : > { %v1069_v2 = vsel %vm459_vm0, %v1065_v37, 0.0 }
 0x782   : > { %1070 = vadd.xlane.f32.xlu1 %v1069_v2 }
 0x7ed   : > { %v1068_v41 = vpop.xlane.xlu2 %1067 }
 0x7ee   : > { %v1072_v42 = vmul.f32 %v1068_v41, %v1544_v10 }
 0x7f0   : > { %v1074_v44 = vadd.f32 1e-05, %v1072_v42 }
 0x7f2   : > { %1430 = vrsqrt.f32 %v1074_v44  ;;  %vm1082_vm10 = vweird.f32 %v1074_v44 }
 0x7f5   : > { %v1071_v45 = vpop.xlane.xlu1 %1070 }
 0x7f6   : > { %v1073_v46 = vmul.f32 %v1071_v45, %v1544_v10  ;;  %v1389_v10 = vld [vmem:[%s1766_s8] ss:$0 sm:$0xff] }
 0x7f8   : > { %v1431_v33 = vpop.eup %1430  ;;  %v1075_v47 = vadd.f32 1e-05, %v1073_v46 }
 0x7f9   : > { %v1077_v48 = vmul.f32 %v1431_v33, %v1074_v44  ;;  %vm1083_vm9 = vweird.f32 %v1431_v33 }
 0x7fa   : > { %1432 = vrsqrt.f32 %v1075_v47  ;;  %vm1084_vm11 = vmor %vm1082_vm10, %vm1083_vm9  ;;  %vm1092_vm13 = vweird.f32 %v1075_v47 }
 0x7fb   : > { %v1078_v49 = vmul.f32 %v1431_v33, %v1077_v48 }
 0x7fd   : > { %v1079_v50 = vmul.f32 0.5, %v1078_v49 }
 0x7ff   : > { %v1080_v51 = vsub.f32 1.5, %v1079_v50 }
 0x800   : > { %v1433_v52 = vpop.eup %1432 }
 0x801   : > { %v1081_v53 = vmul.f32 %v1431_v33, %v1080_v51  ;;  %v1087_v54 = vmul.f32 %v1433_v52, %v1075_v47  ;;  %vm1093_vm12 = vweird.f32 %v1433_v52 }
 0x802   : > { %vm1094_vm14 = vmor %vm1092_vm13, %vm1093_vm12 }
 0x803   : > { %v1088_v55 = vmul.f32 %v1433_v52, %v1087_v54  ;;  %v1085_v56 = vsel %vm1084_vm11, %v1431_v33, %v1081_v53 }
 0x804   : > { %v1096_v59 = vmul.f32 %v1085_v56, %v1062_v28 }
 0x805   : > { %v1089_v57 = vmul.f32 0.5, %v1088_v55 }
 0x806   : > { %v1101_v63 = vmul.f32 %v1389_v10, %v1096_v59 }
 0x807   : > { %v1090_v58 = vsub.f32 1.5, %v1089_v57 }
 0x808   : > { %v1106_v4 = vadd.f32 %v1390_v62, %v1101_v63 }
 0x809   : > { %v1091_v60 = vmul.f32 %v1433_v52, %v1090_v58 }
 0x80b   : > { %v1095_v61 = vsel %vm1094_vm14, %v1433_v52, %v1091_v60 }
 0x80c   : > { %v1097_v1 = vmul.f32 %v1095_v61, %v1063_v34 }
 0x80e   : > { %v1102_v3 = vmul.f32 %v1389_v10, %v1097_v1 }
 0x810   : > { %v1107_v5 = vadd.f32 %v1390_v62, %v1102_v3 }
 0x812   : > { %v1108_v6 = vpack.c.bf16 %v1107_v5, %v1106_v4 }
 0x814   : > { %1343 = vmatmul.msk.bf16.vlgmr.msrb.gmra.mxu0 %vm459_vm0, %v1108_v6 }
 0x891   : > { %v1157_v7 = vpop.f32.mrf.mxu0 }
 0x892   : > { %v1158_v11 = vadd.f32 %v1391_v8, %v1157_v7 }
 0x899   : > { %v1159_v9 = vpop.f32.mrf.mxu0 }
 0x89a   : > { %v1160_v12 = vadd.f32 %v1391_v8, %v1159_v9 }
 0x89c   : > { %v1368_v13 = vpack.c.bf16 %v1160_v12, %v1158_v11 }
 0x89e   : > { %1369 = vst [vmem:[%s453_s20] sm:$0xff] %v1368_v13  }
 0x89f PF: > { %s24_s25 = sadd.s32 1, %s1440_s25  }
 0x8a0   : > { %p21_p4 = scmp.ge.s32.totalorder %s24_s25, 4  }
 0x8a2   :  { %23 = sbr.rel (!%p21_p4) target bundleno = 1 (0x1), region = 110 }

</bundles_post_ra>
